<compile_context>
chip_gen: v5e
topology: v5e:2x2
jax: 0.10.0
libtpu: 0.0.40
codegen_flags: <defaults>
</compile_context>

<pallas_src>
import functools

import jax
import jax.numpy as jnp
from jax.experimental import pallas as pl
from jax.experimental.pallas import tpu as pltpu

OUTPUT_SIZE = 6                                   # spatial "outputSize"
IN_FEATURES = 256 * OUTPUT_SIZE * OUTPUT_SIZE     # 9216
HIDDEN = 4096
NUM_CLASSES = 6
FC3_PAD = 128                                     # lane-dense padded fc3 width
BN_EPS = 1e-5
DQ_CHUNK = 512                                    # in-kernel int8->bf16 dequant chunk (along K)

# Fits comfortably inside v7x's 64 MiB/TC VMEM and lifts v5e's 16 MiB default.
VMEM_LIMIT_BYTES = 48 * 1024 * 1024


# --------------------------------------------------------------------------
# Kernels
# --------------------------------------------------------------------------
def _accumulate_int8(x_ref, w_ref, acc_ref, *, tk, k):
    """acc += x[:, k*tk:(k+1)*tk] @ dequant(w_tile).

    The int8 weight tile is dequantized to bf16 on the VPU in DQ_CHUNK-wide
    k-slices (keeps the bf16/f32 temporaries to a few MB); the per-column
    dequant scale is folded into the epilogue's s_ref, so the cast here is
    exact (int8 values are exactly representable in bf16)."""
    n_chunks = tk // DQ_CHUNK

    @pl.loop(0, n_chunks)
    def _(c):
        xk = pl.multiple_of(k * tk + c * DQ_CHUNK, DQ_CHUNK)
        wk = pl.multiple_of(c * DQ_CHUNK, DQ_CHUNK)
        x_blk = x_ref[:, pl.ds(xk, DQ_CHUNK)]
        w_blk = (w_ref[pl.ds(wk, DQ_CHUNK), :]
                 .astype(jnp.float32).astype(jnp.bfloat16))
        acc_ref[...] += jnp.dot(x_blk, w_blk,
                                preferred_element_type=jnp.float32)


def _fc_bn_relu_kernel(x_ref, w_ref, s_ref, b_ref, o_ref, acc_ref, *, tk):
    """One (j, k) grid step of h = relu((x @ dequant(w)) * scale + shift)."""
    k = pl.program_id(1)

    @pl.when(k == 0)
    def _():
        acc_ref[...] = jnp.zeros_like(acc_ref)

    _accumulate_int8(x_ref, w_ref, acc_ref, tk=tk, k=k)

    @pl.when(k == pl.num_programs(1) - 1)
    def _():
        y = acc_ref[...] * s_ref[...] + b_ref[...]
        o_ref[...] = jnp.maximum(y, 0.0).astype(o_ref.dtype)


def _fc_bn_relu_head_kernel(x_ref, w_ref, s_ref, b_ref, w3_ref, o3_ref,
                            acc_ref, *, tk):
    """fc2+bn2+relu fused with fc3: each j (column tile of the hidden layer)
    emits its partial contribution h_tile @ w3_tile to the logits.  Partials
    are summed in the wrapper, which keeps the 'parallel' j axis megacore-safe
    and avoids writing h2 to HBM at all."""
    k = pl.program_id(1)

    @pl.when(k == 0)
    def _():
        acc_ref[...] = jnp.zeros_like(acc_ref)

    _accumulate_int8(x_ref, w_ref, acc_ref, tk=tk, k=k)

    @pl.when(k == pl.num_programs(1) - 1)
    def _():
        h = jnp.maximum(acc_ref[...] * s_ref[...] + b_ref[...], 0.0)
        p3 = jnp.dot(h.astype(jnp.bfloat16), w3_ref[...],
                     preferred_element_type=jnp.float32)
        o3_ref[...] = p3[None, :, :]


# --------------------------------------------------------------------------
# Wrappers
# --------------------------------------------------------------------------
def fc_bn_relu(x, w_q, scale, shift, *, tn, tk):
    """h = relu((x @ dequant(w_q)) * scale + shift).  x:(M,K) bf16, w_q:(K,N) int8."""
    M, K = x.shape
    Kw, N = w_q.shape
    assert K == Kw and N % tn == 0 and K % tk == 0
    assert tn % 128 == 0 and tk % DQ_CHUNK == 0

    s2d = scale.reshape(1, N).astype(jnp.float32)
    b2d = shift.reshape(1, N).astype(jnp.float32)

    return pl.pallas_call(
        functools.partial(_fc_bn_relu_kernel, tk=tk),
        out_shape=jax.ShapeDtypeStruct((M, N), jnp.bfloat16),
        grid_spec=pltpu.PrefetchScalarGridSpec(
            num_scalar_prefetch=0,
            grid=(N // tn, K // tk),                       # reduction axis last
            in_specs=[
                # LHS: full-K block, constant index -> VMEM-resident, no re-DMA.
                pl.BlockSpec((M, K), lambda j, k: (0, 0)),
                pl.BlockSpec((tk, tn), lambda j, k: (k, j)),   # int8 weight stream
                pl.BlockSpec((1, tn), lambda j, k: (0, j)),
                pl.BlockSpec((1, tn), lambda j, k: (0, j)),
            ],
            out_specs=pl.BlockSpec((M, tn), lambda j, k: (0, j)),
            scratch_shapes=[pltpu.VMEM((M, tn), jnp.float32)],
        ),
        compiler_params=pltpu.CompilerParams(
            dimension_semantics=("parallel", "arbitrary"),
            vmem_limit_bytes=VMEM_LIMIT_BYTES,
        ),
    )(x, w_q, s2d, b2d)


def fc_bn_relu_head(x, w_q, scale, shift, w3, *, tn, tk):
    """Partial logits: for each column tile j of h = relu((x@dq(w_q))*s+b),
    return h[:, j] @ w3[j].  Shape (N//tn, M, FC3_PAD); sum over axis 0 outside."""
    M, K = x.shape
    Kw, N = w_q.shape
    Kw3, N3 = w3.shape
    assert K == Kw and Kw3 == N and N % tn == 0 and K % tk == 0
    assert tn % 128 == 0 and N3 % 128 == 0 and tk % DQ_CHUNK == 0

    s2d = scale.reshape(1, N).astype(jnp.float32)
    b2d = shift.reshape(1, N).astype(jnp.float32)

    return pl.pallas_call(
        functools.partial(_fc_bn_relu_head_kernel, tk=tk),
        out_shape=jax.ShapeDtypeStruct((N // tn, M, N3), jnp.float32),
        grid_spec=pltpu.PrefetchScalarGridSpec(
            num_scalar_prefetch=0,
            grid=(N // tn, K // tk),
            in_specs=[
                pl.BlockSpec((M, K), lambda j, k: (0, 0)),      # VMEM-resident LHS
                pl.BlockSpec((tk, tn), lambda j, k: (k, j)),    # int8 weight stream
                pl.BlockSpec((1, tn), lambda j, k: (0, j)),
                pl.BlockSpec((1, tn), lambda j, k: (0, j)),
                pl.BlockSpec((tn, N3), lambda j, k: (j, 0)),    # fc3 weight tile
            ],
            out_specs=pl.BlockSpec((1, M, N3), lambda j, k: (j, 0, 0)),
            scratch_shapes=[pltpu.VMEM((M, tn), jnp.float32)],
        ),
        compiler_params=pltpu.CompilerParams(
            dimension_semantics=("parallel", "arbitrary"),
            vmem_limit_bytes=VMEM_LIMIT_BYTES,
        ),
    )(x, w_q, s2d, b2d, w3)


# --------------------------------------------------------------------------
# Parameter preparation
# --------------------------------------------------------------------------
def fold_bn(lin_bias, gamma, beta, running_mean, running_var):
    """Fold eval-mode BatchNorm1d into a per-column (scale, shift) applied
    after the matmul:  bn(xW + b) = (xW) * s + ((b - mean) * s + beta)."""
    inv_std = 1.0 / jnp.sqrt(running_var + BN_EPS)
    s = gamma * inv_std
    shift = (lin_bias - running_mean) * s + beta
    return s, shift


def quantize_int8(w):
    """Symmetric per-output-channel int8 quantization: w ~= w_q * scale[None, :]."""
    amax = jnp.max(jnp.abs(w), axis=0)
    scale = jnp.maximum(amax, 1e-8) / 127.0
    w_q = jnp.clip(jnp.round(w / scale), -127, 127).astype(jnp.int8)
    return w_q, scale


def prepare_params(p):
    """Streaming-friendly parameters:
       - fc1/fc2 weights quantized to int8; per-column dequant scale folded
         into the BN scale (so the kernel epilogue applies both at once).
       - eval-mode BatchNorm folded into per-column (scale, shift).
       - fc3 kept bf16, zero-padded from N=6 to N=128 (lane-dense stores);
         its bias is added after the partials are summed in the wrapper."""
    w1q, ws1 = quantize_int8(p["w1"])
    w2q, ws2 = quantize_int8(p["w2"])
    s1, sh1 = fold_bn(p["b1"], p["g1"], p["be1"], p["rm1"], p["rv1"])
    s2, sh2 = fold_bn(p["b2"], p["g2"], p["be2"], p["rm2"], p["rv2"])

    w3p = jnp.zeros((HIDDEN, FC3_PAD), jnp.bfloat16)
    w3p = w3p.at[:, :NUM_CLASSES].set(p["w3"].astype(jnp.bfloat16))

    return dict(
        w1=w1q, s1=s1 * ws1, sh1=sh1,
        w2=w2q, s2=s2 * ws2, sh2=sh2,
        w3=w3p, b3=p["b3"],
    )


def classifier_forward(x, q):
    """Inference forward; Dropout2d layers are identity in eval mode."""
    xb = x.astype(jnp.bfloat16)
    # fc1 + bn1 + relu1   (grid (2, 2): tn=2048 keeps 2-way megacore split)
    h = fc_bn_relu(xb, q["w1"], q["s1"], q["sh1"], tn=2048, tk=4608)
    # fc2 + bn2 + relu2 fused with fc3 (partials per column tile, grid (2, 1))
    p3 = fc_bn_relu_head(h, q["w2"], q["s2"], q["sh2"], q["w3"],
                         tn=2048, tk=HIDDEN)
    return p3.sum(axis=0)[:, :NUM_CLASSES] + q["b3"]


# --------------------------------------------------------------------------
# Init / reference / main
# --------------------------------------------------------------------------
def init_params(key):
    ks = jax.random.split(key, 8)

    def lin(kw, kb, fan_in, fan_out):
        bound = 1.0 / jnp.sqrt(fan_in)
        w = jax.random.uniform(kw, (fan_in, fan_out), jnp.float32, -bound, bound)
        b = jax.random.uniform(kb, (fan_out,), jnp.float32, -bound, bound)
        return w, b

    w1, b1 = lin(ks[0], ks[1], IN_FEATURES, HIDDEN)
    w2, b2 = lin(ks[2], ks[3], HIDDEN, HIDDEN)
    w3, b3 = lin(ks[4], ks[5], HIDDEN, NUM_CLASSES)

    # Deterministic, non-trivial BatchNorm running stats / affine params.
    g1 = 1.0 + 0.05 * jax.random.normal(ks[6], (HIDDEN,), jnp.float32)
    be1 = 0.02 * jax.random.normal(ks[7], (HIDDEN,), jnp.float32)
    rm1 = 0.01 * jnp.sin(jnp.arange(HIDDEN, dtype=jnp.float32))
    rv1 = 1.0 + 0.1 * jnp.cos(jnp.arange(HIDDEN, dtype=jnp.float32)) ** 2

    g2 = 1.0 - 0.03 * jnp.cos(jnp.arange(HIDDEN, dtype=jnp.float32))
    be2 = 0.01 * jnp.sin(0.5 * jnp.arange(HIDDEN, dtype=jnp.float32))
    rm2 = 0.02 * jnp.cos(jnp.arange(HIDDEN, dtype=jnp.float32))
    rv2 = 1.0 + 0.05 * jnp.sin(jnp.arange(HIDDEN, dtype=jnp.float32)) ** 2

    return dict(w1=w1, b1=b1, w2=w2, b2=b2, w3=w3, b3=b3,
                g1=g1, be1=be1, rm1=rm1, rv1=rv1,
                g2=g2, be2=be2, rm2=rm2, rv2=rv2)


def reference_forward(x, p):
    """Pure-JAX reference using the same quantized weights (int8 fc1/fc2
    dequantized back to f32, bf16 fc3, bf16 activations) so it tests kernel
    correctness rather than quantization error.  Math in f32, HIGHEST prec."""
    bf = lambda a: a.astype(jnp.bfloat16).astype(jnp.float32)
    dot = functools.partial(jnp.dot, precision=jax.lax.Precision.HIGHEST)

    def dq(w):
        wq, s = quantize_int8(w)
        return wq.astype(jnp.float32) * s

    def bn(y, g, be, rm, rv):
        return (y - rm) / jnp.sqrt(rv + BN_EPS) * g + be

    h = bf(x)
    h = jnp.maximum(bn(dot(h, dq(p["w1"])) + p["b1"],
                       p["g1"], p["be1"], p["rm1"], p["rv1"]), 0.0)
    h = bf(h)
    h = jnp.maximum(bn(dot(h, dq(p["w2"])) + p["b2"],
                       p["g2"], p["be2"], p["rm2"], p["rv2"]), 0.0)
    h = bf(h)
    return dot(h, bf(p["w3"])) + p["b3"]


if __name__ == "__main__":
    key = jax.random.PRNGKey(0)
    kx, kp = jax.random.split(key)

    B = 8
    x = jax.random.normal(kx, (B, IN_FEATURES), jnp.float32)
    params = init_params(kp)
    prepped = prepare_params(params)

    fwd = jax.jit(classifier_forward)
    out = jax.block_until_ready(fwd(x, prepped))
    assert out.shape == (B, NUM_CLASSES), out.shape

    ref = reference_forward(x, params)
    err = float(jnp.max(jnp.abs(out - ref)))
    assert jnp.allclose(out, ref, atol=2e-2, rtol=2e-2), err

    print("KERNEL_OK")
</pallas_src>

<mosaic_0001>
module attributes {stable_mosaic.version = 11 : i64} {
  func.func @_fc_bn_relu_head_kernel(%arg0: i32, %arg1: i32, %arg2: memref<8x4096xbf16, #tpu.memory_space<vmem>>, %arg3: memref<4096x2048xi8, #tpu.memory_space<vmem>>, %arg4: memref<1x2048xf32, #tpu.memory_space<vmem>>, %arg5: memref<1x2048xf32, #tpu.memory_space<vmem>>, %arg6: memref<2048x128xbf16, #tpu.memory_space<vmem>>, %arg7: memref<1x8x128xf32, #tpu.memory_space<vmem>>, %arg8: memref<8x2048xf32, #tpu.memory_space<vmem>>) attributes {dimension_semantics = [#tpu.dimension_semantics<parallel>, #tpu.dimension_semantics<arbitrary>], iteration_bounds = array<i64: 2, 1>, scalar_prefetch = 0 : i64, scratch_operands = 1 : i64, tpu.core_type = #tpu.core_type<tc>, window_params = [{pipeline_mode = #tpu.pipeline_mode<synchronous>, transform_indices = @transform_0, window_bounds = array<i64: 8, 4096>}, {transform_indices = @transform_1, window_bounds = array<i64: 4096, 2048>}, {transform_indices = @transform_2, window_bounds = array<i64: 1, 2048>}, {transform_indices = @transform_3, window_bounds = array<i64: 1, 2048>}, {transform_indices = @transform_4, window_bounds = array<i64: 2048, 128>}, {transform_indices = @transform_5, window_bounds = array<i64: 1, 8, 128>}]} {
    %c0_i32 = arith.constant 0 : i32
    %0 = arith.cmpi eq, %arg1, %c0_i32 : i32
    %1 = arith.extui %0 : i1 to i32
    %c0_i32_0 = arith.constant 0 : i32
    %2 = arith.cmpi ne, %1, %c0_i32_0 : i32
    scf.if %2 {
      %cst = arith.constant 0.000000e+00 : f32
      %7 = vector.broadcast %cst : f32 to vector<8x2048xf32>
      %c0 = arith.constant 0 : index
      %c0_5 = arith.constant 0 : index
      %8 = vector.load %arg8[%c0, %c0_5] : memref<8x2048xf32, #tpu.memory_space<vmem>>, vector<8x2048xf32>
      tpu.vector_store %arg8[%c0, %c0_5], %7 {strides = array<i32>} : memref<8x2048xf32, #tpu.memory_space<vmem>>, vector<8x2048xf32>,
    } else {
    }
    %c0_i32_1 = arith.constant 0 : i32
    %c8_i32 = arith.constant 8 : i32
    %3 = arith.addi %c0_i32_1, %c8_i32 : i32
    %c1_i32 = arith.constant 1 : i32
    scf.for %arg9 = %c0_i32_1 to %3 step %c1_i32  : i32 {
      %c1_i32_5 = arith.constant 1 : i32
      %7 = arith.muli %arg9, %c1_i32_5 : i32
      %c0_i32_6 = arith.constant 0 : i32
      %8 = arith.addi %c0_i32_6, %7 : i32
      %c4096_i32 = arith.constant 4096 : i32
      %9 = arith.muli %arg1, %c4096_i32 : i32
      %c512_i32 = arith.constant 512 : i32
      %10 = arith.muli %8, %c512_i32 : i32
      %11 = arith.addi %9, %10 : i32
      %12 = tpu.assume_multiple %11, 512 : i32
      %c512_i32_7 = arith.constant 512 : i32
      %13 = arith.muli %8, %c512_i32_7 : i32
      %14 = tpu.assume_multiple %13, 512 : i32
      %c0 = arith.constant 0 : index
      %15 = arith.index_cast %12 : i32 to index
      %16 = vector.load %arg2[%c0, %15] : memref<8x4096xbf16, #tpu.memory_space<vmem>>, vector<8x512xbf16>
      %17 = arith.index_cast %14 : i32 to index
      %c0_8 = arith.constant 0 : index
      %18 = vector.load %arg3[%17, %c0_8] : memref<4096x2048xi8, #tpu.memory_space<vmem>>, vector<512x2048xi8>
      %19 = arith.sitofp %18 : vector<512x2048xi8> to vector<512x2048xf32>
      %20 = arith.truncf %19 : vector<512x2048xf32> to vector<512x2048xbf16>
      %c0_9 = arith.constant 0 : index
      %c0_10 = arith.constant 0 : index
      %21 = vector.load %arg8[%c0_9, %c0_10] : memref<8x2048xf32, #tpu.memory_space<vmem>>, vector<8x2048xf32>
      %cst = arith.constant dense<0.000000e+00> : vector<8x2048xf32>
      %22 = tpu.matmul %16, %20, %cst {dimension_numbers = #tpu.dot_dimension_numbers<[1], [0], [0], [1], [0, 0, 1, 1], [], []>} : vector<8x512xbf16>, vector<512x2048xbf16>, vector<8x2048xf32> -> vector<8x2048xf32>
      %23 = arith.addf %21, %22 : vector<8x2048xf32>
      %c0_11 = arith.constant 0 : index
      %c0_12 = arith.constant 0 : index
      %24 = vector.load %arg8[%c0_11, %c0_12] : memref<8x2048xf32, #tpu.memory_space<vmem>>, vector<8x2048xf32>
      tpu.vector_store %arg8[%c0_11, %c0_12], %23 {strides = array<i32>} : memref<8x2048xf32, #tpu.memory_space<vmem>>, vector<8x2048xf32>,
    }
    %c8_i32_2 = arith.constant 8 : i32
    %c0_i32_3 = arith.constant 0 : i32
    %4 = arith.cmpi eq, %arg1, %c0_i32_3 : i32
    %5 = arith.extui %4 : i1 to i32
    %c0_i32_4 = arith.constant 0 : i32
    %6 = arith.cmpi ne, %5, %c0_i32_4 : i32
    scf.if %6 {
      %c0 = arith.constant 0 : index
      %c0_5 = arith.constant 0 : index
      %7 = vector.load %arg8[%c0, %c0_5] : memref<8x2048xf32, #tpu.memory_space<vmem>>, vector<8x2048xf32>
      %c0_6 = arith.constant 0 : index
      %c0_7 = arith.constant 0 : index
      %8 = vector.load %arg4[%c0_6, %c0_7] : memref<1x2048xf32, #tpu.memory_space<vmem>>, vector<1x2048xf32>
      %9 = vector.broadcast %8 : vector<1x2048xf32> to vector<8x2048xf32>
      %10 = arith.mulf %7, %9 : vector<8x2048xf32>
      %c0_8 = arith.constant 0 : index
      %c0_9 = arith.constant 0 : index
      %11 = vector.load %arg5[%c0_8, %c0_9] : memref<1x2048xf32, #tpu.memory_space<vmem>>, vector<1x2048xf32>
      %12 = vector.broadcast %11 : vector<1x2048xf32> to vector<8x2048xf32>
      %13 = arith.addf %10, %12 : vector<8x2048xf32>
      %cst = arith.constant 0.000000e+00 : f32
      %14 = vector.broadcast %cst : f32 to vector<8x2048xf32>
      %15 = arith.maximumf %13, %14 : vector<8x2048xf32>
      %16 = arith.truncf %15 : vector<8x2048xf32> to vector<8x2048xbf16>
      %c0_10 = arith.constant 0 : index
      %c0_11 = arith.constant 0 : index
      %17 = vector.load %arg6[%c0_10, %c0_11] : memref<2048x128xbf16, #tpu.memory_space<vmem>>, vector<2048x128xbf16>
      %cst_12 = arith.constant dense<0.000000e+00> : vector<8x128xf32>
      %18 = tpu.matmul %16, %17, %cst_12 {dimension_numbers = #tpu.dot_dimension_numbers<[1], [0], [0], [1], [0, 0, 1, 1], [], []>} : vector<8x2048xbf16>, vector<2048x128xbf16>, vector<8x128xf32> -> vector<8x128xf32>
      %19 = vector.shape_cast %18 : vector<8x128xf32> to vector<1x8x128xf32>
      %c0_13 = arith.constant 0 : index
      %c0_14 = arith.constant 0 : index
      %c0_15 = arith.constant 0 : index
      %20 = vector.load %arg7[%c0_13, %c0_14, %c0_15] : memref<1x8x128xf32, #tpu.memory_space<vmem>>, vector<1x8x128xf32>
      tpu.vector_store %arg7[%c0_13, %c0_14, %c0_15], %19 {strides = array<i32>} : memref<1x8x128xf32, #tpu.memory_space<vmem>>, vector<1x8x128xf32>,
    } else {
    }
    return
  }
  func.func @transform_0(%arg0: i32, %arg1: i32) -> (i32, i32) {
    %c0_i32 = arith.constant 0 : i32
    %c0_i32_0 = arith.constant 0 : i32
    %c0_i32_1 = arith.constant 0 : i32
    return %c0_i32, %c0_i32_0 : i32, i32
  }
  func.func @transform_1(%arg0: i32, %arg1: i32) -> (i32, i32) {
    %c0_i32 = arith.constant 0 : i32
    return %arg1, %arg0 : i32, i32
  }
  func.func @transform_2(%arg0: i32, %arg1: i32) -> (i32, i32) {
    %c0_i32 = arith.constant 0 : i32
    %c0_i32_0 = arith.constant 0 : i32
    return %c0_i32, %arg0 : i32, i32
  }
  func.func @transform_3(%arg0: i32, %arg1: i32) -> (i32, i32) {
    %c0_i32 = arith.constant 0 : i32
    %c0_i32_0 = arith.constant 0 : i32
    return %c0_i32, %arg0 : i32, i32
  }
  func.func @transform_4(%arg0: i32, %arg1: i32) -> (i32, i32) {
    %c0_i32 = arith.constant 0 : i32
    %c0_i32_0 = arith.constant 0 : i32
    return %arg0, %c0_i32 : i32, i32
  }
  func.func @transform_5(%arg0: i32, %arg1: i32) -> (i32, i32, i32) {
    %c0_i32 = arith.constant 0 : i32
    %c0_i32_0 = arith.constant 0 : i32
    %c0_i32_1 = arith.constant 0 : i32
    return %arg0, %c0_i32, %c0_i32_0 : i32, i32, i32
  }
}

module attributes {stable_mosaic.version = 11 : i64} {
  func.func @_fc_bn_relu_kernel(%arg0: i32, %arg1: i32, %arg2: memref<8x9216xbf16, #tpu.memory_space<vmem>>, %arg3: memref<4608x2048xi8, #tpu.memory_space<vmem>>, %arg4: memref<1x2048xf32, #tpu.memory_space<vmem>>, %arg5: memref<1x2048xf32, #tpu.memory_space<vmem>>, %arg6: memref<8x2048xbf16, #tpu.memory_space<vmem>>, %arg7: memref<8x2048xf32, #tpu.memory_space<vmem>>) attributes {dimension_semantics = [#tpu.dimension_semantics<parallel>, #tpu.dimension_semantics<arbitrary>], iteration_bounds = array<i64: 2, 2>, scalar_prefetch = 0 : i64, scratch_operands = 1 : i64, tpu.core_type = #tpu.core_type<tc>, window_params = [{pipeline_mode = #tpu.pipeline_mode<synchronous>, transform_indices = @transform_0, window_bounds = array<i64: 8, 9216>}, {transform_indices = @transform_1, window_bounds = array<i64: 4608, 2048>}, {transform_indices = @transform_2, window_bounds = array<i64: 1, 2048>}, {transform_indices = @transform_3, window_bounds = array<i64: 1, 2048>}, {transform_indices = @transform_4, window_bounds = array<i64: 8, 2048>}]} {
    %c0_i32 = arith.constant 0 : i32
    %0 = arith.cmpi eq, %arg1, %c0_i32 : i32
    %1 = arith.extui %0 : i1 to i32
    %c0_i32_0 = arith.constant 0 : i32
    %2 = arith.cmpi ne, %1, %c0_i32_0 : i32
    scf.if %2 {
      %cst = arith.constant 0.000000e+00 : f32
      %7 = vector.broadcast %cst : f32 to vector<8x2048xf32>
      %c0 = arith.constant 0 : index
      %c0_5 = arith.constant 0 : index
      %8 = vector.load %arg7[%c0, %c0_5] : memref<8x2048xf32, #tpu.memory_space<vmem>>, vector<8x2048xf32>
      tpu.vector_store %arg7[%c0, %c0_5], %7 {strides = array<i32>} : memref<8x2048xf32, #tpu.memory_space<vmem>>, vector<8x2048xf32>,
    } else {
    }
    %c0_i32_1 = arith.constant 0 : i32
    %c9_i32 = arith.constant 9 : i32
    %3 = arith.addi %c0_i32_1, %c9_i32 : i32
    %c1_i32 = arith.constant 1 : i32
    scf.for %arg8 = %c0_i32_1 to %3 step %c1_i32  : i32 {
      %c1_i32_5 = arith.constant 1 : i32
      %7 = arith.muli %arg8, %c1_i32_5 : i32
      %c0_i32_6 = arith.constant 0 : i32
      %8 = arith.addi %c0_i32_6, %7 : i32
      %c4608_i32 = arith.constant 4608 : i32
      %9 = arith.muli %arg1, %c4608_i32 : i32
      %c512_i32 = arith.constant 512 : i32
      %10 = arith.muli %8, %c512_i32 : i32
      %11 = arith.addi %9, %10 : i32
      %12 = tpu.assume_multiple %11, 512 : i32
      %c512_i32_7 = arith.constant 512 : i32
      %13 = arith.muli %8, %c512_i32_7 : i32
      %14 = tpu.assume_multiple %13, 512 : i32
      %c0 = arith.constant 0 : index
      %15 = arith.index_cast %12 : i32 to index
      %16 = vector.load %arg2[%c0, %15] : memref<8x9216xbf16, #tpu.memory_space<vmem>>, vector<8x512xbf16>
      %17 = arith.index_cast %14 : i32 to index
      %c0_8 = arith.constant 0 : index
      %18 = vector.load %arg3[%17, %c0_8] : memref<4608x2048xi8, #tpu.memory_space<vmem>>, vector<512x2048xi8>
      %19 = arith.sitofp %18 : vector<512x2048xi8> to vector<512x2048xf32>
      %20 = arith.truncf %19 : vector<512x2048xf32> to vector<512x2048xbf16>
      %c0_9 = arith.constant 0 : index
      %c0_10 = arith.constant 0 : index
      %21 = vector.load %arg7[%c0_9, %c0_10] : memref<8x2048xf32, #tpu.memory_space<vmem>>, vector<8x2048xf32>
      %cst = arith.constant dense<0.000000e+00> : vector<8x2048xf32>
      %22 = tpu.matmul %16, %20, %cst {dimension_numbers = #tpu.dot_dimension_numbers<[1], [0], [0], [1], [0, 0, 1, 1], [], []>} : vector<8x512xbf16>, vector<512x2048xbf16>, vector<8x2048xf32> -> vector<8x2048xf32>
      %23 = arith.addf %21, %22 : vector<8x2048xf32>
      %c0_11 = arith.constant 0 : index
      %c0_12 = arith.constant 0 : index
      %24 = vector.load %arg7[%c0_11, %c0_12] : memref<8x2048xf32, #tpu.memory_space<vmem>>, vector<8x2048xf32>
      tpu.vector_store %arg7[%c0_11, %c0_12], %23 {strides = array<i32>} : memref<8x2048xf32, #tpu.memory_space<vmem>>, vector<8x2048xf32>,
    }
    %c9_i32_2 = arith.constant 9 : i32
    %c1_i32_3 = arith.constant 1 : i32
    %4 = arith.cmpi eq, %arg1, %c1_i32_3 : i32
    %5 = arith.extui %4 : i1 to i32
    %c0_i32_4 = arith.constant 0 : i32
    %6 = arith.cmpi ne, %5, %c0_i32_4 : i32
    scf.if %6 {
      %c0 = arith.constant 0 : index
      %c0_5 = arith.constant 0 : index
      %7 = vector.load %arg7[%c0, %c0_5] : memref<8x2048xf32, #tpu.memory_space<vmem>>, vector<8x2048xf32>
      %c0_6 = arith.constant 0 : index
      %c0_7 = arith.constant 0 : index
      %8 = vector.load %arg4[%c0_6, %c0_7] : memref<1x2048xf32, #tpu.memory_space<vmem>>, vector<1x2048xf32>
      %9 = vector.broadcast %8 : vector<1x2048xf32> to vector<8x2048xf32>
      %10 = arith.mulf %7, %9 : vector<8x2048xf32>
      %c0_8 = arith.constant 0 : index
      %c0_9 = arith.constant 0 : index
      %11 = vector.load %arg5[%c0_8, %c0_9] : memref<1x2048xf32, #tpu.memory_space<vmem>>, vector<1x2048xf32>
      %12 = vector.broadcast %11 : vector<1x2048xf32> to vector<8x2048xf32>
      %13 = arith.addf %10, %12 : vector<8x2048xf32>
      %cst = arith.constant 0.000000e+00 : f32
      %14 = vector.broadcast %cst : f32 to vector<8x2048xf32>
      %15 = arith.maximumf %13, %14 : vector<8x2048xf32>
      %16 = arith.truncf %15 : vector<8x2048xf32> to vector<8x2048xbf16>
      %c0_10 = arith.constant 0 : index
      %c0_11 = arith.constant 0 : index
      %17 = vector.load %arg6[%c0_10, %c0_11] : memref<8x2048xbf16, #tpu.memory_space<vmem>>, vector<8x2048xbf16>
      tpu.vector_store %arg6[%c0_10, %c0_11], %16 {strides = array<i32>} : memref<8x2048xbf16, #tpu.memory_space<vmem>>, vector<8x2048xbf16>,
    } else {
    }
    return
  }
  func.func @transform_0(%arg0: i32, %arg1: i32) -> (i32, i32) {
    %c0_i32 = arith.constant 0 : i32
    %c0_i32_0 = arith.constant 0 : i32
    %c0_i32_1 = arith.constant 0 : i32
    return %c0_i32, %c0_i32_0 : i32, i32
  }
  func.func @transform_1(%arg0: i32, %arg1: i32) -> (i32, i32) {
    %c0_i32 = arith.constant 0 : i32
    return %arg1, %arg0 : i32, i32
  }
  func.func @transform_2(%arg0: i32, %arg1: i32) -> (i32, i32) {
    %c0_i32 = arith.constant 0 : i32
    %c0_i32_0 = arith.constant 0 : i32
    return %c0_i32, %arg0 : i32, i32
  }
  func.func @transform_3(%arg0: i32, %arg1: i32) -> (i32, i32) {
    %c0_i32 = arith.constant 0 : i32
    %c0_i32_0 = arith.constant 0 : i32
    return %c0_i32, %arg0 : i32, i32
  }
  func.func @transform_4(%arg0: i32, %arg1: i32) -> (i32, i32) {
    %c0_i32 = arith.constant 0 : i32
    %c0_i32_0 = arith.constant 0 : i32
    return %c0_i32, %arg0 : i32, i32
  }
}

</mosaic_0001>

<bundles_post_ra>
// kernel: classifier_forward.2
= control target key start
LH: loop header
LB: loop body
LE: loop exit
PB: predicated region body
PF: predicated region fallthrough
CT: control target
= control target key end

     0   :  { %s5474_s0 = inlined_call_operand.vmem [shape: bf16[8,9216], index: 0, kind: input, shape index: {}]   ;;  %s5475_s1 = inlined_call_operand.hbm [shape: s8[9216,4096], index: 1, kind: input, shape index: {}]   ;;  %s5476_s2 = inlined_call_operand.hbm [shape: f32[1,4096], index: 2, kind: input, shape index: {}]   ;;  %s5477_s3 = inlined_call_operand.hbm [shape: f32[1,4096], index: 3, kind: input, shape index: {}]   ;;  %s5478_s4 = inlined_call_operand.vmem [shape: bf16[8,4096], index: 4, kind: output, shape index: {}]  }
   0x1   :  { %5485 = sst [smem:[#allocation17_spill]] %s5474_s0 }
   0x2   :  { %5486 = sst [smem:[#allocation18_spill]] %s5475_s1 }
   0x3   :  { %5487 = sst [smem:[#allocation19_spill]] %s5476_s2 }
   0x4   :  { %9 = vsyncpa [#allocation4], 0 }
   0x5   :  { %11 = vsyncpa [#allocation4 + $0x1], 0 }
   0x6   :  { %12 = vsyncpa [#allocation6], 0 }
   0x7   :  { %14 = vsyncpa [#allocation6 + $0x1], 0  ;;  %s4725_s15 = smov 0   ;;  %s4727_s16 = smov 0  }
   0x8   :  { %s4729_s17 = smov 0   ;;  %s4731_s18 = smov 0  }
   0x9   :  { %s4733_s19 = smov 0   ;;  %s4735_s20 = smov 0  }
   0xa   :  { %s4737_s21 = smov 0   ;;  %s4739_s22 = smov 0  }
   0xb   :  { %s4741_s23 = smov 0   ;;  %s4743_s24 = smov 0  }
   0xc   :  { %s4745_s25 = smov 0  }
   0xd LB: > { %5488 = sst [smem:[#allocation10_spill]] %s4658_s17  ;;  %s5479_s26 = sadd.s32 4294967295, %s4690_s25   ;;  %s4690_s25 = sphi %s4745_s25, %s20_s25   ;;  %s4686_s24 = sphi %s4743_s24, %s5513_s24   ;;  %s4682_s23 = sphi %s4741_s23, %s5512_s23   ;;  %s4678_s22 = sphi %s4739_s22, %s5511_s22   ;;  %s4674_s21 = sphi %s4737_s21, %s5519_s21   ;;  %s4670_s20 = sphi %s4735_s20, %s5518_s20   ;;  %s4666_s19 = sphi %s4733_s19, %s5517_s19   ;;  %s4662_s18 = sphi %s4731_s18, %s5516_s18   ;;  %s4658_s17 = sphi %s4729_s17, %s5508_s17   ;;  %s4654_s16 = sphi %s4727_s16, %s5515_s16   ;;  %s4650_s15 = sphi %s4725_s15, %s5514_s15  }
   0xe   : > { %5489 = sst [smem:[#allocation11_spill]] %s4682_s23  ;;  %s29_s27 = sadd.s32 1, %s4682_s23 }
   0xf   : > { %5490 = sst [smem:[#allocation12_spill]] %s4686_s24  ;;  %p30_p0 = scmp.ge.s32.totalorder %s29_s27, 2 }
  0x10   : > { %s32_s28 = sadd.s32 1, %s4686_s24  ;;  %s62_s29 = sadd.s32 1, %s4670_s20 }
  0x11   : > { %p69_p1 = scmp.ne.s32.totalorder %s4670_s20, %s4666_s19  ;;  %s5521_s27 = smov (%p30_p0, %s29_s27), 0 }
  0x12   : > { %5491 = sst [smem:[#allocation13_spill]] %s5521_s27  ;;  %s5523_s28 = smov (!%p30_p0, %s32_s28), %s4686_s24 }
  0x13   : > { %s57_s30 = ssub.s32 %s4682_s23, %s5521_s27  ;;  %p70_p2 = scmp.eq.s32.totalorder %s4690_s25, 0 }
  0x14   : > { %p34_p3 = scmp.ge.s32.totalorder %s5523_s28, 2  ;;  %p75_p4 = scmp.ne.s32.totalorder %s4666_s19, %s4662_s18 }
  0x15   : > { %p4793_p5 = por %p70_p2, %p69_p1  ;;  %p4799_p6 = scmp.eq.s32.totalorder %s5479_s26, 0 }
  0x16   : > { %s5525_s28 = smov (%p34_p3, %s5523_s28), 0  ;;  %s88_s8 = sadd.s32 1, %s4658_s17 }
  0x17   : > { %5494 = sst [smem:[#allocation14_spill]] %s5525_s28  ;;  %p4807_p7 = por %p4799_p6, %p75_p4 }
  0x18   : > { %s58_s9 = ssub.s32 %s4686_s24, %s5525_s28  ;;  %p95_p8 = scmp.ne.s32.totalorder %s4658_s17, %s4654_s16 }
  0x19   : > { %s59_s10 = sor.u32 %s58_s9, %s57_s30  ;;  %p86_p9 = scmp.eq.s32.totalorder %s58_s9, 0 }
  0x1a   : > { %p60_p10 = scmp.eq.s32.totalorder %s59_s10, 0  ;;  %p4818_p11 = por %p95_p8, %p70_p2 }
  0x1b   : > { %s4823_s12 = scalar_select %p86_p9, %s4658_s17, %s88_s8  }
  0x1c   : > { %s4826_s13 = scalar_select %p60_p10, %s4670_s20, %s62_s29  }
  0x1d   : > { %5497 = sst [smem:[#allocation15_spill]] %s4823_s12  ;;  %p101_p12 = scmp.ne.s32.totalorder %s4654_s16, %s4650_s15 }
  0x1e   : > { %5498 = sst [smem:[#allocation16_spill]] %s4826_s13  ;;  %p4401_p13 = scmp.lt.s32.totalorder %s4690_s25, 4 }
  0x1f   : > { %s4832_s14 = sshll.u32 %s4686_s24, 4  ;;  %p4836_p0 = por %p101_p12, %p4799_p6 }
  0x20   : > { %s4381_s30 = smul.u32 4608, %s4682_s23  ;;  %p4845_p1 = pnand %p4401_p13, %p4793_p5 }
  0x21   : > { %s205_s15 = sand.u32 1, %s4690_s25   ;;  %s5501_s1 = sld [smem:[#allocation18_spill]] }
  0x22   : > { %s190_s29 = sadd.s32 %s4381_s30, %s4832_s14  ;;  %s207_s28 = sand.u32 1, %s4658_s17  }
  0x23   : > { %s4363_s6 = sshll.u32 %s190_s29, 3  ;;  %s4855_s5 = sshll.u32 %s207_s28, 4 }
  0x24   : > { %s5502_s2 = sld [smem:[#allocation19_spill]]  ;;  %s209_s12 = scalar_lea.vmem [#allocation5], %s4855_s5 }
  0x25   : > { %s217_s0 = sshll.u32 %s209_s12, 4  ;;  %p4866_p2 = pnand %p4401_p13, %p4818_p11  ;;  %s218_s0 = int_to_ptr.vmem [resolvable:$true] %s217_s0 }
  0x26   : > { %p4368_p3 = scmp.ge.s32.totalorder %s4690_s25, 1  ;;  %p241_p4 = scmp.lt.s32.totalorder %s4690_s25, 5 }
  0x27   : > { %s192_s26 = scalar_lea.hbm %s5501_s1, %s4363_s6  ;;  %s180_s24 = sand.u32 1, %s4670_s20  }
  0x28   : > { %s193_s27 = sshll.u32 %s192_s26, 4  ;;  %s206_s26 = scalar_lea.sflag [#allocation6], %s205_s15  ;;  %s194_s27 = int_to_ptr.hbm [resolvable:$true] %s193_s27 }
  0x29   : > { %p4874_p5 = pnand %p4368_p3, %p241_p4  ;;  %s4383_s28 = smul.u32 18432, %s180_s24 }
  0x2a   : > { %s213_s13 = scalar_lea.hbm %s5502_s2, %s4832_s14  ;;  %s232_s9 = scalar_lea.hbm %s5477_s3, %s4832_s14 }
  0x2b   : > { %s215_s30 = sshll.u32 %s213_s13, 4  ;;  %s184_s11 = scalar_lea.vmem [#allocation3], %s4383_s28  ;;  %s216_s30 = int_to_ptr.hbm [resolvable:$true] %s215_s30 }
  0x2c   : > { %4397 = dma.hbm_to_vmem [thread:$0]  (!%p4866_p2), %s216_s30, 256, %s218_s0, %s206_s26  }
  0x2d   : > { %s195_s12 = sshll.u32 %s184_s11, 4  ;;  %s234_s10 = sshll.u32 %s232_s9, 4  ;;  %s196_s12 = int_to_ptr.vmem [resolvable:$true] %s195_s12  ;;  %s235_s10 = int_to_ptr.hbm [resolvable:$true] %s234_s10 }
  0x2e   : > { %s181_s1 = scalar_lea.sflag [#allocation4], %s180_s24  ;;  %s4696_s15 = smov 4096  }
  0x2f   : > { %s4697_s2 = smov 2048   ;;  %s4698_s17 = smov 128  }
  0x30   : > { %4394 = dma.hbm_to_vmem [thread:$0]  (!%p4845_p1), %s194_s27, 294912, %s196_s12, %s181_s1, %s4696_s15, %s4697_s2, %s4698_s17  }
  0x31   : > { %s228_s0 = scalar_lea.vmem [#allocation7], %s4855_s5  ;;  %245 = sbr.rel (%p4874_p5) target bundleno = 924 (0x39c), region = 36 }
  0x32   : > { %s236_s30 = sshll.u32 %s228_s0, 4  ;;  %s247_s14 = sand.u32 (!%p4874_p5), 1, %s4666_s19   ;;  %s237_s30 = int_to_ptr.vmem [resolvable:$true] %s236_s30 }
  0x33   : > { %4400 = dma.hbm_to_vmem [thread:$0]  (!%p4866_p2), %s235_s10, 256, %s237_s30, %s206_s26  }
  0x34   : > { %s4891_s28 = smul.u32 (!%p4874_p5), 18432, %s247_s14  ;;  %s248_s24 = scalar_lea.sflag (!%p4874_p5), [#allocation4], %s247_s14 }
  0x36   : > { %s251_s11 = scalar_lea.vmem [#allocation3], %s4891_s28 }
  0x37   : > { %4641 = dma.done.wait (%p4807_p7), %s248_s24, 294912  }
  0x38   : > { %4643 = vsyncadd (%p4807_p7), %s248_s24, 4294672384  ;;  %s5505_s1 = sadd.s32 4294967295, %s4690_s25   ;;  %s259_s17 = sand.u32 1, %s4654_s16  }
  0x39   : > { %s257_s2 = sand.u32 1, %s5505_s1   ;;  %s4901_s27 = sshll.u32 %s259_s17, 4 }
  0x3a   : > { %s258_s8 = scalar_lea.sflag [#allocation6], %s257_s2  ;;  %s261_s5 = scalar_lea.vmem [#allocation5], %s4901_s27 }
  0x3b   : > { %4645 = dma.done.wait (%p4836_p0), %s258_s8, 512  }
  0x3c   : > { %4647 = vsyncadd (%p4836_p0), %s258_s8, 4294966784  ;;  %s4371_s7 = sshll.u32 %s4678_s22, 4  ;;  %s271_s13 = scalar_lea.vmem [#allocation7], %s4901_s27 }
  0x3d   : > { %p312_p6 = scmp.lt.s32.totalorder %s4371_s7, 31  ;;  %p4373_p7 = scmp.ne.s32.totalorder %s4674_s21, 0 }
  0x3f   : > { %s5527_s7 = smov (!%p312_p6, %s4371_s7), 31  ;;  %320 = sbr.rel (%p4373_p7) target bundleno = 85 (0x55), region = 52 }
  0x40   : > { %s4372_s29 = sshll.u32 %s5527_s7, 2 }
  0x41   : > { %s4912_s12 = scalar_lea.vmem %s5478_s4, %s4372_s29 }
  0x44   : > { %v4699_v0 = vmov 0.0  }
  0x45   : > { %321 = vst [vmem:[#allocation2 + $0x30] sm:$0xff] %v4699_v0 }
  0x46   : > { %322 = vst [vmem:[#allocation2] sm:$0xff] %v4699_v0 }
  0x47   : > { %323 = vst [vmem:[#allocation2 + $0x58] sm:$0xff] %v4699_v0 }
  0x48   : > { %324 = vst [vmem:[#allocation2 + $0x18] sm:$0xff] %v4699_v0 }
  0x49   : > { %325 = vst [vmem:[#allocation2 + $0x50] sm:$0xff] %v4699_v0 }
  0x4a   : > { %326 = vst [vmem:[#allocation2 + $0x68] sm:$0xff] %v4699_v0 }
  0x4b   : > { %327 = vst [vmem:[#allocation2 + $0x8] sm:$0xff] %v4699_v0 }
  0x4c   : > { %328 = vst [vmem:[#allocation2 + $0x48] sm:$0xff] %v4699_v0 }
  0x4d   : > { %329 = vst [vmem:[#allocation2 + $0x40] sm:$0xff] %v4699_v0 }
  0x4e   : > { %330 = vst [vmem:[#allocation2 + $0x20] sm:$0xff] %v4699_v0 }
  0x4f   : > { %331 = vst [vmem:[#allocation2 + $0x10] sm:$0xff] %v4699_v0 }
  0x50   : > { %332 = vst [vmem:[#allocation2 + $0x38] sm:$0xff] %v4699_v0 }
  0x51   : > { %333 = vst [vmem:[#allocation2 + $0x60] sm:$0xff] %v4699_v0 }
  0x52   : > { %334 = vst [vmem:[#allocation2 + $0x70] sm:$0xff] %v4699_v0 }
  0x53   : > { %335 = vst [vmem:[#allocation2 + $0x78] sm:$0xff] %v4699_v0 }
  0x54   : > { %336 = vst [vmem:[#allocation2 + $0x28] sm:$0xff] %v4699_v0 }
  0x55 PF: > { %s4916_s22 = smov 0  }
  0x56 LB: >> { %s4374_s18 = sshll.u32 %s4694_s22, 9  ;;  %s343_s15 = smul.u32 4608, %s4674_s21  ;;  %s4694_s22 = sphi %s4916_s22, %s342_s22  }
  0x57   : >> { %s352_s6 = sshra.s32 %s4374_s18, 5  ;;  %s5506_s2 = sld [smem:[#allocation17_spill]] }
  0x58   : >> { %s4382_s9 = sshll.u32 %s352_s6, 7  ;;  %s4955_s0 = sadd.s32 %s4374_s18, %s343_s15 }
  0x59   : >> { %s4926_s10 = scalar_lea.vmem %s251_s11, %s4382_s9 [#allocation3]  ;;  %s346_s30 = sshra.s32 %s4955_s0, 7 }
  0x5a   : >> { %v405_v1 = vld [vmem:[%s4926_s10 + $0x180] sm:$0xff]  ;;  %s4375_s14 = sshll.u32 %s346_s30, 2  ;;  %s342_s22 = sadd.s32 1, %s4694_s22  }
  0x5b   : >> { %v469_v2 = vld [vmem:[%s4926_s10 + $0x380] sm:$0xff]  ;;  %v837_v4 = vunpack.c.2.s8 %v405_v1  ;;  %v853_v5 = vunpack.c.3.s8 %v405_v1  ;;  %v805_v23 = vunpack.c.0.s8 %v405_v1  ;;  %v821_v24 = vunpack.c.1.s8 %v405_v1  ;;  %p339_p8 = scmp.ge.s32.totalorder %s342_s22, 9  }
  0x5c   : >> { %v533_v3 = vld [vmem:[%s4926_s10 + $0x580] sm:$0xff]  ;;  %v1093_v6 = vunpack.c.2.s8 %v469_v2  ;;  %v1109_v7 = vunpack.c.3.s8 %v469_v2  ;;  %v1061_v27 = vunpack.c.0.s8 %v469_v2  ;;  %v1077_v28 = vunpack.c.1.s8 %v469_v2  ;;  %p4378_p9 = scmp.ne.s32.totalorder (%p339_p8), %s4674_s21, 1 }
  0x5d   : >> { %v597_v8 = vld [vmem:[%s4926_s10 + $0x780] sm:$0xff]  ;;  %v1349_v9 = vunpack.c.2.s8 %v533_v3  ;;  %v1365_v10 = vunpack.c.3.s8 %v533_v3  ;;  %v1861_v13 = vcvt.s32.f32 %v837_v4  ;;  %v1877_v14 = vcvt.s32.f32 %v853_v5  ;;  %s4965_s17 = scalar_lea.vmem %s5506_s2, %s4375_s14 }
  0x5e   : >> { %v1605_v11 = vunpack.c.2.s8 %v597_v8  ;;  %v1621_v12 = vunpack.c.3.s8 %v597_v8  ;;  %v2117_v15 = vcvt.s32.f32 %v1093_v6  ;;  %v2133_v16 = vcvt.s32.f32 %v1109_v7  ;;  %v389_v29 = vld [vmem:[%s4926_s10 + $0x100] sm:$0xff] }
  0x5f   : >> { %v2373_v17 = vcvt.s32.f32 %v1349_v9  ;;  %v2389_v18 = vcvt.s32.f32 %v1365_v10  ;;  %v2773_v21 = vpack.c.bf16 %v1877_v14, %v1861_v13  ;;  %v1829_v30 = vcvt.s32.f32 %v805_v23  ;;  %v453_v38 = vld [vmem:[%s4926_s10 + $0x300] sm:$0xff] }
  0x60   : >> { %v2629_v19 = vcvt.s32.f32 %v1605_v11  ;;  %v2645_v20 = vcvt.s32.f32 %v1621_v12  ;;  %v2901_v22 = vpack.c.bf16 %v2133_v16, %v2117_v15  ;;  %v1845_v31 = vcvt.s32.f32 %v821_v24  ;;  %v517_v43 = vld [vmem:[%s4926_s10 + $0x500] sm:$0xff] }
  0x61   : >> { %v3029_v25 = vpack.c.bf16 %v2389_v18, %v2373_v17  ;;  %3203 = vmatpush.bf16.msra.mxu0 %v2773_v21  ;;  %v1317_v32 = vunpack.c.0.s8 %v533_v3  ;;  %v1333_v33 = vunpack.c.1.s8 %v533_v3  ;;  %v2085_v34 = vcvt.s32.f32 %v1061_v27  ;;  %v581_v48 = vld [vmem:[%s4926_s10 + $0x700] sm:$0xff] }
  0x62   : >> { %v3157_v26 = vpack.c.bf16 %v2645_v20, %v2629_v19  ;;  %3216 = vmatpush.bf16.msra.mxu1 %v2901_v22  ;;  %v2101_v35 = vcvt.s32.f32 %v1077_v28  ;;  %v1573_v36 = vunpack.c.0.s8 %v597_v8  ;;  %v1589_v37 = vunpack.c.1.s8 %v597_v8  ;;  %v373_v9 = vld [vmem:[%s4926_s10 + $0x80] sm:$0xff] }
  0x63   : >> { %3229 = vmatpush.bf16.msra.mxu2 %v3029_v25  ;;  %v2757_v39 = vpack.c.bf16 %v1845_v31, %v1829_v30  ;;  %v2341_v40 = vcvt.s32.f32 %v1317_v32  ;;  %v2357_v41 = vcvt.s32.f32 %v1333_v33  ;;  %v773_v42 = vunpack.c.2.s8 %v389_v29  ;;  %v437_v18 = vld [vmem:[%s4926_s10 + $0x280] sm:$0xff] }
  0x64   : >> { %3242 = vmatpush.bf16.msra.mxu3 %v3157_v26  ;;  %v2885_v44 = vpack.c.bf16 %v2101_v35, %v2085_v34  ;;  %v2597_v45 = vcvt.s32.f32 %v1573_v36  ;;  %v2613_v46 = vcvt.s32.f32 %v1589_v37  ;;  %v789_v47 = vunpack.c.3.s8 %v389_v29  ;;  %v501_v23 = vld [vmem:[%s4926_s10 + $0x480] sm:$0xff] }
  0x65   : >> { %3204 = vmatpush.bf16.msra.mxu0 %v2757_v39  ;;  %v3013_v49 = vpack.c.bf16 %v2357_v41, %v2341_v40  ;;  %v1797_v50 = vcvt.s32.f32 %v773_v42  ;;  %v1029_v51 = vunpack.c.2.s8 %v453_v38  ;;  %v1045_v52 = vunpack.c.3.s8 %v453_v38  ;;  %v565_v28 = vld [vmem:[%s4926_s10 + $0x680] sm:$0xff] }
  0x66   : >> { %3217 = vmatpush.bf16.msra.mxu1 %v2885_v44  ;;  %v3141_v53 = vpack.c.bf16 %v2613_v46, %v2597_v45  ;;  %v1813_v54 = vcvt.s32.f32 %v789_v47  ;;  %v1285_v55 = vunpack.c.2.s8 %v517_v43  ;;  %v1301_v56 = vunpack.c.3.s8 %v517_v43 }
  0x67   : >> { %3230 = vmatpush.bf16.msra.mxu2 %v3013_v49  ;;  %v2053_v57 = vcvt.s32.f32 %v1029_v51  ;;  %v2069_v58 = vcvt.s32.f32 %v1045_v52  ;;  %v1541_v59 = vunpack.c.2.s8 %v581_v48  ;;  %v1557_v60 = vunpack.c.3.s8 %v581_v48 }
  0x68   : >> { %3243 = vmatpush.bf16.msra.mxu3 %v3141_v53  ;;  %v2741_v61 = vpack.c.bf16 %v1813_v54, %v1797_v50  ;;  %v2309_v62 = vcvt.s32.f32 %v1285_v55  ;;  %v2325_v63 = vcvt.s32.f32 %v1301_v56  ;;  %v741_v0 = vunpack.c.0.s8 %v389_v29  ;;  %v357_v53 = vld [vmem:[%s4926_s10] sm:$0xff] }
  0x69   : >> { %v2869_v1 = vpack.c.bf16 %v2069_v58, %v2053_v57  ;;  %v2565_v2 = vcvt.s32.f32 %v1541_v59  ;;  %v2581_v3 = vcvt.s32.f32 %v1557_v60  ;;  %v757_v4 = vunpack.c.1.s8 %v389_v29 }
  0x6a   : >> { %3205 = vmatpush.bf16.msra.mxu0 %v2741_v61  ;;  %v2997_v5 = vpack.c.bf16 %v2325_v63, %v2309_v62  ;;  %v1765_v6 = vcvt.s32.f32 %v741_v0  ;;  %v997_v7 = vunpack.c.0.s8 %v453_v38  ;;  %v1013_v8 = vunpack.c.1.s8 %v453_v38  ;;  %v421_v62 = vld [vmem:[%s4926_s10 + $0x200] sm:$0xff] }
  0x6b   : >> { %3218 = vmatpush.bf16.msra.mxu1 %v2869_v1  ;;  %v3125_v10 = vpack.c.bf16 %v2581_v3, %v2565_v2  ;;  %v1781_v11 = vcvt.s32.f32 %v757_v4  ;;  %v1253_v12 = vunpack.c.0.s8 %v517_v43  ;;  %v1269_v13 = vunpack.c.1.s8 %v517_v43  ;;  %v485_v3 = vld [vmem:[%s4926_s10 + $0x400] sm:$0xff] }
  0x6c   : >> { %3231 = vmatpush.bf16.msra.mxu2 %v2997_v5  ;;  %v2021_v14 = vcvt.s32.f32 %v997_v7  ;;  %v2037_v15 = vcvt.s32.f32 %v1013_v8  ;;  %v1509_v16 = vunpack.c.0.s8 %v581_v48  ;;  %v1525_v17 = vunpack.c.1.s8 %v581_v48  ;;  %v549_v8 = vld [vmem:[%s4926_s10 + $0x600] sm:$0xff] }
  0x6d   : >> { %3244 = vmatpush.bf16.msra.mxu3 %v3125_v10  ;;  %v2725_v19 = vpack.c.bf16 %v1781_v11, %v1765_v6  ;;  %v2277_v20 = vcvt.s32.f32 %v1253_v12  ;;  %v2293_v21 = vcvt.s32.f32 %v1269_v13  ;;  %v709_v22 = vunpack.c.2.s8 %v373_v9 }
  0x6e   : >> { %v2853_v24 = vpack.c.bf16 %v2037_v15, %v2021_v14  ;;  %v2533_v25 = vcvt.s32.f32 %v1509_v16  ;;  %v2549_v26 = vcvt.s32.f32 %v1525_v17  ;;  %v725_v27 = vunpack.c.3.s8 %v373_v9 }
  0x6f   : >> { %3206 = vmatpush.bf16.msra.mxu0 %v2725_v19  ;;  %v2981_v29 = vpack.c.bf16 %v2293_v21, %v2277_v20  ;;  %v1733_v30 = vcvt.s32.f32 %v709_v22  ;;  %v965_v31 = vunpack.c.2.s8 %v437_v18  ;;  %v981_v32 = vunpack.c.3.s8 %v437_v18 }
  0x70   : >> { %3219 = vmatpush.bf16.msra.mxu1 %v2853_v24  ;;  %v3109_v33 = vpack.c.bf16 %v2549_v26, %v2533_v25  ;;  %v1749_v34 = vcvt.s32.f32 %v725_v27  ;;  %v1221_v35 = vunpack.c.2.s8 %v501_v23  ;;  %v1237_v36 = vunpack.c.3.s8 %v501_v23 }
  0x71   : >> { %3232 = vmatpush.bf16.msra.mxu2 %v2981_v29  ;;  %v1989_v37 = vcvt.s32.f32 %v965_v31  ;;  %v2005_v38 = vcvt.s32.f32 %v981_v32  ;;  %v1477_v39 = vunpack.c.2.s8 %v565_v28  ;;  %v1493_v40 = vunpack.c.3.s8 %v565_v28 }
  0x72   : >> { %3245 = vmatpush.bf16.msra.mxu3 %v3109_v33  ;;  %v2709_v41 = vpack.c.bf16 %v1749_v34, %v1733_v30  ;;  %v2245_v42 = vcvt.s32.f32 %v1221_v35  ;;  %v2261_v43 = vcvt.s32.f32 %v1237_v36  ;;  %v677_v44 = vunpack.c.0.s8 %v373_v9  ;;  %v406_v33 = vld [vmem:[%s4926_s10 + $0x188] sm:$0xff] }
  0x73   : >> { %v2837_v45 = vpack.c.bf16 %v2005_v38, %v1989_v37  ;;  %v2501_v46 = vcvt.s32.f32 %v1477_v39  ;;  %v2517_v47 = vcvt.s32.f32 %v1493_v40  ;;  %v693_v48 = vunpack.c.1.s8 %v373_v9 }
  0x74   : >> { %3207 = vmatpush.bf16.msra.mxu0 %v2709_v41  ;;  %v2965_v49 = vpack.c.bf16 %v2261_v43, %v2245_v42  ;;  %v1701_v50 = vcvt.s32.f32 %v677_v44  ;;  %v933_v51 = vunpack.c.0.s8 %v437_v18  ;;  %v949_v52 = vunpack.c.1.s8 %v437_v18  ;;  %v470_v42 = vld [vmem:[%s4926_s10 + $0x388] sm:$0xff] }
  0x75   : >> { %3220 = vmatpush.bf16.msra.mxu1 %v2837_v45  ;;  %v3093_v54 = vpack.c.bf16 %v2517_v47, %v2501_v46  ;;  %v1717_v55 = vcvt.s32.f32 %v693_v48  ;;  %v1189_v56 = vunpack.c.0.s8 %v501_v23  ;;  %v1205_v57 = vunpack.c.1.s8 %v501_v23  ;;  %v534_v47 = vld [vmem:[%s4926_s10 + $0x588] sm:$0xff] }
  0x76   : >> { %3233 = vmatpush.bf16.msra.mxu2 %v2965_v49  ;;  %v1957_v58 = vcvt.s32.f32 %v933_v51  ;;  %v1973_v59 = vcvt.s32.f32 %v949_v52  ;;  %v1445_v60 = vunpack.c.0.s8 %v565_v28  ;;  %v1461_v61 = vunpack.c.1.s8 %v565_v28  ;;  %v598_v52 = vld [vmem:[%s4926_s10 + $0x788] sm:$0xff] }
  0x77   : >> { %3246 = vmatpush.bf16.msra.mxu3 %v3093_v54  ;;  %v2693_v63 = vpack.c.bf16 %v1717_v55, %v1701_v50  ;;  %v2213_v0 = vcvt.s32.f32 %v1189_v56  ;;  %v2229_v1 = vcvt.s32.f32 %v1205_v57  ;;  %v645_v2 = vunpack.c.2.s8 %v357_v53 }
  0x78   : >> { %v2821_v4 = vpack.c.bf16 %v1973_v59, %v1957_v58  ;;  %v2469_v5 = vcvt.s32.f32 %v1445_v60  ;;  %v2485_v6 = vcvt.s32.f32 %v1461_v61  ;;  %v661_v7 = vunpack.c.3.s8 %v357_v53 }
  0x79   : >> { %3208 = vmatpush.bf16.msra.mxu0 %v2693_v63  ;;  %v2949_v9 = vpack.c.bf16 %v2229_v1, %v2213_v0  ;;  %v1669_v10 = vcvt.s32.f32 %v645_v2  ;;  %v901_v11 = vunpack.c.2.s8 %v421_v62  ;;  %v917_v12 = vunpack.c.3.s8 %v421_v62 }
  0x7a   : >> { %3221 = vmatpush.bf16.msra.mxu1 %v2821_v4  ;;  %v3077_v13 = vpack.c.bf16 %v2485_v6, %v2469_v5  ;;  %v1685_v14 = vcvt.s32.f32 %v661_v7  ;;  %v1157_v15 = vunpack.c.2.s8 %v485_v3  ;;  %v1173_v16 = vunpack.c.3.s8 %v485_v3 }
  0x7b   : >> { %3234 = vmatpush.bf16.msra.mxu2 %v2949_v9  ;;  %v1925_v17 = vcvt.s32.f32 %v901_v11  ;;  %v1941_v18 = vcvt.s32.f32 %v917_v12  ;;  %v1413_v19 = vunpack.c.2.s8 %v549_v8  ;;  %v1429_v20 = vunpack.c.3.s8 %v549_v8 }
  0x7c   : >> { %3247 = vmatpush.bf16.msra.mxu3 %v3077_v13  ;;  %v2677_v21 = vpack.c.bf16 %v1685_v14, %v1669_v10  ;;  %v2181_v22 = vcvt.s32.f32 %v1157_v15  ;;  %v2197_v23 = vcvt.s32.f32 %v1173_v16  ;;  %v613_v24 = vunpack.c.0.s8 %v357_v53  ;;  %v390_v13 = vld [vmem:[%s4926_s10 + $0x108] sm:$0xff] }
  0x7d   : >> { %v2805_v25 = vpack.c.bf16 %v1941_v18, %v1925_v17  ;;  %v2437_v26 = vcvt.s32.f32 %v1413_v19  ;;  %v2453_v27 = vcvt.s32.f32 %v1429_v20  ;;  %v629_v28 = vunpack.c.1.s8 %v357_v53 }
  0x7e   : >> { %3209 = vmatpush.bf16.msra.mxu0 %v2677_v21  ;;  %v2933_v29 = vpack.c.bf16 %v2197_v23, %v2181_v22  ;;  %v1637_v30 = vcvt.s32.f32 %v613_v24  ;;  %v869_v31 = vunpack.c.0.s8 %v421_v62  ;;  %v885_v32 = vunpack.c.1.s8 %v421_v62  ;;  %v454_v22 = vld [vmem:[%s4926_s10 + $0x308] sm:$0xff] }
  0x7f   : >> { %3222 = vmatpush.bf16.msra.mxu1 %v2805_v25  ;;  %v3061_v34 = vpack.c.bf16 %v2453_v27, %v2437_v26  ;;  %v1653_v35 = vcvt.s32.f32 %v629_v28  ;;  %v1125_v36 = vunpack.c.0.s8 %v485_v3  ;;  %v1141_v37 = vunpack.c.1.s8 %v485_v3  ;;  %v518_v27 = vld [vmem:[%s4926_s10 + $0x508] sm:$0xff] }
  0x80   : >> { %3235 = vmatpush.bf16.msra.mxu2 %v2933_v29  ;;  %v1893_v38 = vcvt.s32.f32 %v869_v31  ;;  %v1909_v39 = vcvt.s32.f32 %v885_v32  ;;  %v1381_v40 = vunpack.c.0.s8 %v549_v8  ;;  %v1397_v41 = vunpack.c.1.s8 %v549_v8  ;;  %v582_v32 = vld [vmem:[%s4926_s10 + $0x708] sm:$0xff] }
  0x81   : >> { %3248 = vmatpush.bf16.msra.mxu3 %v3061_v34  ;;  %v2661_v43 = vpack.c.bf16 %v1653_v35, %v1637_v30  ;;  %v2149_v44 = vcvt.s32.f32 %v1125_v36  ;;  %v2165_v45 = vcvt.s32.f32 %v1141_v37  ;;  %v838_v46 = vunpack.c.2.s8 %v406_v33 }
  0x82   : >> { %v2789_v48 = vpack.c.bf16 %v1909_v39, %v1893_v38  ;;  %v2405_v49 = vcvt.s32.f32 %v1381_v40  ;;  %v2421_v50 = vcvt.s32.f32 %v1397_v41  ;;  %v854_v51 = vunpack.c.3.s8 %v406_v33 }
  0x83   : >> { %3210 = vmatpush.bf16.msra.mxu0 %v2661_v43  ;;  %v2917_v53 = vpack.c.bf16 %v2165_v45, %v2149_v44  ;;  %v1862_v54 = vcvt.s32.f32 %v838_v46  ;;  %v1094_v55 = vunpack.c.2.s8 %v470_v42  ;;  %v1110_v56 = vunpack.c.3.s8 %v470_v42 }
  0x84   : >> { %3223 = vmatpush.bf16.msra.mxu1 %v2789_v48  ;;  %v3045_v57 = vpack.c.bf16 %v2421_v50, %v2405_v49  ;;  %v1878_v58 = vcvt.s32.f32 %v854_v51  ;;  %v1350_v59 = vunpack.c.2.s8 %v534_v47  ;;  %v1366_v60 = vunpack.c.3.s8 %v534_v47 }
  0x85   : >> { %3236 = vmatpush.bf16.msra.mxu2 %v2917_v53  ;;  %v2118_v61 = vcvt.s32.f32 %v1094_v55  ;;  %v2134_v62 = vcvt.s32.f32 %v1110_v56  ;;  %v1606_v63 = vunpack.c.2.s8 %v598_v52  ;;  %v1622_v0 = vunpack.c.3.s8 %v598_v52 }
  0x86   : >> { %3249 = vmatpush.bf16.msra.mxu3 %v3045_v57  ;;  %v2774_v1 = vpack.c.bf16 %v1878_v58, %v1862_v54  ;;  %v2374_v2 = vcvt.s32.f32 %v1350_v59  ;;  %v2390_v3 = vcvt.s32.f32 %v1366_v60  ;;  %v806_v4 = vunpack.c.0.s8 %v406_v33  ;;  %v374_v57 = vld [vmem:[%s4926_s10 + $0x88] sm:$0xff] }
  0x87   : >> { %v2902_v5 = vpack.c.bf16 %v2134_v62, %v2118_v61  ;;  %v2630_v6 = vcvt.s32.f32 %v1606_v63  ;;  %v2646_v7 = vcvt.s32.f32 %v1622_v0  ;;  %v822_v8 = vunpack.c.1.s8 %v406_v33 }
  0x88   : >> { %3255 = vmatpush.bf16.msrb.mxu0 %v2774_v1  ;;  %v3030_v9 = vpack.c.bf16 %v2390_v3, %v2374_v2  ;;  %v1830_v10 = vcvt.s32.f32 %v806_v4  ;;  %v1062_v11 = vunpack.c.0.s8 %v470_v42  ;;  %v1078_v12 = vunpack.c.1.s8 %v470_v42  ;;  %v438_v2 = vld [vmem:[%s4926_s10 + $0x288] sm:$0xff] }
  0x89   : >> { %3268 = vmatpush.bf16.msrb.mxu1 %v2902_v5  ;;  %v3158_v14 = vpack.c.bf16 %v2646_v7, %v2630_v6  ;;  %v1846_v15 = vcvt.s32.f32 %v822_v8  ;;  %v1318_v16 = vunpack.c.0.s8 %v534_v47  ;;  %v1334_v17 = vunpack.c.1.s8 %v534_v47  ;;  %v502_v7 = vld [vmem:[%s4926_s10 + $0x488] sm:$0xff] }
  0x8a   : >> { %3281 = vmatpush.bf16.msrb.mxu2 %v3030_v9  ;;  %v2086_v18 = vcvt.s32.f32 %v1062_v11  ;;  %v2102_v19 = vcvt.s32.f32 %v1078_v12  ;;  %v1574_v20 = vunpack.c.0.s8 %v598_v52  ;;  %v1590_v21 = vunpack.c.1.s8 %v598_v52  ;;  %v566_v12 = vld [vmem:[%s4926_s10 + $0x688] sm:$0xff] }
  0x8b   : >> { %3294 = vmatpush.bf16.msrb.mxu3 %v3158_v14  ;;  %v2758_v23 = vpack.c.bf16 %v1846_v15, %v1830_v10  ;;  %v2342_v24 = vcvt.s32.f32 %v1318_v16  ;;  %v2358_v25 = vcvt.s32.f32 %v1334_v17  ;;  %v774_v26 = vunpack.c.2.s8 %v390_v13 }
  0x8c   : >> { %v2886_v28 = vpack.c.bf16 %v2102_v19, %v2086_v18  ;;  %v2598_v29 = vcvt.s32.f32 %v1574_v20  ;;  %v2614_v30 = vcvt.s32.f32 %v1590_v21  ;;  %v790_v31 = vunpack.c.3.s8 %v390_v13 }
  0x8d   : >> { %3256 = vmatpush.bf16.msrb.mxu0 %v2758_v23  ;;  %v3014_v33 = vpack.c.bf16 %v2358_v25, %v2342_v24  ;;  %v1798_v34 = vcvt.s32.f32 %v774_v26  ;;  %v1030_v35 = vunpack.c.2.s8 %v454_v22  ;;  %v1046_v36 = vunpack.c.3.s8 %v454_v22 }
  0x8e   : >> { %3269 = vmatpush.bf16.msrb.mxu1 %v2886_v28  ;;  %v3142_v37 = vpack.c.bf16 %v2614_v30, %v2598_v29  ;;  %v1814_v38 = vcvt.s32.f32 %v790_v31  ;;  %v1286_v39 = vunpack.c.2.s8 %v518_v27  ;;  %v1302_v40 = vunpack.c.3.s8 %v518_v27 }
  0x8f   : >> { %3282 = vmatpush.bf16.msrb.mxu2 %v3014_v33  ;;  %v2054_v41 = vcvt.s32.f32 %v1030_v35  ;;  %v2070_v42 = vcvt.s32.f32 %v1046_v36  ;;  %v1542_v43 = vunpack.c.2.s8 %v582_v32  ;;  %v1558_v44 = vunpack.c.3.s8 %v582_v32 }
  0x90   : >> { %3295 = vmatpush.bf16.msrb.mxu3 %v3142_v37  ;;  %v2742_v45 = vpack.c.bf16 %v1814_v38, %v1798_v34  ;;  %v2310_v46 = vcvt.s32.f32 %v1286_v39  ;;  %v2326_v47 = vcvt.s32.f32 %v1302_v40  ;;  %v742_v48 = vunpack.c.0.s8 %v390_v13  ;;  %v351_v37 = vld [vmem:[%s4965_s17 + $0x8] sm:$0xff] }
  0x91   : >> { %v2870_v49 = vpack.c.bf16 %v2070_v42, %v2054_v41  ;;  %v2566_v50 = vcvt.s32.f32 %v1542_v43  ;;  %v2582_v51 = vcvt.s32.f32 %v1558_v44  ;;  %v758_v52 = vunpack.c.1.s8 %v390_v13 }
  0x92   : >> { %3257 = vmatpush.bf16.msrb.mxu0 %v2742_v45  ;;  %v2998_v53 = vpack.c.bf16 %v2326_v47, %v2310_v46  ;;  %v1766_v54 = vcvt.s32.f32 %v742_v48  ;;  %v998_v55 = vunpack.c.0.s8 %v454_v22  ;;  %v1014_v56 = vunpack.c.1.s8 %v454_v22  ;;  %v358_v46 = vld [vmem:[%s4926_s10 + $0x8] sm:$0xff] }
  0x93   : >> { %3270 = vmatpush.bf16.msrb.mxu1 %v2870_v49  ;;  %v3126_v58 = vpack.c.bf16 %v2582_v51, %v2566_v50  ;;  %v1782_v59 = vcvt.s32.f32 %v758_v52  ;;  %v1254_v60 = vunpack.c.0.s8 %v518_v27  ;;  %v1270_v61 = vunpack.c.1.s8 %v518_v27  ;;  %v422_v51 = vld [vmem:[%s4926_s10 + $0x208] sm:$0xff] }
  0x94   : >> { %3283 = vmatpush.bf16.msrb.mxu2 %v2998_v53  ;;  %v2022_v62 = vcvt.s32.f32 %v998_v55  ;;  %v2038_v63 = vcvt.s32.f32 %v1014_v56  ;;  %v1510_v0 = vunpack.c.0.s8 %v582_v32  ;;  %v1526_v1 = vunpack.c.1.s8 %v582_v32  ;;  %v486_v56 = vld [vmem:[%s4926_s10 + $0x408] sm:$0xff] }
  0x95   : >> { %3296 = vmatpush.bf16.msrb.mxu3 %v3126_v58  ;;  %v2726_v3 = vpack.c.bf16 %v1782_v59, %v1766_v54  ;;  %v2278_v4 = vcvt.s32.f32 %v1254_v60  ;;  %v2294_v5 = vcvt.s32.f32 %v1270_v61  ;;  %v710_v6 = vunpack.c.2.s8 %v374_v57  ;;  %v550_v61 = vld [vmem:[%s4926_s10 + $0x608] sm:$0xff] }
  0x96   : >> { %v2854_v8 = vpack.c.bf16 %v2038_v63, %v2022_v62  ;;  %v2534_v9 = vcvt.s32.f32 %v1510_v0  ;;  %v2550_v10 = vcvt.s32.f32 %v1526_v1  ;;  %v726_v11 = vunpack.c.3.s8 %v374_v57 }
  0x97   : >> { %3258 = vmatpush.bf16.msrb.mxu0 %v2726_v3  ;;  %v2982_v13 = vpack.c.bf16 %v2294_v5, %v2278_v4  ;;  %v1734_v14 = vcvt.s32.f32 %v710_v6  ;;  %v966_v15 = vunpack.c.2.s8 %v438_v2  ;;  %v982_v16 = vunpack.c.3.s8 %v438_v2 }
  0x98   : >> { %3271 = vmatpush.bf16.msrb.mxu1 %v2854_v8  ;;  %v3110_v17 = vpack.c.bf16 %v2550_v10, %v2534_v9  ;;  %v1750_v18 = vcvt.s32.f32 %v726_v11  ;;  %v1222_v19 = vunpack.c.2.s8 %v502_v7  ;;  %v1238_v20 = vunpack.c.3.s8 %v502_v7 }
  0x99   : >> { %3284 = vmatpush.bf16.msrb.mxu2 %v2982_v13  ;;  %v1990_v21 = vcvt.s32.f32 %v966_v15  ;;  %v2006_v22 = vcvt.s32.f32 %v982_v16  ;;  %v1478_v23 = vunpack.c.2.s8 %v566_v12  ;;  %v1494_v24 = vunpack.c.3.s8 %v566_v12 }
  0x9a   : >> { %3297 = vmatpush.bf16.msrb.mxu3 %v3110_v17  ;;  %v2710_v25 = vpack.c.bf16 %v1750_v18, %v1734_v14  ;;  %v2246_v26 = vcvt.s32.f32 %v1222_v19  ;;  %v2262_v27 = vcvt.s32.f32 %v1238_v20  ;;  %v678_v28 = vunpack.c.0.s8 %v374_v57 }
  0x9b   : >> { %v2838_v29 = vpack.c.bf16 %v2006_v22, %v1990_v21  ;;  %v2502_v30 = vcvt.s32.f32 %v1478_v23  ;;  %v2518_v31 = vcvt.s32.f32 %v1494_v24  ;;  %v694_v32 = vunpack.c.1.s8 %v374_v57 }
  0x9c   : >> { %3259 = vmatpush.bf16.msrb.mxu0 %v2710_v25  ;;  %v2966_v33 = vpack.c.bf16 %v2262_v27, %v2246_v26  ;;  %v1702_v34 = vcvt.s32.f32 %v678_v28  ;;  %v934_v35 = vunpack.c.0.s8 %v438_v2  ;;  %v950_v36 = vunpack.c.1.s8 %v438_v2  ;;  %v350_v2 = vld [vmem:[%s4965_s17] sm:$0xff]  ;;  %v407_v27 = vld [vmem:[%s4926_s10 + $0x190] sm:$0xff] }
  0x9d   : >> { %3272 = vmatpush.bf16.msrb.mxu1 %v2838_v29  ;;  %v3094_v38 = vpack.c.bf16 %v2518_v31, %v2502_v30  ;;  %v1718_v39 = vcvt.s32.f32 %v694_v32  ;;  %v1190_v40 = vunpack.c.0.s8 %v502_v7  ;;  %v1206_v41 = vunpack.c.1.s8 %v502_v7 }
  0x9e   : >> { %3285 = vmatpush.bf16.msrb.mxu2 %v2966_v33  ;;  %v1958_v42 = vcvt.s32.f32 %v934_v35  ;;  %v1974_v43 = vcvt.s32.f32 %v950_v36  ;;  %v1446_v44 = vunpack.c.0.s8 %v566_v12  ;;  %v1462_v45 = vunpack.c.1.s8 %v566_v12  ;;  %v471_v36 = vld [vmem:[%s4926_s10 + $0x390] sm:$0xff] }
  0x9f   : >> { %3298 = vmatpush.bf16.msrb.mxu3 %v3094_v38  ;;  %v2694_v47 = vpack.c.bf16 %v1718_v39, %v1702_v34  ;;  %v2214_v48 = vcvt.s32.f32 %v1190_v40  ;;  %v2230_v49 = vcvt.s32.f32 %v1206_v41  ;;  %v3193_v50 = vunpack.c.l.b16 %v351_v37  ;;  %v535_v41 = vld [vmem:[%s4926_s10 + $0x590] sm:$0xff] }
  0xa0   : >> { %v2822_v52 = vpack.c.bf16 %v1974_v43, %v1958_v42  ;;  %v2470_v53 = vcvt.s32.f32 %v1446_v44  ;;  %v2486_v54 = vcvt.s32.f32 %v1462_v45  ;;  %v3194_v55 = vunpack.c.h.b16 %v351_v37 }
  0xa1   : >> { %3260 = vmatpush.bf16.msrb.mxu0 %v2694_v47  ;;  %v2950_v57 = vpack.c.bf16 %v2230_v49, %v2214_v48  ;;  %v4971_v58 = vpack.c.b16 %v3193_v50, %v3193_v50  ;;  %v646_v59 = vunpack.c.2.s8 %v358_v46  ;;  %v662_v60 = vunpack.c.3.s8 %v358_v46 }
  0xa2   : >> { %3273 = vmatpush.bf16.msrb.mxu1 %v2822_v52  ;;  %v3078_v62 = vpack.c.bf16 %v2486_v54, %v2470_v53  ;;  %v4974_v63 = vpack.c.b16 %v3194_v55, %v3194_v55  ;;  %v902_v0 = vunpack.c.2.s8 %v422_v51  ;;  %v918_v1 = vunpack.c.3.s8 %v422_v51 }
  0xa3   : >> { %3286 = vmatpush.bf16.msrb.mxu2 %v2950_v57  ;;  %v1670_v3 = vcvt.s32.f32 %v646_v59  ;;  %v1686_v4 = vcvt.s32.f32 %v662_v60  ;;  %v1158_v5 = vunpack.c.2.s8 %v486_v56  ;;  %v1174_v6 = vunpack.c.3.s8 %v486_v56 }
  0xa4   : >> { %3299 = vmatpush.bf16.msrb.mxu3 %v3078_v62  ;;  %3237 = vmatmul.bf16.vlgmr.msra.gmra.mxu2 %v4971_v58  ;;  %v1926_v7 = vcvt.s32.f32 %v902_v0  ;;  %v1942_v8 = vcvt.s32.f32 %v918_v1  ;;  %v1414_v9 = vunpack.c.2.s8 %v550_v61  ;;  %v1430_v10 = vunpack.c.3.s8 %v550_v61 }
  0xa5   : >> { %3250 = vmatmul.bf16.vlgmr.msra.gmra.mxu3 %v4974_v63  ;;  %v2678_v11 = vpack.c.bf16 %v1686_v4, %v1670_v3  ;;  %v2182_v12 = vcvt.s32.f32 %v1158_v5  ;;  %v2198_v13 = vcvt.s32.f32 %v1174_v6  ;;  %v3191_v14 = vunpack.c.l.b16 %v350_v2 }
  0xa6   : >> { %v2806_v15 = vpack.c.bf16 %v1942_v8, %v1926_v7  ;;  %v2438_v16 = vcvt.s32.f32 %v1414_v9  ;;  %v2454_v17 = vcvt.s32.f32 %v1430_v10  ;;  %v3192_v18 = vunpack.c.h.b16 %v350_v2  ;;  %v391_v9 = vld [vmem:[%s4926_s10 + $0x110] sm:$0xff] }
  0xa7   : >> { %3261 = vmatpush.bf16.msrb.mxu0 %v2678_v11  ;;  %v2934_v19 = vpack.c.bf16 %v2198_v13, %v2182_v12  ;;  %v4979_v20 = vpack.c.b16 %v3191_v14, %v3191_v14  ;;  %v614_v21 = vunpack.c.0.s8 %v358_v46  ;;  %v630_v22 = vunpack.c.1.s8 %v358_v46  ;;  %v599_v46 = vld [vmem:[%s4926_s10 + $0x790] sm:$0xff] }
  0xa8   : >> { %3274 = vmatpush.bf16.msrb.mxu1 %v2806_v15  ;;  %v3062_v23 = vpack.c.bf16 %v2454_v17, %v2438_v16  ;;  %v4981_v24 = vpack.c.b16 %v3192_v18, %v3192_v18  ;;  %v870_v25 = vunpack.c.0.s8 %v422_v51  ;;  %v886_v26 = vunpack.c.1.s8 %v422_v51  ;;  %v455_v18 = vld [vmem:[%s4926_s10 + $0x310] sm:$0xff] }
  0xa9   : >> { %3287 = vmatpush.bf16.msrb.mxu2 %v2934_v19  ;;  %3211 = vmatmul.bf16.vlgmr.msra.gmra.mxu0 %v4979_v20  ;;  %v1638_v28 = vcvt.s32.f32 %v614_v21  ;;  %v1654_v29 = vcvt.s32.f32 %v630_v22  ;;  %v1126_v30 = vunpack.c.0.s8 %v486_v56  ;;  %v1142_v31 = vunpack.c.1.s8 %v486_v56 }
  0xaa   : >> { %3300 = vmatpush.bf16.msrb.mxu3 %v3062_v23  ;;  %3224 = vmatmul.bf16.vlgmr.msra.gmra.mxu1 %v4981_v24  ;;  %v1894_v32 = vcvt.s32.f32 %v870_v25  ;;  %v1910_v33 = vcvt.s32.f32 %v886_v26  ;;  %v1382_v34 = vunpack.c.0.s8 %v550_v61  ;;  %v1398_v35 = vunpack.c.1.s8 %v550_v61  ;;  %v519_v25 = vld [vmem:[%s4926_s10 + $0x510] sm:$0xff] }
  0xab   : >> { %v2662_v37 = vpack.c.bf16 %v1654_v29, %v1638_v28  ;;  %v2150_v38 = vcvt.s32.f32 %v1126_v30  ;;  %v2166_v39 = vcvt.s32.f32 %v1142_v31  ;;  %v839_v40 = vunpack.c.2.s8 %v407_v27  ;;  %v583_v30 = vld [vmem:[%s4926_s10 + $0x710] sm:$0xff] }
  0xac   : >> { %v2790_v42 = vpack.c.bf16 %v1910_v33, %v1894_v32  ;;  %v2406_v43 = vcvt.s32.f32 %v1382_v34  ;;  %v2422_v44 = vcvt.s32.f32 %v1398_v35  ;;  %v855_v45 = vunpack.c.3.s8 %v407_v27 }
  0xad   : >> { %3262 = vmatpush.bf16.msrb.mxu0 %v2662_v37  ;;  %v2918_v47 = vpack.c.bf16 %v2166_v39, %v2150_v38  ;;  %v1863_v48 = vcvt.s32.f32 %v839_v40  ;;  %v1095_v49 = vunpack.c.2.s8 %v471_v36  ;;  %v1111_v50 = vunpack.c.3.s8 %v471_v36 }
  0xae   : >> { %3275 = vmatpush.bf16.msrb.mxu1 %v2790_v42  ;;  %v3046_v51 = vpack.c.bf16 %v2422_v44, %v2406_v43  ;;  %v1879_v52 = vcvt.s32.f32 %v855_v45  ;;  %v1351_v53 = vunpack.c.2.s8 %v535_v41  ;;  %v1367_v54 = vunpack.c.3.s8 %v535_v41 }
  0xaf   : >> { %3288 = vmatpush.bf16.msrb.mxu2 %v2918_v47  ;;  %v2119_v55 = vcvt.s32.f32 %v1095_v49  ;;  %v2135_v56 = vcvt.s32.f32 %v1111_v50  ;;  %v1607_v57 = vunpack.c.2.s8 %v599_v46  ;;  %v1623_v59 = vunpack.c.3.s8 %v599_v46 }
  0xb0   : >> { %3301 = vmatpush.bf16.msrb.mxu3 %v3046_v51  ;;  %v2775_v60 = vpack.c.bf16 %v1879_v52, %v1863_v48  ;;  %v2375_v61 = vcvt.s32.f32 %v1351_v53  ;;  %v2391_v62 = vcvt.s32.f32 %v1367_v54  ;;  %v807_v0 = vunpack.c.0.s8 %v407_v27 }
  0xb1   : >> { %v2903_v1 = vpack.c.bf16 %v2135_v56, %v2119_v55  ;;  %v2631_v2 = vcvt.s32.f32 %v1607_v57  ;;  %v2647_v3 = vcvt.s32.f32 %v1623_v59  ;;  %v823_v4 = vunpack.c.1.s8 %v407_v27  ;;  %v375_v55 = vld [vmem:[%s4926_s10 + $0x90] sm:$0xff] }
  0xb2   : >> { %3307 = vmatpush.bf16.msra.mxu0 %v2775_v60  ;;  %v3031_v5 = vpack.c.bf16 %v2391_v62, %v2375_v61  ;;  %v1831_v6 = vcvt.s32.f32 %v807_v0  ;;  %v1063_v7 = vunpack.c.0.s8 %v471_v36  ;;  %v1079_v8 = vunpack.c.1.s8 %v471_v36 }
  0xb3   : >> { %3320 = vmatpush.bf16.msra.mxu1 %v2903_v1  ;;  %v3159_v10 = vpack.c.bf16 %v2647_v3, %v2631_v2  ;;  %v1847_v11 = vcvt.s32.f32 %v823_v4  ;;  %v1319_v12 = vunpack.c.0.s8 %v535_v41  ;;  %v1335_v13 = vunpack.c.1.s8 %v535_v41  ;;  %v439_v2 = vld [vmem:[%s4926_s10 + $0x290] sm:$0xff] }
  0xb4   : >> { %3333 = vmatpush.bf16.msra.mxu2 %v3031_v5  ;;  %v2087_v14 = vcvt.s32.f32 %v1063_v7  ;;  %v2103_v15 = vcvt.s32.f32 %v1079_v8  ;;  %v1575_v16 = vunpack.c.0.s8 %v599_v46  ;;  %v1591_v17 = vunpack.c.1.s8 %v599_v46  ;;  %v503_v7 = vld [vmem:[%s4926_s10 + $0x490] sm:$0xff] }
  0xb5   : >> { %3346 = vmatpush.bf16.msra.mxu3 %v3159_v10  ;;  %v2759_v19 = vpack.c.bf16 %v1847_v11, %v1831_v6  ;;  %v2343_v21 = vcvt.s32.f32 %v1319_v12  ;;  %v2359_v22 = vcvt.s32.f32 %v1335_v13  ;;  %v775_v23 = vunpack.c.2.s8 %v391_v9  ;;  %3289 = vmatmul.bf16.vlgmr.msrb.gmra.mxu2 %v4971_v58  ;;  %v567_v12 = vld [vmem:[%s4926_s10 + $0x690] sm:$0xff] }
  0xb6   : >> { %v2887_v26 = vpack.c.bf16 %v2103_v15, %v2087_v14  ;;  %v2599_v27 = vcvt.s32.f32 %v1575_v16  ;;  %v2615_v28 = vcvt.s32.f32 %v1591_v17  ;;  %v791_v29 = vunpack.c.3.s8 %v391_v9  ;;  %3302 = vmatmul.bf16.vlgmr.msrb.gmra.mxu3 %v4974_v63 }
  0xb7   : >> { %3308 = vmatpush.bf16.msra.mxu0 %v2759_v19  ;;  %v3015_v31 = vpack.c.bf16 %v2359_v22, %v2343_v21  ;;  %v1799_v32 = vcvt.s32.f32 %v775_v23  ;;  %v1031_v33 = vunpack.c.2.s8 %v455_v18  ;;  %v1047_v34 = vunpack.c.3.s8 %v455_v18 }
  0xb8   : >> { %3321 = vmatpush.bf16.msra.mxu1 %v2887_v26  ;;  %v3143_v35 = vpack.c.bf16 %v2615_v28, %v2599_v27  ;;  %v1815_v36 = vcvt.s32.f32 %v791_v29  ;;  %v1287_v37 = vunpack.c.2.s8 %v519_v25  ;;  %v1303_v38 = vunpack.c.3.s8 %v519_v25 }
  0xb9   : >> { %3334 = vmatpush.bf16.msra.mxu2 %v3015_v31  ;;  %v2055_v39 = vcvt.s32.f32 %v1031_v33  ;;  %v2071_v40 = vcvt.s32.f32 %v1047_v34  ;;  %v1543_v41 = vunpack.c.2.s8 %v583_v30  ;;  %v1559_v42 = vunpack.c.3.s8 %v583_v30  ;;  %3263 = vmatmul.bf16.vlgmr.msrb.gmra.mxu0 %v4979_v20 }
  0xba   : >> { %3347 = vmatpush.bf16.msra.mxu3 %v3143_v35  ;;  %v2743_v43 = vpack.c.bf16 %v1815_v36, %v1799_v32  ;;  %v2311_v44 = vcvt.s32.f32 %v1287_v37  ;;  %v2327_v45 = vcvt.s32.f32 %v1303_v38  ;;  %v743_v46 = vunpack.c.0.s8 %v391_v9  ;;  %3276 = vmatmul.bf16.vlgmr.msrb.gmra.mxu1 %v4981_v24 }
  0xbb   : >> { %v2871_v47 = vpack.c.bf16 %v2071_v40, %v2055_v39  ;;  %v2567_v48 = vcvt.s32.f32 %v1543_v41  ;;  %v2583_v49 = vcvt.s32.f32 %v1559_v42  ;;  %v759_v50 = vunpack.c.1.s8 %v391_v9  ;;  %v359_v39 = vld [vmem:[%s4926_s10 + $0x10] sm:$0xff] }
  0xbc   : >> { %3309 = vmatpush.bf16.msra.mxu0 %v2743_v43  ;;  %v2999_v51 = vpack.c.bf16 %v2327_v45, %v2311_v44  ;;  %v1767_v52 = vcvt.s32.f32 %v743_v46  ;;  %v999_v53 = vunpack.c.0.s8 %v455_v18  ;;  %v1015_v54 = vunpack.c.1.s8 %v455_v18 }
  0xbd   : >> { %3322 = vmatpush.bf16.msra.mxu1 %v2871_v47  ;;  %v3127_v56 = vpack.c.bf16 %v2583_v49, %v2567_v48  ;;  %v1783_v57 = vcvt.s32.f32 %v759_v50  ;;  %v1255_v59 = vunpack.c.0.s8 %v519_v25  ;;  %v1271_v60 = vunpack.c.1.s8 %v519_v25  ;;  %v423_v48 = vld [vmem:[%s4926_s10 + $0x210] sm:$0xff] }
  0xbe   : >> { %3335 = vmatpush.bf16.msra.mxu2 %v2999_v51  ;;  %v2023_v61 = vcvt.s32.f32 %v999_v53  ;;  %v2039_v62 = vcvt.s32.f32 %v1015_v54  ;;  %v1511_v0 = vunpack.c.0.s8 %v583_v30  ;;  %v1527_v1 = vunpack.c.1.s8 %v583_v30  ;;  %v487_v53 = vld [vmem:[%s4926_s10 + $0x410] sm:$0xff] }
  0xbf   : >> { %3348 = vmatpush.bf16.msra.mxu3 %v3127_v56  ;;  %v2727_v3 = vpack.c.bf16 %v1783_v57, %v1767_v52  ;;  %v2279_v4 = vcvt.s32.f32 %v1255_v59  ;;  %v2295_v5 = vcvt.s32.f32 %v1271_v60  ;;  %v711_v6 = vunpack.c.2.s8 %v375_v55  ;;  %v551_v59 = vld [vmem:[%s4926_s10 + $0x610] sm:$0xff] }
  0xc0   : >> { %v2855_v8 = vpack.c.bf16 %v2039_v62, %v2023_v61  ;;  %v2535_v9 = vcvt.s32.f32 %v1511_v0  ;;  %v2551_v10 = vcvt.s32.f32 %v1527_v1  ;;  %v727_v11 = vunpack.c.3.s8 %v375_v55 }
  0xc1   : >> { %3310 = vmatpush.bf16.msra.mxu0 %v2727_v3  ;;  %v2983_v13 = vpack.c.bf16 %v2295_v5, %v2279_v4  ;;  %v1735_v14 = vcvt.s32.f32 %v711_v6  ;;  %v967_v15 = vunpack.c.2.s8 %v439_v2  ;;  %v983_v16 = vunpack.c.3.s8 %v439_v2 }
  0xc2   : >> { %3323 = vmatpush.bf16.msra.mxu1 %v2855_v8  ;;  %v3111_v17 = vpack.c.bf16 %v2551_v10, %v2535_v9  ;;  %v1751_v18 = vcvt.s32.f32 %v727_v11  ;;  %v1223_v19 = vunpack.c.2.s8 %v503_v7  ;;  %v1239_v21 = vunpack.c.3.s8 %v503_v7 }
  0xc3   : >> { %3336 = vmatpush.bf16.msra.mxu2 %v2983_v13  ;;  %v1991_v22 = vcvt.s32.f32 %v967_v15  ;;  %v2007_v23 = vcvt.s32.f32 %v983_v16  ;;  %v1479_v25 = vunpack.c.2.s8 %v567_v12  ;;  %v1495_v26 = vunpack.c.3.s8 %v567_v12 }
  0xc4   : >> { %3349 = vmatpush.bf16.msra.mxu3 %v3111_v17  ;;  %v2711_v27 = vpack.c.bf16 %v1751_v18, %v1735_v14  ;;  %v2247_v28 = vcvt.s32.f32 %v1223_v19  ;;  %v2263_v29 = vcvt.s32.f32 %v1239_v21  ;;  %v679_v30 = vunpack.c.0.s8 %v375_v55 }
  0xc5   : >> { %v2839_v31 = vpack.c.bf16 %v2007_v23, %v1991_v22  ;;  %v2503_v32 = vcvt.s32.f32 %v1479_v25  ;;  %v2519_v33 = vcvt.s32.f32 %v1495_v26  ;;  %v695_v34 = vunpack.c.1.s8 %v375_v55  ;;  %v408_v22 = vld [vmem:[%s4926_s10 + $0x198] sm:$0xff] }
  0xc6   : >> { %3311 = vmatpush.bf16.msra.mxu0 %v2711_v27  ;;  %v2967_v35 = vpack.c.bf16 %v2263_v29, %v2247_v28  ;;  %v1703_v36 = vcvt.s32.f32 %v679_v30  ;;  %v935_v37 = vunpack.c.0.s8 %v439_v2  ;;  %v951_v38 = vunpack.c.1.s8 %v439_v2 }
  0xc7   : >> { %3324 = vmatpush.bf16.msra.mxu1 %v2839_v31  ;;  %v3095_v40 = vpack.c.bf16 %v2519_v33, %v2503_v32  ;;  %v1719_v41 = vcvt.s32.f32 %v695_v34  ;;  %v1191_v42 = vunpack.c.0.s8 %v503_v7  ;;  %v1207_v43 = vunpack.c.1.s8 %v503_v7  ;;  %v472_v32 = vld [vmem:[%s4926_s10 + $0x398] sm:$0xff] }
  0xc8   : >> { %3337 = vmatpush.bf16.msra.mxu2 %v2967_v35  ;;  %v1959_v44 = vcvt.s32.f32 %v935_v37  ;;  %v1975_v45 = vcvt.s32.f32 %v951_v38  ;;  %v1447_v46 = vunpack.c.0.s8 %v567_v12  ;;  %v1463_v47 = vunpack.c.1.s8 %v567_v12  ;;  %v536_v37 = vld [vmem:[%s4926_s10 + $0x598] sm:$0xff] }
  0xc9   : >> { %3350 = vmatpush.bf16.msra.mxu3 %v3095_v40  ;;  %v2695_v49 = vpack.c.bf16 %v1719_v41, %v1703_v36  ;;  %v2215_v50 = vcvt.s32.f32 %v1191_v42  ;;  %v2231_v51 = vcvt.s32.f32 %v1207_v43  ;;  %v647_v52 = vunpack.c.2.s8 %v359_v39  ;;  %v600_v42 = vld [vmem:[%s4926_s10 + $0x798] sm:$0xff] }
  0xca   : >> { %v2823_v54 = vpack.c.bf16 %v1975_v45, %v1959_v44  ;;  %v2471_v55 = vcvt.s32.f32 %v1447_v46  ;;  %v2487_v56 = vcvt.s32.f32 %v1463_v47  ;;  %v663_v57 = vunpack.c.3.s8 %v359_v39 }
  0xcb   : >> { %3312 = vmatpush.bf16.msra.mxu0 %v2695_v49  ;;  %v2951_v60 = vpack.c.bf16 %v2231_v51, %v2215_v50  ;;  %v1671_v61 = vcvt.s32.f32 %v647_v52  ;;  %v903_v62 = vunpack.c.2.s8 %v423_v48  ;;  %v919_v0 = vunpack.c.3.s8 %v423_v48 }
  0xcc   : >> { %3325 = vmatpush.bf16.msra.mxu1 %v2823_v54  ;;  %v3079_v1 = vpack.c.bf16 %v2487_v56, %v2471_v55  ;;  %v1687_v2 = vcvt.s32.f32 %v663_v57  ;;  %v1159_v3 = vunpack.c.2.s8 %v487_v53  ;;  %v1175_v4 = vunpack.c.3.s8 %v487_v53 }
  0xcd   : >> { %3338 = vmatpush.bf16.msra.mxu2 %v2951_v60  ;;  %v1927_v5 = vcvt.s32.f32 %v903_v62  ;;  %v1943_v6 = vcvt.s32.f32 %v919_v0  ;;  %v1415_v7 = vunpack.c.2.s8 %v551_v59  ;;  %v1431_v8 = vunpack.c.3.s8 %v551_v59 }
  0xce   : >> { %3351 = vmatpush.bf16.msra.mxu3 %v3079_v1  ;;  %v2679_v9 = vpack.c.bf16 %v1687_v2, %v1671_v61  ;;  %v2183_v10 = vcvt.s32.f32 %v1159_v3  ;;  %v2199_v11 = vcvt.s32.f32 %v1175_v4  ;;  %v615_v12 = vunpack.c.0.s8 %v359_v39 }
  0xcf   : >> { %v2807_v13 = vpack.c.bf16 %v1943_v6, %v1927_v5  ;;  %v2439_v14 = vcvt.s32.f32 %v1415_v7  ;;  %v2455_v15 = vcvt.s32.f32 %v1431_v8  ;;  %v631_v16 = vunpack.c.1.s8 %v359_v39  ;;  %v392_v5 = vld [vmem:[%s4926_s10 + $0x118] sm:$0xff] }
  0xd0   : >> { %3313 = vmatpush.bf16.msra.mxu0 %v2679_v9  ;;  %v2935_v17 = vpack.c.bf16 %v2199_v11, %v2183_v10  ;;  %v1639_v18 = vcvt.s32.f32 %v615_v12  ;;  %v871_v19 = vunpack.c.0.s8 %v423_v48  ;;  %v887_v21 = vunpack.c.1.s8 %v423_v48 }
  0xd1   : >> { %3326 = vmatpush.bf16.msra.mxu1 %v2807_v13  ;;  %v3063_v23 = vpack.c.bf16 %v2455_v15, %v2439_v14  ;;  %v1655_v25 = vcvt.s32.f32 %v631_v16  ;;  %v1127_v26 = vunpack.c.0.s8 %v487_v53  ;;  %v1143_v27 = vunpack.c.1.s8 %v487_v53  ;;  %v456_v14 = vld [vmem:[%s4926_s10 + $0x318] sm:$0xff] }
  0xd2   : >> { %3339 = vmatpush.bf16.msra.mxu2 %v2935_v17  ;;  %v1895_v28 = vcvt.s32.f32 %v871_v19  ;;  %v1911_v29 = vcvt.s32.f32 %v887_v21  ;;  %v1383_v30 = vunpack.c.0.s8 %v551_v59  ;;  %v1399_v31 = vunpack.c.1.s8 %v551_v59  ;;  %v520_v19 = vld [vmem:[%s4926_s10 + $0x518] sm:$0xff] }
  0xd3   : >> { %3352 = vmatpush.bf16.msra.mxu3 %v3063_v23  ;;  %v2663_v33 = vpack.c.bf16 %v1655_v25, %v1639_v18  ;;  %v2151_v34 = vcvt.s32.f32 %v1127_v26  ;;  %v2167_v35 = vcvt.s32.f32 %v1143_v27  ;;  %v840_v36 = vunpack.c.2.s8 %v408_v22  ;;  %v584_v26 = vld [vmem:[%s4926_s10 + $0x718] sm:$0xff] }
  0xd4   : >> { %v2791_v38 = vpack.c.bf16 %v1911_v29, %v1895_v28  ;;  %v2407_v39 = vcvt.s32.f32 %v1383_v30  ;;  %v2423_v40 = vcvt.s32.f32 %v1399_v31  ;;  %v856_v41 = vunpack.c.3.s8 %v408_v22 }
  0xd5   : >> { %3314 = vmatpush.bf16.msra.mxu0 %v2663_v33  ;;  %v2919_v43 = vpack.c.bf16 %v2167_v35, %v2151_v34  ;;  %v1864_v44 = vcvt.s32.f32 %v840_v36  ;;  %v1096_v45 = vunpack.c.2.s8 %v472_v32  ;;  %v1112_v46 = vunpack.c.3.s8 %v472_v32 }
  0xd6   : >> { %3327 = vmatpush.bf16.msra.mxu1 %v2791_v38  ;;  %v3047_v47 = vpack.c.bf16 %v2423_v40, %v2407_v39  ;;  %v1880_v48 = vcvt.s32.f32 %v856_v41  ;;  %v1352_v49 = vunpack.c.2.s8 %v536_v37  ;;  %v1368_v50 = vunpack.c.3.s8 %v536_v37 }
  0xd7   : >> { %3340 = vmatpush.bf16.msra.mxu2 %v2919_v43  ;;  %v2120_v51 = vcvt.s32.f32 %v1096_v45  ;;  %v2136_v52 = vcvt.s32.f32 %v1112_v46  ;;  %v1608_v53 = vunpack.c.2.s8 %v600_v42  ;;  %v1624_v54 = vunpack.c.3.s8 %v600_v42 }
  0xd8   : >> { %3353 = vmatpush.bf16.msra.mxu3 %v3047_v47  ;;  %v2776_v55 = vpack.c.bf16 %v1880_v48, %v1864_v44  ;;  %v2376_v56 = vcvt.s32.f32 %v1352_v49  ;;  %v2392_v57 = vcvt.s32.f32 %v1368_v50  ;;  %v808_v59 = vunpack.c.0.s8 %v408_v22  ;;  %3315 = vmatmul.bf16.vlgmr.msra.gmra.mxu0 %v4979_v20 }
  0xd9   : >> { %v2904_v60 = vpack.c.bf16 %v2136_v52, %v2120_v51  ;;  %v2632_v61 = vcvt.s32.f32 %v1608_v53  ;;  %v2648_v62 = vcvt.s32.f32 %v1624_v54  ;;  %v824_v0 = vunpack.c.1.s8 %v408_v22  ;;  %3328 = vmatmul.bf16.vlgmr.msra.gmra.mxu1 %v4981_v24  ;;  %v376_v51 = vld [vmem:[%s4926_s10 + $0x98] sm:$0xff] }
  0xda   : >> { %3359 = vmatpush.bf16.msrb.mxu0 %v2776_v55  ;;  %v3032_v1 = vpack.c.bf16 %v2392_v57, %v2376_v56  ;;  %v1832_v2 = vcvt.s32.f32 %v808_v59  ;;  %v1064_v3 = vunpack.c.0.s8 %v472_v32  ;;  %v1080_v4 = vunpack.c.1.s8 %v472_v32  ;;  %3341 = vmatmul.bf16.vlgmr.msra.gmra.mxu2 %v4971_v58 }
  0xdb   : >> { %3372 = vmatpush.bf16.msrb.mxu1 %v2904_v60  ;;  %v3160_v6 = vpack.c.bf16 %v2648_v62, %v2632_v61  ;;  %v1848_v7 = vcvt.s32.f32 %v824_v0  ;;  %v1320_v8 = vunpack.c.0.s8 %v536_v37  ;;  %v1336_v9 = vunpack.c.1.s8 %v536_v37  ;;  %3354 = vmatmul.bf16.vlgmr.msra.gmra.mxu3 %v4974_v63  ;;  %v440_v61 = vld [vmem:[%s4926_s10 + $0x298] sm:$0xff] }
  0xdc   : >> { %3385 = vmatpush.bf16.msrb.mxu2 %v3032_v1  ;;  %v2088_v10 = vcvt.s32.f32 %v1064_v3  ;;  %v2104_v11 = vcvt.s32.f32 %v1080_v4  ;;  %v1576_v12 = vunpack.c.0.s8 %v600_v42  ;;  %v1592_v13 = vunpack.c.1.s8 %v600_v42  ;;  %v504_v3 = vld [vmem:[%s4926_s10 + $0x498] sm:$0xff] }
  0xdd   : >> { %3398 = vmatpush.bf16.msrb.mxu3 %v3160_v6  ;;  %v2760_v15 = vpack.c.bf16 %v1848_v7, %v1832_v2  ;;  %v2344_v16 = vcvt.s32.f32 %v1320_v8  ;;  %v2360_v17 = vcvt.s32.f32 %v1336_v9  ;;  %v776_v18 = vunpack.c.2.s8 %v392_v5  ;;  %v568_v8 = vld [vmem:[%s4926_s10 + $0x698] sm:$0xff] }
  0xde   : >> { %v2888_v21 = vpack.c.bf16 %v2104_v11, %v2088_v10  ;;  %v2600_v22 = vcvt.s32.f32 %v1576_v12  ;;  %v2616_v23 = vcvt.s32.f32 %v1592_v13  ;;  %v792_v25 = vunpack.c.3.s8 %v392_v5 }
  0xdf   : >> { %3360 = vmatpush.bf16.msrb.mxu0 %v2760_v15  ;;  %v3016_v27 = vpack.c.bf16 %v2360_v17, %v2344_v16  ;;  %v1800_v28 = vcvt.s32.f32 %v776_v18  ;;  %v1032_v29 = vunpack.c.2.s8 %v456_v14  ;;  %v1048_v30 = vunpack.c.3.s8 %v456_v14 }
  0xe0   : >> { %3373 = vmatpush.bf16.msrb.mxu1 %v2888_v21  ;;  %v3144_v31 = vpack.c.bf16 %v2616_v23, %v2600_v22  ;;  %v1816_v32 = vcvt.s32.f32 %v792_v25  ;;  %v1288_v33 = vunpack.c.2.s8 %v520_v19  ;;  %v1304_v34 = vunpack.c.3.s8 %v520_v19 }
  0xe1   : >> { %3386 = vmatpush.bf16.msrb.mxu2 %v3016_v27  ;;  %v2056_v35 = vcvt.s32.f32 %v1032_v29  ;;  %v2072_v36 = vcvt.s32.f32 %v1048_v30  ;;  %v1544_v37 = vunpack.c.2.s8 %v584_v26  ;;  %v1560_v38 = vunpack.c.3.s8 %v584_v26 }
  0xe2   : >> { %3399 = vmatpush.bf16.msrb.mxu3 %v3144_v31  ;;  %v2744_v39 = vpack.c.bf16 %v1816_v32, %v1800_v28  ;;  %v2312_v40 = vcvt.s32.f32 %v1288_v33  ;;  %v2328_v41 = vcvt.s32.f32 %v1304_v34  ;;  %v744_v42 = vunpack.c.0.s8 %v392_v5 }
  0xe3   : >> { %v2872_v43 = vpack.c.bf16 %v2072_v36, %v2056_v35  ;;  %v2568_v44 = vcvt.s32.f32 %v1544_v37  ;;  %v2584_v45 = vcvt.s32.f32 %v1560_v38  ;;  %v760_v46 = vunpack.c.1.s8 %v392_v5  ;;  %v360_v35 = vld [vmem:[%s4926_s10 + $0x18] sm:$0xff] }
  0xe4   : >> { %3361 = vmatpush.bf16.msrb.mxu0 %v2744_v39  ;;  %v3000_v47 = vpack.c.bf16 %v2328_v41, %v2312_v40  ;;  %v1768_v48 = vcvt.s32.f32 %v744_v42  ;;  %v1000_v49 = vunpack.c.0.s8 %v456_v14  ;;  %v1016_v50 = vunpack.c.1.s8 %v456_v14 }
  0xe5   : >> { %3374 = vmatpush.bf16.msrb.mxu1 %v2872_v43  ;;  %v3128_v52 = vpack.c.bf16 %v2584_v45, %v2568_v44  ;;  %v1784_v53 = vcvt.s32.f32 %v760_v46  ;;  %v1256_v54 = vunpack.c.0.s8 %v520_v19  ;;  %v1272_v55 = vunpack.c.1.s8 %v520_v19  ;;  %v424_v44 = vld [vmem:[%s4926_s10 + $0x218] sm:$0xff] }
  0xe6   : >> { %3387 = vmatpush.bf16.msrb.mxu2 %v3000_v47  ;;  %v2024_v56 = vcvt.s32.f32 %v1000_v49  ;;  %v2040_v57 = vcvt.s32.f32 %v1016_v50  ;;  %v1512_v59 = vunpack.c.0.s8 %v584_v26  ;;  %v1528_v60 = vunpack.c.1.s8 %v584_v26  ;;  %v488_v49 = vld [vmem:[%s4926_s10 + $0x418] sm:$0xff] }
  0xe7   : >> { %3400 = vmatpush.bf16.msrb.mxu3 %v3128_v52  ;;  %v2728_v62 = vpack.c.bf16 %v1784_v53, %v1768_v48  ;;  %v2280_v0 = vcvt.s32.f32 %v1256_v54  ;;  %v2296_v1 = vcvt.s32.f32 %v1272_v55  ;;  %v712_v2 = vunpack.c.2.s8 %v376_v51  ;;  %v552_v54 = vld [vmem:[%s4926_s10 + $0x618] sm:$0xff] }
  0xe8   : >> { %v2856_v4 = vpack.c.bf16 %v2040_v57, %v2024_v56  ;;  %v2536_v5 = vcvt.s32.f32 %v1512_v59  ;;  %v2552_v6 = vcvt.s32.f32 %v1528_v60  ;;  %v728_v7 = vunpack.c.3.s8 %v376_v51 }
  0xe9   : >> { %3362 = vmatpush.bf16.msrb.mxu0 %v2728_v62  ;;  %v2984_v9 = vpack.c.bf16 %v2296_v1, %v2280_v0  ;;  %v1736_v10 = vcvt.s32.f32 %v712_v2  ;;  %v968_v11 = vunpack.c.2.s8 %v440_v61  ;;  %v984_v12 = vunpack.c.3.s8 %v440_v61 }
  0xea   : >> { %3375 = vmatpush.bf16.msrb.mxu1 %v2856_v4  ;;  %v3112_v13 = vpack.c.bf16 %v2552_v6, %v2536_v5  ;;  %v1752_v14 = vcvt.s32.f32 %v728_v7  ;;  %v1224_v15 = vunpack.c.2.s8 %v504_v3  ;;  %v1240_v16 = vunpack.c.3.s8 %v504_v3 }
  0xeb   : >> { %3388 = vmatpush.bf16.msrb.mxu2 %v2984_v9  ;;  %v1992_v17 = vcvt.s32.f32 %v968_v11  ;;  %v2008_v18 = vcvt.s32.f32 %v984_v12  ;;  %v1480_v19 = vunpack.c.2.s8 %v568_v8  ;;  %v1496_v21 = vunpack.c.3.s8 %v568_v8 }
  0xec   : >> { %3401 = vmatpush.bf16.msrb.mxu3 %v3112_v13  ;;  %v2712_v22 = vpack.c.bf16 %v1752_v14, %v1736_v10  ;;  %v2248_v23 = vcvt.s32.f32 %v1224_v15  ;;  %v2264_v25 = vcvt.s32.f32 %v1240_v16  ;;  %v680_v26 = vunpack.c.0.s8 %v376_v51 }
  0xed   : >> { %v2840_v27 = vpack.c.bf16 %v2008_v18, %v1992_v17  ;;  %v2504_v28 = vcvt.s32.f32 %v1480_v19  ;;  %v2520_v29 = vcvt.s32.f32 %v1496_v21  ;;  %v696_v30 = vunpack.c.1.s8 %v376_v51  ;;  %v409_v17 = vld [vmem:[%s4926_s10 + $0x1a0] sm:$0xff] }
  0xee   : >> { %3363 = vmatpush.bf16.msrb.mxu0 %v2712_v22  ;;  %v2968_v31 = vpack.c.bf16 %v2264_v25, %v2248_v23  ;;  %v1704_v32 = vcvt.s32.f32 %v680_v26  ;;  %v936_v33 = vunpack.c.0.s8 %v440_v61  ;;  %v952_v34 = vunpack.c.1.s8 %v440_v61 }
  0xef   : >> { %3376 = vmatpush.bf16.msrb.mxu1 %v2840_v27  ;;  %v3096_v36 = vpack.c.bf16 %v2520_v29, %v2504_v28  ;;  %v1720_v37 = vcvt.s32.f32 %v696_v30  ;;  %v1192_v38 = vunpack.c.0.s8 %v504_v3  ;;  %v1208_v39 = vunpack.c.1.s8 %v504_v3  ;;  %v473_v28 = vld [vmem:[%s4926_s10 + $0x3a0] sm:$0xff] }
  0xf0   : >> { %3389 = vmatpush.bf16.msrb.mxu2 %v2968_v31  ;;  %v1960_v40 = vcvt.s32.f32 %v936_v33  ;;  %v1976_v41 = vcvt.s32.f32 %v952_v34  ;;  %v1448_v42 = vunpack.c.0.s8 %v568_v8  ;;  %v1464_v43 = vunpack.c.1.s8 %v568_v8  ;;  %v537_v33 = vld [vmem:[%s4926_s10 + $0x5a0] sm:$0xff] }
  0xf1   : >> { %3402 = vmatpush.bf16.msrb.mxu3 %v3096_v36  ;;  %v2696_v45 = vpack.c.bf16 %v1720_v37, %v1704_v32  ;;  %v2216_v46 = vcvt.s32.f32 %v1192_v38  ;;  %v2232_v47 = vcvt.s32.f32 %v1208_v39  ;;  %v648_v48 = vunpack.c.2.s8 %v360_v35  ;;  %v601_v38 = vld [vmem:[%s4926_s10 + $0x7a0] sm:$0xff] }
  0xf2   : >> { %v2824_v50 = vpack.c.bf16 %v1976_v41, %v1960_v40  ;;  %v2472_v51 = vcvt.s32.f32 %v1448_v42  ;;  %v2488_v52 = vcvt.s32.f32 %v1464_v43  ;;  %v664_v53 = vunpack.c.3.s8 %v360_v35 }
  0xf3   : >> { %3364 = vmatpush.bf16.msrb.mxu0 %v2696_v45  ;;  %v2952_v55 = vpack.c.bf16 %v2232_v47, %v2216_v46  ;;  %v1672_v56 = vcvt.s32.f32 %v648_v48  ;;  %v904_v57 = vunpack.c.2.s8 %v424_v44  ;;  %v920_v59 = vunpack.c.3.s8 %v424_v44 }
  0xf4   : >> { %3377 = vmatpush.bf16.msrb.mxu1 %v2824_v50  ;;  %v3080_v60 = vpack.c.bf16 %v2488_v52, %v2472_v51  ;;  %v1688_v61 = vcvt.s32.f32 %v664_v53  ;;  %v1160_v62 = vunpack.c.2.s8 %v488_v49  ;;  %v1176_v0 = vunpack.c.3.s8 %v488_v49 }
  0xf5   : >> { %3390 = vmatpush.bf16.msrb.mxu2 %v2952_v55  ;;  %v1928_v1 = vcvt.s32.f32 %v904_v57  ;;  %v1944_v2 = vcvt.s32.f32 %v920_v59  ;;  %v1416_v3 = vunpack.c.2.s8 %v552_v54  ;;  %v1432_v4 = vunpack.c.3.s8 %v552_v54 }
  0xf6   : >> { %3403 = vmatpush.bf16.msrb.mxu3 %v3080_v60  ;;  %v2680_v5 = vpack.c.bf16 %v1688_v61, %v1672_v56  ;;  %v2184_v6 = vcvt.s32.f32 %v1160_v62  ;;  %v2200_v7 = vcvt.s32.f32 %v1176_v0  ;;  %v616_v8 = vunpack.c.0.s8 %v360_v35 }
  0xf7   : >> { %v2808_v9 = vpack.c.bf16 %v1944_v2, %v1928_v1  ;;  %v2440_v10 = vcvt.s32.f32 %v1416_v3  ;;  %v2456_v11 = vcvt.s32.f32 %v1432_v4  ;;  %v632_v12 = vunpack.c.1.s8 %v360_v35  ;;  %v393_v1 = vld [vmem:[%s4926_s10 + $0x120] sm:$0xff] }
  0xf8   : >> { %3365 = vmatpush.bf16.msrb.mxu0 %v2680_v5  ;;  %v2936_v13 = vpack.c.bf16 %v2200_v7, %v2184_v6  ;;  %v1640_v14 = vcvt.s32.f32 %v616_v8  ;;  %v872_v15 = vunpack.c.0.s8 %v424_v44  ;;  %v888_v16 = vunpack.c.1.s8 %v424_v44 }
  0xf9   : >> { %3378 = vmatpush.bf16.msrb.mxu1 %v2808_v9  ;;  %v3064_v18 = vpack.c.bf16 %v2456_v11, %v2440_v10  ;;  %v1656_v19 = vcvt.s32.f32 %v632_v12  ;;  %v1128_v21 = vunpack.c.0.s8 %v488_v49  ;;  %v1144_v22 = vunpack.c.1.s8 %v488_v49  ;;  %v457_v10 = vld [vmem:[%s4926_s10 + $0x320] sm:$0xff] }
  0xfa   : >> { %3391 = vmatpush.bf16.msrb.mxu2 %v2936_v13  ;;  %v1896_v23 = vcvt.s32.f32 %v872_v15  ;;  %v1912_v25 = vcvt.s32.f32 %v888_v16  ;;  %v1384_v26 = vunpack.c.0.s8 %v552_v54  ;;  %v1400_v27 = vunpack.c.1.s8 %v552_v54  ;;  %v521_v15 = vld [vmem:[%s4926_s10 + $0x520] sm:$0xff] }
  0xfb   : >> { %3404 = vmatpush.bf16.msrb.mxu3 %v3064_v18  ;;  %v2664_v29 = vpack.c.bf16 %v1656_v19, %v1640_v14  ;;  %v2152_v30 = vcvt.s32.f32 %v1128_v21  ;;  %v2168_v31 = vcvt.s32.f32 %v1144_v22  ;;  %v841_v32 = vunpack.c.2.s8 %v409_v17  ;;  %v585_v21 = vld [vmem:[%s4926_s10 + $0x720] sm:$0xff] }
  0xfc   : >> { %v2792_v34 = vpack.c.bf16 %v1912_v25, %v1896_v23  ;;  %v2408_v35 = vcvt.s32.f32 %v1384_v26  ;;  %v2424_v36 = vcvt.s32.f32 %v1400_v27  ;;  %v857_v37 = vunpack.c.3.s8 %v409_v17 }
  0xfd   : >> { %3366 = vmatpush.bf16.msrb.mxu0 %v2664_v29  ;;  %v2920_v39 = vpack.c.bf16 %v2168_v31, %v2152_v30  ;;  %v1865_v40 = vcvt.s32.f32 %v841_v32  ;;  %v1097_v41 = vunpack.c.2.s8 %v473_v28  ;;  %v1113_v42 = vunpack.c.3.s8 %v473_v28 }
  0xfe   : >> { %3379 = vmatpush.bf16.msrb.mxu1 %v2792_v34  ;;  %v3048_v43 = vpack.c.bf16 %v2424_v36, %v2408_v35  ;;  %v1881_v44 = vcvt.s32.f32 %v857_v37  ;;  %v1353_v45 = vunpack.c.2.s8 %v537_v33  ;;  %v1369_v46 = vunpack.c.3.s8 %v537_v33 }
  0xff   : >> { %3392 = vmatpush.bf16.msrb.mxu2 %v2920_v39  ;;  %v2121_v47 = vcvt.s32.f32 %v1097_v41  ;;  %v2137_v48 = vcvt.s32.f32 %v1113_v42  ;;  %v1609_v49 = vunpack.c.2.s8 %v601_v38  ;;  %v1625_v50 = vunpack.c.3.s8 %v601_v38 }
 0x100   : >> { %3405 = vmatpush.bf16.msrb.mxu3 %v3048_v43  ;;  %v2777_v51 = vpack.c.bf16 %v1881_v44, %v1865_v40  ;;  %v2377_v52 = vcvt.s32.f32 %v1353_v45  ;;  %v2393_v53 = vcvt.s32.f32 %v1369_v46  ;;  %v809_v54 = vunpack.c.0.s8 %v409_v17  ;;  %3367 = vmatmul.bf16.vlgmr.msrb.gmra.mxu0 %v4979_v20 }
 0x101   : >> { %v2905_v55 = vpack.c.bf16 %v2137_v48, %v2121_v47  ;;  %v2633_v56 = vcvt.s32.f32 %v1609_v49  ;;  %v2649_v57 = vcvt.s32.f32 %v1625_v50  ;;  %v825_v59 = vunpack.c.1.s8 %v409_v17  ;;  %3380 = vmatmul.bf16.vlgmr.msrb.gmra.mxu1 %v4981_v24  ;;  %v377_v47 = vld [vmem:[%s4926_s10 + $0xa0] sm:$0xff] }
 0x102   : >> { %3411 = vmatpush.bf16.msra.mxu0 %v2777_v51  ;;  %v3033_v60 = vpack.c.bf16 %v2393_v53, %v2377_v52  ;;  %v1833_v61 = vcvt.s32.f32 %v809_v54  ;;  %v1065_v62 = vunpack.c.0.s8 %v473_v28  ;;  %v1081_v0 = vunpack.c.1.s8 %v473_v28  ;;  %3393 = vmatmul.bf16.vlgmr.msrb.gmra.mxu2 %v4971_v58 }
 0x103   : >> { %3424 = vmatpush.bf16.msra.mxu1 %v2905_v55  ;;  %v3161_v2 = vpack.c.bf16 %v2649_v57, %v2633_v56  ;;  %v1849_v3 = vcvt.s32.f32 %v825_v59  ;;  %v1321_v4 = vunpack.c.0.s8 %v537_v33  ;;  %v1337_v5 = vunpack.c.1.s8 %v537_v33  ;;  %3406 = vmatmul.bf16.vlgmr.msrb.gmra.mxu3 %v4974_v63  ;;  %v441_v56 = vld [vmem:[%s4926_s10 + $0x2a0] sm:$0xff] }
 0x104   : >> { %3437 = vmatpush.bf16.msra.mxu2 %v3033_v60  ;;  %v2089_v6 = vcvt.s32.f32 %v1065_v62  ;;  %v2105_v7 = vcvt.s32.f32 %v1081_v0  ;;  %v1577_v8 = vunpack.c.0.s8 %v601_v38  ;;  %v1593_v9 = vunpack.c.1.s8 %v601_v38  ;;  %v505_v62 = vld [vmem:[%s4926_s10 + $0x4a0] sm:$0xff] }
 0x105   : >> { %3450 = vmatpush.bf16.msra.mxu3 %v3161_v2  ;;  %v2761_v11 = vpack.c.bf16 %v1849_v3, %v1833_v61  ;;  %v2345_v12 = vcvt.s32.f32 %v1321_v4  ;;  %v2361_v13 = vcvt.s32.f32 %v1337_v5  ;;  %v777_v14 = vunpack.c.2.s8 %v393_v1  ;;  %v569_v4 = vld [vmem:[%s4926_s10 + $0x6a0] sm:$0xff] }
 0x106   : >> { %v2889_v16 = vpack.c.bf16 %v2105_v7, %v2089_v6  ;;  %v2601_v17 = vcvt.s32.f32 %v1577_v8  ;;  %v2617_v18 = vcvt.s32.f32 %v1593_v9  ;;  %v793_v19 = vunpack.c.3.s8 %v393_v1 }
 0x107   : >> { %3412 = vmatpush.bf16.msra.mxu0 %v2761_v11  ;;  %v3017_v22 = vpack.c.bf16 %v2361_v13, %v2345_v12  ;;  %v1801_v23 = vcvt.s32.f32 %v777_v14  ;;  %v1033_v25 = vunpack.c.2.s8 %v457_v10  ;;  %v1049_v26 = vunpack.c.3.s8 %v457_v10 }
 0x108   : >> { %3425 = vmatpush.bf16.msra.mxu1 %v2889_v16  ;;  %v3145_v27 = vpack.c.bf16 %v2617_v18, %v2601_v17  ;;  %v1817_v28 = vcvt.s32.f32 %v793_v19  ;;  %v1289_v29 = vunpack.c.2.s8 %v521_v15  ;;  %v1305_v30 = vunpack.c.3.s8 %v521_v15 }
 0x109   : >> { %3438 = vmatpush.bf16.msra.mxu2 %v3017_v22  ;;  %v2057_v31 = vcvt.s32.f32 %v1033_v25  ;;  %v2073_v32 = vcvt.s32.f32 %v1049_v26  ;;  %v1545_v33 = vunpack.c.2.s8 %v585_v21  ;;  %v1561_v34 = vunpack.c.3.s8 %v585_v21 }
 0x10a   : >> { %3451 = vmatpush.bf16.msra.mxu3 %v3145_v27  ;;  %v2745_v35 = vpack.c.bf16 %v1817_v28, %v1801_v23  ;;  %v2313_v36 = vcvt.s32.f32 %v1289_v29  ;;  %v2329_v37 = vcvt.s32.f32 %v1305_v30  ;;  %v745_v38 = vunpack.c.0.s8 %v393_v1 }
 0x10b   : >> { %v2873_v39 = vpack.c.bf16 %v2073_v32, %v2057_v31  ;;  %v2569_v40 = vcvt.s32.f32 %v1545_v33  ;;  %v2585_v41 = vcvt.s32.f32 %v1561_v34  ;;  %v761_v42 = vunpack.c.1.s8 %v393_v1  ;;  %v361_v31 = vld [vmem:[%s4926_s10 + $0x20] sm:$0xff] }
 0x10c   : >> { %3413 = vmatpush.bf16.msra.mxu0 %v2745_v35  ;;  %v3001_v43 = vpack.c.bf16 %v2329_v37, %v2313_v36  ;;  %v1769_v44 = vcvt.s32.f32 %v745_v38  ;;  %v1001_v45 = vunpack.c.0.s8 %v457_v10  ;;  %v1017_v46 = vunpack.c.1.s8 %v457_v10 }
 0x10d   : >> { %3426 = vmatpush.bf16.msra.mxu1 %v2873_v39  ;;  %v3129_v48 = vpack.c.bf16 %v2585_v41, %v2569_v40  ;;  %v1785_v49 = vcvt.s32.f32 %v761_v42  ;;  %v1257_v50 = vunpack.c.0.s8 %v521_v15  ;;  %v1273_v51 = vunpack.c.1.s8 %v521_v15  ;;  %v425_v40 = vld [vmem:[%s4926_s10 + $0x220] sm:$0xff] }
 0x10e   : >> { %3439 = vmatpush.bf16.msra.mxu2 %v3001_v43  ;;  %v2025_v52 = vcvt.s32.f32 %v1001_v45  ;;  %v2041_v53 = vcvt.s32.f32 %v1017_v46  ;;  %v1513_v54 = vunpack.c.0.s8 %v585_v21  ;;  %v1529_v55 = vunpack.c.1.s8 %v585_v21  ;;  %v489_v45 = vld [vmem:[%s4926_s10 + $0x420] sm:$0xff] }
 0x10f   : >> { %3452 = vmatpush.bf16.msra.mxu3 %v3129_v48  ;;  %v2729_v57 = vpack.c.bf16 %v1785_v49, %v1769_v44  ;;  %v2281_v59 = vcvt.s32.f32 %v1257_v50  ;;  %v2297_v60 = vcvt.s32.f32 %v1273_v51  ;;  %v713_v61 = vunpack.c.2.s8 %v377_v47  ;;  %v553_v50 = vld [vmem:[%s4926_s10 + $0x620] sm:$0xff] }
 0x110   : >> { %v2857_v0 = vpack.c.bf16 %v2041_v53, %v2025_v52  ;;  %v2537_v1 = vcvt.s32.f32 %v1513_v54  ;;  %v2553_v2 = vcvt.s32.f32 %v1529_v55  ;;  %v729_v3 = vunpack.c.3.s8 %v377_v47 }
 0x111   : >> { %3414 = vmatpush.bf16.msra.mxu0 %v2729_v57  ;;  %v2985_v5 = vpack.c.bf16 %v2297_v60, %v2281_v59  ;;  %v1737_v6 = vcvt.s32.f32 %v713_v61  ;;  %v969_v7 = vunpack.c.2.s8 %v441_v56  ;;  %v985_v8 = vunpack.c.3.s8 %v441_v56 }
 0x112   : >> { %3427 = vmatpush.bf16.msra.mxu1 %v2857_v0  ;;  %v3113_v9 = vpack.c.bf16 %v2553_v2, %v2537_v1  ;;  %v1753_v10 = vcvt.s32.f32 %v729_v3  ;;  %v1225_v11 = vunpack.c.2.s8 %v505_v62  ;;  %v1241_v12 = vunpack.c.3.s8 %v505_v62 }
 0x113   : >> { %3440 = vmatpush.bf16.msra.mxu2 %v2985_v5  ;;  %v1993_v13 = vcvt.s32.f32 %v969_v7  ;;  %v2009_v14 = vcvt.s32.f32 %v985_v8  ;;  %v1481_v15 = vunpack.c.2.s8 %v569_v4  ;;  %v1497_v16 = vunpack.c.3.s8 %v569_v4 }
 0x114   : >> { %3453 = vmatpush.bf16.msra.mxu3 %v3113_v9  ;;  %v2713_v17 = vpack.c.bf16 %v1753_v10, %v1737_v6  ;;  %v2249_v18 = vcvt.s32.f32 %v1225_v11  ;;  %v2265_v19 = vcvt.s32.f32 %v1241_v12  ;;  %v681_v21 = vunpack.c.0.s8 %v377_v47 }
 0x115   : >> { %v2841_v22 = vpack.c.bf16 %v2009_v14, %v1993_v13  ;;  %v2505_v23 = vcvt.s32.f32 %v1481_v15  ;;  %v2521_v25 = vcvt.s32.f32 %v1497_v16  ;;  %v697_v26 = vunpack.c.1.s8 %v377_v47  ;;  %v410_v13 = vld [vmem:[%s4926_s10 + $0x1a8] sm:$0xff] }
 0x116   : >> { %3415 = vmatpush.bf16.msra.mxu0 %v2713_v17  ;;  %v2969_v27 = vpack.c.bf16 %v2265_v19, %v2249_v18  ;;  %v1705_v28 = vcvt.s32.f32 %v681_v21  ;;  %v937_v29 = vunpack.c.0.s8 %v441_v56  ;;  %v953_v30 = vunpack.c.1.s8 %v441_v56 }
 0x117   : >> { %3428 = vmatpush.bf16.msra.mxu1 %v2841_v22  ;;  %v3097_v32 = vpack.c.bf16 %v2521_v25, %v2505_v23  ;;  %v1721_v33 = vcvt.s32.f32 %v697_v26  ;;  %v1193_v34 = vunpack.c.0.s8 %v505_v62  ;;  %v1209_v35 = vunpack.c.1.s8 %v505_v62  ;;  %v474_v23 = vld [vmem:[%s4926_s10 + $0x3a8] sm:$0xff] }
 0x118   : >> { %3441 = vmatpush.bf16.msra.mxu2 %v2969_v27  ;;  %v1961_v36 = vcvt.s32.f32 %v937_v29  ;;  %v1977_v37 = vcvt.s32.f32 %v953_v30  ;;  %v1449_v38 = vunpack.c.0.s8 %v569_v4  ;;  %v1465_v39 = vunpack.c.1.s8 %v569_v4  ;;  %v538_v29 = vld [vmem:[%s4926_s10 + $0x5a8] sm:$0xff] }
 0x119   : >> { %3454 = vmatpush.bf16.msra.mxu3 %v3097_v32  ;;  %v2697_v41 = vpack.c.bf16 %v1721_v33, %v1705_v28  ;;  %v2217_v42 = vcvt.s32.f32 %v1193_v34  ;;  %v2233_v43 = vcvt.s32.f32 %v1209_v35  ;;  %v649_v44 = vunpack.c.2.s8 %v361_v31  ;;  %v602_v34 = vld [vmem:[%s4926_s10 + $0x7a8] sm:$0xff] }
 0x11a   : >> { %v2825_v46 = vpack.c.bf16 %v1977_v37, %v1961_v36  ;;  %v2473_v47 = vcvt.s32.f32 %v1449_v38  ;;  %v2489_v48 = vcvt.s32.f32 %v1465_v39  ;;  %v665_v49 = vunpack.c.3.s8 %v361_v31 }
 0x11b   : >> { %3416 = vmatpush.bf16.msra.mxu0 %v2697_v41  ;;  %v2953_v51 = vpack.c.bf16 %v2233_v43, %v2217_v42  ;;  %v1673_v52 = vcvt.s32.f32 %v649_v44  ;;  %v905_v53 = vunpack.c.2.s8 %v425_v40  ;;  %v921_v54 = vunpack.c.3.s8 %v425_v40 }
 0x11c   : >> { %3429 = vmatpush.bf16.msra.mxu1 %v2825_v46  ;;  %v3081_v55 = vpack.c.bf16 %v2489_v48, %v2473_v47  ;;  %v1689_v56 = vcvt.s32.f32 %v665_v49  ;;  %v1161_v57 = vunpack.c.2.s8 %v489_v45  ;;  %v1177_v59 = vunpack.c.3.s8 %v489_v45 }
 0x11d   : >> { %3442 = vmatpush.bf16.msra.mxu2 %v2953_v51  ;;  %v1929_v60 = vcvt.s32.f32 %v905_v53  ;;  %v1945_v61 = vcvt.s32.f32 %v921_v54  ;;  %v1417_v62 = vunpack.c.2.s8 %v553_v50  ;;  %v1433_v0 = vunpack.c.3.s8 %v553_v50 }
 0x11e   : >> { %3455 = vmatpush.bf16.msra.mxu3 %v3081_v55  ;;  %v2681_v1 = vpack.c.bf16 %v1689_v56, %v1673_v52  ;;  %v2185_v2 = vcvt.s32.f32 %v1161_v57  ;;  %v2201_v3 = vcvt.s32.f32 %v1177_v59  ;;  %v617_v4 = vunpack.c.0.s8 %v361_v31 }
 0x11f   : >> { %v2809_v5 = vpack.c.bf16 %v1945_v61, %v1929_v60  ;;  %v2441_v6 = vcvt.s32.f32 %v1417_v62  ;;  %v2457_v7 = vcvt.s32.f32 %v1433_v0  ;;  %v633_v8 = vunpack.c.1.s8 %v361_v31  ;;  %v394_v60 = vld [vmem:[%s4926_s10 + $0x128] sm:$0xff] }
 0x120   : >> { %3417 = vmatpush.bf16.msra.mxu0 %v2681_v1  ;;  %v2937_v9 = vpack.c.bf16 %v2201_v3, %v2185_v2  ;;  %v1641_v10 = vcvt.s32.f32 %v617_v4  ;;  %v873_v11 = vunpack.c.0.s8 %v425_v40  ;;  %v889_v12 = vunpack.c.1.s8 %v425_v40 }
 0x121   : >> { %3430 = vmatpush.bf16.msra.mxu1 %v2809_v5  ;;  %v3065_v14 = vpack.c.bf16 %v2457_v7, %v2441_v6  ;;  %v1657_v15 = vcvt.s32.f32 %v633_v8  ;;  %v1129_v16 = vunpack.c.0.s8 %v489_v45  ;;  %v1145_v17 = vunpack.c.1.s8 %v489_v45  ;;  %v458_v6 = vld [vmem:[%s4926_s10 + $0x328] sm:$0xff] }
 0x122   : >> { %3443 = vmatpush.bf16.msra.mxu2 %v2937_v9  ;;  %v1897_v18 = vcvt.s32.f32 %v873_v11  ;;  %v1913_v19 = vcvt.s32.f32 %v889_v12  ;;  %v1385_v21 = vunpack.c.0.s8 %v553_v50  ;;  %v1401_v22 = vunpack.c.1.s8 %v553_v50  ;;  %v522_v11 = vld [vmem:[%s4926_s10 + $0x528] sm:$0xff] }
 0x123   : >> { %3456 = vmatpush.bf16.msra.mxu3 %v3065_v14  ;;  %v2665_v25 = vpack.c.bf16 %v1657_v15, %v1641_v10  ;;  %v2153_v26 = vcvt.s32.f32 %v1129_v16  ;;  %v2169_v27 = vcvt.s32.f32 %v1145_v17  ;;  %v842_v28 = vunpack.c.2.s8 %v410_v13  ;;  %v586_v16 = vld [vmem:[%s4926_s10 + $0x728] sm:$0xff] }
 0x124   : >> { %v2793_v30 = vpack.c.bf16 %v1913_v19, %v1897_v18  ;;  %v2409_v31 = vcvt.s32.f32 %v1385_v21  ;;  %v2425_v32 = vcvt.s32.f32 %v1401_v22  ;;  %v858_v33 = vunpack.c.3.s8 %v410_v13 }
 0x125   : >> { %3418 = vmatpush.bf16.msra.mxu0 %v2665_v25  ;;  %v2921_v35 = vpack.c.bf16 %v2169_v27, %v2153_v26  ;;  %v1866_v36 = vcvt.s32.f32 %v842_v28  ;;  %v1098_v37 = vunpack.c.2.s8 %v474_v23  ;;  %v1114_v38 = vunpack.c.3.s8 %v474_v23 }
 0x126   : >> { %3431 = vmatpush.bf16.msra.mxu1 %v2793_v30  ;;  %v3049_v39 = vpack.c.bf16 %v2425_v32, %v2409_v31  ;;  %v1882_v40 = vcvt.s32.f32 %v858_v33  ;;  %v1354_v41 = vunpack.c.2.s8 %v538_v29  ;;  %v1370_v42 = vunpack.c.3.s8 %v538_v29 }
 0x127   : >> { %3444 = vmatpush.bf16.msra.mxu2 %v2921_v35  ;;  %v2122_v43 = vcvt.s32.f32 %v1098_v37  ;;  %v2138_v44 = vcvt.s32.f32 %v1114_v38  ;;  %v1610_v45 = vunpack.c.2.s8 %v602_v34  ;;  %v1626_v46 = vunpack.c.3.s8 %v602_v34 }
 0x128   : >> { %3457 = vmatpush.bf16.msra.mxu3 %v3049_v39  ;;  %v2778_v47 = vpack.c.bf16 %v1882_v40, %v1866_v36  ;;  %v2378_v48 = vcvt.s32.f32 %v1354_v41  ;;  %v2394_v49 = vcvt.s32.f32 %v1370_v42  ;;  %v810_v50 = vunpack.c.0.s8 %v410_v13  ;;  %3419 = vmatmul.bf16.vlgmr.msra.gmra.mxu0 %v4979_v20 }
 0x129   : >> { %v2906_v51 = vpack.c.bf16 %v2138_v44, %v2122_v43  ;;  %v2634_v52 = vcvt.s32.f32 %v1610_v45  ;;  %v2650_v53 = vcvt.s32.f32 %v1626_v46  ;;  %v826_v54 = vunpack.c.1.s8 %v410_v13  ;;  %3432 = vmatmul.bf16.vlgmr.msra.gmra.mxu1 %v4981_v24  ;;  %v378_v43 = vld [vmem:[%s4926_s10 + $0xa8] sm:$0xff] }
 0x12a   : >> { %3463 = vmatpush.bf16.msrb.mxu0 %v2778_v47  ;;  %v3034_v55 = vpack.c.bf16 %v2394_v49, %v2378_v48  ;;  %v1834_v56 = vcvt.s32.f32 %v810_v50  ;;  %v1066_v57 = vunpack.c.0.s8 %v474_v23  ;;  %v1082_v59 = vunpack.c.1.s8 %v474_v23  ;;  %3445 = vmatmul.bf16.vlgmr.msra.gmra.mxu2 %v4971_v58 }
 0x12b   : >> { %3476 = vmatpush.bf16.msrb.mxu1 %v2906_v51  ;;  %v3162_v61 = vpack.c.bf16 %v2650_v53, %v2634_v52  ;;  %v1850_v62 = vcvt.s32.f32 %v826_v54  ;;  %v1322_v0 = vunpack.c.0.s8 %v538_v29  ;;  %v1338_v1 = vunpack.c.1.s8 %v538_v29  ;;  %3458 = vmatmul.bf16.vlgmr.msra.gmra.mxu3 %v4974_v63  ;;  %v442_v52 = vld [vmem:[%s4926_s10 + $0x2a8] sm:$0xff] }
 0x12c   : >> { %3489 = vmatpush.bf16.msrb.mxu2 %v3034_v55  ;;  %v2090_v2 = vcvt.s32.f32 %v1066_v57  ;;  %v2106_v3 = vcvt.s32.f32 %v1082_v59  ;;  %v1578_v4 = vunpack.c.0.s8 %v602_v34  ;;  %v1594_v5 = vunpack.c.1.s8 %v602_v34  ;;  %v506_v57 = vld [vmem:[%s4926_s10 + $0x4a8] sm:$0xff] }
 0x12d   : >> { %3502 = vmatpush.bf16.msrb.mxu3 %v3162_v61  ;;  %v2762_v7 = vpack.c.bf16 %v1850_v62, %v1834_v56  ;;  %v2346_v8 = vcvt.s32.f32 %v1322_v0  ;;  %v2362_v9 = vcvt.s32.f32 %v1338_v1  ;;  %v778_v10 = vunpack.c.2.s8 %v394_v60  ;;  %v570_v0 = vld [vmem:[%s4926_s10 + $0x6a8] sm:$0xff] }
 0x12e   : >> { %v2890_v12 = vpack.c.bf16 %v2106_v3, %v2090_v2  ;;  %v2602_v13 = vcvt.s32.f32 %v1578_v4  ;;  %v2618_v14 = vcvt.s32.f32 %v1594_v5  ;;  %v794_v15 = vunpack.c.3.s8 %v394_v60 }
 0x12f   : >> { %3464 = vmatpush.bf16.msrb.mxu0 %v2762_v7  ;;  %v3018_v17 = vpack.c.bf16 %v2362_v9, %v2346_v8  ;;  %v1802_v18 = vcvt.s32.f32 %v778_v10  ;;  %v1034_v19 = vunpack.c.2.s8 %v458_v6  ;;  %v1050_v21 = vunpack.c.3.s8 %v458_v6  ;;  %v5061_v9 = vpop.f32.mrf.mxu0  ;;  %v5063_v10 = vpop.f32.mrf.mxu1 }
 0x130   : >> { %3477 = vmatpush.bf16.msrb.mxu1 %v2890_v12  ;;  %v3146_v22 = vpack.c.bf16 %v2618_v14, %v2602_v13  ;;  %v1818_v23 = vcvt.s32.f32 %v794_v15  ;;  %v1290_v25 = vunpack.c.2.s8 %v522_v11  ;;  %v1306_v26 = vunpack.c.3.s8 %v522_v11  ;;  %v5065_v15 = vpop.f32.mrf.mxu2 }
 0x131   : >> { %3490 = vmatpush.bf16.msrb.mxu2 %v3018_v17  ;;  %v2058_v27 = vcvt.s32.f32 %v1034_v19  ;;  %v2074_v28 = vcvt.s32.f32 %v1050_v21  ;;  %v1546_v29 = vunpack.c.2.s8 %v586_v16  ;;  %v1562_v30 = vunpack.c.3.s8 %v586_v16 }
 0x132   : >> { %3503 = vmatpush.bf16.msrb.mxu3 %v3146_v22  ;;  %v2746_v31 = vpack.c.bf16 %v1818_v23, %v1802_v18  ;;  %v2314_v32 = vcvt.s32.f32 %v1290_v25  ;;  %v2330_v33 = vcvt.s32.f32 %v1306_v26  ;;  %v746_v34 = vunpack.c.0.s8 %v394_v60 }
 0x133   : >> { %v2874_v35 = vpack.c.bf16 %v2074_v28, %v2058_v27  ;;  %v2570_v36 = vcvt.s32.f32 %v1546_v29  ;;  %v2586_v37 = vcvt.s32.f32 %v1562_v30  ;;  %v762_v38 = vunpack.c.1.s8 %v394_v60 }
 0x134   : >> { %3465 = vmatpush.bf16.msrb.mxu0 %v2746_v31  ;;  %v3002_v39 = vpack.c.bf16 %v2330_v33, %v2314_v32  ;;  %v1770_v40 = vcvt.s32.f32 %v746_v34  ;;  %v1002_v41 = vunpack.c.0.s8 %v458_v6  ;;  %v1018_v42 = vunpack.c.1.s8 %v458_v6  ;;  %v362_v31 = vld [vmem:[%s4926_s10 + $0x28] sm:$0xff] }
 0x135   : >> { %3478 = vmatpush.bf16.msrb.mxu1 %v2874_v35  ;;  %v3130_v44 = vpack.c.bf16 %v2586_v37, %v2570_v36  ;;  %v1786_v45 = vcvt.s32.f32 %v762_v38  ;;  %v1258_v46 = vunpack.c.0.s8 %v522_v11  ;;  %v1274_v47 = vunpack.c.1.s8 %v522_v11 }
 0x136   : >> { %3491 = vmatpush.bf16.msrb.mxu2 %v3002_v39  ;;  %v2026_v48 = vcvt.s32.f32 %v1002_v41  ;;  %v2042_v49 = vcvt.s32.f32 %v1018_v42  ;;  %v1514_v50 = vunpack.c.0.s8 %v586_v16  ;;  %v1530_v51 = vunpack.c.1.s8 %v586_v16  ;;  %v5067_v16 = vpop.f32.mrf.mxu3 }
 0x137   : >> { %3504 = vmatpush.bf16.msrb.mxu3 %v3130_v44  ;;  %v2730_v53 = vpack.c.bf16 %v1786_v45, %v1770_v40  ;;  %v2282_v54 = vcvt.s32.f32 %v1258_v46  ;;  %v2298_v55 = vcvt.s32.f32 %v1274_v47  ;;  %v714_v56 = vunpack.c.2.s8 %v378_v43  ;;  %v426_v40 = vld [vmem:[%s4926_s10 + $0x228] sm:$0xff] }
 0x138   : >> { %v2858_v59 = vpack.c.bf16 %v2042_v49, %v2026_v48  ;;  %v2538_v60 = vcvt.s32.f32 %v1514_v50  ;;  %v2554_v61 = vcvt.s32.f32 %v1530_v51  ;;  %v730_v62 = vunpack.c.3.s8 %v378_v43  ;;  %v490_v45 = vld [vmem:[%s4926_s10 + $0x428] sm:$0xff]  ;;  %v3214_v51 = vpop.f32.mrf.mxu0 }
 0x139   : >> { %3466 = vmatpush.bf16.msrb.mxu0 %v2730_v53  ;;  %v2986_v1 = vpack.c.bf16 %v2298_v55, %v2282_v54  ;;  %v1738_v2 = vcvt.s32.f32 %v714_v56  ;;  %v970_v3 = vunpack.c.2.s8 %v442_v52  ;;  %v986_v4 = vunpack.c.3.s8 %v442_v52  ;;  %v554_v50 = vld [vmem:[%s4926_s10 + $0x628] sm:$0xff] }
 0x13a   : >> { %3479 = vmatpush.bf16.msrb.mxu1 %v2858_v59  ;;  %v3114_v5 = vpack.c.bf16 %v2554_v61, %v2538_v60  ;;  %v1754_v6 = vcvt.s32.f32 %v730_v62  ;;  %v1226_v7 = vunpack.c.2.s8 %v506_v57  ;;  %v1242_v8 = vunpack.c.3.s8 %v506_v57 }
 0x13b   : >> { %3492 = vmatpush.bf16.msrb.mxu2 %v2986_v1  ;;  %v1994_v11 = vcvt.s32.f32 %v970_v3  ;;  %v2010_v12 = vcvt.s32.f32 %v986_v4  ;;  %v1482_v13 = vunpack.c.2.s8 %v570_v0  ;;  %v1498_v14 = vunpack.c.3.s8 %v570_v0 }
 0x13c   : >> { %3505 = vmatpush.bf16.msrb.mxu3 %v3114_v5  ;;  %v2714_v17 = vpack.c.bf16 %v1754_v6, %v1738_v2  ;;  %v2250_v18 = vcvt.s32.f32 %v1226_v7  ;;  %v2266_v19 = vcvt.s32.f32 %v1242_v8  ;;  %v682_v21 = vunpack.c.0.s8 %v378_v43 }
 0x13d   : >> { %v2842_v22 = vpack.c.bf16 %v2010_v12, %v1994_v11  ;;  %v2506_v23 = vcvt.s32.f32 %v1482_v13  ;;  %v2522_v25 = vcvt.s32.f32 %v1498_v14  ;;  %v698_v26 = vunpack.c.1.s8 %v378_v43 }
 0x13e   : >> { %3467 = vmatpush.bf16.msrb.mxu0 %v2714_v17  ;;  %v2970_v27 = vpack.c.bf16 %v2266_v19, %v2250_v18  ;;  %v1706_v28 = vcvt.s32.f32 %v682_v21  ;;  %v938_v29 = vunpack.c.0.s8 %v442_v52  ;;  %v954_v30 = vunpack.c.1.s8 %v442_v52  ;;  %v3227_v52 = vpop.f32.mrf.mxu1  ;;  %v3253_v59 = vpop.f32.mrf.mxu3 }
 0x13f   : >> { %3480 = vmatpush.bf16.msrb.mxu1 %v2842_v22  ;;  %v3098_v32 = vpack.c.bf16 %v2522_v25, %v2506_v23  ;;  %v1722_v33 = vcvt.s32.f32 %v698_v26  ;;  %v1194_v34 = vunpack.c.0.s8 %v506_v57  ;;  %v1210_v35 = vunpack.c.1.s8 %v506_v57  ;;  %v3240_v57 = vpop.f32.mrf.mxu2  ;;  %v411_v22 = vld [vmem:[%s4926_s10 + $0x1b0] sm:$0xff] }
 0x140   : >> { %3493 = vmatpush.bf16.msrb.mxu2 %v2970_v27  ;;  %v1962_v36 = vcvt.s32.f32 %v938_v29  ;;  %v1978_v37 = vcvt.s32.f32 %v954_v30  ;;  %v1450_v38 = vunpack.c.0.s8 %v570_v0  ;;  %v1466_v39 = vunpack.c.1.s8 %v570_v0 }
 0x141   : >> { %3506 = vmatpush.bf16.msrb.mxu3 %v3098_v32  ;;  %v2698_v41 = vpack.c.bf16 %v1722_v33, %v1706_v28  ;;  %v2218_v42 = vcvt.s32.f32 %v1194_v34  ;;  %v2234_v43 = vcvt.s32.f32 %v1210_v35  ;;  %v650_v44 = vunpack.c.2.s8 %v362_v31 }
 0x142   : >> { %v2826_v46 = vpack.c.bf16 %v1978_v37, %v1962_v36  ;;  %v2474_v47 = vcvt.s32.f32 %v1450_v38  ;;  %v2490_v48 = vcvt.s32.f32 %v1466_v39  ;;  %v666_v49 = vunpack.c.3.s8 %v362_v31  ;;  %v539_v37 = vld [vmem:[%s4926_s10 + $0x5b0] sm:$0xff] }
 0x143   : >> { %3468 = vmatpush.bf16.msrb.mxu0 %v2698_v41  ;;  %v2954_v53 = vpack.c.bf16 %v2234_v43, %v2218_v42  ;;  %v1674_v54 = vcvt.s32.f32 %v650_v44  ;;  %v906_v55 = vunpack.c.2.s8 %v426_v40  ;;  %v922_v56 = vunpack.c.3.s8 %v426_v40  ;;  %v603_v42 = vld [vmem:[%s4926_s10 + $0x7b0] sm:$0xff] }
 0x144   : >> { %3481 = vmatpush.bf16.msrb.mxu1 %v2826_v46  ;;  %v3082_v60 = vpack.c.bf16 %v2490_v48, %v2474_v47  ;;  %v1690_v61 = vcvt.s32.f32 %v666_v49  ;;  %v1162_v62 = vunpack.c.2.s8 %v490_v45  ;;  %v1178_v0 = vunpack.c.3.s8 %v490_v45 }
 0x145   : >> { %3494 = vmatpush.bf16.msrb.mxu2 %v2954_v53  ;;  %v1930_v1 = vcvt.s32.f32 %v906_v55  ;;  %v1946_v2 = vcvt.s32.f32 %v922_v56  ;;  %v1418_v3 = vunpack.c.2.s8 %v554_v50  ;;  %v1434_v4 = vunpack.c.3.s8 %v554_v50 }
 0x146   : >> { %3507 = vmatpush.bf16.msrb.mxu3 %v3082_v60  ;;  %v2682_v5 = vpack.c.bf16 %v1690_v61, %v1674_v54  ;;  %v2186_v6 = vcvt.s32.f32 %v1162_v62  ;;  %v2202_v7 = vcvt.s32.f32 %v1178_v0  ;;  %v618_v8 = vunpack.c.0.s8 %v362_v31 }
 0x147   : >> { %v2810_v11 = vpack.c.bf16 %v1946_v2, %v1930_v1  ;;  %v2442_v12 = vcvt.s32.f32 %v1418_v3  ;;  %v2458_v13 = vcvt.s32.f32 %v1434_v4  ;;  %v634_v14 = vunpack.c.1.s8 %v362_v31  ;;  %v475_v31 = vld [vmem:[%s4926_s10 + $0x3b0] sm:$0xff] }
 0x148   : >> { %3469 = vmatpush.bf16.msrb.mxu0 %v2682_v5  ;;  %v2938_v17 = vpack.c.bf16 %v2202_v7, %v2186_v6  ;;  %v1642_v18 = vcvt.s32.f32 %v618_v8  ;;  %v874_v19 = vunpack.c.0.s8 %v426_v40  ;;  %v890_v21 = vunpack.c.1.s8 %v426_v40 }
 0x149   : >> { %3482 = vmatpush.bf16.msrb.mxu1 %v2810_v11  ;;  %v3066_v23 = vpack.c.bf16 %v2458_v13, %v2442_v12  ;;  %v1658_v25 = vcvt.s32.f32 %v634_v14  ;;  %v1130_v26 = vunpack.c.0.s8 %v490_v45  ;;  %v1146_v27 = vunpack.c.1.s8 %v490_v45  ;;  %v395_v11 = vld [vmem:[%s4926_s10 + $0x130] sm:$0xff] }
 0x14a   : >> { %3495 = vmatpush.bf16.msrb.mxu2 %v2938_v17  ;;  %v1898_v28 = vcvt.s32.f32 %v874_v19  ;;  %v1914_v29 = vcvt.s32.f32 %v890_v21  ;;  %v1386_v30 = vunpack.c.0.s8 %v554_v50  ;;  %v1402_v32 = vunpack.c.1.s8 %v554_v50 }
 0x14b   : >> { %3508 = vmatpush.bf16.msrb.mxu3 %v3066_v23  ;;  %v2666_v33 = vpack.c.bf16 %v1658_v25, %v1642_v18  ;;  %v2154_v34 = vcvt.s32.f32 %v1130_v26  ;;  %v2170_v35 = vcvt.s32.f32 %v1146_v27  ;;  %v843_v36 = vunpack.c.2.s8 %v411_v22  ;;  %v459_v18 = vld [vmem:[%s4926_s10 + $0x330] sm:$0xff] }
 0x14c   : >> { %v2794_v38 = vpack.c.bf16 %v1914_v29, %v1898_v28  ;;  %v2410_v39 = vcvt.s32.f32 %v1386_v30  ;;  %v2426_v40 = vcvt.s32.f32 %v1402_v32  ;;  %v859_v41 = vunpack.c.3.s8 %v411_v22  ;;  %v523_v25 = vld [vmem:[%s4926_s10 + $0x530] sm:$0xff] }
 0x14d   : >> { %3470 = vmatpush.bf16.msrb.mxu0 %v2666_v33  ;;  %v2922_v43 = vpack.c.bf16 %v2170_v35, %v2154_v34  ;;  %v1867_v44 = vcvt.s32.f32 %v843_v36  ;;  %v1099_v45 = vunpack.c.2.s8 %v475_v31  ;;  %v1115_v46 = vunpack.c.3.s8 %v475_v31  ;;  %v587_v34 = vld [vmem:[%s4926_s10 + $0x730] sm:$0xff] }
 0x14e   : >> { %3483 = vmatpush.bf16.msrb.mxu1 %v2794_v38  ;;  %v3050_v47 = vpack.c.bf16 %v2426_v40, %v2410_v39  ;;  %v1883_v48 = vcvt.s32.f32 %v859_v41  ;;  %v1355_v49 = vunpack.c.2.s8 %v539_v37  ;;  %v1371_v50 = vunpack.c.3.s8 %v539_v37  ;;  %v3173_v36 = vld [vmem:[#allocation2 + $0x30] sm:$0xff] }
 0x14f   : >> { %3496 = vmatpush.bf16.msrb.mxu2 %v2922_v43  ;;  %v2123_v51 = vcvt.s32.f32 %v1099_v45  ;;  %v2139_v52 = vcvt.s32.f32 %v1115_v46  ;;  %v1611_v53 = vunpack.c.2.s8 %v603_v42  ;;  %v1627_v54 = vunpack.c.3.s8 %v603_v42 }
 0x150   : >> { %3509 = vmatpush.bf16.msrb.mxu3 %v3050_v47  ;;  %v2779_v55 = vpack.c.bf16 %v1883_v48, %v1867_v44  ;;  %v2379_v56 = vcvt.s32.f32 %v1355_v49  ;;  %v2395_v57 = vcvt.s32.f32 %v1371_v50  ;;  %v811_v59 = vunpack.c.0.s8 %v411_v22  ;;  %3471 = vmatmul.bf16.vlgmr.msrb.gmra.mxu0 %v4979_v20 }
 0x151   : >> { %v2907_v60 = vpack.c.bf16 %v2139_v52, %v2123_v51  ;;  %v2635_v61 = vcvt.s32.f32 %v1611_v53  ;;  %v2651_v62 = vcvt.s32.f32 %v1627_v54  ;;  %v827_v0 = vunpack.c.1.s8 %v411_v22  ;;  %3484 = vmatmul.bf16.vlgmr.msrb.gmra.mxu1 %v4981_v24 }
 0x152   : >> { %3515 = vmatpush.bf16.msra.mxu0 %v2779_v55  ;;  %v3035_v1 = vpack.c.bf16 %v2395_v57, %v2379_v56  ;;  %v1835_v2 = vcvt.s32.f32 %v811_v59  ;;  %v1067_v3 = vunpack.c.0.s8 %v475_v31  ;;  %v1083_v4 = vunpack.c.1.s8 %v475_v31  ;;  %3497 = vmatmul.bf16.vlgmr.msrb.gmra.mxu2 %v4971_v58  ;;  %v379_v56 = vld [vmem:[%s4926_s10 + $0xb0] sm:$0xff] }
 0x153   : >> { %3528 = vmatpush.bf16.msra.mxu1 %v2907_v60  ;;  %v3163_v5 = vpack.c.bf16 %v2651_v62, %v2635_v61  ;;  %v1851_v6 = vcvt.s32.f32 %v827_v0  ;;  %v1323_v7 = vunpack.c.0.s8 %v539_v37  ;;  %v1339_v8 = vunpack.c.1.s8 %v539_v37  ;;  %3510 = vmatmul.bf16.vlgmr.msrb.gmra.mxu3 %v4974_v63 }
 0x154   : >> { %3541 = vmatpush.bf16.msra.mxu2 %v3035_v1  ;;  %v2091_v12 = vcvt.s32.f32 %v1067_v3  ;;  %v2107_v13 = vcvt.s32.f32 %v1083_v4  ;;  %v1579_v14 = vunpack.c.0.s8 %v603_v42  ;;  %v1595_v17 = vunpack.c.1.s8 %v603_v42  ;;  %v443_v3 = vld [vmem:[%s4926_s10 + $0x2b0] sm:$0xff] }
 0x155   : >> { %3554 = vmatpush.bf16.msra.mxu3 %v3163_v5  ;;  %v2763_v19 = vpack.c.bf16 %v1851_v6, %v1835_v2  ;;  %v2347_v21 = vcvt.s32.f32 %v1323_v7  ;;  %v2363_v22 = vcvt.s32.f32 %v1339_v8  ;;  %v3226_v23 = vadd.f32 %v5063_v10, %v5061_v9  ;;  %v507_v8 = vld [vmem:[%s4926_s10 + $0x4b0] sm:$0xff] }
 0x156   : >> { %v2891_v26 = vpack.c.bf16 %v2107_v13, %v2091_v12  ;;  %v2603_v27 = vcvt.s32.f32 %v1579_v14  ;;  %v2619_v28 = vcvt.s32.f32 %v1595_v17  ;;  %v779_v29 = vunpack.c.2.s8 %v395_v11  ;;  %v571_v17 = vld [vmem:[%s4926_s10 + $0x6b0] sm:$0xff] }
 0x157   : >> { %3516 = vmatpush.bf16.msra.mxu0 %v2763_v19  ;;  %v3019_v30 = vpack.c.bf16 %v2363_v22, %v2347_v21  ;;  %v3239_v32 = vadd.f32 %v5065_v15, %v3226_v23  ;;  %v795_v31 = vunpack.c.3.s8 %v395_v11  ;;  %v1035_v33 = vunpack.c.2.s8 %v459_v18 }
 0x158   : >> { %3529 = vmatpush.bf16.msra.mxu1 %v2891_v26  ;;  %v3147_v35 = vpack.c.bf16 %v2619_v28, %v2603_v27  ;;  %v1803_v37 = vcvt.s32.f32 %v779_v29  ;;  %v1051_v38 = vunpack.c.3.s8 %v459_v18  ;;  %v1291_v39 = vunpack.c.2.s8 %v523_v25  ;;  %v5093_v28 = vpop.f32.mrf.mxu0  ;;  %v5095_v29 = vpop.f32.mrf.mxu1 }
 0x159   : >> { %3542 = vmatpush.bf16.msra.mxu2 %v3019_v30  ;;  %v3252_v9 = vadd.f32 %v5067_v16, %v3239_v32  ;;  %v1819_v10 = vcvt.s32.f32 %v795_v31  ;;  %v2059_v40 = vcvt.s32.f32 %v1035_v33  ;;  %v1307_v41 = vunpack.c.3.s8 %v523_v25 }
 0x15a   : >> { %3555 = vmatpush.bf16.msra.mxu3 %v3147_v35  ;;  %v2075_v42 = vcvt.s32.f32 %v1051_v38  ;;  %v2315_v43 = vcvt.s32.f32 %v1291_v39  ;;  %v1547_v44 = vunpack.c.2.s8 %v587_v34  ;;  %v1563_v15 = vunpack.c.3.s8 %v587_v34  ;;  %v5099_v35 = vpop.f32.mrf.mxu3 }
 0x15b   : >> { %v4035_v45 = vadd.f32 %v3252_v9, %v3173_v36  ;;  %v2747_v46 = vpack.c.bf16 %v1819_v10, %v1803_v37  ;;  %v2331_v47 = vcvt.s32.f32 %v1307_v41  ;;  %v747_v48 = vunpack.c.0.s8 %v395_v11 }
 0x15c   : >> { %v2875_v49 = vpack.c.bf16 %v2075_v42, %v2059_v40  ;;  %v2571_v50 = vcvt.s32.f32 %v1547_v44  ;;  %v2587_v51 = vcvt.s32.f32 %v1563_v15  ;;  %v763_v52 = vunpack.c.1.s8 %v395_v11 }
 0x15d   : >> { %4051 = vst [vmem:[#allocation2 + $0x30] sm:$0xff] %v4035_v45  ;;  %3517 = vmatpush.bf16.msra.mxu0 %v2747_v46  ;;  %v3003_v16 = vpack.c.bf16 %v2331_v47, %v2315_v43  ;;  %v1771_v53 = vcvt.s32.f32 %v747_v48  ;;  %v1003_v54 = vunpack.c.0.s8 %v459_v18  ;;  %v1019_v55 = vunpack.c.1.s8 %v459_v18  ;;  %v363_v45 = vld [vmem:[%s4926_s10 + $0x30] sm:$0xff] }
 0x15e   : >> { %3530 = vmatpush.bf16.msra.mxu1 %v2875_v49  ;;  %v3131_v57 = vpack.c.bf16 %v2587_v51, %v2571_v50  ;;  %v1787_v59 = vcvt.s32.f32 %v763_v52  ;;  %v1259_v60 = vunpack.c.0.s8 %v523_v25  ;;  %v1275_v61 = vunpack.c.1.s8 %v523_v25 }
 0x15f   : >> { %3543 = vmatpush.bf16.msra.mxu2 %v3003_v16  ;;  %v2027_v62 = vcvt.s32.f32 %v1003_v54  ;;  %v2043_v0 = vcvt.s32.f32 %v1019_v55  ;;  %v1515_v1 = vunpack.c.0.s8 %v587_v34  ;;  %v1531_v2 = vunpack.c.1.s8 %v587_v34  ;;  %v5097_v34 = vpop.f32.mrf.mxu2 }
 0x160   : >> { %3556 = vmatpush.bf16.msra.mxu3 %v3131_v57  ;;  %v2731_v4 = vpack.c.bf16 %v1787_v59, %v1771_v53  ;;  %v2283_v5 = vcvt.s32.f32 %v1259_v60  ;;  %v2299_v6 = vcvt.s32.f32 %v1275_v61  ;;  %v715_v7 = vunpack.c.2.s8 %v379_v56  ;;  %v427_v53 = vld [vmem:[%s4926_s10 + $0x230] sm:$0xff] }
 0x161   : >> { %v2859_v11 = vpack.c.bf16 %v2043_v0, %v2027_v62  ;;  %v2539_v12 = vcvt.s32.f32 %v1515_v1  ;;  %v2555_v13 = vcvt.s32.f32 %v1531_v2  ;;  %v731_v14 = vunpack.c.3.s8 %v379_v56  ;;  %v491_v59 = vld [vmem:[%s4926_s10 + $0x430] sm:$0xff]  ;;  %v3266_v2 = vpop.f32.mrf.mxu0 }
 0x162   : >> { %3518 = vmatpush.bf16.msra.mxu0 %v2731_v4  ;;  %v2987_v18 = vpack.c.bf16 %v2299_v6, %v2283_v5  ;;  %v1739_v19 = vcvt.s32.f32 %v715_v7  ;;  %v971_v21 = vunpack.c.2.s8 %v443_v3  ;;  %v987_v22 = vunpack.c.3.s8 %v443_v3  ;;  %v555_v1 = vld [vmem:[%s4926_s10 + $0x630] sm:$0xff] }
 0x163   : >> { %3531 = vmatpush.bf16.msra.mxu1 %v2859_v11  ;;  %v3115_v23 = vpack.c.bf16 %v2555_v13, %v2539_v12  ;;  %v1755_v25 = vcvt.s32.f32 %v731_v14  ;;  %v1227_v26 = vunpack.c.2.s8 %v507_v8  ;;  %v1243_v27 = vunpack.c.3.s8 %v507_v8  ;;  %v3305_v11 = vpop.f32.mrf.mxu3 }
 0x164   : >> { %3544 = vmatpush.bf16.msra.mxu2 %v2987_v18  ;;  %v1995_v30 = vcvt.s32.f32 %v971_v21  ;;  %v2011_v32 = vcvt.s32.f32 %v987_v22  ;;  %v1483_v31 = vunpack.c.2.s8 %v571_v17  ;;  %v1499_v33 = vunpack.c.3.s8 %v571_v17 }
 0x165   : >> { %3557 = vmatpush.bf16.msra.mxu3 %v3115_v23  ;;  %v2715_v36 = vpack.c.bf16 %v1755_v25, %v1739_v19  ;;  %v2251_v37 = vcvt.s32.f32 %v1227_v26  ;;  %v2267_v38 = vcvt.s32.f32 %v1243_v27  ;;  %v683_v39 = vunpack.c.0.s8 %v379_v56 }
 0x166   : >> { %v2843_v9 = vpack.c.bf16 %v2011_v32, %v1995_v30  ;;  %v2507_v10 = vcvt.s32.f32 %v1483_v31  ;;  %v2523_v40 = vcvt.s32.f32 %v1499_v33  ;;  %v699_v41 = vunpack.c.1.s8 %v379_v56 }
 0x167   : >> { %3519 = vmatpush.bf16.msra.mxu0 %v2715_v36  ;;  %v2971_v42 = vpack.c.bf16 %v2267_v38, %v2251_v37  ;;  %v1707_v43 = vcvt.s32.f32 %v683_v39  ;;  %v939_v44 = vunpack.c.0.s8 %v443_v3  ;;  %v955_v15 = vunpack.c.1.s8 %v443_v3  ;;  %v3279_v3 = vpop.f32.mrf.mxu1 }
 0x168   : >> { %3532 = vmatpush.bf16.msra.mxu1 %v2843_v9  ;;  %v3099_v46 = vpack.c.bf16 %v2523_v40, %v2507_v10  ;;  %v1723_v47 = vcvt.s32.f32 %v699_v41  ;;  %v1195_v48 = vunpack.c.0.s8 %v507_v8  ;;  %v1211_v49 = vunpack.c.1.s8 %v507_v8  ;;  %v3292_v8 = vpop.f32.mrf.mxu2  ;;  %v412_v9 = vld [vmem:[%s4926_s10 + $0x1b8] sm:$0xff] }
 0x169   : >> { %3545 = vmatpush.bf16.msra.mxu2 %v2971_v42  ;;  %v1963_v50 = vcvt.s32.f32 %v939_v44  ;;  %v1979_v51 = vcvt.s32.f32 %v955_v15  ;;  %v1451_v52 = vunpack.c.0.s8 %v571_v17  ;;  %v1467_v16 = vunpack.c.1.s8 %v571_v17 }
 0x16a   : >> { %3558 = vmatpush.bf16.msra.mxu3 %v3099_v46  ;;  %v2699_v54 = vpack.c.bf16 %v1723_v47, %v1707_v43  ;;  %v2219_v55 = vcvt.s32.f32 %v1195_v48  ;;  %v2235_v56 = vcvt.s32.f32 %v1211_v49  ;;  %v651_v57 = vunpack.c.2.s8 %v363_v45 }
 0x16b   : >> { %v2827_v60 = vpack.c.bf16 %v1979_v51, %v1963_v50  ;;  %v2475_v61 = vcvt.s32.f32 %v1451_v52  ;;  %v2491_v62 = vcvt.s32.f32 %v1467_v16  ;;  %v667_v0 = vunpack.c.3.s8 %v363_v45  ;;  %v540_v51 = vld [vmem:[%s4926_s10 + $0x5b8] sm:$0xff] }
 0x16c   : >> { %3520 = vmatpush.bf16.msra.mxu0 %v2699_v54  ;;  %v2955_v4 = vpack.c.bf16 %v2235_v56, %v2219_v55  ;;  %v1675_v5 = vcvt.s32.f32 %v651_v57  ;;  %v907_v6 = vunpack.c.2.s8 %v427_v53  ;;  %v923_v7 = vunpack.c.3.s8 %v427_v53  ;;  %v604_v55 = vld [vmem:[%s4926_s10 + $0x7b8] sm:$0xff] }
 0x16d   : >> { %3533 = vmatpush.bf16.msra.mxu1 %v2827_v60  ;;  %v3083_v12 = vpack.c.bf16 %v2491_v62, %v2475_v61  ;;  %v1691_v13 = vcvt.s32.f32 %v667_v0  ;;  %v1163_v14 = vunpack.c.2.s8 %v491_v59  ;;  %v1179_v17 = vunpack.c.3.s8 %v491_v59 }
 0x16e   : >> { %3546 = vmatpush.bf16.msra.mxu2 %v2955_v4  ;;  %v1931_v18 = vcvt.s32.f32 %v907_v6  ;;  %v1947_v19 = vcvt.s32.f32 %v923_v7  ;;  %v1419_v21 = vunpack.c.2.s8 %v555_v1  ;;  %v1435_v22 = vunpack.c.3.s8 %v555_v1 }
 0x16f   : >> { %3559 = vmatpush.bf16.msra.mxu3 %v3083_v12  ;;  %v2683_v23 = vpack.c.bf16 %v1691_v13, %v1675_v5  ;;  %v2187_v25 = vcvt.s32.f32 %v1163_v14  ;;  %v2203_v26 = vcvt.s32.f32 %v1179_v17  ;;  %v619_v27 = vunpack.c.0.s8 %v363_v45 }
 0x170   : >> { %v2811_v30 = vpack.c.bf16 %v1947_v19, %v1931_v18  ;;  %v2443_v32 = vcvt.s32.f32 %v1419_v21  ;;  %v2459_v31 = vcvt.s32.f32 %v1435_v22  ;;  %v635_v33 = vunpack.c.1.s8 %v363_v45  ;;  %v476_v45 = vld [vmem:[%s4926_s10 + $0x3b8] sm:$0xff] }
 0x171   : >> { %3521 = vmatpush.bf16.msra.mxu0 %v2683_v23  ;;  %v2939_v36 = vpack.c.bf16 %v2203_v26, %v2187_v25  ;;  %v1643_v37 = vcvt.s32.f32 %v619_v27  ;;  %v875_v38 = vunpack.c.0.s8 %v427_v53  ;;  %v891_v39 = vunpack.c.1.s8 %v427_v53 }
 0x172   : >> { %3534 = vmatpush.bf16.msra.mxu1 %v2811_v30  ;;  %v3067_v10 = vpack.c.bf16 %v2459_v31, %v2443_v32  ;;  %v1659_v40 = vcvt.s32.f32 %v635_v33  ;;  %v1131_v41 = vunpack.c.0.s8 %v491_v59  ;;  %v1147_v42 = vunpack.c.1.s8 %v491_v59  ;;  %v396_v30 = vld [vmem:[%s4926_s10 + $0x138] sm:$0xff] }
 0x173   : >> { %3547 = vmatpush.bf16.msra.mxu2 %v2939_v36  ;;  %v1899_v43 = vcvt.s32.f32 %v875_v38  ;;  %v1915_v44 = vcvt.s32.f32 %v891_v39  ;;  %v1387_v15 = vunpack.c.0.s8 %v555_v1  ;;  %v1403_v46 = vunpack.c.1.s8 %v555_v1 }
 0x174   : >> { %3560 = vmatpush.bf16.msra.mxu3 %v3067_v10  ;;  %v2667_v47 = vpack.c.bf16 %v1659_v40, %v1643_v37  ;;  %v2155_v48 = vcvt.s32.f32 %v1131_v41  ;;  %v2171_v49 = vcvt.s32.f32 %v1147_v42  ;;  %v844_v50 = vunpack.c.2.s8 %v412_v9  ;;  %v460_v37 = vld [vmem:[%s4926_s10 + $0x338] sm:$0xff] }
 0x175   : >> { %v2795_v52 = vpack.c.bf16 %v1915_v44, %v1899_v43  ;;  %v2411_v16 = vcvt.s32.f32 %v1387_v15  ;;  %v2427_v53 = vcvt.s32.f32 %v1403_v46  ;;  %v860_v54 = vunpack.c.3.s8 %v412_v9  ;;  %v524_v40 = vld [vmem:[%s4926_s10 + $0x538] sm:$0xff] }
 0x176   : >> { %3522 = vmatpush.bf16.msra.mxu0 %v2667_v47  ;;  %v2923_v56 = vpack.c.bf16 %v2171_v49, %v2155_v48  ;;  %v1868_v57 = vcvt.s32.f32 %v844_v50  ;;  %v1100_v59 = vunpack.c.2.s8 %v476_v45  ;;  %v1116_v60 = vunpack.c.3.s8 %v476_v45  ;;  %v588_v48 = vld [vmem:[%s4926_s10 + $0x738] sm:$0xff]  ;;  %v3174_v50 = vld [vmem:[#allocation2] sm:$0xff] }
 0x177   : >> { %3535 = vmatpush.bf16.msra.mxu1 %v2795_v52  ;;  %v3051_v61 = vpack.c.bf16 %v2427_v53, %v2411_v16  ;;  %v1884_v62 = vcvt.s32.f32 %v860_v54  ;;  %v1356_v0 = vunpack.c.2.s8 %v540_v51  ;;  %v1372_v1 = vunpack.c.3.s8 %v540_v51 }
 0x178   : >> { %3548 = vmatpush.bf16.msra.mxu2 %v2923_v56  ;;  %v2124_v2 = vcvt.s32.f32 %v1100_v59  ;;  %v2140_v3 = vcvt.s32.f32 %v1116_v60  ;;  %v1612_v4 = vunpack.c.2.s8 %v604_v55  ;;  %v1628_v5 = vunpack.c.3.s8 %v604_v55 }
 0x179   : >> { %3561 = vmatpush.bf16.msra.mxu3 %v3051_v61  ;;  %v2780_v6 = vpack.c.bf16 %v1884_v62, %v1868_v57  ;;  %v2380_v7 = vcvt.s32.f32 %v1356_v0  ;;  %v2396_v8 = vcvt.s32.f32 %v1372_v1  ;;  %v812_v11 = vunpack.c.0.s8 %v412_v9  ;;  %3523 = vmatmul.bf16.vlgmr.msra.gmra.mxu0 %v4979_v20 }
 0x17a   : >> { %v2908_v12 = vpack.c.bf16 %v2140_v3, %v2124_v2  ;;  %v2636_v13 = vcvt.s32.f32 %v1612_v4  ;;  %v2652_v14 = vcvt.s32.f32 %v1628_v5  ;;  %v828_v17 = vunpack.c.1.s8 %v412_v9  ;;  %3536 = vmatmul.bf16.vlgmr.msra.gmra.mxu1 %v4981_v24 }
 0x17b   : >> { %3567 = vmatpush.bf16.msrb.mxu0 %v2780_v6  ;;  %v3036_v18 = vpack.c.bf16 %v2396_v8, %v2380_v7  ;;  %v1836_v19 = vcvt.s32.f32 %v812_v11  ;;  %v1068_v21 = vunpack.c.0.s8 %v476_v45  ;;  %v1084_v22 = vunpack.c.1.s8 %v476_v45  ;;  %3549 = vmatmul.bf16.vlgmr.msra.gmra.mxu2 %v4971_v58  ;;  %v380_v7 = vld [vmem:[%s4926_s10 + $0xb8] sm:$0xff] }
 0x17c   : >> { %3580 = vmatpush.bf16.msrb.mxu1 %v2908_v12  ;;  %v3164_v23 = vpack.c.bf16 %v2652_v14, %v2636_v13  ;;  %v1852_v25 = vcvt.s32.f32 %v828_v17  ;;  %v1324_v26 = vunpack.c.0.s8 %v540_v51  ;;  %v1340_v27 = vunpack.c.1.s8 %v540_v51  ;;  %3562 = vmatmul.bf16.vlgmr.msra.gmra.mxu3 %v4974_v63 }
 0x17d   : >> { %3593 = vmatpush.bf16.msrb.mxu2 %v3036_v18  ;;  %v2092_v32 = vcvt.s32.f32 %v1068_v21  ;;  %v2108_v31 = vcvt.s32.f32 %v1084_v22  ;;  %v1580_v33 = vunpack.c.0.s8 %v604_v55  ;;  %v1596_v36 = vunpack.c.1.s8 %v604_v55  ;;  %v444_v21 = vld [vmem:[%s4926_s10 + $0x2b8] sm:$0xff] }
 0x17e   : >> { %3606 = vmatpush.bf16.msrb.mxu3 %v3164_v23  ;;  %v2764_v38 = vpack.c.bf16 %v1852_v25, %v1836_v19  ;;  %v2348_v39 = vcvt.s32.f32 %v1324_v26  ;;  %v2364_v9 = vcvt.s32.f32 %v1340_v27  ;;  %v3278_v10 = vadd.f32 %v5095_v29, %v5093_v28  ;;  %v508_v27 = vld [vmem:[%s4926_s10 + $0x4b8] sm:$0xff] }
 0x17f   : >> { %v2892_v41 = vpack.c.bf16 %v2108_v31, %v2092_v32  ;;  %v2604_v42 = vcvt.s32.f32 %v1580_v33  ;;  %v2620_v43 = vcvt.s32.f32 %v1596_v36  ;;  %v780_v44 = vunpack.c.2.s8 %v396_v30  ;;  %v572_v36 = vld [vmem:[%s4926_s10 + $0x6b8] sm:$0xff] }
 0x180   : >> { %3568 = vmatpush.bf16.msrb.mxu0 %v2764_v38  ;;  %v3020_v15 = vpack.c.bf16 %v2364_v9, %v2348_v39  ;;  %v3291_v46 = vadd.f32 %v5097_v34, %v3278_v10  ;;  %v796_v45 = vunpack.c.3.s8 %v396_v30  ;;  %v1036_v47 = vunpack.c.2.s8 %v460_v37 }
 0x181   : >> { %3581 = vmatpush.bf16.msrb.mxu1 %v2892_v41  ;;  %v3148_v49 = vpack.c.bf16 %v2620_v43, %v2604_v42  ;;  %v1804_v51 = vcvt.s32.f32 %v780_v44  ;;  %v1052_v52 = vunpack.c.3.s8 %v460_v37  ;;  %v1292_v16 = vunpack.c.2.s8 %v524_v40  ;;  %v5125_v43 = vpop.f32.mrf.mxu0  ;;  %v5127_v44 = vpop.f32.mrf.mxu1 }
 0x182   : >> { %3594 = vmatpush.bf16.msrb.mxu2 %v3020_v15  ;;  %v3304_v28 = vadd.f32 %v5099_v35, %v3291_v46  ;;  %v1820_v29 = vcvt.s32.f32 %v796_v45  ;;  %v2060_v53 = vcvt.s32.f32 %v1036_v47  ;;  %v1308_v54 = vunpack.c.3.s8 %v524_v40 }
 0x183   : >> { %3607 = vmatpush.bf16.msrb.mxu3 %v3148_v49  ;;  %v2076_v55 = vcvt.s32.f32 %v1052_v52  ;;  %v2316_v56 = vcvt.s32.f32 %v1292_v16  ;;  %v1548_v57 = vunpack.c.2.s8 %v588_v48  ;;  %v1564_v34 = vunpack.c.3.s8 %v588_v48  ;;  %v5131_v49 = vpop.f32.mrf.mxu3 }
 0x184   : >> { %v4036_v59 = vadd.f32 %v3304_v28, %v3174_v50  ;;  %v2748_v60 = vpack.c.bf16 %v1820_v29, %v1804_v51  ;;  %v2332_v61 = vcvt.s32.f32 %v1308_v54  ;;  %v748_v62 = vunpack.c.0.s8 %v396_v30 }
 0x185   : >> { %v2876_v0 = vpack.c.bf16 %v2076_v55, %v2060_v53  ;;  %v2572_v1 = vcvt.s32.f32 %v1548_v57  ;;  %v2588_v2 = vcvt.s32.f32 %v1564_v34  ;;  %v764_v3 = vunpack.c.1.s8 %v396_v30 }
 0x186   : >> { %4052 = vst [vmem:[#allocation2] sm:$0xff] %v4036_v59  ;;  %3569 = vmatpush.bf16.msrb.mxu0 %v2748_v60  ;;  %v3004_v35 = vpack.c.bf16 %v2332_v61, %v2316_v56  ;;  %v1772_v4 = vcvt.s32.f32 %v748_v62  ;;  %v1004_v5 = vunpack.c.0.s8 %v460_v37  ;;  %v1020_v6 = vunpack.c.1.s8 %v460_v37  ;;  %v364_v59 = vld [vmem:[%s4926_s10 + $0x38] sm:$0xff] }
 0x187   : >> { %3582 = vmatpush.bf16.msrb.mxu1 %v2876_v0  ;;  %v3132_v8 = vpack.c.bf16 %v2588_v2, %v2572_v1  ;;  %v1788_v11 = vcvt.s32.f32 %v764_v3  ;;  %v1260_v12 = vunpack.c.0.s8 %v524_v40  ;;  %v1276_v13 = vunpack.c.1.s8 %v524_v40 }
 0x188   : >> { %3595 = vmatpush.bf16.msrb.mxu2 %v3004_v35  ;;  %v2028_v14 = vcvt.s32.f32 %v1004_v5  ;;  %v2044_v17 = vcvt.s32.f32 %v1020_v6  ;;  %v1516_v18 = vunpack.c.0.s8 %v588_v48  ;;  %v1532_v19 = vunpack.c.1.s8 %v588_v48  ;;  %v5129_v48 = vpop.f32.mrf.mxu2 }
 0x189   : >> { %3608 = vmatpush.bf16.msrb.mxu3 %v3132_v8  ;;  %v2732_v22 = vpack.c.bf16 %v1788_v11, %v1772_v4  ;;  %v2284_v23 = vcvt.s32.f32 %v1260_v12  ;;  %v2300_v25 = vcvt.s32.f32 %v1276_v13  ;;  %v716_v26 = vunpack.c.2.s8 %v380_v7  ;;  %v428_v4 = vld [vmem:[%s4926_s10 + $0x238] sm:$0xff] }
 0x18a   : >> { %v2860_v30 = vpack.c.bf16 %v2044_v17, %v2028_v14  ;;  %v2540_v32 = vcvt.s32.f32 %v1516_v18  ;;  %v2556_v31 = vcvt.s32.f32 %v1532_v19  ;;  %v732_v33 = vunpack.c.3.s8 %v380_v7  ;;  %v492_v11 = vld [vmem:[%s4926_s10 + $0x438] sm:$0xff]  ;;  %v3318_v19 = vpop.f32.mrf.mxu0 }
 0x18b   : >> { %3570 = vmatpush.bf16.msrb.mxu0 %v2732_v22  ;;  %v2988_v37 = vpack.c.bf16 %v2300_v25, %v2284_v23  ;;  %v1740_v38 = vcvt.s32.f32 %v716_v26  ;;  %v972_v39 = vunpack.c.2.s8 %v444_v21  ;;  %v988_v9 = vunpack.c.3.s8 %v444_v21  ;;  %v556_v18 = vld [vmem:[%s4926_s10 + $0x638] sm:$0xff] }
 0x18c   : >> { %3583 = vmatpush.bf16.msrb.mxu1 %v2860_v30  ;;  %v3116_v10 = vpack.c.bf16 %v2556_v31, %v2540_v32  ;;  %v1756_v40 = vcvt.s32.f32 %v732_v33  ;;  %v1228_v41 = vunpack.c.2.s8 %v508_v27  ;;  %v1244_v42 = vunpack.c.3.s8 %v508_v27  ;;  %v3357_v30 = vpop.f32.mrf.mxu3 }
 0x18d   : >> { %3596 = vmatpush.bf16.msrb.mxu2 %v2988_v37  ;;  %v1996_v15 = vcvt.s32.f32 %v972_v39  ;;  %v2012_v46 = vcvt.s32.f32 %v988_v9  ;;  %v1484_v45 = vunpack.c.2.s8 %v572_v36  ;;  %v1500_v47 = vunpack.c.3.s8 %v572_v36 }
 0x18e   : >> { %3609 = vmatpush.bf16.msrb.mxu3 %v3116_v10  ;;  %v2716_v50 = vpack.c.bf16 %v1756_v40, %v1740_v38  ;;  %v2252_v51 = vcvt.s32.f32 %v1228_v41  ;;  %v2268_v52 = vcvt.s32.f32 %v1244_v42  ;;  %v684_v16 = vunpack.c.0.s8 %v380_v7 }
 0x18f   : >> { %v2844_v28 = vpack.c.bf16 %v2012_v46, %v1996_v15  ;;  %v2508_v29 = vcvt.s32.f32 %v1484_v45  ;;  %v2524_v53 = vcvt.s32.f32 %v1500_v47  ;;  %v700_v54 = vunpack.c.1.s8 %v380_v7 }
 0x190   : >> { %3571 = vmatpush.bf16.msrb.mxu0 %v2716_v50  ;;  %v2972_v55 = vpack.c.bf16 %v2268_v52, %v2252_v51  ;;  %v1708_v56 = vcvt.s32.f32 %v684_v16  ;;  %v940_v57 = vunpack.c.0.s8 %v444_v21  ;;  %v956_v34 = vunpack.c.1.s8 %v444_v21  ;;  %v3331_v21 = vpop.f32.mrf.mxu1 }
 0x191   : >> { %3584 = vmatpush.bf16.msrb.mxu1 %v2844_v28  ;;  %v3100_v60 = vpack.c.bf16 %v2524_v53, %v2508_v29  ;;  %v1724_v61 = vcvt.s32.f32 %v700_v54  ;;  %v1196_v62 = vunpack.c.0.s8 %v508_v27  ;;  %v1212_v0 = vunpack.c.1.s8 %v508_v27  ;;  %v3344_v27 = vpop.f32.mrf.mxu2  ;;  %v413_v28 = vld [vmem:[%s4926_s10 + $0x1c0] sm:$0xff] }
 0x192   : >> { %3597 = vmatpush.bf16.msrb.mxu2 %v2972_v55  ;;  %v1964_v1 = vcvt.s32.f32 %v940_v57  ;;  %v1980_v2 = vcvt.s32.f32 %v956_v34  ;;  %v1452_v3 = vunpack.c.0.s8 %v572_v36  ;;  %v1468_v35 = vunpack.c.1.s8 %v572_v36 }
 0x193   : >> { %3610 = vmatpush.bf16.msrb.mxu3 %v3100_v60  ;;  %v2700_v5 = vpack.c.bf16 %v1724_v61, %v1708_v56  ;;  %v2220_v6 = vcvt.s32.f32 %v1196_v62  ;;  %v2236_v7 = vcvt.s32.f32 %v1212_v0  ;;  %v652_v8 = vunpack.c.2.s8 %v364_v59 }
 0x194   : >> { %v2828_v12 = vpack.c.bf16 %v1980_v2, %v1964_v1  ;;  %v2476_v13 = vcvt.s32.f32 %v1452_v3  ;;  %v2492_v14 = vcvt.s32.f32 %v1468_v35  ;;  %v668_v17 = vunpack.c.3.s8 %v364_v59  ;;  %v541_v2 = vld [vmem:[%s4926_s10 + $0x5c0] sm:$0xff] }
 0x195   : >> { %3572 = vmatpush.bf16.msrb.mxu0 %v2700_v5  ;;  %v2956_v22 = vpack.c.bf16 %v2236_v7, %v2220_v6  ;;  %v1676_v23 = vcvt.s32.f32 %v652_v8  ;;  %v908_v25 = vunpack.c.2.s8 %v428_v4  ;;  %v924_v26 = vunpack.c.3.s8 %v428_v4  ;;  %v605_v6 = vld [vmem:[%s4926_s10 + $0x7c0] sm:$0xff] }
 0x196   : >> { %3585 = vmatpush.bf16.msrb.mxu1 %v2828_v12  ;;  %v3084_v32 = vpack.c.bf16 %v2492_v14, %v2476_v13  ;;  %v1692_v31 = vcvt.s32.f32 %v668_v17  ;;  %v1164_v33 = vunpack.c.2.s8 %v492_v11  ;;  %v1180_v36 = vunpack.c.3.s8 %v492_v11 }
 0x197   : >> { %3598 = vmatpush.bf16.msrb.mxu2 %v2956_v22  ;;  %v1932_v37 = vcvt.s32.f32 %v908_v25  ;;  %v1948_v38 = vcvt.s32.f32 %v924_v26  ;;  %v1420_v39 = vunpack.c.2.s8 %v556_v18  ;;  %v1436_v9 = vunpack.c.3.s8 %v556_v18 }
 0x198   : >> { %3611 = vmatpush.bf16.msrb.mxu3 %v3084_v32  ;;  %v2684_v10 = vpack.c.bf16 %v1692_v31, %v1676_v23  ;;  %v2188_v40 = vcvt.s32.f32 %v1164_v33  ;;  %v2204_v41 = vcvt.s32.f32 %v1180_v36  ;;  %v620_v42 = vunpack.c.0.s8 %v364_v59 }
 0x199   : >> { %v2812_v15 = vpack.c.bf16 %v1948_v38, %v1932_v37  ;;  %v2444_v46 = vcvt.s32.f32 %v1420_v39  ;;  %v2460_v45 = vcvt.s32.f32 %v1436_v9  ;;  %v636_v47 = vunpack.c.1.s8 %v364_v59  ;;  %v477_v59 = vld [vmem:[%s4926_s10 + $0x3c0] sm:$0xff] }
 0x19a   : >> { %3573 = vmatpush.bf16.msrb.mxu0 %v2684_v10  ;;  %v2940_v50 = vpack.c.bf16 %v2204_v41, %v2188_v40  ;;  %v1644_v51 = vcvt.s32.f32 %v620_v42  ;;  %v876_v52 = vunpack.c.0.s8 %v428_v4  ;;  %v892_v16 = vunpack.c.1.s8 %v428_v4 }
 0x19b   : >> { %3586 = vmatpush.bf16.msrb.mxu1 %v2812_v15  ;;  %v3068_v29 = vpack.c.bf16 %v2460_v45, %v2444_v46  ;;  %v1660_v53 = vcvt.s32.f32 %v636_v47  ;;  %v1132_v54 = vunpack.c.0.s8 %v492_v11  ;;  %v1148_v55 = vunpack.c.1.s8 %v492_v11  ;;  %v397_v15 = vld [vmem:[%s4926_s10 + $0x140] sm:$0xff] }
 0x19c   : >> { %3599 = vmatpush.bf16.msrb.mxu2 %v2940_v50  ;;  %v1900_v56 = vcvt.s32.f32 %v876_v52  ;;  %v1916_v57 = vcvt.s32.f32 %v892_v16  ;;  %v1388_v34 = vunpack.c.0.s8 %v556_v18  ;;  %v1404_v60 = vunpack.c.1.s8 %v556_v18 }
 0x19d   : >> { %3612 = vmatpush.bf16.msrb.mxu3 %v3068_v29  ;;  %v2668_v61 = vpack.c.bf16 %v1660_v53, %v1644_v51  ;;  %v2156_v62 = vcvt.s32.f32 %v1132_v54  ;;  %v2172_v0 = vcvt.s32.f32 %v1148_v55  ;;  %v845_v1 = vunpack.c.2.s8 %v413_v28  ;;  %v461_v51 = vld [vmem:[%s4926_s10 + $0x340] sm:$0xff] }
 0x19e   : >> { %v2796_v3 = vpack.c.bf16 %v1916_v57, %v1900_v56  ;;  %v2412_v35 = vcvt.s32.f32 %v1388_v34  ;;  %v2428_v4 = vcvt.s32.f32 %v1404_v60  ;;  %v861_v5 = vunpack.c.3.s8 %v413_v28  ;;  %v525_v53 = vld [vmem:[%s4926_s10 + $0x540] sm:$0xff] }
 0x19f   : >> { %3574 = vmatpush.bf16.msrb.mxu0 %v2668_v61  ;;  %v2924_v7 = vpack.c.bf16 %v2172_v0, %v2156_v62  ;;  %v1869_v8 = vcvt.s32.f32 %v845_v1  ;;  %v1101_v11 = vunpack.c.2.s8 %v477_v59  ;;  %v1117_v12 = vunpack.c.3.s8 %v477_v59  ;;  %v589_v62 = vld [vmem:[%s4926_s10 + $0x740] sm:$0xff]  ;;  %v3175_v1 = vld [vmem:[#allocation2 + $0x58] sm:$0xff] }
 0x1a0   : >> { %3587 = vmatpush.bf16.msrb.mxu1 %v2796_v3  ;;  %v3052_v13 = vpack.c.bf16 %v2428_v4, %v2412_v35  ;;  %v1885_v14 = vcvt.s32.f32 %v861_v5  ;;  %v1357_v17 = vunpack.c.2.s8 %v541_v2  ;;  %v1373_v18 = vunpack.c.3.s8 %v541_v2 }
 0x1a1   : >> { %3600 = vmatpush.bf16.msrb.mxu2 %v2924_v7  ;;  %v2125_v19 = vcvt.s32.f32 %v1101_v11  ;;  %v2141_v21 = vcvt.s32.f32 %v1117_v12  ;;  %v1613_v22 = vunpack.c.2.s8 %v605_v6  ;;  %v1629_v23 = vunpack.c.3.s8 %v605_v6 }
 0x1a2   : >> { %3613 = vmatpush.bf16.msrb.mxu3 %v3052_v13  ;;  %v2781_v25 = vpack.c.bf16 %v1885_v14, %v1869_v8  ;;  %v2381_v26 = vcvt.s32.f32 %v1357_v17  ;;  %v2397_v27 = vcvt.s32.f32 %v1373_v18  ;;  %v813_v30 = vunpack.c.0.s8 %v413_v28  ;;  %3575 = vmatmul.bf16.vlgmr.msrb.gmra.mxu0 %v4979_v20 }
 0x1a3   : >> { %v2909_v32 = vpack.c.bf16 %v2141_v21, %v2125_v19  ;;  %v2637_v31 = vcvt.s32.f32 %v1613_v22  ;;  %v2653_v33 = vcvt.s32.f32 %v1629_v23  ;;  %v829_v36 = vunpack.c.1.s8 %v413_v28  ;;  %3588 = vmatmul.bf16.vlgmr.msrb.gmra.mxu1 %v4981_v24 }
 0x1a4   : >> { %3619 = vmatpush.bf16.msra.mxu0 %v2781_v25  ;;  %v3037_v37 = vpack.c.bf16 %v2397_v27, %v2381_v26  ;;  %v1837_v38 = vcvt.s32.f32 %v813_v30  ;;  %v1069_v39 = vunpack.c.0.s8 %v477_v59  ;;  %v1085_v9 = vunpack.c.1.s8 %v477_v59  ;;  %3601 = vmatmul.bf16.vlgmr.msrb.gmra.mxu2 %v4971_v58  ;;  %v381_v26 = vld [vmem:[%s4926_s10 + $0xc0] sm:$0xff] }
 0x1a5   : >> { %3632 = vmatpush.bf16.msra.mxu1 %v2909_v32  ;;  %v3165_v10 = vpack.c.bf16 %v2653_v33, %v2637_v31  ;;  %v1853_v40 = vcvt.s32.f32 %v829_v36  ;;  %v1325_v41 = vunpack.c.0.s8 %v541_v2  ;;  %v1341_v42 = vunpack.c.1.s8 %v541_v2  ;;  %3614 = vmatmul.bf16.vlgmr.msrb.gmra.mxu3 %v4974_v63 }
 0x1a6   : >> { %3645 = vmatpush.bf16.msra.mxu2 %v3037_v37  ;;  %v2093_v46 = vcvt.s32.f32 %v1069_v39  ;;  %v2109_v45 = vcvt.s32.f32 %v1085_v9  ;;  %v1581_v47 = vunpack.c.0.s8 %v605_v6  ;;  %v1597_v50 = vunpack.c.1.s8 %v605_v6  ;;  %v445_v39 = vld [vmem:[%s4926_s10 + $0x2c0] sm:$0xff] }
 0x1a7   : >> { %3658 = vmatpush.bf16.msra.mxu3 %v3165_v10  ;;  %v2765_v52 = vpack.c.bf16 %v1853_v40, %v1837_v38  ;;  %v2349_v16 = vcvt.s32.f32 %v1325_v41  ;;  %v2365_v28 = vcvt.s32.f32 %v1341_v42  ;;  %v3330_v29 = vadd.f32 %v5127_v44, %v5125_v43  ;;  %v509_v42 = vld [vmem:[%s4926_s10 + $0x4c0] sm:$0xff] }
 0x1a8   : >> { %v2893_v54 = vpack.c.bf16 %v2109_v45, %v2093_v46  ;;  %v2605_v55 = vcvt.s32.f32 %v1581_v47  ;;  %v2621_v56 = vcvt.s32.f32 %v1597_v50  ;;  %v781_v57 = vunpack.c.2.s8 %v397_v15  ;;  %v573_v50 = vld [vmem:[%s4926_s10 + $0x6c0] sm:$0xff] }
 0x1a9   : >> { %3620 = vmatpush.bf16.msra.mxu0 %v2765_v52  ;;  %v3021_v34 = vpack.c.bf16 %v2365_v28, %v2349_v16  ;;  %v3343_v60 = vadd.f32 %v5129_v48, %v3330_v29  ;;  %v797_v59 = vunpack.c.3.s8 %v397_v15  ;;  %v1037_v61 = vunpack.c.2.s8 %v461_v51 }
 0x1aa   : >> { %3633 = vmatpush.bf16.msra.mxu1 %v2893_v54  ;;  %v3149_v0 = vpack.c.bf16 %v2621_v56, %v2605_v55  ;;  %v1805_v2 = vcvt.s32.f32 %v781_v57  ;;  %v1053_v3 = vunpack.c.3.s8 %v461_v51  ;;  %v1293_v35 = vunpack.c.2.s8 %v525_v53  ;;  %v5157_v56 = vpop.f32.mrf.mxu0  ;;  %v5159_v57 = vpop.f32.mrf.mxu1 }
 0x1ab   : >> { %3646 = vmatpush.bf16.msra.mxu2 %v3021_v34  ;;  %v3356_v43 = vadd.f32 %v5131_v49, %v3343_v60  ;;  %v1821_v44 = vcvt.s32.f32 %v797_v59  ;;  %v2061_v4 = vcvt.s32.f32 %v1037_v61  ;;  %v1309_v5 = vunpack.c.3.s8 %v525_v53 }
 0x1ac   : >> { %3659 = vmatpush.bf16.msra.mxu3 %v3149_v0  ;;  %v2077_v6 = vcvt.s32.f32 %v1053_v3  ;;  %v2317_v7 = vcvt.s32.f32 %v1293_v35  ;;  %v1549_v8 = vunpack.c.2.s8 %v589_v62  ;;  %v1565_v48 = vunpack.c.3.s8 %v589_v62  ;;  %v5163_v0 = vpop.f32.mrf.mxu3 }
 0x1ad   : >> { %v4037_v11 = vadd.f32 %v3356_v43, %v3175_v1  ;;  %v2749_v12 = vpack.c.bf16 %v1821_v44, %v1805_v2  ;;  %v2333_v13 = vcvt.s32.f32 %v1309_v5  ;;  %v749_v14 = vunpack.c.0.s8 %v397_v15 }
 0x1ae   : >> { %v2877_v17 = vpack.c.bf16 %v2077_v6, %v2061_v4  ;;  %v2573_v18 = vcvt.s32.f32 %v1549_v8  ;;  %v2589_v19 = vcvt.s32.f32 %v1565_v48  ;;  %v765_v21 = vunpack.c.1.s8 %v397_v15 }
 0x1af   : >> { %4053 = vst [vmem:[#allocation2 + $0x58] sm:$0xff] %v4037_v11  ;;  %3621 = vmatpush.bf16.msra.mxu0 %v2749_v12  ;;  %v3005_v49 = vpack.c.bf16 %v2333_v13, %v2317_v7  ;;  %v1773_v22 = vcvt.s32.f32 %v749_v14  ;;  %v1005_v23 = vunpack.c.0.s8 %v461_v51  ;;  %v1021_v25 = vunpack.c.1.s8 %v461_v51  ;;  %v365_v11 = vld [vmem:[%s4926_s10 + $0x40] sm:$0xff] }
 0x1b0   : >> { %3634 = vmatpush.bf16.msra.mxu1 %v2877_v17  ;;  %v3133_v27 = vpack.c.bf16 %v2589_v19, %v2573_v18  ;;  %v1789_v30 = vcvt.s32.f32 %v765_v21  ;;  %v1261_v32 = vunpack.c.0.s8 %v525_v53  ;;  %v1277_v31 = vunpack.c.1.s8 %v525_v53 }
 0x1b1   : >> { %3647 = vmatpush.bf16.msra.mxu2 %v3005_v49  ;;  %v2029_v33 = vcvt.s32.f32 %v1005_v23  ;;  %v2045_v36 = vcvt.s32.f32 %v1021_v25  ;;  %v1517_v37 = vunpack.c.0.s8 %v589_v62  ;;  %v1533_v38 = vunpack.c.1.s8 %v589_v62  ;;  %v5161_v62 = vpop.f32.mrf.mxu2 }
 0x1b2   : >> { %3660 = vmatpush.bf16.msra.mxu3 %v3133_v27  ;;  %v2733_v9 = vpack.c.bf16 %v1789_v30, %v1773_v22  ;;  %v2285_v10 = vcvt.s32.f32 %v1261_v32  ;;  %v2301_v40 = vcvt.s32.f32 %v1277_v31  ;;  %v717_v41 = vunpack.c.2.s8 %v381_v26  ;;  %v429_v22 = vld [vmem:[%s4926_s10 + $0x240] sm:$0xff] }
 0x1b3   : >> { %v2861_v15 = vpack.c.bf16 %v2045_v36, %v2029_v33  ;;  %v2541_v46 = vcvt.s32.f32 %v1517_v37  ;;  %v2557_v45 = vcvt.s32.f32 %v1533_v38  ;;  %v733_v47 = vunpack.c.3.s8 %v381_v26  ;;  %v493_v30 = vld [vmem:[%s4926_s10 + $0x440] sm:$0xff]  ;;  %v3370_v38 = vpop.f32.mrf.mxu0 }
 0x1b4   : >> { %3622 = vmatpush.bf16.msra.mxu0 %v2733_v9  ;;  %v2989_v51 = vpack.c.bf16 %v2301_v40, %v2285_v10  ;;  %v1741_v52 = vcvt.s32.f32 %v717_v41  ;;  %v973_v16 = vunpack.c.2.s8 %v445_v39  ;;  %v989_v28 = vunpack.c.3.s8 %v445_v39  ;;  %v557_v37 = vld [vmem:[%s4926_s10 + $0x640] sm:$0xff] }
 0x1b5   : >> { %3635 = vmatpush.bf16.msra.mxu1 %v2861_v15  ;;  %v3117_v29 = vpack.c.bf16 %v2557_v45, %v2541_v46  ;;  %v1757_v53 = vcvt.s32.f32 %v733_v47  ;;  %v1229_v54 = vunpack.c.2.s8 %v509_v42  ;;  %v1245_v55 = vunpack.c.3.s8 %v509_v42  ;;  %v3409_v15 = vpop.f32.mrf.mxu3 }
 0x1b6   : >> { %3648 = vmatpush.bf16.msra.mxu2 %v2989_v51  ;;  %v1997_v34 = vcvt.s32.f32 %v973_v16  ;;  %v2013_v60 = vcvt.s32.f32 %v989_v28  ;;  %v1485_v59 = vunpack.c.2.s8 %v573_v50  ;;  %v1501_v61 = vunpack.c.3.s8 %v573_v50 }
 0x1b7   : >> { %3661 = vmatpush.bf16.msra.mxu3 %v3117_v29  ;;  %v2717_v1 = vpack.c.bf16 %v1757_v53, %v1741_v52  ;;  %v2253_v2 = vcvt.s32.f32 %v1229_v54  ;;  %v2269_v3 = vcvt.s32.f32 %v1245_v55  ;;  %v685_v35 = vunpack.c.0.s8 %v381_v26 }
 0x1b8   : >> { %v2845_v43 = vpack.c.bf16 %v2013_v60, %v1997_v34  ;;  %v2509_v44 = vcvt.s32.f32 %v1485_v59  ;;  %v2525_v4 = vcvt.s32.f32 %v1501_v61  ;;  %v701_v5 = vunpack.c.1.s8 %v381_v26 }
 0x1b9   : >> { %3623 = vmatpush.bf16.msra.mxu0 %v2717_v1  ;;  %v2973_v6 = vpack.c.bf16 %v2269_v3, %v2253_v2  ;;  %v1709_v7 = vcvt.s32.f32 %v685_v35  ;;  %v941_v8 = vunpack.c.0.s8 %v445_v39  ;;  %v957_v48 = vunpack.c.1.s8 %v445_v39  ;;  %v3383_v39 = vpop.f32.mrf.mxu1 }
 0x1ba   : >> { %3636 = vmatpush.bf16.msra.mxu1 %v2845_v43  ;;  %v3101_v12 = vpack.c.bf16 %v2525_v4, %v2509_v44  ;;  %v1725_v13 = vcvt.s32.f32 %v701_v5  ;;  %v1197_v14 = vunpack.c.0.s8 %v509_v42  ;;  %v1213_v17 = vunpack.c.1.s8 %v509_v42  ;;  %v3396_v42 = vpop.f32.mrf.mxu2  ;;  %v414_v43 = vld [vmem:[%s4926_s10 + $0x1c8] sm:$0xff] }
 0x1bb   : >> { %3649 = vmatpush.bf16.msra.mxu2 %v2973_v6  ;;  %v1965_v18 = vcvt.s32.f32 %v941_v8  ;;  %v1981_v19 = vcvt.s32.f32 %v957_v48  ;;  %v1453_v21 = vunpack.c.0.s8 %v573_v50  ;;  %v1469_v49 = vunpack.c.1.s8 %v573_v50 }
 0x1bc   : >> { %3662 = vmatpush.bf16.msra.mxu3 %v3101_v12  ;;  %v2701_v23 = vpack.c.bf16 %v1725_v13, %v1709_v7  ;;  %v2221_v25 = vcvt.s32.f32 %v1197_v14  ;;  %v2237_v26 = vcvt.s32.f32 %v1213_v17  ;;  %v653_v27 = vunpack.c.2.s8 %v365_v11 }
 0x1bd   : >> { %v2829_v32 = vpack.c.bf16 %v1981_v19, %v1965_v18  ;;  %v2477_v31 = vcvt.s32.f32 %v1453_v21  ;;  %v2493_v33 = vcvt.s32.f32 %v1469_v49  ;;  %v669_v36 = vunpack.c.3.s8 %v365_v11  ;;  %v542_v19 = vld [vmem:[%s4926_s10 + $0x5c8] sm:$0xff] }
 0x1be   : >> { %3624 = vmatpush.bf16.msra.mxu0 %v2701_v23  ;;  %v2957_v9 = vpack.c.bf16 %v2237_v26, %v2221_v25  ;;  %v1677_v10 = vcvt.s32.f32 %v653_v27  ;;  %v909_v40 = vunpack.c.2.s8 %v429_v22  ;;  %v925_v41 = vunpack.c.3.s8 %v429_v22  ;;  %v606_v25 = vld [vmem:[%s4926_s10 + $0x7c8] sm:$0xff] }
 0x1bf   : >> { %3637 = vmatpush.bf16.msra.mxu1 %v2829_v32  ;;  %v3085_v46 = vpack.c.bf16 %v2493_v33, %v2477_v31  ;;  %v1693_v45 = vcvt.s32.f32 %v669_v36  ;;  %v1165_v47 = vunpack.c.2.s8 %v493_v30  ;;  %v1181_v50 = vunpack.c.3.s8 %v493_v30 }
 0x1c0   : >> { %3650 = vmatpush.bf16.msra.mxu2 %v2957_v9  ;;  %v1933_v51 = vcvt.s32.f32 %v909_v40  ;;  %v1949_v52 = vcvt.s32.f32 %v925_v41  ;;  %v1421_v16 = vunpack.c.2.s8 %v557_v37  ;;  %v1437_v28 = vunpack.c.3.s8 %v557_v37 }
 0x1c1   : >> { %3663 = vmatpush.bf16.msra.mxu3 %v3085_v46  ;;  %v2685_v29 = vpack.c.bf16 %v1693_v45, %v1677_v10  ;;  %v2189_v53 = vcvt.s32.f32 %v1165_v47  ;;  %v2205_v54 = vcvt.s32.f32 %v1181_v50  ;;  %v621_v55 = vunpack.c.0.s8 %v365_v11 }
 0x1c2   : >> { %v2813_v34 = vpack.c.bf16 %v1949_v52, %v1933_v51  ;;  %v2445_v60 = vcvt.s32.f32 %v1421_v16  ;;  %v2461_v59 = vcvt.s32.f32 %v1437_v28  ;;  %v637_v61 = vunpack.c.1.s8 %v365_v11  ;;  %v478_v11 = vld [vmem:[%s4926_s10 + $0x3c8] sm:$0xff] }
 0x1c3   : >> { %3625 = vmatpush.bf16.msra.mxu0 %v2685_v29  ;;  %v2941_v1 = vpack.c.bf16 %v2205_v54, %v2189_v53  ;;  %v1645_v2 = vcvt.s32.f32 %v621_v55  ;;  %v877_v3 = vunpack.c.0.s8 %v429_v22  ;;  %v893_v35 = vunpack.c.1.s8 %v429_v22 }
 0x1c4   : >> { %3638 = vmatpush.bf16.msra.mxu1 %v2813_v34  ;;  %v3069_v44 = vpack.c.bf16 %v2461_v59, %v2445_v60  ;;  %v1661_v4 = vcvt.s32.f32 %v637_v61  ;;  %v1133_v5 = vunpack.c.0.s8 %v493_v30  ;;  %v1149_v6 = vunpack.c.1.s8 %v493_v30  ;;  %v398_v34 = vld [vmem:[%s4926_s10 + $0x148] sm:$0xff] }
 0x1c5   : >> { %3651 = vmatpush.bf16.msra.mxu2 %v2941_v1  ;;  %v1901_v7 = vcvt.s32.f32 %v877_v3  ;;  %v1917_v8 = vcvt.s32.f32 %v893_v35  ;;  %v1389_v48 = vunpack.c.0.s8 %v557_v37  ;;  %v1405_v12 = vunpack.c.1.s8 %v557_v37 }
 0x1c6   : >> { %3664 = vmatpush.bf16.msra.mxu3 %v3069_v44  ;;  %v2669_v13 = vpack.c.bf16 %v1661_v4, %v1645_v2  ;;  %v2157_v14 = vcvt.s32.f32 %v1133_v5  ;;  %v2173_v17 = vcvt.s32.f32 %v1149_v6  ;;  %v846_v18 = vunpack.c.2.s8 %v414_v43  ;;  %v462_v2 = vld [vmem:[%s4926_s10 + $0x348] sm:$0xff] }
 0x1c7   : >> { %v2797_v21 = vpack.c.bf16 %v1917_v8, %v1901_v7  ;;  %v2413_v49 = vcvt.s32.f32 %v1389_v48  ;;  %v2429_v22 = vcvt.s32.f32 %v1405_v12  ;;  %v862_v23 = vunpack.c.3.s8 %v414_v43  ;;  %v526_v4 = vld [vmem:[%s4926_s10 + $0x548] sm:$0xff] }
 0x1c8   : >> { %3626 = vmatpush.bf16.msra.mxu0 %v2669_v13  ;;  %v2925_v26 = vpack.c.bf16 %v2173_v17, %v2157_v14  ;;  %v1870_v27 = vcvt.s32.f32 %v846_v18  ;;  %v1102_v30 = vunpack.c.2.s8 %v478_v11  ;;  %v1118_v32 = vunpack.c.3.s8 %v478_v11  ;;  %v590_v14 = vld [vmem:[%s4926_s10 + $0x748] sm:$0xff]  ;;  %v3176_v18 = vld [vmem:[#allocation2 + $0x18] sm:$0xff] }
 0x1c9   : >> { %3639 = vmatpush.bf16.msra.mxu1 %v2797_v21  ;;  %v3053_v31 = vpack.c.bf16 %v2429_v22, %v2413_v49  ;;  %v1886_v33 = vcvt.s32.f32 %v862_v23  ;;  %v1358_v36 = vunpack.c.2.s8 %v542_v19  ;;  %v1374_v37 = vunpack.c.3.s8 %v542_v19 }
 0x1ca   : >> { %3652 = vmatpush.bf16.msra.mxu2 %v2925_v26  ;;  %v2126_v38 = vcvt.s32.f32 %v1102_v30  ;;  %v2142_v39 = vcvt.s32.f32 %v1118_v32  ;;  %v1614_v9 = vunpack.c.2.s8 %v606_v25  ;;  %v1630_v10 = vunpack.c.3.s8 %v606_v25 }
 0x1cb   : >> { %3665 = vmatpush.bf16.msra.mxu3 %v3053_v31  ;;  %v2782_v40 = vpack.c.bf16 %v1886_v33, %v1870_v27  ;;  %v2382_v41 = vcvt.s32.f32 %v1358_v36  ;;  %v2398_v42 = vcvt.s32.f32 %v1374_v37  ;;  %v814_v15 = vunpack.c.0.s8 %v414_v43  ;;  %3627 = vmatmul.bf16.vlgmr.msra.gmra.mxu0 %v4979_v20 }
 0x1cc   : >> { %v2910_v46 = vpack.c.bf16 %v2142_v39, %v2126_v38  ;;  %v2638_v45 = vcvt.s32.f32 %v1614_v9  ;;  %v2654_v47 = vcvt.s32.f32 %v1630_v10  ;;  %v830_v50 = vunpack.c.1.s8 %v414_v43  ;;  %3640 = vmatmul.bf16.vlgmr.msra.gmra.mxu1 %v4981_v24 }
 0x1cd   : >> { %3671 = vmatpush.bf16.msrb.mxu0 %v2782_v40  ;;  %v3038_v51 = vpack.c.bf16 %v2398_v42, %v2382_v41  ;;  %v1838_v52 = vcvt.s32.f32 %v814_v15  ;;  %v1070_v16 = vunpack.c.0.s8 %v478_v11  ;;  %v1086_v28 = vunpack.c.1.s8 %v478_v11  ;;  %3653 = vmatmul.bf16.vlgmr.msra.gmra.mxu2 %v4971_v58  ;;  %v382_v41 = vld [vmem:[%s4926_s10 + $0xc8] sm:$0xff] }
 0x1ce   : >> { %3684 = vmatpush.bf16.msrb.mxu1 %v2910_v46  ;;  %v3166_v29 = vpack.c.bf16 %v2654_v47, %v2638_v45  ;;  %v1854_v53 = vcvt.s32.f32 %v830_v50  ;;  %v1326_v54 = vunpack.c.0.s8 %v542_v19  ;;  %v1342_v55 = vunpack.c.1.s8 %v542_v19  ;;  %3666 = vmatmul.bf16.vlgmr.msra.gmra.mxu3 %v4974_v63 }
 0x1cf   : >> { %3697 = vmatpush.bf16.msrb.mxu2 %v3038_v51  ;;  %v2094_v60 = vcvt.s32.f32 %v1070_v16  ;;  %v2110_v59 = vcvt.s32.f32 %v1086_v28  ;;  %v1582_v61 = vunpack.c.0.s8 %v606_v25  ;;  %v1598_v1 = vunpack.c.1.s8 %v606_v25  ;;  %v446_v16 = vld [vmem:[%s4926_s10 + $0x2c8] sm:$0xff] }
 0x1d0   : >> { %3710 = vmatpush.bf16.msrb.mxu3 %v3166_v29  ;;  %v2766_v3 = vpack.c.bf16 %v1854_v53, %v1838_v52  ;;  %v2350_v35 = vcvt.s32.f32 %v1326_v54  ;;  %v2366_v43 = vcvt.s32.f32 %v1342_v55  ;;  %v3382_v44 = vadd.f32 %v5159_v57, %v5157_v56  ;;  %v510_v55 = vld [vmem:[%s4926_s10 + $0x4c8] sm:$0xff] }
 0x1d1   : >> { %v2894_v5 = vpack.c.bf16 %v2110_v59, %v2094_v60  ;;  %v2606_v6 = vcvt.s32.f32 %v1582_v61  ;;  %v2622_v7 = vcvt.s32.f32 %v1598_v1  ;;  %v782_v8 = vunpack.c.2.s8 %v398_v34  ;;  %v574_v1 = vld [vmem:[%s4926_s10 + $0x6c8] sm:$0xff] }
 0x1d2   : >> { %3672 = vmatpush.bf16.msrb.mxu0 %v2766_v3  ;;  %v3022_v48 = vpack.c.bf16 %v2366_v43, %v2350_v35  ;;  %v3395_v12 = vadd.f32 %v5161_v62, %v3382_v44  ;;  %v798_v11 = vunpack.c.3.s8 %v398_v34  ;;  %v1038_v13 = vunpack.c.2.s8 %v462_v2 }
 0x1d3   : >> { %3685 = vmatpush.bf16.msrb.mxu1 %v2894_v5  ;;  %v3150_v17 = vpack.c.bf16 %v2622_v7, %v2606_v6  ;;  %v1806_v19 = vcvt.s32.f32 %v782_v8  ;;  %v1054_v21 = vunpack.c.3.s8 %v462_v2  ;;  %v1294_v49 = vunpack.c.2.s8 %v526_v4  ;;  %v5189_v7 = vpop.f32.mrf.mxu0  ;;  %v5191_v8 = vpop.f32.mrf.mxu1 }
 0x1d4   : >> { %3698 = vmatpush.bf16.msrb.mxu2 %v3022_v48  ;;  %v3408_v56 = vadd.f32 %v5163_v0, %v3395_v12  ;;  %v1822_v57 = vcvt.s32.f32 %v798_v11  ;;  %v2062_v22 = vcvt.s32.f32 %v1038_v13  ;;  %v1310_v23 = vunpack.c.3.s8 %v526_v4 }
 0x1d5   : >> { %3711 = vmatpush.bf16.msrb.mxu3 %v3150_v17  ;;  %v2078_v25 = vcvt.s32.f32 %v1054_v21  ;;  %v2318_v26 = vcvt.s32.f32 %v1294_v49  ;;  %v1550_v27 = vunpack.c.2.s8 %v590_v14  ;;  %v1566_v62 = vunpack.c.3.s8 %v590_v14  ;;  %v5195_v17 = vpop.f32.mrf.mxu3 }
 0x1d6   : >> { %v4038_v30 = vadd.f32 %v3408_v56, %v3176_v18  ;;  %v2750_v32 = vpack.c.bf16 %v1822_v57, %v1806_v19  ;;  %v2334_v31 = vcvt.s32.f32 %v1310_v23  ;;  %v750_v33 = vunpack.c.0.s8 %v398_v34 }
 0x1d7   : >> { %v2878_v36 = vpack.c.bf16 %v2078_v25, %v2062_v22  ;;  %v2574_v37 = vcvt.s32.f32 %v1550_v27  ;;  %v2590_v38 = vcvt.s32.f32 %v1566_v62  ;;  %v766_v39 = vunpack.c.1.s8 %v398_v34 }
 0x1d8   : >> { %4054 = vst [vmem:[#allocation2 + $0x18] sm:$0xff] %v4038_v30  ;;  %3673 = vmatpush.bf16.msrb.mxu0 %v2750_v32  ;;  %v3006_v0 = vpack.c.bf16 %v2334_v31, %v2318_v26  ;;  %v1774_v9 = vcvt.s32.f32 %v750_v33  ;;  %v1006_v10 = vunpack.c.0.s8 %v462_v2  ;;  %v1022_v40 = vunpack.c.1.s8 %v462_v2  ;;  %v366_v30 = vld [vmem:[%s4926_s10 + $0x48] sm:$0xff] }
 0x1d9   : >> { %3686 = vmatpush.bf16.msrb.mxu1 %v2878_v36  ;;  %v3134_v42 = vpack.c.bf16 %v2590_v38, %v2574_v37  ;;  %v1790_v15 = vcvt.s32.f32 %v766_v39  ;;  %v1262_v46 = vunpack.c.0.s8 %v526_v4  ;;  %v1278_v45 = vunpack.c.1.s8 %v526_v4 }
 0x1da   : >> { %3699 = vmatpush.bf16.msrb.mxu2 %v3006_v0  ;;  %v2030_v47 = vcvt.s32.f32 %v1006_v10  ;;  %v2046_v50 = vcvt.s32.f32 %v1022_v40  ;;  %v1518_v51 = vunpack.c.0.s8 %v590_v14  ;;  %v1534_v52 = vunpack.c.1.s8 %v590_v14  ;;  %v5193_v14 = vpop.f32.mrf.mxu2 }
 0x1db   : >> { %3712 = vmatpush.bf16.msrb.mxu3 %v3134_v42  ;;  %v2734_v28 = vpack.c.bf16 %v1790_v15, %v1774_v9  ;;  %v2286_v29 = vcvt.s32.f32 %v1262_v46  ;;  %v2302_v53 = vcvt.s32.f32 %v1278_v45  ;;  %v718_v54 = vunpack.c.2.s8 %v382_v41  ;;  %v430_v9 = vld [vmem:[%s4926_s10 + $0x248] sm:$0xff] }
 0x1dc   : >> { %v2862_v34 = vpack.c.bf16 %v2046_v50, %v2030_v47  ;;  %v2542_v60 = vcvt.s32.f32 %v1518_v51  ;;  %v2558_v59 = vcvt.s32.f32 %v1534_v52  ;;  %v734_v61 = vunpack.c.3.s8 %v382_v41  ;;  %v494_v15 = vld [vmem:[%s4926_s10 + $0x448] sm:$0xff]  ;;  %v3422_v52 = vpop.f32.mrf.mxu0 }
 0x1dd   : >> { %3674 = vmatpush.bf16.msrb.mxu0 %v2734_v28  ;;  %v2990_v2 = vpack.c.bf16 %v2302_v53, %v2286_v29  ;;  %v1742_v3 = vcvt.s32.f32 %v718_v54  ;;  %v974_v35 = vunpack.c.2.s8 %v446_v16  ;;  %v990_v43 = vunpack.c.3.s8 %v446_v16  ;;  %v558_v51 = vld [vmem:[%s4926_s10 + $0x648] sm:$0xff] }
 0x1de   : >> { %3687 = vmatpush.bf16.msrb.mxu1 %v2862_v34  ;;  %v3118_v44 = vpack.c.bf16 %v2558_v59, %v2542_v60  ;;  %v1758_v4 = vcvt.s32.f32 %v734_v61  ;;  %v1230_v5 = vunpack.c.2.s8 %v510_v55  ;;  %v1246_v6 = vunpack.c.3.s8 %v510_v55  ;;  %v3461_v34 = vpop.f32.mrf.mxu3 }
 0x1df   : >> { %3700 = vmatpush.bf16.msrb.mxu2 %v2990_v2  ;;  %v1998_v48 = vcvt.s32.f32 %v974_v35  ;;  %v2014_v12 = vcvt.s32.f32 %v990_v43  ;;  %v1486_v11 = vunpack.c.2.s8 %v574_v1  ;;  %v1502_v13 = vunpack.c.3.s8 %v574_v1 }
 0x1e0   : >> { %3713 = vmatpush.bf16.msrb.mxu3 %v3118_v44  ;;  %v2718_v18 = vpack.c.bf16 %v1758_v4, %v1742_v3  ;;  %v2254_v19 = vcvt.s32.f32 %v1230_v5  ;;  %v2270_v21 = vcvt.s32.f32 %v1246_v6  ;;  %v686_v49 = vunpack.c.0.s8 %v382_v41 }
 0x1e1   : >> { %v2846_v56 = vpack.c.bf16 %v2014_v12, %v1998_v48  ;;  %v2510_v57 = vcvt.s32.f32 %v1486_v11  ;;  %v2526_v22 = vcvt.s32.f32 %v1502_v13  ;;  %v702_v23 = vunpack.c.1.s8 %v382_v41 }
 0x1e2   : >> { %3675 = vmatpush.bf16.msrb.mxu0 %v2718_v18  ;;  %v2974_v25 = vpack.c.bf16 %v2270_v21, %v2254_v19  ;;  %v1710_v26 = vcvt.s32.f32 %v686_v49  ;;  %v942_v27 = vunpack.c.0.s8 %v446_v16  ;;  %v958_v62 = vunpack.c.1.s8 %v446_v16  ;;  %v3435_v16 = vpop.f32.mrf.mxu1 }
 0x1e3   : >> { %3688 = vmatpush.bf16.msrb.mxu1 %v2846_v56  ;;  %v3102_v32 = vpack.c.bf16 %v2526_v22, %v2510_v57  ;;  %v1726_v31 = vcvt.s32.f32 %v702_v23  ;;  %v1198_v33 = vunpack.c.0.s8 %v510_v55  ;;  %v1214_v36 = vunpack.c.1.s8 %v510_v55  ;;  %v3448_v55 = vpop.f32.mrf.mxu2  ;;  %v415_v56 = vld [vmem:[%s4926_s10 + $0x1d0] sm:$0xff] }
 0x1e4   : >> { %3701 = vmatpush.bf16.msrb.mxu2 %v2974_v25  ;;  %v1966_v37 = vcvt.s32.f32 %v942_v27  ;;  %v1982_v38 = vcvt.s32.f32 %v958_v62  ;;  %v1454_v39 = vunpack.c.0.s8 %v574_v1  ;;  %v1470_v0 = vunpack.c.1.s8 %v574_v1 }
 0x1e5   : >> { %3714 = vmatpush.bf16.msrb.mxu3 %v3102_v32  ;;  %v2702_v10 = vpack.c.bf16 %v1726_v31, %v1710_v26  ;;  %v2222_v40 = vcvt.s32.f32 %v1198_v33  ;;  %v2238_v41 = vcvt.s32.f32 %v1214_v36  ;;  %v654_v42 = vunpack.c.2.s8 %v366_v30 }
 0x1e6   : >> { %v2830_v46 = vpack.c.bf16 %v1982_v38, %v1966_v37  ;;  %v2478_v45 = vcvt.s32.f32 %v1454_v39  ;;  %v2494_v47 = vcvt.s32.f32 %v1470_v0  ;;  %v670_v50 = vunpack.c.3.s8 %v366_v30  ;;  %v543_v38 = vld [vmem:[%s4926_s10 + $0x5d0] sm:$0xff] }
 0x1e7   : >> { %3676 = vmatpush.bf16.msrb.mxu0 %v2702_v10  ;;  %v2958_v28 = vpack.c.bf16 %v2238_v41, %v2222_v40  ;;  %v1678_v29 = vcvt.s32.f32 %v654_v42  ;;  %v910_v53 = vunpack.c.2.s8 %v430_v9  ;;  %v926_v54 = vunpack.c.3.s8 %v430_v9  ;;  %v607_v40 = vld [vmem:[%s4926_s10 + $0x7d0] sm:$0xff] }
 0x1e8   : >> { %3689 = vmatpush.bf16.msrb.mxu1 %v2830_v46  ;;  %v3086_v60 = vpack.c.bf16 %v2494_v47, %v2478_v45  ;;  %v1694_v59 = vcvt.s32.f32 %v670_v50  ;;  %v1166_v61 = vunpack.c.2.s8 %v494_v15  ;;  %v1182_v1 = vunpack.c.3.s8 %v494_v15 }
 0x1e9   : >> { %3702 = vmatpush.bf16.msrb.mxu2 %v2958_v28  ;;  %v1934_v2 = vcvt.s32.f32 %v910_v53  ;;  %v1950_v3 = vcvt.s32.f32 %v926_v54  ;;  %v1422_v35 = vunpack.c.2.s8 %v558_v51  ;;  %v1438_v43 = vunpack.c.3.s8 %v558_v51 }
 0x1ea   : >> { %3715 = vmatpush.bf16.msrb.mxu3 %v3086_v60  ;;  %v2686_v44 = vpack.c.bf16 %v1694_v59, %v1678_v29  ;;  %v2190_v4 = vcvt.s32.f32 %v1166_v61  ;;  %v2206_v5 = vcvt.s32.f32 %v1182_v1  ;;  %v622_v6 = vunpack.c.0.s8 %v366_v30 }
 0x1eb   : >> { %v2814_v48 = vpack.c.bf16 %v1950_v3, %v1934_v2  ;;  %v2446_v12 = vcvt.s32.f32 %v1422_v35  ;;  %v2462_v11 = vcvt.s32.f32 %v1438_v43  ;;  %v638_v13 = vunpack.c.1.s8 %v366_v30  ;;  %v479_v30 = vld [vmem:[%s4926_s10 + $0x3d0] sm:$0xff] }
 0x1ec   : >> { %3677 = vmatpush.bf16.msrb.mxu0 %v2686_v44  ;;  %v2942_v18 = vpack.c.bf16 %v2206_v5, %v2190_v4  ;;  %v1646_v19 = vcvt.s32.f32 %v622_v6  ;;  %v878_v21 = vunpack.c.0.s8 %v430_v9  ;;  %v894_v49 = vunpack.c.1.s8 %v430_v9 }
 0x1ed   : >> { %3690 = vmatpush.bf16.msrb.mxu1 %v2814_v48  ;;  %v3070_v57 = vpack.c.bf16 %v2462_v11, %v2446_v12  ;;  %v1662_v22 = vcvt.s32.f32 %v638_v13  ;;  %v1134_v23 = vunpack.c.0.s8 %v494_v15  ;;  %v1150_v25 = vunpack.c.1.s8 %v494_v15  ;;  %v399_v48 = vld [vmem:[%s4926_s10 + $0x150] sm:$0xff] }
 0x1ee   : >> { %3703 = vmatpush.bf16.msrb.mxu2 %v2942_v18  ;;  %v1902_v26 = vcvt.s32.f32 %v878_v21  ;;  %v1918_v27 = vcvt.s32.f32 %v894_v49  ;;  %v1390_v62 = vunpack.c.0.s8 %v558_v51  ;;  %v1406_v32 = vunpack.c.1.s8 %v558_v51 }
 0x1ef   : >> { %3716 = vmatpush.bf16.msrb.mxu3 %v3070_v57  ;;  %v2670_v31 = vpack.c.bf16 %v1662_v22, %v1646_v19  ;;  %v2158_v33 = vcvt.s32.f32 %v1134_v23  ;;  %v2174_v36 = vcvt.s32.f32 %v1150_v25  ;;  %v847_v37 = vunpack.c.2.s8 %v415_v56  ;;  %v463_v19 = vld [vmem:[%s4926_s10 + $0x350] sm:$0xff] }
 0x1f0   : >> { %v2798_v39 = vpack.c.bf16 %v1918_v27, %v1902_v26  ;;  %v2414_v0 = vcvt.s32.f32 %v1390_v62  ;;  %v2430_v9 = vcvt.s32.f32 %v1406_v32  ;;  %v863_v10 = vunpack.c.3.s8 %v415_v56  ;;  %v527_v22 = vld [vmem:[%s4926_s10 + $0x550] sm:$0xff] }
 0x1f1   : >> { %3678 = vmatpush.bf16.msrb.mxu0 %v2670_v31  ;;  %v2926_v41 = vpack.c.bf16 %v2174_v36, %v2158_v33  ;;  %v1871_v42 = vcvt.s32.f32 %v847_v37  ;;  %v1103_v15 = vunpack.c.2.s8 %v479_v30  ;;  %v1119_v46 = vunpack.c.3.s8 %v479_v30  ;;  %v591_v33 = vld [vmem:[%s4926_s10 + $0x750] sm:$0xff] }
 0x1f2   : >> { %3691 = vmatpush.bf16.msrb.mxu1 %v2798_v39  ;;  %v3054_v45 = vpack.c.bf16 %v2430_v9, %v2414_v0  ;;  %v1887_v47 = vcvt.s32.f32 %v863_v10  ;;  %v1359_v50 = vunpack.c.2.s8 %v543_v38  ;;  %v1375_v51 = vunpack.c.3.s8 %v543_v38  ;;  %v3177_v37 = vld [vmem:[#allocation2 + $0x50] sm:$0xff] }
 0x1f3   : >> { %3704 = vmatpush.bf16.msrb.mxu2 %v2926_v41  ;;  %v2127_v52 = vcvt.s32.f32 %v1103_v15  ;;  %v2143_v16 = vcvt.s32.f32 %v1119_v46  ;;  %v1615_v28 = vunpack.c.2.s8 %v607_v40  ;;  %v1631_v29 = vunpack.c.3.s8 %v607_v40 }
 0x1f4   : >> { %3717 = vmatpush.bf16.msrb.mxu3 %v3054_v45  ;;  %v2783_v53 = vpack.c.bf16 %v1887_v47, %v1871_v42  ;;  %v2383_v54 = vcvt.s32.f32 %v1359_v50  ;;  %v2399_v55 = vcvt.s32.f32 %v1375_v51  ;;  %v815_v34 = vunpack.c.0.s8 %v415_v56  ;;  %3679 = vmatmul.bf16.vlgmr.msrb.gmra.mxu0 %v4979_v20 }
 0x1f5   : >> { %v2911_v60 = vpack.c.bf16 %v2143_v16, %v2127_v52  ;;  %v2639_v59 = vcvt.s32.f32 %v1615_v28  ;;  %v2655_v61 = vcvt.s32.f32 %v1631_v29  ;;  %v831_v1 = vunpack.c.1.s8 %v415_v56  ;;  %3692 = vmatmul.bf16.vlgmr.msrb.gmra.mxu1 %v4981_v24 }
 0x1f6   : >> { %3723 = vmatpush.bf16.msra.mxu0 %v2783_v53  ;;  %v3039_v2 = vpack.c.bf16 %v2399_v55, %v2383_v54  ;;  %v1839_v3 = vcvt.s32.f32 %v815_v34  ;;  %v1071_v35 = vunpack.c.0.s8 %v479_v30  ;;  %v1087_v43 = vunpack.c.1.s8 %v479_v30  ;;  %3705 = vmatmul.bf16.vlgmr.msrb.gmra.mxu2 %v4971_v58  ;;  %v383_v54 = vld [vmem:[%s4926_s10 + $0xd0] sm:$0xff] }
 0x1f7   : >> { %3736 = vmatpush.bf16.msra.mxu1 %v2911_v60  ;;  %v3167_v44 = vpack.c.bf16 %v2655_v61, %v2639_v59  ;;  %v1855_v4 = vcvt.s32.f32 %v831_v1  ;;  %v1327_v5 = vunpack.c.0.s8 %v543_v38  ;;  %v1343_v6 = vunpack.c.1.s8 %v543_v38  ;;  %3718 = vmatmul.bf16.vlgmr.msrb.gmra.mxu3 %v4974_v63 }
 0x1f8   : >> { %3749 = vmatpush.bf16.msra.mxu2 %v3039_v2  ;;  %v2095_v12 = vcvt.s32.f32 %v1071_v35  ;;  %v2111_v11 = vcvt.s32.f32 %v1087_v43  ;;  %v1583_v13 = vunpack.c.0.s8 %v607_v40  ;;  %v1599_v18 = vunpack.c.1.s8 %v607_v40  ;;  %v447_v35 = vld [vmem:[%s4926_s10 + $0x2d0] sm:$0xff] }
 0x1f9   : >> { %3762 = vmatpush.bf16.msra.mxu3 %v3167_v44  ;;  %v2767_v21 = vpack.c.bf16 %v1855_v4, %v1839_v3  ;;  %v2351_v49 = vcvt.s32.f32 %v1327_v5  ;;  %v2367_v56 = vcvt.s32.f32 %v1343_v6  ;;  %v3434_v57 = vadd.f32 %v5191_v8, %v5189_v7  ;;  %v511_v6 = vld [vmem:[%s4926_s10 + $0x4d0] sm:$0xff] }
 0x1fa   : >> { %v2895_v23 = vpack.c.bf16 %v2111_v11, %v2095_v12  ;;  %v2607_v25 = vcvt.s32.f32 %v1583_v13  ;;  %v2623_v26 = vcvt.s32.f32 %v1599_v18  ;;  %v783_v27 = vunpack.c.2.s8 %v399_v48  ;;  %v575_v18 = vld [vmem:[%s4926_s10 + $0x6d0] sm:$0xff] }
 0x1fb   : >> { %3724 = vmatpush.bf16.msra.mxu0 %v2767_v21  ;;  %v3023_v62 = vpack.c.bf16 %v2367_v56, %v2351_v49  ;;  %v3447_v32 = vadd.f32 %v5193_v14, %v3434_v57  ;;  %v799_v30 = vunpack.c.3.s8 %v399_v48  ;;  %v1039_v31 = vunpack.c.2.s8 %v463_v19 }
 0x1fc   : >> { %3737 = vmatpush.bf16.msra.mxu1 %v2895_v23  ;;  %v3151_v36 = vpack.c.bf16 %v2623_v26, %v2607_v25  ;;  %v1807_v38 = vcvt.s32.f32 %v783_v27  ;;  %v1055_v39 = vunpack.c.3.s8 %v463_v19  ;;  %v1295_v0 = vunpack.c.2.s8 %v527_v22  ;;  %v5221_v26 = vpop.f32.mrf.mxu0  ;;  %v5223_v27 = vpop.f32.mrf.mxu1 }
 0x1fd   : >> { %3750 = vmatpush.bf16.msra.mxu2 %v3023_v62  ;;  %v3460_v7 = vadd.f32 %v5195_v17, %v3447_v32  ;;  %v1823_v8 = vcvt.s32.f32 %v799_v30  ;;  %v2063_v9 = vcvt.s32.f32 %v1039_v31  ;;  %v1311_v10 = vunpack.c.3.s8 %v527_v22 }
 0x1fe   : >> { %3763 = vmatpush.bf16.msra.mxu3 %v3151_v36  ;;  %v2079_v40 = vcvt.s32.f32 %v1055_v39  ;;  %v2319_v41 = vcvt.s32.f32 %v1295_v0  ;;  %v1551_v42 = vunpack.c.2.s8 %v591_v33  ;;  %v1567_v14 = vunpack.c.3.s8 %v591_v33  ;;  %v5227_v36 = vpop.f32.mrf.mxu3 }
 0x1ff   : >> { %v4039_v15 = vadd.f32 %v3460_v7, %v3177_v37  ;;  %v2751_v46 = vpack.c.bf16 %v1823_v8, %v1807_v38  ;;  %v2335_v45 = vcvt.s32.f32 %v1311_v10  ;;  %v751_v47 = vunpack.c.0.s8 %v399_v48 }
 0x200   : >> { %v2879_v50 = vpack.c.bf16 %v2079_v40, %v2063_v9  ;;  %v2575_v51 = vcvt.s32.f32 %v1551_v42  ;;  %v2591_v52 = vcvt.s32.f32 %v1567_v14  ;;  %v767_v16 = vunpack.c.1.s8 %v399_v48 }
 0x201   : >> { %4055 = vst [vmem:[#allocation2 + $0x50] sm:$0xff] %v4039_v15  ;;  %3725 = vmatpush.bf16.msra.mxu0 %v2751_v46  ;;  %v3007_v17 = vpack.c.bf16 %v2335_v45, %v2319_v41  ;;  %v1775_v28 = vcvt.s32.f32 %v751_v47  ;;  %v1007_v29 = vunpack.c.0.s8 %v463_v19  ;;  %v1023_v53 = vunpack.c.1.s8 %v463_v19  ;;  %v367_v15 = vld [vmem:[%s4926_s10 + $0x50] sm:$0xff] }
 0x202   : >> { %3738 = vmatpush.bf16.msra.mxu1 %v2879_v50  ;;  %v3135_v55 = vpack.c.bf16 %v2591_v52, %v2575_v51  ;;  %v1791_v34 = vcvt.s32.f32 %v767_v16  ;;  %v1263_v60 = vunpack.c.0.s8 %v527_v22  ;;  %v1279_v59 = vunpack.c.1.s8 %v527_v22 }
 0x203   : >> { %3751 = vmatpush.bf16.msra.mxu2 %v3007_v17  ;;  %v2031_v61 = vcvt.s32.f32 %v1007_v29  ;;  %v2047_v1 = vcvt.s32.f32 %v1023_v53  ;;  %v1519_v2 = vunpack.c.0.s8 %v591_v33  ;;  %v1535_v3 = vunpack.c.1.s8 %v591_v33  ;;  %v5225_v33 = vpop.f32.mrf.mxu2 }
 0x204   : >> { %3764 = vmatpush.bf16.msra.mxu3 %v3135_v55  ;;  %v2735_v43 = vpack.c.bf16 %v1791_v34, %v1775_v28  ;;  %v2287_v44 = vcvt.s32.f32 %v1263_v60  ;;  %v2303_v4 = vcvt.s32.f32 %v1279_v59  ;;  %v719_v5 = vunpack.c.2.s8 %v383_v54  ;;  %v431_v28 = vld [vmem:[%s4926_s10 + $0x250] sm:$0xff] }
 0x205   : >> { %v2863_v48 = vpack.c.bf16 %v2047_v1, %v2031_v61  ;;  %v2543_v12 = vcvt.s32.f32 %v1519_v2  ;;  %v2559_v11 = vcvt.s32.f32 %v1535_v3  ;;  %v735_v13 = vunpack.c.3.s8 %v383_v54  ;;  %v495_v34 = vld [vmem:[%s4926_s10 + $0x450] sm:$0xff]  ;;  %v3474_v3 = vpop.f32.mrf.mxu0 }
 0x206   : >> { %3726 = vmatpush.bf16.msra.mxu0 %v2735_v43  ;;  %v2991_v19 = vpack.c.bf16 %v2303_v4, %v2287_v44  ;;  %v1743_v21 = vcvt.s32.f32 %v719_v5  ;;  %v975_v49 = vunpack.c.2.s8 %v447_v35  ;;  %v991_v56 = vunpack.c.3.s8 %v447_v35  ;;  %v559_v2 = vld [vmem:[%s4926_s10 + $0x650] sm:$0xff] }
 0x207   : >> { %3739 = vmatpush.bf16.msra.mxu1 %v2863_v48  ;;  %v3119_v57 = vpack.c.bf16 %v2559_v11, %v2543_v12  ;;  %v1759_v22 = vcvt.s32.f32 %v735_v13  ;;  %v1231_v23 = vunpack.c.2.s8 %v511_v6  ;;  %v1247_v25 = vunpack.c.3.s8 %v511_v6  ;;  %v3513_v48 = vpop.f32.mrf.mxu3 }
 0x208   : >> { %3752 = vmatpush.bf16.msra.mxu2 %v2991_v19  ;;  %v1999_v62 = vcvt.s32.f32 %v975_v49  ;;  %v2015_v32 = vcvt.s32.f32 %v991_v56  ;;  %v1487_v30 = vunpack.c.2.s8 %v575_v18  ;;  %v1503_v31 = vunpack.c.3.s8 %v575_v18 }
 0x209   : >> { %3765 = vmatpush.bf16.msra.mxu3 %v3119_v57  ;;  %v2719_v37 = vpack.c.bf16 %v1759_v22, %v1743_v21  ;;  %v2255_v38 = vcvt.s32.f32 %v1231_v23  ;;  %v2271_v39 = vcvt.s32.f32 %v1247_v25  ;;  %v687_v0 = vunpack.c.0.s8 %v383_v54 }
 0x20a   : >> { %v2847_v7 = vpack.c.bf16 %v2015_v32, %v1999_v62  ;;  %v2511_v8 = vcvt.s32.f32 %v1487_v30  ;;  %v2527_v9 = vcvt.s32.f32 %v1503_v31  ;;  %v703_v10 = vunpack.c.1.s8 %v383_v54 }
 0x20b   : >> { %3727 = vmatpush.bf16.msra.mxu0 %v2719_v37  ;;  %v2975_v40 = vpack.c.bf16 %v2271_v39, %v2255_v38  ;;  %v1711_v41 = vcvt.s32.f32 %v687_v0  ;;  %v943_v42 = vunpack.c.0.s8 %v447_v35  ;;  %v959_v14 = vunpack.c.1.s8 %v447_v35  ;;  %v3487_v35 = vpop.f32.mrf.mxu1 }
 0x20c   : >> { %3740 = vmatpush.bf16.msra.mxu1 %v2847_v7  ;;  %v3103_v46 = vpack.c.bf16 %v2527_v9, %v2511_v8  ;;  %v1727_v45 = vcvt.s32.f32 %v703_v10  ;;  %v1199_v47 = vunpack.c.0.s8 %v511_v6  ;;  %v1215_v50 = vunpack.c.1.s8 %v511_v6  ;;  %v3500_v6 = vpop.f32.mrf.mxu2  ;;  %v416_v7 = vld [vmem:[%s4926_s10 + $0x1d8] sm:$0xff] }
 0x20d   : >> { %3753 = vmatpush.bf16.msra.mxu2 %v2975_v40  ;;  %v1967_v51 = vcvt.s32.f32 %v943_v42  ;;  %v1983_v52 = vcvt.s32.f32 %v959_v14  ;;  %v1455_v16 = vunpack.c.0.s8 %v575_v18  ;;  %v1471_v17 = vunpack.c.1.s8 %v575_v18 }
 0x20e   : >> { %3766 = vmatpush.bf16.msra.mxu3 %v3103_v46  ;;  %v2703_v29 = vpack.c.bf16 %v1727_v45, %v1711_v41  ;;  %v2223_v53 = vcvt.s32.f32 %v1199_v47  ;;  %v2239_v54 = vcvt.s32.f32 %v1215_v50  ;;  %v655_v55 = vunpack.c.2.s8 %v367_v15 }
 0x20f   : >> { %v2831_v60 = vpack.c.bf16 %v1983_v52, %v1967_v51  ;;  %v2479_v59 = vcvt.s32.f32 %v1455_v16  ;;  %v2495_v61 = vcvt.s32.f32 %v1471_v17  ;;  %v671_v1 = vunpack.c.3.s8 %v367_v15  ;;  %v544_v52 = vld [vmem:[%s4926_s10 + $0x5d8] sm:$0xff] }
 0x210   : >> { %3728 = vmatpush.bf16.msra.mxu0 %v2703_v29  ;;  %v2959_v43 = vpack.c.bf16 %v2239_v54, %v2223_v53  ;;  %v1679_v44 = vcvt.s32.f32 %v655_v55  ;;  %v911_v4 = vunpack.c.2.s8 %v431_v28  ;;  %v927_v5 = vunpack.c.3.s8 %v431_v28  ;;  %v608_v53 = vld [vmem:[%s4926_s10 + $0x7d8] sm:$0xff] }
 0x211   : >> { %3741 = vmatpush.bf16.msra.mxu1 %v2831_v60  ;;  %v3087_v12 = vpack.c.bf16 %v2495_v61, %v2479_v59  ;;  %v1695_v11 = vcvt.s32.f32 %v671_v1  ;;  %v1167_v13 = vunpack.c.2.s8 %v495_v34  ;;  %v1183_v18 = vunpack.c.3.s8 %v495_v34 }
 0x212   : >> { %3754 = vmatpush.bf16.msra.mxu2 %v2959_v43  ;;  %v1935_v19 = vcvt.s32.f32 %v911_v4  ;;  %v1951_v21 = vcvt.s32.f32 %v927_v5  ;;  %v1423_v49 = vunpack.c.2.s8 %v559_v2  ;;  %v1439_v56 = vunpack.c.3.s8 %v559_v2 }
 0x213   : >> { %3767 = vmatpush.bf16.msra.mxu3 %v3087_v12  ;;  %v2687_v57 = vpack.c.bf16 %v1695_v11, %v1679_v44  ;;  %v2191_v22 = vcvt.s32.f32 %v1167_v13  ;;  %v2207_v23 = vcvt.s32.f32 %v1183_v18  ;;  %v623_v25 = vunpack.c.0.s8 %v367_v15 }
 0x214   : >> { %v2815_v62 = vpack.c.bf16 %v1951_v21, %v1935_v19  ;;  %v2447_v32 = vcvt.s32.f32 %v1423_v49  ;;  %v2463_v30 = vcvt.s32.f32 %v1439_v56  ;;  %v639_v31 = vunpack.c.1.s8 %v367_v15  ;;  %v480_v15 = vld [vmem:[%s4926_s10 + $0x3d8] sm:$0xff] }
 0x215   : >> { %3729 = vmatpush.bf16.msra.mxu0 %v2687_v57  ;;  %v2943_v37 = vpack.c.bf16 %v2207_v23, %v2191_v22  ;;  %v1647_v38 = vcvt.s32.f32 %v623_v25  ;;  %v879_v39 = vunpack.c.0.s8 %v431_v28  ;;  %v895_v0 = vunpack.c.1.s8 %v431_v28 }
 0x216   : >> { %3742 = vmatpush.bf16.msra.mxu1 %v2815_v62  ;;  %v3071_v8 = vpack.c.bf16 %v2463_v30, %v2447_v32  ;;  %v1663_v9 = vcvt.s32.f32 %v639_v31  ;;  %v1135_v10 = vunpack.c.0.s8 %v495_v34  ;;  %v1151_v40 = vunpack.c.1.s8 %v495_v34  ;;  %v400_v62 = vld [vmem:[%s4926_s10 + $0x158] sm:$0xff] }
 0x217   : >> { %3755 = vmatpush.bf16.msra.mxu2 %v2943_v37  ;;  %v1903_v41 = vcvt.s32.f32 %v879_v39  ;;  %v1919_v42 = vcvt.s32.f32 %v895_v0  ;;  %v1391_v14 = vunpack.c.0.s8 %v559_v2  ;;  %v1407_v46 = vunpack.c.1.s8 %v559_v2 }
 0x218   : >> { %3768 = vmatpush.bf16.msra.mxu3 %v3071_v8  ;;  %v2671_v45 = vpack.c.bf16 %v1663_v9, %v1647_v38  ;;  %v2159_v47 = vcvt.s32.f32 %v1135_v10  ;;  %v2175_v50 = vcvt.s32.f32 %v1151_v40  ;;  %v848_v51 = vunpack.c.2.s8 %v416_v7  ;;  %v464_v38 = vld [vmem:[%s4926_s10 + $0x358] sm:$0xff] }
 0x219   : >> { %v2799_v16 = vpack.c.bf16 %v1919_v42, %v1903_v41  ;;  %v2415_v17 = vcvt.s32.f32 %v1391_v14  ;;  %v2431_v28 = vcvt.s32.f32 %v1407_v46  ;;  %v864_v29 = vunpack.c.3.s8 %v416_v7  ;;  %v528_v9 = vld [vmem:[%s4926_s10 + $0x558] sm:$0xff] }
 0x21a   : >> { %3730 = vmatpush.bf16.msra.mxu0 %v2671_v45  ;;  %v2927_v54 = vpack.c.bf16 %v2175_v50, %v2159_v47  ;;  %v1872_v55 = vcvt.s32.f32 %v848_v51  ;;  %v1104_v34 = vunpack.c.2.s8 %v480_v15  ;;  %v1120_v60 = vunpack.c.3.s8 %v480_v15  ;;  %v592_v47 = vld [vmem:[%s4926_s10 + $0x758] sm:$0xff]  ;;  %v3178_v51 = vld [vmem:[#allocation2 + $0x68] sm:$0xff] }
 0x21b   : >> { %3743 = vmatpush.bf16.msra.mxu1 %v2799_v16  ;;  %v3055_v59 = vpack.c.bf16 %v2431_v28, %v2415_v17  ;;  %v1888_v61 = vcvt.s32.f32 %v864_v29  ;;  %v1360_v1 = vunpack.c.2.s8 %v544_v52  ;;  %v1376_v2 = vunpack.c.3.s8 %v544_v52 }
 0x21c   : >> { %3756 = vmatpush.bf16.msra.mxu2 %v2927_v54  ;;  %v2128_v3 = vcvt.s32.f32 %v1104_v34  ;;  %v2144_v35 = vcvt.s32.f32 %v1120_v60  ;;  %v1616_v43 = vunpack.c.2.s8 %v608_v53  ;;  %v1632_v44 = vunpack.c.3.s8 %v608_v53 }
 0x21d   : >> { %3769 = vmatpush.bf16.msra.mxu3 %v3055_v59  ;;  %v2784_v4 = vpack.c.bf16 %v1888_v61, %v1872_v55  ;;  %v2384_v5 = vcvt.s32.f32 %v1360_v1  ;;  %v2400_v6 = vcvt.s32.f32 %v1376_v2  ;;  %v816_v48 = vunpack.c.0.s8 %v416_v7  ;;  %3731 = vmatmul.bf16.vlgmr.msra.gmra.mxu0 %v4979_v20 }
 0x21e   : >> { %v2912_v12 = vpack.c.bf16 %v2144_v35, %v2128_v3  ;;  %v2640_v11 = vcvt.s32.f32 %v1616_v43  ;;  %v2656_v13 = vcvt.s32.f32 %v1632_v44  ;;  %v832_v18 = vunpack.c.1.s8 %v416_v7  ;;  %3744 = vmatmul.bf16.vlgmr.msra.gmra.mxu1 %v4981_v24 }
 0x21f   : >> { %3775 = vmatpush.bf16.msrb.mxu0 %v2784_v4  ;;  %v3040_v19 = vpack.c.bf16 %v2400_v6, %v2384_v5  ;;  %v1840_v21 = vcvt.s32.f32 %v816_v48  ;;  %v1072_v49 = vunpack.c.0.s8 %v480_v15  ;;  %v1088_v56 = vunpack.c.1.s8 %v480_v15  ;;  %3757 = vmatmul.bf16.vlgmr.msra.gmra.mxu2 %v4971_v58  ;;  %v384_v5 = vld [vmem:[%s4926_s10 + $0xd8] sm:$0xff] }
 0x220   : >> { %3788 = vmatpush.bf16.msrb.mxu1 %v2912_v12  ;;  %v3168_v57 = vpack.c.bf16 %v2656_v13, %v2640_v11  ;;  %v1856_v22 = vcvt.s32.f32 %v832_v18  ;;  %v1328_v23 = vunpack.c.0.s8 %v544_v52  ;;  %v1344_v25 = vunpack.c.1.s8 %v544_v52  ;;  %3770 = vmatmul.bf16.vlgmr.msra.gmra.mxu3 %v4974_v63 }
 0x221   : >> { %3801 = vmatpush.bf16.msrb.mxu2 %v3040_v19  ;;  %v2096_v32 = vcvt.s32.f32 %v1072_v49  ;;  %v2112_v30 = vcvt.s32.f32 %v1088_v56  ;;  %v1584_v31 = vunpack.c.0.s8 %v608_v53  ;;  %v1600_v37 = vunpack.c.1.s8 %v608_v53  ;;  %v448_v49 = vld [vmem:[%s4926_s10 + $0x2d8] sm:$0xff] }
 0x222   : >> { %3814 = vmatpush.bf16.msrb.mxu3 %v3168_v57  ;;  %v2768_v39 = vpack.c.bf16 %v1856_v22, %v1840_v21  ;;  %v2352_v0 = vcvt.s32.f32 %v1328_v23  ;;  %v2368_v7 = vcvt.s32.f32 %v1344_v25  ;;  %v3486_v8 = vadd.f32 %v5223_v27, %v5221_v26  ;;  %v512_v25 = vld [vmem:[%s4926_s10 + $0x4d8] sm:$0xff] }
 0x223   : >> { %v2896_v10 = vpack.c.bf16 %v2112_v30, %v2096_v32  ;;  %v2608_v40 = vcvt.s32.f32 %v1584_v31  ;;  %v2624_v41 = vcvt.s32.f32 %v1600_v37  ;;  %v784_v42 = vunpack.c.2.s8 %v400_v62  ;;  %v576_v37 = vld [vmem:[%s4926_s10 + $0x6d8] sm:$0xff] }
 0x224   : >> { %3776 = vmatpush.bf16.msrb.mxu0 %v2768_v39  ;;  %v3024_v14 = vpack.c.bf16 %v2368_v7, %v2352_v0  ;;  %v3499_v46 = vadd.f32 %v5225_v33, %v3486_v8  ;;  %v800_v15 = vunpack.c.3.s8 %v400_v62  ;;  %v1040_v45 = vunpack.c.2.s8 %v464_v38 }
 0x225   : >> { %3789 = vmatpush.bf16.msrb.mxu1 %v2896_v10  ;;  %v3152_v50 = vpack.c.bf16 %v2624_v41, %v2608_v40  ;;  %v1808_v52 = vcvt.s32.f32 %v784_v42  ;;  %v1056_v16 = vunpack.c.3.s8 %v464_v38  ;;  %v1296_v17 = vunpack.c.2.s8 %v528_v9  ;;  %v5253_v41 = vpop.f32.mrf.mxu0  ;;  %v5255_v42 = vpop.f32.mrf.mxu1 }
 0x226   : >> { %3802 = vmatpush.bf16.msrb.mxu2 %v3024_v14  ;;  %v3512_v26 = vadd.f32 %v5227_v36, %v3499_v46  ;;  %v1824_v27 = vcvt.s32.f32 %v800_v15  ;;  %v2064_v28 = vcvt.s32.f32 %v1040_v45  ;;  %v1312_v29 = vunpack.c.3.s8 %v528_v9 }
 0x227   : >> { %3815 = vmatpush.bf16.msrb.mxu3 %v3152_v50  ;;  %v2080_v53 = vcvt.s32.f32 %v1056_v16  ;;  %v2320_v54 = vcvt.s32.f32 %v1296_v17  ;;  %v1552_v55 = vunpack.c.2.s8 %v592_v47  ;;  %v1568_v33 = vunpack.c.3.s8 %v592_v47  ;;  %v5259_v50 = vpop.f32.mrf.mxu3 }
 0x228   : >> { %v4040_v34 = vadd.f32 %v3512_v26, %v3178_v51  ;;  %v2752_v60 = vpack.c.bf16 %v1824_v27, %v1808_v52  ;;  %v2336_v59 = vcvt.s32.f32 %v1312_v29  ;;  %v752_v61 = vunpack.c.0.s8 %v400_v62 }
 0x229   : >> { %v2880_v1 = vpack.c.bf16 %v2080_v53, %v2064_v28  ;;  %v2576_v2 = vcvt.s32.f32 %v1552_v55  ;;  %v2592_v3 = vcvt.s32.f32 %v1568_v33  ;;  %v768_v35 = vunpack.c.1.s8 %v400_v62 }
 0x22a   : >> { %4056 = vst [vmem:[#allocation2 + $0x68] sm:$0xff] %v4040_v34  ;;  %3777 = vmatpush.bf16.msrb.mxu0 %v2752_v60  ;;  %v3008_v36 = vpack.c.bf16 %v2336_v59, %v2320_v54  ;;  %v1776_v43 = vcvt.s32.f32 %v752_v61  ;;  %v1008_v44 = vunpack.c.0.s8 %v464_v38  ;;  %v1024_v4 = vunpack.c.1.s8 %v464_v38  ;;  %v368_v34 = vld [vmem:[%s4926_s10 + $0x58] sm:$0xff] }
 0x22b   : >> { %3790 = vmatpush.bf16.msrb.mxu1 %v2880_v1  ;;  %v3136_v6 = vpack.c.bf16 %v2592_v3, %v2576_v2  ;;  %v1792_v48 = vcvt.s32.f32 %v768_v35  ;;  %v1264_v12 = vunpack.c.0.s8 %v528_v9  ;;  %v1280_v11 = vunpack.c.1.s8 %v528_v9 }
 0x22c   : >> { %3803 = vmatpush.bf16.msrb.mxu2 %v3008_v36  ;;  %v2032_v13 = vcvt.s32.f32 %v1008_v44  ;;  %v2048_v18 = vcvt.s32.f32 %v1024_v4  ;;  %v1520_v19 = vunpack.c.0.s8 %v592_v47  ;;  %v1536_v21 = vunpack.c.1.s8 %v592_v47  ;;  %v5257_v47 = vpop.f32.mrf.mxu2 }
 0x22d   : >> { %3816 = vmatpush.bf16.msrb.mxu3 %v3136_v6  ;;  %v2736_v56 = vpack.c.bf16 %v1792_v48, %v1776_v43  ;;  %v2288_v57 = vcvt.s32.f32 %v1264_v12  ;;  %v2304_v22 = vcvt.s32.f32 %v1280_v11  ;;  %v720_v23 = vunpack.c.2.s8 %v384_v5  ;;  %v432_v43 = vld [vmem:[%s4926_s10 + $0x258] sm:$0xff] }
 0x22e   : >> { %v2864_v62 = vpack.c.bf16 %v2048_v18, %v2032_v13  ;;  %v2544_v32 = vcvt.s32.f32 %v1520_v19  ;;  %v2560_v30 = vcvt.s32.f32 %v1536_v21  ;;  %v736_v31 = vunpack.c.3.s8 %v384_v5  ;;  %v496_v48 = vld [vmem:[%s4926_s10 + $0x458] sm:$0xff]  ;;  %v3526_v21 = vpop.f32.mrf.mxu0 }
 0x22f   : >> { %3778 = vmatpush.bf16.msrb.mxu0 %v2736_v56  ;;  %v2992_v38 = vpack.c.bf16 %v2304_v22, %v2288_v57  ;;  %v1744_v39 = vcvt.s32.f32 %v720_v23  ;;  %v976_v0 = vunpack.c.2.s8 %v448_v49  ;;  %v992_v7 = vunpack.c.3.s8 %v448_v49  ;;  %v560_v19 = vld [vmem:[%s4926_s10 + $0x658] sm:$0xff] }
 0x230   : >> { %3791 = vmatpush.bf16.msrb.mxu1 %v2864_v62  ;;  %v3120_v8 = vpack.c.bf16 %v2560_v30, %v2544_v32  ;;  %v1760_v9 = vcvt.s32.f32 %v736_v31  ;;  %v1232_v10 = vunpack.c.2.s8 %v512_v25  ;;  %v1248_v40 = vunpack.c.3.s8 %v512_v25  ;;  %v3565_v62 = vpop.f32.mrf.mxu3 }
 0x231   : >> { %3804 = vmatpush.bf16.msrb.mxu2 %v2992_v38  ;;  %v2000_v14 = vcvt.s32.f32 %v976_v0  ;;  %v2016_v46 = vcvt.s32.f32 %v992_v7  ;;  %v1488_v15 = vunpack.c.2.s8 %v576_v37  ;;  %v1504_v45 = vunpack.c.3.s8 %v576_v37 }
 0x232   : >> { %3817 = vmatpush.bf16.msrb.mxu3 %v3120_v8  ;;  %v2720_v51 = vpack.c.bf16 %v1760_v9, %v1744_v39  ;;  %v2256_v52 = vcvt.s32.f32 %v1232_v10  ;;  %v2272_v16 = vcvt.s32.f32 %v1248_v40  ;;  %v688_v17 = vunpack.c.0.s8 %v384_v5 }
 0x233   : >> { %v2848_v26 = vpack.c.bf16 %v2016_v46, %v2000_v14  ;;  %v2512_v27 = vcvt.s32.f32 %v1488_v15  ;;  %v2528_v28 = vcvt.s32.f32 %v1504_v45  ;;  %v704_v29 = vunpack.c.1.s8 %v384_v5 }
 0x234   : >> { %3779 = vmatpush.bf16.msrb.mxu0 %v2720_v51  ;;  %v2976_v53 = vpack.c.bf16 %v2272_v16, %v2256_v52  ;;  %v1712_v54 = vcvt.s32.f32 %v688_v17  ;;  %v944_v55 = vunpack.c.0.s8 %v448_v49  ;;  %v960_v33 = vunpack.c.1.s8 %v448_v49  ;;  %v3539_v49 = vpop.f32.mrf.mxu1 }
 0x235   : >> { %3792 = vmatpush.bf16.msrb.mxu1 %v2848_v26  ;;  %v3104_v60 = vpack.c.bf16 %v2528_v28, %v2512_v27  ;;  %v1728_v59 = vcvt.s32.f32 %v704_v29  ;;  %v1200_v61 = vunpack.c.0.s8 %v512_v25  ;;  %v1216_v1 = vunpack.c.1.s8 %v512_v25  ;;  %v3552_v25 = vpop.f32.mrf.mxu2  ;;  %v417_v26 = vld [vmem:[%s4926_s10 + $0x1e0] sm:$0xff] }
 0x236   : >> { %3805 = vmatpush.bf16.msrb.mxu2 %v2976_v53  ;;  %v1968_v2 = vcvt.s32.f32 %v944_v55  ;;  %v1984_v3 = vcvt.s32.f32 %v960_v33  ;;  %v1456_v35 = vunpack.c.0.s8 %v576_v37  ;;  %v1472_v36 = vunpack.c.1.s8 %v576_v37 }
 0x237   : >> { %3818 = vmatpush.bf16.msrb.mxu3 %v3104_v60  ;;  %v2704_v44 = vpack.c.bf16 %v1728_v59, %v1712_v54  ;;  %v2224_v4 = vcvt.s32.f32 %v1200_v61  ;;  %v2240_v5 = vcvt.s32.f32 %v1216_v1  ;;  %v656_v6 = vunpack.c.2.s8 %v368_v34 }
 0x238   : >> { %v2832_v12 = vpack.c.bf16 %v1984_v3, %v1968_v2  ;;  %v2480_v11 = vcvt.s32.f32 %v1456_v35  ;;  %v2496_v13 = vcvt.s32.f32 %v1472_v36  ;;  %v672_v18 = vunpack.c.3.s8 %v368_v34  ;;  %v545_v3 = vld [vmem:[%s4926_s10 + $0x5e0] sm:$0xff] }
 0x239   : >> { %3780 = vmatpush.bf16.msrb.mxu0 %v2704_v44  ;;  %v2960_v56 = vpack.c.bf16 %v2240_v5, %v2224_v4  ;;  %v1680_v57 = vcvt.s32.f32 %v656_v6  ;;  %v912_v22 = vunpack.c.2.s8 %v432_v43  ;;  %v928_v23 = vunpack.c.3.s8 %v432_v43  ;;  %v609_v4 = vld [vmem:[%s4926_s10 + $0x7e0] sm:$0xff] }
 0x23a   : >> { %3793 = vmatpush.bf16.msrb.mxu1 %v2832_v12  ;;  %v3088_v32 = vpack.c.bf16 %v2496_v13, %v2480_v11  ;;  %v1696_v30 = vcvt.s32.f32 %v672_v18  ;;  %v1168_v31 = vunpack.c.2.s8 %v496_v48  ;;  %v1184_v37 = vunpack.c.3.s8 %v496_v48 }
 0x23b   : >> { %3806 = vmatpush.bf16.msrb.mxu2 %v2960_v56  ;;  %v1936_v38 = vcvt.s32.f32 %v912_v22  ;;  %v1952_v39 = vcvt.s32.f32 %v928_v23  ;;  %v1424_v0 = vunpack.c.2.s8 %v560_v19  ;;  %v1440_v7 = vunpack.c.3.s8 %v560_v19 }
 0x23c   : >> { %3819 = vmatpush.bf16.msrb.mxu3 %v3088_v32  ;;  %v2688_v8 = vpack.c.bf16 %v1696_v30, %v1680_v57  ;;  %v2192_v9 = vcvt.s32.f32 %v1168_v31  ;;  %v2208_v10 = vcvt.s32.f32 %v1184_v37  ;;  %v624_v40 = vunpack.c.0.s8 %v368_v34 }
 0x23d   : >> { %v2816_v14 = vpack.c.bf16 %v1952_v39, %v1936_v38  ;;  %v2448_v46 = vcvt.s32.f32 %v1424_v0  ;;  %v2464_v15 = vcvt.s32.f32 %v1440_v7  ;;  %v640_v45 = vunpack.c.1.s8 %v368_v34  ;;  %v481_v34 = vld [vmem:[%s4926_s10 + $0x3e0] sm:$0xff] }
 0x23e   : >> { %3781 = vmatpush.bf16.msrb.mxu0 %v2688_v8  ;;  %v2944_v51 = vpack.c.bf16 %v2208_v10, %v2192_v9  ;;  %v1648_v52 = vcvt.s32.f32 %v624_v40  ;;  %v880_v16 = vunpack.c.0.s8 %v432_v43  ;;  %v896_v17 = vunpack.c.1.s8 %v432_v43 }
 0x23f   : >> { %3794 = vmatpush.bf16.msrb.mxu1 %v2816_v14  ;;  %v3072_v27 = vpack.c.bf16 %v2464_v15, %v2448_v46  ;;  %v1664_v28 = vcvt.s32.f32 %v640_v45  ;;  %v1136_v29 = vunpack.c.0.s8 %v496_v48  ;;  %v1152_v53 = vunpack.c.1.s8 %v496_v48  ;;  %v401_v14 = vld [vmem:[%s4926_s10 + $0x160] sm:$0xff] }
 0x240   : >> { %3807 = vmatpush.bf16.msrb.mxu2 %v2944_v51  ;;  %v1904_v54 = vcvt.s32.f32 %v880_v16  ;;  %v1920_v55 = vcvt.s32.f32 %v896_v17  ;;  %v1392_v33 = vunpack.c.0.s8 %v560_v19  ;;  %v1408_v60 = vunpack.c.1.s8 %v560_v19 }
 0x241   : >> { %3820 = vmatpush.bf16.msrb.mxu3 %v3072_v27  ;;  %v2672_v59 = vpack.c.bf16 %v1664_v28, %v1648_v52  ;;  %v2160_v61 = vcvt.s32.f32 %v1136_v29  ;;  %v2176_v1 = vcvt.s32.f32 %v1152_v53  ;;  %v849_v2 = vunpack.c.2.s8 %v417_v26  ;;  %v465_v52 = vld [vmem:[%s4926_s10 + $0x360] sm:$0xff] }
 0x242   : >> { %v2800_v35 = vpack.c.bf16 %v1920_v55, %v1904_v54  ;;  %v2416_v36 = vcvt.s32.f32 %v1392_v33  ;;  %v2432_v43 = vcvt.s32.f32 %v1408_v60  ;;  %v865_v44 = vunpack.c.3.s8 %v417_v26  ;;  %v529_v28 = vld [vmem:[%s4926_s10 + $0x560] sm:$0xff] }
 0x243   : >> { %3782 = vmatpush.bf16.msrb.mxu0 %v2672_v59  ;;  %v2928_v5 = vpack.c.bf16 %v2176_v1, %v2160_v61  ;;  %v1873_v6 = vcvt.s32.f32 %v849_v2  ;;  %v1105_v48 = vunpack.c.2.s8 %v481_v34  ;;  %v1121_v12 = vunpack.c.3.s8 %v481_v34  ;;  %v593_v61 = vld [vmem:[%s4926_s10 + $0x760] sm:$0xff]  ;;  %v3179_v2 = vld [vmem:[#allocation2 + $0x8] sm:$0xff] }
 0x244   : >> { %3795 = vmatpush.bf16.msrb.mxu1 %v2800_v35  ;;  %v3056_v11 = vpack.c.bf16 %v2432_v43, %v2416_v36  ;;  %v1889_v13 = vcvt.s32.f32 %v865_v44  ;;  %v1361_v18 = vunpack.c.2.s8 %v545_v3  ;;  %v1377_v19 = vunpack.c.3.s8 %v545_v3 }
 0x245   : >> { %3808 = vmatpush.bf16.msrb.mxu2 %v2928_v5  ;;  %v2129_v21 = vcvt.s32.f32 %v1105_v48  ;;  %v2145_v49 = vcvt.s32.f32 %v1121_v12  ;;  %v1617_v56 = vunpack.c.2.s8 %v609_v4  ;;  %v1633_v57 = vunpack.c.3.s8 %v609_v4 }
 0x246   : >> { %3821 = vmatpush.bf16.msrb.mxu3 %v3056_v11  ;;  %v2785_v22 = vpack.c.bf16 %v1889_v13, %v1873_v6  ;;  %v2385_v23 = vcvt.s32.f32 %v1361_v18  ;;  %v2401_v25 = vcvt.s32.f32 %v1377_v19  ;;  %v817_v62 = vunpack.c.0.s8 %v417_v26  ;;  %3783 = vmatmul.bf16.vlgmr.msrb.gmra.mxu0 %v4979_v20 }
 0x247   : >> { %v2913_v32 = vpack.c.bf16 %v2145_v49, %v2129_v21  ;;  %v2641_v30 = vcvt.s32.f32 %v1617_v56  ;;  %v2657_v31 = vcvt.s32.f32 %v1633_v57  ;;  %v833_v37 = vunpack.c.1.s8 %v417_v26  ;;  %3796 = vmatmul.bf16.vlgmr.msrb.gmra.mxu1 %v4981_v24 }
 0x248   : >> { %3827 = vmatpush.bf16.msra.mxu0 %v2785_v22  ;;  %v3041_v38 = vpack.c.bf16 %v2401_v25, %v2385_v23  ;;  %v1841_v39 = vcvt.s32.f32 %v817_v62  ;;  %v1073_v0 = vunpack.c.0.s8 %v481_v34  ;;  %v1089_v7 = vunpack.c.1.s8 %v481_v34  ;;  %3809 = vmatmul.bf16.vlgmr.msrb.gmra.mxu2 %v4971_v58  ;;  %v385_v23 = vld [vmem:[%s4926_s10 + $0xe0] sm:$0xff] }
 0x249   : >> { %3840 = vmatpush.bf16.msra.mxu1 %v2913_v32  ;;  %v3169_v8 = vpack.c.bf16 %v2657_v31, %v2641_v30  ;;  %v1857_v9 = vcvt.s32.f32 %v833_v37  ;;  %v1329_v10 = vunpack.c.0.s8 %v545_v3  ;;  %v1345_v40 = vunpack.c.1.s8 %v545_v3  ;;  %3822 = vmatmul.bf16.vlgmr.msrb.gmra.mxu3 %v4974_v63 }
 0x24a   : >> { %3853 = vmatpush.bf16.msra.mxu2 %v3041_v38  ;;  %v2097_v46 = vcvt.s32.f32 %v1073_v0  ;;  %v2113_v15 = vcvt.s32.f32 %v1089_v7  ;;  %v1585_v45 = vunpack.c.0.s8 %v609_v4  ;;  %v1601_v51 = vunpack.c.1.s8 %v609_v4  ;;  %v449_v0 = vld [vmem:[%s4926_s10 + $0x2e0] sm:$0xff] }
 0x24b   : >> { %3866 = vmatpush.bf16.msra.mxu3 %v3169_v8  ;;  %v2769_v16 = vpack.c.bf16 %v1857_v9, %v1841_v39  ;;  %v2353_v17 = vcvt.s32.f32 %v1329_v10  ;;  %v2369_v26 = vcvt.s32.f32 %v1345_v40  ;;  %v3538_v27 = vadd.f32 %v5255_v42, %v5253_v41  ;;  %v513_v40 = vld [vmem:[%s4926_s10 + $0x4e0] sm:$0xff] }
 0x24c   : >> { %v2897_v29 = vpack.c.bf16 %v2113_v15, %v2097_v46  ;;  %v2609_v53 = vcvt.s32.f32 %v1585_v45  ;;  %v2625_v54 = vcvt.s32.f32 %v1601_v51  ;;  %v785_v55 = vunpack.c.2.s8 %v401_v14  ;;  %v577_v51 = vld [vmem:[%s4926_s10 + $0x6e0] sm:$0xff] }
 0x24d   : >> { %3828 = vmatpush.bf16.msra.mxu0 %v2769_v16  ;;  %v3025_v33 = vpack.c.bf16 %v2369_v26, %v2353_v17  ;;  %v3551_v60 = vadd.f32 %v5257_v47, %v3538_v27  ;;  %v801_v34 = vunpack.c.3.s8 %v401_v14  ;;  %v1041_v59 = vunpack.c.2.s8 %v465_v52 }
 0x24e   : >> { %3841 = vmatpush.bf16.msra.mxu1 %v2897_v29  ;;  %v3153_v1 = vpack.c.bf16 %v2625_v54, %v2609_v53  ;;  %v1809_v3 = vcvt.s32.f32 %v785_v55  ;;  %v1057_v35 = vunpack.c.3.s8 %v465_v52  ;;  %v1297_v36 = vunpack.c.2.s8 %v529_v28  ;;  %v5285_v54 = vpop.f32.mrf.mxu0  ;;  %v5287_v55 = vpop.f32.mrf.mxu1 }
 0x24f   : >> { %3854 = vmatpush.bf16.msra.mxu2 %v3025_v33  ;;  %v3564_v41 = vadd.f32 %v5259_v50, %v3551_v60  ;;  %v1825_v42 = vcvt.s32.f32 %v801_v34  ;;  %v2065_v43 = vcvt.s32.f32 %v1041_v59  ;;  %v1313_v44 = vunpack.c.3.s8 %v529_v28 }
 0x250   : >> { %3867 = vmatpush.bf16.msra.mxu3 %v3153_v1  ;;  %v2081_v4 = vcvt.s32.f32 %v1057_v35  ;;  %v2321_v5 = vcvt.s32.f32 %v1297_v36  ;;  %v1553_v6 = vunpack.c.2.s8 %v593_v61  ;;  %v1569_v47 = vunpack.c.3.s8 %v593_v61  ;;  %v5291_v1 = vpop.f32.mrf.mxu3 }
 0x251   : >> { %v4041_v48 = vadd.f32 %v3564_v41, %v3179_v2  ;;  %v2753_v12 = vpack.c.bf16 %v1825_v42, %v1809_v3  ;;  %v2337_v11 = vcvt.s32.f32 %v1313_v44  ;;  %v753_v13 = vunpack.c.0.s8 %v401_v14 }
 0x252   : >> { %v2881_v18 = vpack.c.bf16 %v2081_v4, %v2065_v43  ;;  %v2577_v19 = vcvt.s32.f32 %v1553_v6  ;;  %v2593_v21 = vcvt.s32.f32 %v1569_v47  ;;  %v769_v49 = vunpack.c.1.s8 %v401_v14 }
 0x253   : >> { %4057 = vst [vmem:[#allocation2 + $0x8] sm:$0xff] %v4041_v48  ;;  %3829 = vmatpush.bf16.msra.mxu0 %v2753_v12  ;;  %v3009_v50 = vpack.c.bf16 %v2337_v11, %v2321_v5  ;;  %v1777_v56 = vcvt.s32.f32 %v753_v13  ;;  %v1009_v57 = vunpack.c.0.s8 %v465_v52  ;;  %v1025_v22 = vunpack.c.1.s8 %v465_v52  ;;  %v369_v48 = vld [vmem:[%s4926_s10 + $0x60] sm:$0xff] }
 0x254   : >> { %3842 = vmatpush.bf16.msra.mxu1 %v2881_v18  ;;  %v3137_v25 = vpack.c.bf16 %v2593_v21, %v2577_v19  ;;  %v1793_v62 = vcvt.s32.f32 %v769_v49  ;;  %v1265_v32 = vunpack.c.0.s8 %v529_v28  ;;  %v1281_v30 = vunpack.c.1.s8 %v529_v28 }
 0x255   : >> { %3855 = vmatpush.bf16.msra.mxu2 %v3009_v50  ;;  %v2033_v31 = vcvt.s32.f32 %v1009_v57  ;;  %v2049_v37 = vcvt.s32.f32 %v1025_v22  ;;  %v1521_v38 = vunpack.c.0.s8 %v593_v61  ;;  %v1537_v39 = vunpack.c.1.s8 %v593_v61  ;;  %v5289_v61 = vpop.f32.mrf.mxu2 }
 0x256   : >> { %3868 = vmatpush.bf16.msra.mxu3 %v3137_v25  ;;  %v2737_v7 = vpack.c.bf16 %v1793_v62, %v1777_v56  ;;  %v2289_v8 = vcvt.s32.f32 %v1265_v32  ;;  %v2305_v9 = vcvt.s32.f32 %v1281_v30  ;;  %v721_v10 = vunpack.c.2.s8 %v385_v23  ;;  %v433_v56 = vld [vmem:[%s4926_s10 + $0x260] sm:$0xff] }
 0x257   : >> { %v2865_v14 = vpack.c.bf16 %v2049_v37, %v2033_v31  ;;  %v2545_v46 = vcvt.s32.f32 %v1521_v38  ;;  %v2561_v15 = vcvt.s32.f32 %v1537_v39  ;;  %v737_v45 = vunpack.c.3.s8 %v385_v23  ;;  %v497_v62 = vld [vmem:[%s4926_s10 + $0x460] sm:$0xff]  ;;  %v3578_v39 = vpop.f32.mrf.mxu0 }
 0x258   : >> { %3830 = vmatpush.bf16.msra.mxu0 %v2737_v7  ;;  %v2993_v52 = vpack.c.bf16 %v2305_v9, %v2289_v8  ;;  %v1745_v16 = vcvt.s32.f32 %v721_v10  ;;  %v977_v17 = vunpack.c.2.s8 %v449_v0  ;;  %v993_v26 = vunpack.c.3.s8 %v449_v0  ;;  %v561_v38 = vld [vmem:[%s4926_s10 + $0x660] sm:$0xff] }
 0x259   : >> { %3843 = vmatpush.bf16.msra.mxu1 %v2865_v14  ;;  %v3121_v27 = vpack.c.bf16 %v2561_v15, %v2545_v46  ;;  %v1761_v28 = vcvt.s32.f32 %v737_v45  ;;  %v1233_v29 = vunpack.c.2.s8 %v513_v40  ;;  %v1249_v53 = vunpack.c.3.s8 %v513_v40  ;;  %v3617_v14 = vpop.f32.mrf.mxu3 }
 0x25a   : >> { %3856 = vmatpush.bf16.msra.mxu2 %v2993_v52  ;;  %v2001_v33 = vcvt.s32.f32 %v977_v17  ;;  %v2017_v60 = vcvt.s32.f32 %v993_v26  ;;  %v1489_v34 = vunpack.c.2.s8 %v577_v51  ;;  %v1505_v59 = vunpack.c.3.s8 %v577_v51 }
 0x25b   : >> { %3869 = vmatpush.bf16.msra.mxu3 %v3121_v27  ;;  %v2721_v2 = vpack.c.bf16 %v1761_v28, %v1745_v16  ;;  %v2257_v3 = vcvt.s32.f32 %v1233_v29  ;;  %v2273_v35 = vcvt.s32.f32 %v1249_v53  ;;  %v689_v36 = vunpack.c.0.s8 %v385_v23 }
 0x25c   : >> { %v2849_v41 = vpack.c.bf16 %v2017_v60, %v2001_v33  ;;  %v2513_v42 = vcvt.s32.f32 %v1489_v34  ;;  %v2529_v43 = vcvt.s32.f32 %v1505_v59  ;;  %v705_v44 = vunpack.c.1.s8 %v385_v23 }
 0x25d   : >> { %3831 = vmatpush.bf16.msra.mxu0 %v2721_v2  ;;  %v2977_v4 = vpack.c.bf16 %v2273_v35, %v2257_v3  ;;  %v1713_v5 = vcvt.s32.f32 %v689_v36  ;;  %v945_v6 = vunpack.c.0.s8 %v449_v0  ;;  %v961_v47 = vunpack.c.1.s8 %v449_v0  ;;  %v3591_v0 = vpop.f32.mrf.mxu1 }
 0x25e   : >> { %3844 = vmatpush.bf16.msra.mxu1 %v2849_v41  ;;  %v3105_v12 = vpack.c.bf16 %v2529_v43, %v2513_v42  ;;  %v1729_v11 = vcvt.s32.f32 %v705_v44  ;;  %v1201_v13 = vunpack.c.0.s8 %v513_v40  ;;  %v1217_v18 = vunpack.c.1.s8 %v513_v40  ;;  %v3604_v40 = vpop.f32.mrf.mxu2  ;;  %v418_v41 = vld [vmem:[%s4926_s10 + $0x1e8] sm:$0xff] }
 0x25f   : >> { %3857 = vmatpush.bf16.msra.mxu2 %v2977_v4  ;;  %v1969_v19 = vcvt.s32.f32 %v945_v6  ;;  %v1985_v21 = vcvt.s32.f32 %v961_v47  ;;  %v1457_v49 = vunpack.c.0.s8 %v577_v51  ;;  %v1473_v50 = vunpack.c.1.s8 %v577_v51 }
 0x260   : >> { %3870 = vmatpush.bf16.msra.mxu3 %v3105_v12  ;;  %v2705_v57 = vpack.c.bf16 %v1729_v11, %v1713_v5  ;;  %v2225_v22 = vcvt.s32.f32 %v1201_v13  ;;  %v2241_v23 = vcvt.s32.f32 %v1217_v18  ;;  %v657_v25 = vunpack.c.2.s8 %v369_v48 }
 0x261   : >> { %v2833_v32 = vpack.c.bf16 %v1985_v21, %v1969_v19  ;;  %v2481_v30 = vcvt.s32.f32 %v1457_v49  ;;  %v2497_v31 = vcvt.s32.f32 %v1473_v50  ;;  %v673_v37 = vunpack.c.3.s8 %v369_v48  ;;  %v546_v21 = vld [vmem:[%s4926_s10 + $0x5e8] sm:$0xff] }
 0x262   : >> { %3832 = vmatpush.bf16.msra.mxu0 %v2705_v57  ;;  %v2961_v7 = vpack.c.bf16 %v2241_v23, %v2225_v22  ;;  %v1681_v8 = vcvt.s32.f32 %v657_v25  ;;  %v913_v9 = vunpack.c.2.s8 %v433_v56  ;;  %v929_v10 = vunpack.c.3.s8 %v433_v56  ;;  %v610_v22 = vld [vmem:[%s4926_s10 + $0x7e8] sm:$0xff] }
 0x263   : >> { %3845 = vmatpush.bf16.msra.mxu1 %v2833_v32  ;;  %v3089_v46 = vpack.c.bf16 %v2497_v31, %v2481_v30  ;;  %v1697_v15 = vcvt.s32.f32 %v673_v37  ;;  %v1169_v45 = vunpack.c.2.s8 %v497_v62  ;;  %v1185_v51 = vunpack.c.3.s8 %v497_v62 }
 0x264   : >> { %3858 = vmatpush.bf16.msra.mxu2 %v2961_v7  ;;  %v1937_v52 = vcvt.s32.f32 %v913_v9  ;;  %v1953_v16 = vcvt.s32.f32 %v929_v10  ;;  %v1425_v17 = vunpack.c.2.s8 %v561_v38  ;;  %v1441_v26 = vunpack.c.3.s8 %v561_v38 }
 0x265   : >> { %3871 = vmatpush.bf16.msra.mxu3 %v3089_v46  ;;  %v2689_v27 = vpack.c.bf16 %v1697_v15, %v1681_v8  ;;  %v2193_v28 = vcvt.s32.f32 %v1169_v45  ;;  %v2209_v29 = vcvt.s32.f32 %v1185_v51  ;;  %v625_v53 = vunpack.c.0.s8 %v369_v48 }
 0x266   : >> { %v2817_v33 = vpack.c.bf16 %v1953_v16, %v1937_v52  ;;  %v2449_v60 = vcvt.s32.f32 %v1425_v17  ;;  %v2465_v34 = vcvt.s32.f32 %v1441_v26  ;;  %v641_v59 = vunpack.c.1.s8 %v369_v48  ;;  %v482_v48 = vld [vmem:[%s4926_s10 + $0x3e8] sm:$0xff] }
 0x267   : >> { %3833 = vmatpush.bf16.msra.mxu0 %v2689_v27  ;;  %v2945_v2 = vpack.c.bf16 %v2209_v29, %v2193_v28  ;;  %v1649_v3 = vcvt.s32.f32 %v625_v53  ;;  %v881_v35 = vunpack.c.0.s8 %v433_v56  ;;  %v897_v36 = vunpack.c.1.s8 %v433_v56 }
 0x268   : >> { %3846 = vmatpush.bf16.msra.mxu1 %v2817_v33  ;;  %v3073_v42 = vpack.c.bf16 %v2465_v34, %v2449_v60  ;;  %v1665_v43 = vcvt.s32.f32 %v641_v59  ;;  %v1137_v44 = vunpack.c.0.s8 %v497_v62  ;;  %v1153_v4 = vunpack.c.1.s8 %v497_v62  ;;  %v402_v33 = vld [vmem:[%s4926_s10 + $0x168] sm:$0xff] }
 0x269   : >> { %3859 = vmatpush.bf16.msra.mxu2 %v2945_v2  ;;  %v1905_v5 = vcvt.s32.f32 %v881_v35  ;;  %v1921_v6 = vcvt.s32.f32 %v897_v36  ;;  %v1393_v47 = vunpack.c.0.s8 %v561_v38  ;;  %v1409_v12 = vunpack.c.1.s8 %v561_v38 }
 0x26a   : >> { %3872 = vmatpush.bf16.msra.mxu3 %v3073_v42  ;;  %v2673_v11 = vpack.c.bf16 %v1665_v43, %v1649_v3  ;;  %v2161_v13 = vcvt.s32.f32 %v1137_v44  ;;  %v2177_v18 = vcvt.s32.f32 %v1153_v4  ;;  %v850_v19 = vunpack.c.2.s8 %v418_v41  ;;  %v466_v3 = vld [vmem:[%s4926_s10 + $0x368] sm:$0xff] }
 0x26b   : >> { %v2801_v49 = vpack.c.bf16 %v1921_v6, %v1905_v5  ;;  %v2417_v50 = vcvt.s32.f32 %v1393_v47  ;;  %v2433_v56 = vcvt.s32.f32 %v1409_v12  ;;  %v866_v57 = vunpack.c.3.s8 %v418_v41  ;;  %v530_v43 = vld [vmem:[%s4926_s10 + $0x568] sm:$0xff] }
 0x26c   : >> { %3834 = vmatpush.bf16.msra.mxu0 %v2673_v11  ;;  %v2929_v23 = vpack.c.bf16 %v2177_v18, %v2161_v13  ;;  %v1874_v25 = vcvt.s32.f32 %v850_v19  ;;  %v1106_v62 = vunpack.c.2.s8 %v482_v48  ;;  %v1122_v32 = vunpack.c.3.s8 %v482_v48  ;;  %v594_v13 = vld [vmem:[%s4926_s10 + $0x768] sm:$0xff] }
 0x26d   : >> { %3847 = vmatpush.bf16.msra.mxu1 %v2801_v49  ;;  %v3057_v30 = vpack.c.bf16 %v2433_v56, %v2417_v50  ;;  %v1890_v31 = vcvt.s32.f32 %v866_v57  ;;  %v1362_v37 = vunpack.c.2.s8 %v546_v21  ;;  %v1378_v38 = vunpack.c.3.s8 %v546_v21  ;;  %v3180_v19 = vld [vmem:[#allocation2 + $0x48] sm:$0xff] }
 0x26e   : >> { %3860 = vmatpush.bf16.msra.mxu2 %v2929_v23  ;;  %v2130_v39 = vcvt.s32.f32 %v1106_v62  ;;  %v2146_v0 = vcvt.s32.f32 %v1122_v32  ;;  %v1618_v7 = vunpack.c.2.s8 %v610_v22  ;;  %v1634_v8 = vunpack.c.3.s8 %v610_v22 }
 0x26f   : >> { %3873 = vmatpush.bf16.msra.mxu3 %v3057_v30  ;;  %v2786_v9 = vpack.c.bf16 %v1890_v31, %v1874_v25  ;;  %v2386_v10 = vcvt.s32.f32 %v1362_v37  ;;  %v2402_v40 = vcvt.s32.f32 %v1378_v38  ;;  %v818_v14 = vunpack.c.0.s8 %v418_v41  ;;  %3835 = vmatmul.bf16.vlgmr.msra.gmra.mxu0 %v4979_v20 }
 0x270   : >> { %v2914_v46 = vpack.c.bf16 %v2146_v0, %v2130_v39  ;;  %v2642_v15 = vcvt.s32.f32 %v1618_v7  ;;  %v2658_v45 = vcvt.s32.f32 %v1634_v8  ;;  %v834_v51 = vunpack.c.1.s8 %v418_v41  ;;  %3848 = vmatmul.bf16.vlgmr.msra.gmra.mxu1 %v4981_v24 }
 0x271   : >> { %3879 = vmatpush.bf16.msrb.mxu0 %v2786_v9  ;;  %v3042_v52 = vpack.c.bf16 %v2402_v40, %v2386_v10  ;;  %v1842_v16 = vcvt.s32.f32 %v818_v14  ;;  %v1074_v17 = vunpack.c.0.s8 %v482_v48  ;;  %v1090_v26 = vunpack.c.1.s8 %v482_v48  ;;  %3861 = vmatmul.bf16.vlgmr.msra.gmra.mxu2 %v4971_v58  ;;  %v386_v10 = vld [vmem:[%s4926_s10 + $0xe8] sm:$0xff] }
 0x272   : >> { %3892 = vmatpush.bf16.msrb.mxu1 %v2914_v46  ;;  %v3170_v27 = vpack.c.bf16 %v2658_v45, %v2642_v15  ;;  %v1858_v28 = vcvt.s32.f32 %v834_v51  ;;  %v1330_v29 = vunpack.c.0.s8 %v546_v21  ;;  %v1346_v53 = vunpack.c.1.s8 %v546_v21  ;;  %3874 = vmatmul.bf16.vlgmr.msra.gmra.mxu3 %v4974_v63 }
 0x273   : >> { %3905 = vmatpush.bf16.msrb.mxu2 %v3042_v52  ;;  %v2098_v60 = vcvt.s32.f32 %v1074_v17  ;;  %v2114_v34 = vcvt.s32.f32 %v1090_v26  ;;  %v1586_v59 = vunpack.c.0.s8 %v610_v22  ;;  %v1602_v2 = vunpack.c.1.s8 %v610_v22  ;;  %v450_v17 = vld [vmem:[%s4926_s10 + $0x2e8] sm:$0xff] }
 0x274   : >> { %3918 = vmatpush.bf16.msrb.mxu3 %v3170_v27  ;;  %v2770_v35 = vpack.c.bf16 %v1858_v28, %v1842_v16  ;;  %v2354_v36 = vcvt.s32.f32 %v1330_v29  ;;  %v2370_v41 = vcvt.s32.f32 %v1346_v53  ;;  %v3590_v42 = vadd.f32 %v5287_v55, %v5285_v54  ;;  %v514_v53 = vld [vmem:[%s4926_s10 + $0x4e8] sm:$0xff] }
 0x275   : >> { %v2898_v44 = vpack.c.bf16 %v2114_v34, %v2098_v60  ;;  %v2610_v4 = vcvt.s32.f32 %v1586_v59  ;;  %v2626_v5 = vcvt.s32.f32 %v1602_v2  ;;  %v786_v6 = vunpack.c.2.s8 %v402_v33  ;;  %v578_v2 = vld [vmem:[%s4926_s10 + $0x6e8] sm:$0xff] }
 0x276   : >> { %3880 = vmatpush.bf16.msrb.mxu0 %v2770_v35  ;;  %v3026_v47 = vpack.c.bf16 %v2370_v41, %v2354_v36  ;;  %v3603_v12 = vadd.f32 %v5289_v61, %v3590_v42  ;;  %v802_v48 = vunpack.c.3.s8 %v402_v33  ;;  %v1042_v11 = vunpack.c.2.s8 %v466_v3 }
 0x277   : >> { %3893 = vmatpush.bf16.msrb.mxu1 %v2898_v44  ;;  %v3154_v18 = vpack.c.bf16 %v2626_v5, %v2610_v4  ;;  %v1810_v21 = vcvt.s32.f32 %v786_v6  ;;  %v1058_v49 = vunpack.c.3.s8 %v466_v3  ;;  %v1298_v50 = vunpack.c.2.s8 %v530_v43  ;;  %v5317_v5 = vpop.f32.mrf.mxu0  ;;  %v5319_v6 = vpop.f32.mrf.mxu1 }
 0x278   : >> { %3906 = vmatpush.bf16.msrb.mxu2 %v3026_v47  ;;  %v3616_v54 = vadd.f32 %v5291_v1, %v3603_v12  ;;  %v1826_v55 = vcvt.s32.f32 %v802_v48  ;;  %v2066_v56 = vcvt.s32.f32 %v1042_v11  ;;  %v1314_v57 = vunpack.c.3.s8 %v530_v43 }
 0x279   : >> { %3919 = vmatpush.bf16.msrb.mxu3 %v3154_v18  ;;  %v2082_v22 = vcvt.s32.f32 %v1058_v49  ;;  %v2322_v23 = vcvt.s32.f32 %v1298_v50  ;;  %v1554_v25 = vunpack.c.2.s8 %v594_v13  ;;  %v1570_v61 = vunpack.c.3.s8 %v594_v13  ;;  %v5323_v18 = vpop.f32.mrf.mxu3 }
 0x27a   : >> { %v4042_v62 = vadd.f32 %v3616_v54, %v3180_v19  ;;  %v2754_v32 = vpack.c.bf16 %v1826_v55, %v1810_v21  ;;  %v2338_v30 = vcvt.s32.f32 %v1314_v57  ;;  %v754_v31 = vunpack.c.0.s8 %v402_v33 }
 0x27b   : >> { %v2882_v37 = vpack.c.bf16 %v2082_v22, %v2066_v56  ;;  %v2578_v38 = vcvt.s32.f32 %v1554_v25  ;;  %v2594_v39 = vcvt.s32.f32 %v1570_v61  ;;  %v770_v0 = vunpack.c.1.s8 %v402_v33 }
 0x27c   : >> { %4058 = vst [vmem:[#allocation2 + $0x48] sm:$0xff] %v4042_v62  ;;  %3881 = vmatpush.bf16.msrb.mxu0 %v2754_v32  ;;  %v3010_v1 = vpack.c.bf16 %v2338_v30, %v2322_v23  ;;  %v1778_v7 = vcvt.s32.f32 %v754_v31  ;;  %v1010_v8 = vunpack.c.0.s8 %v466_v3  ;;  %v1026_v9 = vunpack.c.1.s8 %v466_v3  ;;  %v370_v62 = vld [vmem:[%s4926_s10 + $0x68] sm:$0xff] }
 0x27d   : >> { %3894 = vmatpush.bf16.msrb.mxu1 %v2882_v37  ;;  %v3138_v40 = vpack.c.bf16 %v2594_v39, %v2578_v38  ;;  %v1794_v14 = vcvt.s32.f32 %v770_v0  ;;  %v1266_v46 = vunpack.c.0.s8 %v530_v43  ;;  %v1282_v15 = vunpack.c.1.s8 %v530_v43 }
 0x27e   : >> { %3907 = vmatpush.bf16.msrb.mxu2 %v3010_v1  ;;  %v2034_v45 = vcvt.s32.f32 %v1010_v8  ;;  %v2050_v51 = vcvt.s32.f32 %v1026_v9  ;;  %v1522_v52 = vunpack.c.0.s8 %v594_v13  ;;  %v1538_v16 = vunpack.c.1.s8 %v594_v13  ;;  %v5321_v13 = vpop.f32.mrf.mxu2 }
 0x27f   : >> { %3920 = vmatpush.bf16.msrb.mxu3 %v3138_v40  ;;  %v2738_v26 = vpack.c.bf16 %v1794_v14, %v1778_v7  ;;  %v2290_v27 = vcvt.s32.f32 %v1266_v46  ;;  %v2306_v28 = vcvt.s32.f32 %v1282_v15  ;;  %v722_v29 = vunpack.c.2.s8 %v386_v10  ;;  %v434_v7 = vld [vmem:[%s4926_s10 + $0x268] sm:$0xff] }
 0x280   : >> { %v2866_v33 = vpack.c.bf16 %v2050_v51, %v2034_v45  ;;  %v2546_v60 = vcvt.s32.f32 %v1522_v52  ;;  %v2562_v34 = vcvt.s32.f32 %v1538_v16  ;;  %v738_v59 = vunpack.c.3.s8 %v386_v10  ;;  %v498_v14 = vld [vmem:[%s4926_s10 + $0x468] sm:$0xff]  ;;  %v3630_v16 = vpop.f32.mrf.mxu0 }
 0x281   : >> { %3882 = vmatpush.bf16.msrb.mxu0 %v2738_v26  ;;  %v2994_v3 = vpack.c.bf16 %v2306_v28, %v2290_v27  ;;  %v1746_v35 = vcvt.s32.f32 %v722_v29  ;;  %v978_v36 = vunpack.c.2.s8 %v450_v17  ;;  %v994_v41 = vunpack.c.3.s8 %v450_v17  ;;  %v562_v52 = vld [vmem:[%s4926_s10 + $0x668] sm:$0xff] }
 0x282   : >> { %3895 = vmatpush.bf16.msrb.mxu1 %v2866_v33  ;;  %v3122_v42 = vpack.c.bf16 %v2562_v34, %v2546_v60  ;;  %v1762_v43 = vcvt.s32.f32 %v738_v59  ;;  %v1234_v44 = vunpack.c.2.s8 %v514_v53  ;;  %v1250_v4 = vunpack.c.3.s8 %v514_v53  ;;  %v3669_v33 = vpop.f32.mrf.mxu3 }
 0x283   : >> { %3908 = vmatpush.bf16.msrb.mxu2 %v2994_v3  ;;  %v2002_v47 = vcvt.s32.f32 %v978_v36  ;;  %v2018_v12 = vcvt.s32.f32 %v994_v41  ;;  %v1490_v48 = vunpack.c.2.s8 %v578_v2  ;;  %v1506_v11 = vunpack.c.3.s8 %v578_v2 }
 0x284   : >> { %3921 = vmatpush.bf16.msrb.mxu3 %v3122_v42  ;;  %v2722_v19 = vpack.c.bf16 %v1762_v43, %v1746_v35  ;;  %v2258_v21 = vcvt.s32.f32 %v1234_v44  ;;  %v2274_v49 = vcvt.s32.f32 %v1250_v4  ;;  %v690_v50 = vunpack.c.0.s8 %v386_v10 }
 0x285   : >> { %v2850_v54 = vpack.c.bf16 %v2018_v12, %v2002_v47  ;;  %v2514_v55 = vcvt.s32.f32 %v1490_v48  ;;  %v2530_v56 = vcvt.s32.f32 %v1506_v11  ;;  %v706_v57 = vunpack.c.1.s8 %v386_v10 }
 0x286   : >> { %3883 = vmatpush.bf16.msrb.mxu0 %v2722_v19  ;;  %v2978_v22 = vpack.c.bf16 %v2274_v49, %v2258_v21  ;;  %v1714_v23 = vcvt.s32.f32 %v690_v50  ;;  %v946_v25 = vunpack.c.0.s8 %v450_v17  ;;  %v962_v61 = vunpack.c.1.s8 %v450_v17  ;;  %v3643_v17 = vpop.f32.mrf.mxu1 }
 0x287   : >> { %3896 = vmatpush.bf16.msrb.mxu1 %v2850_v54  ;;  %v3106_v32 = vpack.c.bf16 %v2530_v56, %v2514_v55  ;;  %v1730_v30 = vcvt.s32.f32 %v706_v57  ;;  %v1202_v31 = vunpack.c.0.s8 %v514_v53  ;;  %v1218_v37 = vunpack.c.1.s8 %v514_v53  ;;  %v3656_v53 = vpop.f32.mrf.mxu2  ;;  %v419_v54 = vld [vmem:[%s4926_s10 + $0x1f0] sm:$0xff] }
 0x288   : >> { %3909 = vmatpush.bf16.msrb.mxu2 %v2978_v22  ;;  %v1970_v38 = vcvt.s32.f32 %v946_v25  ;;  %v1986_v39 = vcvt.s32.f32 %v962_v61  ;;  %v1458_v0 = vunpack.c.0.s8 %v578_v2  ;;  %v1474_v1 = vunpack.c.1.s8 %v578_v2 }
 0x289   : >> { %3922 = vmatpush.bf16.msrb.mxu3 %v3106_v32  ;;  %v2706_v8 = vpack.c.bf16 %v1730_v30, %v1714_v23  ;;  %v2226_v9 = vcvt.s32.f32 %v1202_v31  ;;  %v2242_v10 = vcvt.s32.f32 %v1218_v37  ;;  %v658_v40 = vunpack.c.2.s8 %v370_v62 }
 0x28a   : >> { %v2834_v46 = vpack.c.bf16 %v1986_v39, %v1970_v38  ;;  %v2482_v15 = vcvt.s32.f32 %v1458_v0  ;;  %v2498_v45 = vcvt.s32.f32 %v1474_v1  ;;  %v674_v51 = vunpack.c.3.s8 %v370_v62  ;;  %v547_v39 = vld [vmem:[%s4926_s10 + $0x5f0] sm:$0xff] }
 0x28b   : >> { %3884 = vmatpush.bf16.msrb.mxu0 %v2706_v8  ;;  %v2962_v26 = vpack.c.bf16 %v2242_v10, %v2226_v9  ;;  %v1682_v27 = vcvt.s32.f32 %v658_v40  ;;  %v914_v28 = vunpack.c.2.s8 %v434_v7  ;;  %v930_v29 = vunpack.c.3.s8 %v434_v7  ;;  %v611_v9 = vld [vmem:[%s4926_s10 + $0x7f0] sm:$0xff] }
 0x28c   : >> { %3897 = vmatpush.bf16.msrb.mxu1 %v2834_v46  ;;  %v3090_v60 = vpack.c.bf16 %v2498_v45, %v2482_v15  ;;  %v1698_v34 = vcvt.s32.f32 %v674_v51  ;;  %v1170_v59 = vunpack.c.2.s8 %v498_v14  ;;  %v1186_v2 = vunpack.c.3.s8 %v498_v14 }
 0x28d   : >> { %3910 = vmatpush.bf16.msrb.mxu2 %v2962_v26  ;;  %v1938_v3 = vcvt.s32.f32 %v914_v28  ;;  %v1954_v35 = vcvt.s32.f32 %v930_v29  ;;  %v1426_v36 = vunpack.c.2.s8 %v562_v52  ;;  %v1442_v41 = vunpack.c.3.s8 %v562_v52 }
 0x28e   : >> { %3923 = vmatpush.bf16.msrb.mxu3 %v3090_v60  ;;  %v2690_v42 = vpack.c.bf16 %v1698_v34, %v1682_v27  ;;  %v2194_v43 = vcvt.s32.f32 %v1170_v59  ;;  %v2210_v44 = vcvt.s32.f32 %v1186_v2  ;;  %v626_v4 = vunpack.c.0.s8 %v370_v62 }
 0x28f   : >> { %v2818_v47 = vpack.c.bf16 %v1954_v35, %v1938_v3  ;;  %v2450_v12 = vcvt.s32.f32 %v1426_v36  ;;  %v2466_v48 = vcvt.s32.f32 %v1442_v41  ;;  %v642_v11 = vunpack.c.1.s8 %v370_v62  ;;  %v483_v62 = vld [vmem:[%s4926_s10 + $0x3f0] sm:$0xff] }
 0x290   : >> { %3885 = vmatpush.bf16.msrb.mxu0 %v2690_v42  ;;  %v2946_v19 = vpack.c.bf16 %v2210_v44, %v2194_v43  ;;  %v1650_v21 = vcvt.s32.f32 %v626_v4  ;;  %v882_v49 = vunpack.c.0.s8 %v434_v7  ;;  %v898_v50 = vunpack.c.1.s8 %v434_v7 }
 0x291   : >> { %3898 = vmatpush.bf16.msrb.mxu1 %v2818_v47  ;;  %v3074_v55 = vpack.c.bf16 %v2466_v48, %v2450_v12  ;;  %v1666_v56 = vcvt.s32.f32 %v642_v11  ;;  %v1138_v57 = vunpack.c.0.s8 %v498_v14  ;;  %v1154_v22 = vunpack.c.1.s8 %v498_v14  ;;  %v403_v47 = vld [vmem:[%s4926_s10 + $0x170] sm:$0xff] }
 0x292   : >> { %3911 = vmatpush.bf16.msrb.mxu2 %v2946_v19  ;;  %v1906_v23 = vcvt.s32.f32 %v882_v49  ;;  %v1922_v25 = vcvt.s32.f32 %v898_v50  ;;  %v1394_v61 = vunpack.c.0.s8 %v562_v52  ;;  %v1410_v32 = vunpack.c.1.s8 %v562_v52 }
 0x293   : >> { %3924 = vmatpush.bf16.msrb.mxu3 %v3074_v55  ;;  %v2674_v30 = vpack.c.bf16 %v1666_v56, %v1650_v21  ;;  %v2162_v31 = vcvt.s32.f32 %v1138_v57  ;;  %v2178_v37 = vcvt.s32.f32 %v1154_v22  ;;  %v851_v38 = vunpack.c.2.s8 %v419_v54  ;;  %v467_v21 = vld [vmem:[%s4926_s10 + $0x370] sm:$0xff] }
 0x294   : >> { %v2802_v0 = vpack.c.bf16 %v1922_v25, %v1906_v23  ;;  %v2418_v1 = vcvt.s32.f32 %v1394_v61  ;;  %v2434_v7 = vcvt.s32.f32 %v1410_v32  ;;  %v867_v8 = vunpack.c.3.s8 %v419_v54  ;;  %v531_v56 = vld [vmem:[%s4926_s10 + $0x570] sm:$0xff] }
 0x295   : >> { %3886 = vmatpush.bf16.msrb.mxu0 %v2674_v30  ;;  %v2930_v10 = vpack.c.bf16 %v2178_v37, %v2162_v31  ;;  %v1875_v40 = vcvt.s32.f32 %v851_v38  ;;  %v1107_v14 = vunpack.c.2.s8 %v483_v62  ;;  %v1123_v46 = vunpack.c.3.s8 %v483_v62  ;;  %v595_v31 = vld [vmem:[%s4926_s10 + $0x770] sm:$0xff]  ;;  %v3181_v38 = vld [vmem:[#allocation2 + $0x40] sm:$0xff] }
 0x296   : >> { %3899 = vmatpush.bf16.msrb.mxu1 %v2802_v0  ;;  %v3058_v15 = vpack.c.bf16 %v2434_v7, %v2418_v1  ;;  %v1891_v45 = vcvt.s32.f32 %v867_v8  ;;  %v1363_v51 = vunpack.c.2.s8 %v547_v39  ;;  %v1379_v52 = vunpack.c.3.s8 %v547_v39 }
 0x297   : >> { %3912 = vmatpush.bf16.msrb.mxu2 %v2930_v10  ;;  %v2131_v16 = vcvt.s32.f32 %v1107_v14  ;;  %v2147_v17 = vcvt.s32.f32 %v1123_v46  ;;  %v1619_v26 = vunpack.c.2.s8 %v611_v9  ;;  %v1635_v27 = vunpack.c.3.s8 %v611_v9 }
 0x298   : >> { %3925 = vmatpush.bf16.msrb.mxu3 %v3058_v15  ;;  %v2787_v28 = vpack.c.bf16 %v1891_v45, %v1875_v40  ;;  %v2387_v29 = vcvt.s32.f32 %v1363_v51  ;;  %v2403_v53 = vcvt.s32.f32 %v1379_v52  ;;  %v819_v33 = vunpack.c.0.s8 %v419_v54  ;;  %3887 = vmatmul.bf16.vlgmr.msrb.gmra.mxu0 %v4979_v20 }
 0x299   : >> { %v2915_v60 = vpack.c.bf16 %v2147_v17, %v2131_v16  ;;  %v2643_v34 = vcvt.s32.f32 %v1619_v26  ;;  %v2659_v59 = vcvt.s32.f32 %v1635_v27  ;;  %v835_v2 = vunpack.c.1.s8 %v419_v54  ;;  %3900 = vmatmul.bf16.vlgmr.msrb.gmra.mxu1 %v4981_v24 }
 0x29a   : >> { %3931 = vmatpush.bf16.msra.mxu0 %v2787_v28  ;;  %v3043_v3 = vpack.c.bf16 %v2403_v53, %v2387_v29  ;;  %v1843_v35 = vcvt.s32.f32 %v819_v33  ;;  %v1075_v36 = vunpack.c.0.s8 %v483_v62  ;;  %v1091_v41 = vunpack.c.1.s8 %v483_v62  ;;  %3913 = vmatmul.bf16.vlgmr.msrb.gmra.mxu2 %v4971_v58  ;;  %v387_v29 = vld [vmem:[%s4926_s10 + $0xf0] sm:$0xff] }
 0x29b   : >> { %3944 = vmatpush.bf16.msra.mxu1 %v2915_v60  ;;  %v3171_v42 = vpack.c.bf16 %v2659_v59, %v2643_v34  ;;  %v1859_v43 = vcvt.s32.f32 %v835_v2  ;;  %v1331_v44 = vunpack.c.0.s8 %v547_v39  ;;  %v1347_v4 = vunpack.c.1.s8 %v547_v39  ;;  %3926 = vmatmul.bf16.vlgmr.msrb.gmra.mxu3 %v4974_v63 }
 0x29c   : >> { %3957 = vmatpush.bf16.msra.mxu2 %v3043_v3  ;;  %v2099_v12 = vcvt.s32.f32 %v1075_v36  ;;  %v2115_v48 = vcvt.s32.f32 %v1091_v41  ;;  %v1587_v11 = vunpack.c.0.s8 %v611_v9  ;;  %v1603_v19 = vunpack.c.1.s8 %v611_v9  ;;  %v451_v36 = vld [vmem:[%s4926_s10 + $0x2f0] sm:$0xff] }
 0x29d   : >> { %3970 = vmatpush.bf16.msra.mxu3 %v3171_v42  ;;  %v2771_v49 = vpack.c.bf16 %v1859_v43, %v1843_v35  ;;  %v2355_v50 = vcvt.s32.f32 %v1331_v44  ;;  %v2371_v54 = vcvt.s32.f32 %v1347_v4  ;;  %v3642_v55 = vadd.f32 %v5319_v6, %v5317_v5  ;;  %v515_v4 = vld [vmem:[%s4926_s10 + $0x4f0] sm:$0xff] }
 0x29e   : >> { %v2899_v57 = vpack.c.bf16 %v2115_v48, %v2099_v12  ;;  %v2611_v22 = vcvt.s32.f32 %v1587_v11  ;;  %v2627_v23 = vcvt.s32.f32 %v1603_v19  ;;  %v787_v25 = vunpack.c.2.s8 %v403_v47  ;;  %v579_v19 = vld [vmem:[%s4926_s10 + $0x6f0] sm:$0xff] }
 0x29f   : >> { %3932 = vmatpush.bf16.msra.mxu0 %v2771_v49  ;;  %v3027_v61 = vpack.c.bf16 %v2371_v54, %v2355_v50  ;;  %v3655_v32 = vadd.f32 %v5321_v13, %v3642_v55  ;;  %v803_v62 = vunpack.c.3.s8 %v403_v47  ;;  %v1043_v30 = vunpack.c.2.s8 %v467_v21 }
 0x2a0   : >> { %3945 = vmatpush.bf16.msra.mxu1 %v2899_v57  ;;  %v3155_v37 = vpack.c.bf16 %v2627_v23, %v2611_v22  ;;  %v1811_v39 = vcvt.s32.f32 %v787_v25  ;;  %v1059_v0 = vunpack.c.3.s8 %v467_v21  ;;  %v1299_v1 = vunpack.c.2.s8 %v531_v56  ;;  %v5349_v23 = vpop.f32.mrf.mxu0  ;;  %v5351_v25 = vpop.f32.mrf.mxu1 }
 0x2a1   : >> { %3958 = vmatpush.bf16.msra.mxu2 %v3027_v61  ;;  %v3668_v5 = vadd.f32 %v5323_v18, %v3655_v32  ;;  %v1827_v6 = vcvt.s32.f32 %v803_v62  ;;  %v2067_v7 = vcvt.s32.f32 %v1043_v30  ;;  %v1315_v8 = vunpack.c.3.s8 %v531_v56 }
 0x2a2   : >> { %3971 = vmatpush.bf16.msra.mxu3 %v3155_v37  ;;  %v2083_v9 = vcvt.s32.f32 %v1059_v0  ;;  %v2323_v10 = vcvt.s32.f32 %v1299_v1  ;;  %v1555_v40 = vunpack.c.2.s8 %v595_v31  ;;  %v1571_v13 = vunpack.c.3.s8 %v595_v31  ;;  %v5355_v37 = vpop.f32.mrf.mxu3 }
 0x2a3   : >> { %v4043_v14 = vadd.f32 %v3668_v5, %v3181_v38  ;;  %v2755_v46 = vpack.c.bf16 %v1827_v6, %v1811_v39  ;;  %v2339_v15 = vcvt.s32.f32 %v1315_v8  ;;  %v755_v45 = vunpack.c.0.s8 %v403_v47 }
 0x2a4   : >> { %v2883_v51 = vpack.c.bf16 %v2083_v9, %v2067_v7  ;;  %v2579_v52 = vcvt.s32.f32 %v1555_v40  ;;  %v2595_v16 = vcvt.s32.f32 %v1571_v13  ;;  %v771_v17 = vunpack.c.1.s8 %v403_v47 }
 0x2a5   : >> { %4059 = vst [vmem:[#allocation2 + $0x40] sm:$0xff] %v4043_v14  ;;  %3933 = vmatpush.bf16.msra.mxu0 %v2755_v46  ;;  %v3011_v18 = vpack.c.bf16 %v2339_v15, %v2323_v10  ;;  %v1779_v26 = vcvt.s32.f32 %v755_v45  ;;  %v1011_v27 = vunpack.c.0.s8 %v467_v21  ;;  %v1027_v28 = vunpack.c.1.s8 %v467_v21  ;;  %v371_v14 = vld [vmem:[%s4926_s10 + $0x70] sm:$0xff] }
 0x2a6   : >> { %3946 = vmatpush.bf16.msra.mxu1 %v2883_v51  ;;  %v3139_v53 = vpack.c.bf16 %v2595_v16, %v2579_v52  ;;  %v1795_v33 = vcvt.s32.f32 %v771_v17  ;;  %v1267_v60 = vunpack.c.0.s8 %v531_v56  ;;  %v1283_v34 = vunpack.c.1.s8 %v531_v56 }
 0x2a7   : >> { %3959 = vmatpush.bf16.msra.mxu2 %v3011_v18  ;;  %v2035_v59 = vcvt.s32.f32 %v1011_v27  ;;  %v2051_v2 = vcvt.s32.f32 %v1027_v28  ;;  %v1523_v3 = vunpack.c.0.s8 %v595_v31  ;;  %v1539_v35 = vunpack.c.1.s8 %v595_v31  ;;  %v5353_v31 = vpop.f32.mrf.mxu2 }
 0x2a8   : >> { %3972 = vmatpush.bf16.msra.mxu3 %v3139_v53  ;;  %v2739_v41 = vpack.c.bf16 %v1795_v33, %v1779_v26  ;;  %v2291_v42 = vcvt.s32.f32 %v1267_v60  ;;  %v2307_v43 = vcvt.s32.f32 %v1283_v34  ;;  %v723_v44 = vunpack.c.2.s8 %v387_v29  ;;  %v435_v26 = vld [vmem:[%s4926_s10 + $0x270] sm:$0xff] }
 0x2a9   : >> { %v2867_v47 = vpack.c.bf16 %v2051_v2, %v2035_v59  ;;  %v2547_v12 = vcvt.s32.f32 %v1523_v3  ;;  %v2563_v48 = vcvt.s32.f32 %v1539_v35  ;;  %v739_v11 = vunpack.c.3.s8 %v387_v29  ;;  %v499_v33 = vld [vmem:[%s4926_s10 + $0x470] sm:$0xff]  ;;  %v3682_v35 = vpop.f32.mrf.mxu0 }
 0x2aa   : >> { %3934 = vmatpush.bf16.msra.mxu0 %v2739_v41  ;;  %v2995_v21 = vpack.c.bf16 %v2307_v43, %v2291_v42  ;;  %v1747_v49 = vcvt.s32.f32 %v723_v44  ;;  %v979_v50 = vunpack.c.2.s8 %v451_v36  ;;  %v995_v54 = vunpack.c.3.s8 %v451_v36  ;;  %v563_v3 = vld [vmem:[%s4926_s10 + $0x670] sm:$0xff] }
 0x2ab   : >> { %3947 = vmatpush.bf16.msra.mxu1 %v2867_v47  ;;  %v3123_v55 = vpack.c.bf16 %v2563_v48, %v2547_v12  ;;  %v1763_v56 = vcvt.s32.f32 %v739_v11  ;;  %v1235_v57 = vunpack.c.2.s8 %v515_v4  ;;  %v1251_v22 = vunpack.c.3.s8 %v515_v4  ;;  %v3721_v47 = vpop.f32.mrf.mxu3 }
 0x2ac   : >> { %3960 = vmatpush.bf16.msra.mxu2 %v2995_v21  ;;  %v2003_v61 = vcvt.s32.f32 %v979_v50  ;;  %v2019_v32 = vcvt.s32.f32 %v995_v54  ;;  %v1491_v62 = vunpack.c.2.s8 %v579_v19  ;;  %v1507_v30 = vunpack.c.3.s8 %v579_v19 }
 0x2ad   : >> { %3973 = vmatpush.bf16.msra.mxu3 %v3123_v55  ;;  %v2723_v38 = vpack.c.bf16 %v1763_v56, %v1747_v49  ;;  %v2259_v39 = vcvt.s32.f32 %v1235_v57  ;;  %v2275_v0 = vcvt.s32.f32 %v1251_v22  ;;  %v691_v1 = vunpack.c.0.s8 %v387_v29 }
 0x2ae   : >> { %v2851_v5 = vpack.c.bf16 %v2019_v32, %v2003_v61  ;;  %v2515_v6 = vcvt.s32.f32 %v1491_v62  ;;  %v2531_v7 = vcvt.s32.f32 %v1507_v30  ;;  %v707_v8 = vunpack.c.1.s8 %v387_v29 }
 0x2af   : >> { %3935 = vmatpush.bf16.msra.mxu0 %v2723_v38  ;;  %v2979_v9 = vpack.c.bf16 %v2275_v0, %v2259_v39  ;;  %v1715_v10 = vcvt.s32.f32 %v691_v1  ;;  %v947_v40 = vunpack.c.0.s8 %v451_v36  ;;  %v963_v13 = vunpack.c.1.s8 %v451_v36  ;;  %v3695_v36 = vpop.f32.mrf.mxu1 }
 0x2b0   : >> { %3948 = vmatpush.bf16.msra.mxu1 %v2851_v5  ;;  %v3107_v46 = vpack.c.bf16 %v2531_v7, %v2515_v6  ;;  %v1731_v15 = vcvt.s32.f32 %v707_v8  ;;  %v1203_v45 = vunpack.c.0.s8 %v515_v4  ;;  %v1219_v51 = vunpack.c.1.s8 %v515_v4  ;;  %v3708_v4 = vpop.f32.mrf.mxu2  ;;  %v420_v5 = vld [vmem:[%s4926_s10 + $0x1f8] sm:$0xff] }
 0x2b1   : >> { %3961 = vmatpush.bf16.msra.mxu2 %v2979_v9  ;;  %v1971_v52 = vcvt.s32.f32 %v947_v40  ;;  %v1987_v16 = vcvt.s32.f32 %v963_v13  ;;  %v1459_v17 = vunpack.c.0.s8 %v579_v19  ;;  %v1475_v18 = vunpack.c.1.s8 %v579_v19 }
 0x2b2   : >> { %3974 = vmatpush.bf16.msra.mxu3 %v3107_v46  ;;  %v2707_v27 = vpack.c.bf16 %v1731_v15, %v1715_v10  ;;  %v2227_v28 = vcvt.s32.f32 %v1203_v45  ;;  %v2243_v29 = vcvt.s32.f32 %v1219_v51  ;;  %v659_v53 = vunpack.c.2.s8 %v371_v14 }
 0x2b3   : >> { %v2835_v60 = vpack.c.bf16 %v1987_v16, %v1971_v52  ;;  %v2483_v34 = vcvt.s32.f32 %v1459_v17  ;;  %v2499_v59 = vcvt.s32.f32 %v1475_v18  ;;  %v675_v2 = vunpack.c.3.s8 %v371_v14  ;;  %v548_v16 = vld [vmem:[%s4926_s10 + $0x5f8] sm:$0xff] }
 0x2b4   : >> { %3936 = vmatpush.bf16.msra.mxu0 %v2707_v27  ;;  %v2963_v41 = vpack.c.bf16 %v2243_v29, %v2227_v28  ;;  %v1683_v42 = vcvt.s32.f32 %v659_v53  ;;  %v915_v43 = vunpack.c.2.s8 %v435_v26  ;;  %v931_v44 = vunpack.c.3.s8 %v435_v26  ;;  %v612_v28 = vld [vmem:[%s4926_s10 + $0x7f8] sm:$0xff] }
 0x2b5   : >> { %3949 = vmatpush.bf16.msra.mxu1 %v2835_v60  ;;  %v3091_v12 = vpack.c.bf16 %v2499_v59, %v2483_v34  ;;  %v1699_v48 = vcvt.s32.f32 %v675_v2  ;;  %v1171_v11 = vunpack.c.2.s8 %v499_v33  ;;  %v1187_v19 = vunpack.c.3.s8 %v499_v33 }
 0x2b6   : >> { %3962 = vmatpush.bf16.msra.mxu2 %v2963_v41  ;;  %v1939_v21 = vcvt.s32.f32 %v915_v43  ;;  %v1955_v49 = vcvt.s32.f32 %v931_v44  ;;  %v1427_v50 = vunpack.c.2.s8 %v563_v3  ;;  %v1443_v54 = vunpack.c.3.s8 %v563_v3 }
 0x2b7   : >> { %3975 = vmatpush.bf16.msra.mxu3 %v3091_v12  ;;  %v2691_v55 = vpack.c.bf16 %v1699_v48, %v1683_v42  ;;  %v2195_v56 = vcvt.s32.f32 %v1171_v11  ;;  %v2211_v57 = vcvt.s32.f32 %v1187_v19  ;;  %v627_v22 = vunpack.c.0.s8 %v371_v14 }
 0x2b8   : >> { %v2819_v61 = vpack.c.bf16 %v1955_v49, %v1939_v21  ;;  %v2451_v32 = vcvt.s32.f32 %v1427_v50  ;;  %v2467_v62 = vcvt.s32.f32 %v1443_v54  ;;  %v643_v30 = vunpack.c.1.s8 %v371_v14  ;;  %v484_v14 = vld [vmem:[%s4926_s10 + $0x3f8] sm:$0xff] }
 0x2b9   : >> { %3937 = vmatpush.bf16.msra.mxu0 %v2691_v55  ;;  %v2947_v38 = vpack.c.bf16 %v2211_v57, %v2195_v56  ;;  %v1651_v39 = vcvt.s32.f32 %v627_v22  ;;  %v883_v0 = vunpack.c.0.s8 %v435_v26  ;;  %v899_v1 = vunpack.c.1.s8 %v435_v26 }
 0x2ba   : >> { %3950 = vmatpush.bf16.msra.mxu1 %v2819_v61  ;;  %v3075_v6 = vpack.c.bf16 %v2467_v62, %v2451_v32  ;;  %v1667_v7 = vcvt.s32.f32 %v643_v30  ;;  %v1139_v8 = vunpack.c.0.s8 %v499_v33  ;;  %v1155_v9 = vunpack.c.1.s8 %v499_v33  ;;  %v404_v61 = vld [vmem:[%s4926_s10 + $0x178] sm:$0xff] }
 0x2bb   : >> { %3963 = vmatpush.bf16.msra.mxu2 %v2947_v38  ;;  %v1907_v10 = vcvt.s32.f32 %v883_v0  ;;  %v1923_v40 = vcvt.s32.f32 %v899_v1  ;;  %v1395_v13 = vunpack.c.0.s8 %v563_v3  ;;  %v1411_v46 = vunpack.c.1.s8 %v563_v3 }
 0x2bc   : >> { %3976 = vmatpush.bf16.msra.mxu3 %v3075_v6  ;;  %v2675_v15 = vpack.c.bf16 %v1667_v7, %v1651_v39  ;;  %v2163_v45 = vcvt.s32.f32 %v1139_v8  ;;  %v2179_v51 = vcvt.s32.f32 %v1155_v9  ;;  %v852_v52 = vunpack.c.2.s8 %v420_v5  ;;  %v468_v39 = vld [vmem:[%s4926_s10 + $0x378] sm:$0xff] }
 0x2bd   : >> { %v2803_v17 = vpack.c.bf16 %v1923_v40, %v1907_v10  ;;  %v2419_v18 = vcvt.s32.f32 %v1395_v13  ;;  %v2435_v26 = vcvt.s32.f32 %v1411_v46  ;;  %v868_v27 = vunpack.c.3.s8 %v420_v5  ;;  %v532_v7 = vld [vmem:[%s4926_s10 + $0x578] sm:$0xff] }
 0x2be   : >> { %3938 = vmatpush.bf16.msra.mxu0 %v2675_v15  ;;  %v2931_v29 = vpack.c.bf16 %v2179_v51, %v2163_v45  ;;  %v1876_v53 = vcvt.s32.f32 %v852_v52  ;;  %v1108_v33 = vunpack.c.2.s8 %v484_v14  ;;  %v1124_v60 = vunpack.c.3.s8 %v484_v14  ;;  %v596_v45 = vld [vmem:[%s4926_s10 + $0x778] sm:$0xff]  ;;  %v3182_v52 = vld [vmem:[#allocation2 + $0x20] sm:$0xff] }
 0x2bf   : >> { %3951 = vmatpush.bf16.msra.mxu1 %v2803_v17  ;;  %v3059_v34 = vpack.c.bf16 %v2435_v26, %v2419_v18  ;;  %v1892_v59 = vcvt.s32.f32 %v868_v27  ;;  %v1364_v2 = vunpack.c.2.s8 %v548_v16  ;;  %v1380_v3 = vunpack.c.3.s8 %v548_v16 }
 0x2c0   : >> { %3964 = vmatpush.bf16.msra.mxu2 %v2931_v29  ;;  %v2132_v35 = vcvt.s32.f32 %v1108_v33  ;;  %v2148_v36 = vcvt.s32.f32 %v1124_v60  ;;  %v1620_v41 = vunpack.c.2.s8 %v612_v28  ;;  %v1636_v42 = vunpack.c.3.s8 %v612_v28 }
 0x2c1   : >> { %3977 = vmatpush.bf16.msra.mxu3 %v3059_v34  ;;  %v2788_v43 = vpack.c.bf16 %v1892_v59, %v1876_v53  ;;  %v2388_v44 = vcvt.s32.f32 %v1364_v2  ;;  %v2404_v4 = vcvt.s32.f32 %v1380_v3  ;;  %v820_v47 = vunpack.c.0.s8 %v420_v5  ;;  %3939 = vmatmul.bf16.vlgmr.msra.gmra.mxu0 %v4979_v20 }
 0x2c2   : >> { %v2916_v12 = vpack.c.bf16 %v2148_v36, %v2132_v35  ;;  %v2644_v48 = vcvt.s32.f32 %v1620_v41  ;;  %v2660_v11 = vcvt.s32.f32 %v1636_v42  ;;  %v836_v19 = vunpack.c.1.s8 %v420_v5  ;;  %3952 = vmatmul.bf16.vlgmr.msra.gmra.mxu1 %v4981_v24  ;;  %v5377_v41 = vpop.f32.mrf.mxu0 }
 0x2c3   : >> { %3983 = vmatpush.bf16.msrb.mxu0 %v2788_v43  ;;  %v3044_v21 = vpack.c.bf16 %v2404_v4, %v2388_v44  ;;  %v1844_v49 = vcvt.s32.f32 %v820_v47  ;;  %v1076_v50 = vunpack.c.0.s8 %v484_v14  ;;  %v1092_v54 = vunpack.c.1.s8 %v484_v14  ;;  %3965 = vmatmul.bf16.vlgmr.msra.gmra.mxu2 %v4971_v58  ;;  %v388_v47 = vld [vmem:[%s4926_s10 + $0xf8] sm:$0xff] }
 0x2c4   : >> { %3996 = vmatpush.bf16.msrb.mxu1 %v2916_v12  ;;  %v3172_v55 = vpack.c.bf16 %v2660_v11, %v2644_v48  ;;  %v1860_v56 = vcvt.s32.f32 %v836_v19  ;;  %v1332_v57 = vunpack.c.0.s8 %v548_v16  ;;  %v1348_v22 = vunpack.c.1.s8 %v548_v16  ;;  %3978 = vmatmul.bf16.vlgmr.msra.gmra.mxu3 %v4974_v63  ;;  %v5382_v12 = vpop.f32.mrf.mxu2  ;;  %v5384_v48 = vpop.f32.mrf.mxu3 }
 0x2c5   : >> { %4009 = vmatpush.bf16.msrb.mxu2 %v3044_v21  ;;  %v2100_v32 = vcvt.s32.f32 %v1076_v50  ;;  %v2116_v62 = vcvt.s32.f32 %v1092_v54  ;;  %v1588_v30 = vunpack.c.0.s8 %v612_v28  ;;  %v1604_v38 = vunpack.c.1.s8 %v612_v28 }
 0x2c6   : >> { %4022 = vmatpush.bf16.msrb.mxu3 %v3172_v55  ;;  %v2772_v0 = vpack.c.bf16 %v1860_v56, %v1844_v49  ;;  %v2356_v1 = vcvt.s32.f32 %v1332_v57  ;;  %v2372_v5 = vcvt.s32.f32 %v1348_v22  ;;  %v3694_v6 = vadd.f32 %v5351_v25, %v5349_v23  ;;  %v452_v57 = vld [vmem:[%s4926_s10 + $0x2f8] sm:$0xff] }
 0x2c7   : >> { %v2900_v8 = vpack.c.bf16 %v2116_v62, %v2100_v32  ;;  %v2612_v9 = vcvt.s32.f32 %v1588_v30  ;;  %v2628_v10 = vcvt.s32.f32 %v1604_v38  ;;  %v788_v40 = vunpack.c.2.s8 %v404_v61  ;;  %v516_v30 = vld [vmem:[%s4926_s10 + $0x4f8] sm:$0xff] }
 0x2c8   : >> { %3984 = vmatpush.bf16.msrb.mxu0 %v2772_v0  ;;  %v3028_v13 = vpack.c.bf16 %v2372_v5, %v2356_v1  ;;  %v3707_v46 = vadd.f32 %v5353_v31, %v3694_v6  ;;  %v804_v14 = vunpack.c.3.s8 %v404_v61  ;;  %v1044_v15 = vunpack.c.2.s8 %v468_v39  ;;  %v580_v5 = vld [vmem:[%s4926_s10 + $0x6f8] sm:$0xff] }
 0x2c9   : >> { %3997 = vmatpush.bf16.msrb.mxu1 %v2900_v8  ;;  %v3156_v51 = vpack.c.bf16 %v2628_v10, %v2612_v9  ;;  %v1812_v16 = vcvt.s32.f32 %v788_v40  ;;  %v1060_v17 = vunpack.c.3.s8 %v468_v39  ;;  %v1300_v18 = vunpack.c.2.s8 %v532_v7 }
 0x2ca   : >> { %4010 = vmatpush.bf16.msrb.mxu2 %v3028_v13  ;;  %v3720_v23 = vadd.f32 %v5355_v37, %v3707_v46  ;;  %v1828_v25 = vcvt.s32.f32 %v804_v14  ;;  %v2068_v26 = vcvt.s32.f32 %v1044_v15  ;;  %v1316_v27 = vunpack.c.3.s8 %v532_v7  ;;  %v5379_v37 = vpop.f32.mrf.mxu1 }
 0x2cb   : >> { %4023 = vmatpush.bf16.msrb.mxu3 %v3156_v51  ;;  %v2084_v28 = vcvt.s32.f32 %v1060_v17  ;;  %v2324_v29 = vcvt.s32.f32 %v1300_v18  ;;  %v1556_v53 = vunpack.c.2.s8 %v596_v45  ;;  %v1572_v31 = vunpack.c.3.s8 %v596_v45 }
 0x2cc   : >> { %v4044_v33 = vadd.f32 %v3720_v23, %v3182_v52  ;;  %v2756_v60 = vpack.c.bf16 %v1828_v25, %v1812_v16  ;;  %v2340_v34 = vcvt.s32.f32 %v1316_v27  ;;  %v756_v59 = vunpack.c.0.s8 %v404_v61  ;;  %v3734_v52 = vpop.f32.mrf.mxu0  ;;  %v3773_v27 = vpop.f32.mrf.mxu3 }
 0x2cd   : >> { %v2884_v2 = vpack.c.bf16 %v2084_v28, %v2068_v26  ;;  %v2580_v3 = vcvt.s32.f32 %v1556_v53  ;;  %v2596_v35 = vcvt.s32.f32 %v1572_v31  ;;  %v772_v36 = vunpack.c.1.s8 %v404_v61  ;;  %v3760_v26 = vpop.f32.mrf.mxu2 }
 0x2ce   : >> { %4060 = vst [vmem:[#allocation2 + $0x20] sm:$0xff] %v4044_v33  ;;  %3985 = vmatpush.bf16.msrb.mxu0 %v2756_v60  ;;  %v3012_v42 = vpack.c.bf16 %v2340_v34, %v2324_v29  ;;  %v1780_v43 = vcvt.s32.f32 %v756_v59  ;;  %v1012_v44 = vunpack.c.0.s8 %v468_v39  ;;  %v1028_v4 = vunpack.c.1.s8 %v468_v39 }
 0x2cf   : >> { %3998 = vmatpush.bf16.msrb.mxu1 %v2884_v2  ;;  %v3140_v11 = vpack.c.bf16 %v2596_v35, %v2580_v3  ;;  %v1796_v19 = vcvt.s32.f32 %v772_v36  ;;  %v1268_v21 = vunpack.c.0.s8 %v532_v7  ;;  %v1284_v49 = vunpack.c.1.s8 %v532_v7  ;;  %v372_v2 = vld [vmem:[%s4926_s10 + $0x78] sm:$0xff] }
 0x2d0   : >> { %4011 = vmatpush.bf16.msrb.mxu2 %v3012_v42  ;;  %v2036_v50 = vcvt.s32.f32 %v1012_v44  ;;  %v2052_v54 = vcvt.s32.f32 %v1028_v4  ;;  %v1524_v55 = vunpack.c.0.s8 %v596_v45  ;;  %v1540_v56 = vunpack.c.1.s8 %v596_v45 }
 0x2d1   : >> { %4024 = vmatpush.bf16.msrb.mxu3 %v3140_v11  ;;  %v2740_v22 = vpack.c.bf16 %v1796_v19, %v1780_v43  ;;  %v2292_v61 = vcvt.s32.f32 %v1268_v21  ;;  %v2308_v32 = vcvt.s32.f32 %v1284_v49  ;;  %v724_v62 = vunpack.c.2.s8 %v388_v47 }
 0x2d2   : >> { %v2868_v38 = vpack.c.bf16 %v2052_v54, %v2036_v50  ;;  %v2548_v39 = vcvt.s32.f32 %v1524_v55  ;;  %v2564_v0 = vcvt.s32.f32 %v1540_v56  ;;  %v740_v1 = vunpack.c.3.s8 %v388_v47  ;;  %v3747_v16 = vpop.f32.mrf.mxu1  ;;  %v500_v54 = vld [vmem:[%s4926_s10 + $0x478] sm:$0xff] }
 0x2d3   : >> { %3986 = vmatpush.bf16.msrb.mxu0 %v2740_v22  ;;  %v2996_v6 = vpack.c.bf16 %v2308_v32, %v2292_v61  ;;  %v1748_v7 = vcvt.s32.f32 %v724_v62  ;;  %v980_v8 = vunpack.c.2.s8 %v452_v57  ;;  %v996_v9 = vunpack.c.3.s8 %v452_v57  ;;  %v564_v61 = vld [vmem:[%s4926_s10 + $0x678] sm:$0xff] }
 0x2d4   : >> { %3999 = vmatpush.bf16.msrb.mxu1 %v2868_v38  ;;  %v3124_v10 = vpack.c.bf16 %v2564_v0, %v2548_v39  ;;  %v1764_v40 = vcvt.s32.f32 %v740_v1  ;;  %v1236_v13 = vunpack.c.2.s8 %v516_v30  ;;  %v1252_v46 = vunpack.c.3.s8 %v516_v30  ;;  %v3784_v39 = vpop.f32.mrf.mxu0 }
 0x2d5   : >> { %4012 = vmatpush.bf16.msrb.mxu2 %v2996_v6  ;;  %v2004_v14 = vcvt.s32.f32 %v980_v8  ;;  %v2020_v15 = vcvt.s32.f32 %v996_v9  ;;  %v1492_v45 = vunpack.c.2.s8 %v580_v5  ;;  %v1508_v51 = vunpack.c.3.s8 %v580_v5  ;;  %v3810_v8 = vpop.f32.mrf.mxu2  ;;  %v3823_v9 = vpop.f32.mrf.mxu3 }
 0x2d6   : >> { %4025 = vmatpush.bf16.msrb.mxu3 %v3124_v10  ;;  %v2724_v17 = vpack.c.bf16 %v1764_v40, %v1748_v7  ;;  %v2260_v18 = vcvt.s32.f32 %v1236_v13  ;;  %v2276_v23 = vcvt.s32.f32 %v1252_v46  ;;  %v692_v25 = vunpack.c.0.s8 %v388_v47 }
 0x2d7   : >> { %v2852_v28 = vpack.c.bf16 %v2020_v15, %v2004_v14  ;;  %v2516_v29 = vcvt.s32.f32 %v1492_v45  ;;  %v2532_v53 = vcvt.s32.f32 %v1508_v51  ;;  %v708_v31 = vunpack.c.1.s8 %v388_v47  ;;  %v436_v47 = vld [vmem:[%s4926_s10 + $0x278] sm:$0xff] }
 0x2d8   : >> { %3987 = vmatpush.bf16.msrb.mxu0 %v2724_v17  ;;  %v2980_v33 = vpack.c.bf16 %v2276_v23, %v2260_v18  ;;  %v1716_v60 = vcvt.s32.f32 %v692_v25  ;;  %v948_v34 = vunpack.c.0.s8 %v452_v57  ;;  %v964_v59 = vunpack.c.1.s8 %v452_v57 }
 0x2d9   : >> { %4000 = vmatpush.bf16.msrb.mxu1 %v2852_v28  ;;  %v3108_v3 = vpack.c.bf16 %v2532_v53, %v2516_v29  ;;  %v1732_v35 = vcvt.s32.f32 %v708_v31  ;;  %v1204_v36 = vunpack.c.0.s8 %v516_v30  ;;  %v1220_v42 = vunpack.c.1.s8 %v516_v30 }
 0x2da   : >> { %4013 = vmatpush.bf16.msrb.mxu2 %v2980_v33  ;;  %v1972_v43 = vcvt.s32.f32 %v948_v34  ;;  %v1988_v44 = vcvt.s32.f32 %v964_v59  ;;  %v1460_v4 = vunpack.c.0.s8 %v580_v5  ;;  %v1476_v11 = vunpack.c.1.s8 %v580_v5  ;;  %v3797_v0 = vpop.f32.mrf.mxu1 }
 0x2db   : >> { %4026 = vmatpush.bf16.msrb.mxu3 %v3108_v3  ;;  %v2708_v19 = vpack.c.bf16 %v1732_v35, %v1716_v60  ;;  %v2228_v21 = vcvt.s32.f32 %v1204_v36  ;;  %v2244_v49 = vcvt.s32.f32 %v1220_v42  ;;  %v660_v50 = vunpack.c.2.s8 %v372_v2 }
 0x2dc   : >> { %v2836_v55 = vpack.c.bf16 %v1988_v44, %v1972_v43  ;;  %v2484_v56 = vcvt.s32.f32 %v1460_v4  ;;  %v2500_v57 = vcvt.s32.f32 %v1476_v11  ;;  %v676_v22 = vunpack.c.3.s8 %v372_v2  ;;  %v3786_v42 = vpop.f32.mrf.mxu0 }
 0x2dd   : >> { %3988 = vmatpush.bf16.msrb.mxu0 %v2708_v19  ;;  %v2964_v32 = vpack.c.bf16 %v2244_v49, %v2228_v21  ;;  %v1684_v62 = vcvt.s32.f32 %v660_v50  ;;  %v916_v30 = vunpack.c.2.s8 %v436_v47  ;;  %v932_v38 = vunpack.c.3.s8 %v436_v47  ;;  %v3812_v19 = vpop.f32.mrf.mxu2  ;;  %v3825_v21 = vpop.f32.mrf.mxu3 }
 0x2de   : >> { %4001 = vmatpush.bf16.msrb.mxu1 %v2836_v55  ;;  %v3092_v1 = vpack.c.bf16 %v2500_v57, %v2484_v56  ;;  %v1700_v5 = vcvt.s32.f32 %v676_v22  ;;  %v1172_v6 = vunpack.c.2.s8 %v500_v54  ;;  %v1188_v7 = vunpack.c.3.s8 %v500_v54  ;;  %v3183_v55 = vld [vmem:[#allocation2 + $0x10] sm:$0xff] }
 0x2df   : >> { %4014 = vmatpush.bf16.msrb.mxu2 %v2964_v32  ;;  %v1940_v10 = vcvt.s32.f32 %v916_v30  ;;  %v1956_v40 = vcvt.s32.f32 %v932_v38  ;;  %v1428_v13 = vunpack.c.2.s8 %v564_v61  ;;  %v1444_v46 = vunpack.c.3.s8 %v564_v61 }
 0x2e0   : >> { %4027 = vmatpush.bf16.msrb.mxu3 %v3092_v1  ;;  %v2692_v14 = vpack.c.bf16 %v1700_v5, %v1684_v62  ;;  %v2196_v15 = vcvt.s32.f32 %v1172_v6  ;;  %v2212_v45 = vcvt.s32.f32 %v1188_v7  ;;  %v628_v51 = vunpack.c.0.s8 %v372_v2 }
 0x2e1   : >> { %v2820_v52 = vpack.c.bf16 %v1956_v40, %v1940_v10  ;;  %v2452_v16 = vcvt.s32.f32 %v1428_v13  ;;  %v2468_v17 = vcvt.s32.f32 %v1444_v46  ;;  %v644_v18 = vunpack.c.1.s8 %v372_v2  ;;  %v3186_v46 = vld [vmem:[#allocation2 + $0x70] sm:$0xff] }
 0x2e2   : >> { %3989 = vmatpush.bf16.msrb.mxu0 %v2692_v14  ;;  %v2948_v23 = vpack.c.bf16 %v2212_v45, %v2196_v15  ;;  %v1652_v25 = vcvt.s32.f32 %v628_v51  ;;  %v884_v26 = vunpack.c.0.s8 %v436_v47  ;;  %v900_v27 = vunpack.c.1.s8 %v436_v47  ;;  %v3799_v43 = vpop.f32.mrf.mxu1 }
 0x2e3   : >> { %4002 = vmatpush.bf16.msrb.mxu1 %v2820_v52  ;;  %v3076_v28 = vpack.c.bf16 %v2468_v17, %v2452_v16  ;;  %v1668_v29 = vcvt.s32.f32 %v644_v18  ;;  %v1140_v53 = vunpack.c.0.s8 %v500_v54  ;;  %v1156_v31 = vunpack.c.1.s8 %v500_v54  ;;  %v3188_v43 = vld [vmem:[#allocation2 + $0x28] sm:$0xff] }
 0x2e4   : >> { %4015 = vmatpush.bf16.msrb.mxu2 %v2948_v23  ;;  %v1908_v33 = vcvt.s32.f32 %v884_v26  ;;  %v1924_v60 = vcvt.s32.f32 %v900_v27  ;;  %v1396_v34 = vunpack.c.0.s8 %v564_v61  ;;  %v1412_v59 = vunpack.c.1.s8 %v564_v61 }
 0x2e5   : >> { %4028 = vmatpush.bf16.msrb.mxu3 %v3076_v28  ;;  %v2676_v3 = vpack.c.bf16 %v1668_v29, %v1652_v25  ;;  %v2164_v35 = vcvt.s32.f32 %v1140_v53  ;;  %v2180_v36 = vcvt.s32.f32 %v1156_v31  ;;  %v3746_v2 = vadd.f32 %v5379_v37, %v5377_v41  ;;  %v3184_v41 = vld [vmem:[#allocation2 + $0x38] sm:$0xff] }
 0x2e6   : >> { %v2804_v44 = vpack.c.bf16 %v1924_v60, %v1908_v33  ;;  %v2420_v4 = vcvt.s32.f32 %v1396_v34  ;;  %v2436_v11 = vcvt.s32.f32 %v1412_v59  ;;  %v3798_v47 = vadd.f32 %v3797_v0, %v3784_v39  ;;  %v3185_v0 = vld [vmem:[#allocation2 + $0x60] sm:$0xff]  ;;  %v3187_v28 = vld [vmem:[#allocation2 + $0x78] sm:$0xff] }
 0x2e7   : >> { %3990 = vmatpush.bf16.msrb.mxu0 %v2676_v3  ;;  %v2932_v49 = vpack.c.bf16 %v2180_v36, %v2164_v35  ;;  %v3759_v50 = vadd.f32 %v5382_v12, %v3746_v2 }
 0x2e8   : >> { %4003 = vmatpush.bf16.msrb.mxu1 %v2804_v44  ;;  %v3060_v54 = vpack.c.bf16 %v2436_v11, %v2420_v4  ;;  %v3811_v56 = vadd.f32 %v3810_v8, %v3798_v47 }
 0x2e9   : >> { %4016 = vmatpush.bf16.msrb.mxu2 %v2932_v49  ;;  %v3772_v57 = vadd.f32 %v5384_v48, %v3759_v50 }
 0x2ea   : >> { %4029 = vmatpush.bf16.msrb.mxu3 %v3060_v54  ;;  %3991 = vmatmul.bf16.vlgmr.msrb.gmra.mxu0 %v4979_v20  ;;  %v3824_v37 = vadd.f32 %v3823_v9, %v3811_v56 }
 0x2eb   : >> { %4004 = vmatmul.bf16.vlgmr.msrb.gmra.mxu1 %v4981_v24  ;;  %v4045_v22 = vadd.f32 %v3772_v57, %v3183_v55 }
 0x2ec   : >> { %4017 = vmatmul.bf16.vlgmr.msrb.gmra.mxu2 %v4971_v58  ;;  %v4046_v61 = vadd.f32 %v3824_v37, %v3184_v41  ;;  %v3836_v12 = vpop.f32.mrf.mxu0 }
 0x2ed   : >> { %4030 = vmatmul.bf16.vlgmr.msrb.gmra.mxu3 %v4974_v63  ;;  %4061 = vst [vmem:[#allocation2 + $0x10] sm:$0xff] %v4045_v22  ;;  %v3849_v32 = vpop.f32.mrf.mxu1 }
 0x2ee   : >> { %4062 = vst [vmem:[#allocation2 + $0x38] sm:$0xff] %v4046_v61  ;;  %v3850_v62 = vadd.f32 %v3849_v32, %v3836_v12 }
 0x2f4   : >> { %v3862_v30 = vpop.f32.mrf.mxu2  ;;  %v3838_v39 = vpop.f32.mrf.mxu0 }
 0x2f5   : >> { %v3863_v48 = vadd.f32 %v3862_v30, %v3850_v62  ;;  %v3875_v38 = vpop.f32.mrf.mxu3  ;;  %v3851_v20 = vpop.f32.mrf.mxu1 }
 0x2f7   : >> { %v3876_v1 = vadd.f32 %v3875_v38, %v3863_v48 }
 0x2f9   : >> { %v4047_v5 = vadd.f32 %v3876_v1, %v3185_v0 }
 0x2fb   : >> { %4063 = vst [vmem:[#allocation2 + $0x60] sm:$0xff] %v4047_v5 }
 0x2fc   : >> { %v3864_v24 = vpop.f32.mrf.mxu2 }
 0x2fd   : >> { %v3877_v6 = vpop.f32.mrf.mxu3 }
 0x315   : >> { %v3888_v58 = vpop.f32.mrf.mxu0 }
 0x316   : >> { %v3901_v7 = vpop.f32.mrf.mxu1 }
 0x317   : >> { %v3902_v8 = vadd.f32 %v3901_v7, %v3888_v58 }
 0x31d   : >> { %v3914_v63 = vpop.f32.mrf.mxu2  ;;  %v3890_v9 = vpop.f32.mrf.mxu0 }
 0x31e   : >> { %v3915_v10 = vadd.f32 %v3914_v63, %v3902_v8  ;;  %v3927_v40 = vpop.f32.mrf.mxu3  ;;  %v3903_v13 = vpop.f32.mrf.mxu1 }
 0x320   : >> { %v3928_v14 = vadd.f32 %v3927_v40, %v3915_v10 }
 0x322   : >> { %v4048_v15 = vadd.f32 %v3928_v14, %v3186_v46 }
 0x324   : >> { %4064 = vst [vmem:[#allocation2 + $0x70] sm:$0xff] %v4048_v15 }
 0x325   : >> { %v3916_v45 = vpop.f32.mrf.mxu2 }
 0x326   : >> { %v3929_v51 = vpop.f32.mrf.mxu3 }
 0x33e   : >> { %v3940_v52 = vpop.f32.mrf.mxu0 }
 0x33f   : >> { %v3953_v16 = vpop.f32.mrf.mxu1 }
 0x340   : >> { %v3954_v17 = vadd.f32 %v3953_v16, %v3940_v52 }
 0x346   : >> { %v3966_v18 = vpop.f32.mrf.mxu2  ;;  %v3942_v23 = vpop.f32.mrf.mxu0 }
 0x347   : >> { %v3967_v25 = vadd.f32 %v3966_v18, %v3954_v17  ;;  %v3979_v26 = vpop.f32.mrf.mxu3  ;;  %v3955_v27 = vpop.f32.mrf.mxu1 }
 0x349   : >> { %v3980_v29 = vadd.f32 %v3979_v26, %v3967_v25 }
 0x34b   : >> { %v4049_v53 = vadd.f32 %v3980_v29, %v3187_v28 }
 0x34d   : >> { %4065 = vst [vmem:[#allocation2 + $0x78] sm:$0xff] %v4049_v53 }
 0x34e   : >> { %v3968_v31 = vpop.f32.mrf.mxu2 }
 0x34f   : >> { %v3981_v33 = vpop.f32.mrf.mxu3 }
 0x367   : >> { %v3992_v60 = vpop.f32.mrf.mxu0 }
 0x368   : >> { %v4005_v34 = vpop.f32.mrf.mxu1 }
 0x369   : >> { %v4006_v59 = vadd.f32 %v4005_v34, %v3992_v60 }
 0x36f   : >> { %v4018_v3 = vpop.f32.mrf.mxu2  ;;  %v3994_v35 = vpop.f32.mrf.mxu0 }
 0x370   : >> { %v4019_v36 = vadd.f32 %v4018_v3, %v4006_v59  ;;  %v4031_v2 = vpop.f32.mrf.mxu3  ;;  %v4007_v42 = vpop.f32.mrf.mxu1 }
 0x372   : >> { %v4032_v44 = vadd.f32 %v4031_v2, %v4019_v36 }
 0x374   : >> { %v4050_v4 = vadd.f32 %v4032_v44, %v3188_v43  ;;  %341 = sbr.rel (!%p339_p8) target bundleno = 86 (0x56), region = 117 }
 0x376   : >> { %4066 = vst [vmem:[#allocation2 + $0x28] sm:$0xff] %v4050_v4 }
 0x377   : >> { %v4020_v11 = vpop.f32.mrf.mxu2 }
 0x378   : >> { %v4033_v47 = vpop.f32.mrf.mxu3 }
 0x379   : > { %4070 = sbr.rel (%p4378_p9) target bundleno = 924 (0x39c), region = 63 }
 0x37e   : > { %v4071_v19 = vld [vmem:[#allocation2 + $0x30] sm:$0xff]  ;;  %v4072_v21 = vld [vmem:[#allocation2] sm:$0xff]  ;;  %v4073_v56 = vld [vmem:[#allocation2 + $0x58] sm:$0xff] }
 0x37f   : > { %v4087_v49 = vld [vmem:[%s261_s5] sm:$0xff]  ;;  %v4074_v57 = vld [vmem:[#allocation2 + $0x18] sm:$0xff]  ;;  %v4076_v39 = vld [vmem:[#allocation2 + $0x68] sm:$0xff] }
 0x380   : > { %v4091_v50 = vperm.slane %v4087_v49, 0  ;;  %v4092_v54 = vperm.slane %v4087_v49, 1  ;;  %v4139_v55 = vld [vmem:[%s271_s13] sm:$0xff]  ;;  %v4093_v41 = vperm.slane %v4087_v49, 2  ;;  %v4094_v61 = vperm.slane %v4087_v49, 3  ;;  %v4077_v8 = vld [vmem:[#allocation2 + $0x8] sm:$0xff] }
 0x381   : > { %v4143_v37 = vperm.slane %v4139_v55, 0  ;;  %v4144_v22 = vperm.slane %v4139_v55, 1  ;;  %v4145_v12 = vperm.slane %v4139_v55, 2  ;;  %v4146_v48 = vperm.slane %v4139_v55, 3  ;;  %v4075_v38 = vld [vmem:[#allocation2 + $0x50] sm:$0xff]  ;;  %v4078_v40 = vld [vmem:[#allocation2 + $0x48] sm:$0xff] }
 0x382   : > { %v4123_v32 = vmul.f32 %v4091_v50, %v4071_v19  ;;  %v4124_v62 = vmul.f32 %v4092_v54, %v4072_v21  ;;  %v4125_v30 = vmul.f32 %v4093_v41, %v4073_v56  ;;  %v4126_v0 = vmul.f32 %v4094_v61, %v4074_v57  ;;  %v5411_v51 = vld [vmem:[%s261_s5 + $0x8] sm:$0xff]  ;;  %v4079_v29 = vld [vmem:[#allocation2 + $0x40] sm:$0xff]  ;;  %v4081_v2 = vld [vmem:[#allocation2 + $0x10] sm:$0xff] }
 0x383   : > { %v4095_v20 = vperm.slane %v4087_v49, 4  ;;  %v4096_v1 = vperm.slane %v4087_v49, 5  ;;  %v4147_v5 = vperm.slane %v4139_v55, 4  ;;  %v4148_v7 = vperm.slane %v4139_v55, 5  ;;  %v5415_v23 = vld [vmem:[%s271_s13 + $0x8] sm:$0xff]  ;;  %v4080_v60 = vld [vmem:[#allocation2 + $0x20] sm:$0xff] }
 0x384   : > { %v4175_v24 = vadd.f32 %v4143_v37, %v4123_v32  ;;  %v4176_v6 = vadd.f32 %v4144_v22, %v4124_v62  ;;  %v4177_v58 = vadd.f32 %v4145_v12, %v4125_v30  ;;  %v4178_v63 = vadd.f32 %v4146_v48, %v4126_v0  ;;  %v4082_v4 = vld [vmem:[#allocation2 + $0x38] sm:$0xff]  ;;  %v4083_v57 = vld [vmem:[#allocation2 + $0x60] sm:$0xff]  ;;  %v4084_v61 = vld [vmem:[#allocation2 + $0x70] sm:$0xff] }
 0x385   : > { %v4127_v9 = vmul.f32 %v4095_v20, %v4075_v38  ;;  %v4128_v10 = vmul.f32 %v4096_v1, %v4076_v39  ;;  %v4097_v13 = vperm.slane %v4087_v49, 6  ;;  %v4098_v45 = vperm.slane %v4087_v49, 7  ;;  %v4085_v1 = vld [vmem:[#allocation2 + $0x78] sm:$0xff] }
 0x386   : > { %v4191_v46 = vmax.f32 %v4175_v24, 0.0  ;;  %v4192_v14 = vmax.f32 %v4176_v6, 0.0  ;;  %v4193_v15 = vmax.f32 %v4177_v58, 0.0  ;;  %v4194_v52 = vmax.f32 %v4178_v63, 0.0 }
 0x387   : > { %v4179_v16 = vadd.f32 %v4147_v5, %v4127_v9  ;;  %v4180_v17 = vadd.f32 %v4148_v7, %v4128_v10  ;;  %v4129_v18 = vmul.f32 %v4097_v13, %v4077_v8  ;;  %v4130_v26 = vmul.f32 %v4098_v45, %v4078_v40  ;;  %v4086_v5 = vld [vmem:[#allocation2 + $0x28] sm:$0xff] }
 0x388   : > { %v4207_v25 = vpack.c.bf16 %v4192_v14, %v4191_v46  ;;  %v4149_v27 = vperm.slane %v4139_v55, 6  ;;  %v4150_v28 = vperm.slane %v4139_v55, 7  ;;  %v4208_v53 = vpack.c.bf16 %v4194_v52, %v4193_v15 }
 0x389   : > { %v4195_v31 = vmax.f32 %v4179_v16, 0.0  ;;  %v4196_v33 = vmax.f32 %v4180_v17, 0.0  ;;  %v4099_v34 = vperm.slane %v5411_v51, 0  ;;  %v4100_v35 = vperm.slane %v5411_v51, 1 }
 0x38a   : > { %4215 = vst [vmem:[%s4912_s12] sm:$0xff] %v4207_v25  ;;  %v4181_v59 = vadd.f32 %v4149_v27, %v4129_v18  ;;  %v4182_v3 = vadd.f32 %v4150_v28, %v4130_v26  ;;  %v4151_v36 = vperm.slane %v5415_v23, 0  ;;  %v4152_v44 = vperm.slane %v5415_v23, 1 }
 0x38b   : > { %4216 = vst [vmem:[%s4912_s12 + $0x8] sm:$0xff] %v4208_v53  ;;  %v4209_v42 = vpack.c.bf16 %v4196_v33, %v4195_v31  ;;  %v4131_v43 = vmul.f32 %v4099_v34, %v4079_v29  ;;  %v4101_v11 = vperm.slane %v5411_v51, 2  ;;  %v4132_v21 = vmul.f32 %v4100_v35, %v4080_v60 }
 0x38c   : > { %v4197_v47 = vmax.f32 %v4181_v59, 0.0  ;;  %v4198_v19 = vmax.f32 %v4182_v3, 0.0  ;;  %v4102_v49 = vperm.slane %v5411_v51, 3  ;;  %v4153_v55 = vperm.slane %v5415_v23, 2 }
 0x38d   : > { %4217 = vst [vmem:[%s4912_s12 + $0x10] sm:$0xff] %v4209_v42  ;;  %v4183_v50 = vadd.f32 %v4151_v36, %v4131_v43  ;;  %v4133_v54 = vmul.f32 %v4101_v11, %v4081_v2  ;;  %v4154_v56 = vperm.slane %v5415_v23, 3  ;;  %v4184_v37 = vadd.f32 %v4152_v44, %v4132_v21 }
 0x38e   : > { %v4210_v41 = vpack.c.bf16 %v4198_v19, %v4197_v47  ;;  %v4134_v22 = vmul.f32 %v4102_v49, %v4082_v4  ;;  %v4103_v12 = vperm.slane %v5411_v51, 4  ;;  %v4104_v30 = vperm.slane %v5411_v51, 5 }
 0x38f   : > { %v4199_v32 = vmax.f32 %v4183_v50, 0.0  ;;  %v4185_v62 = vadd.f32 %v4153_v55, %v4133_v54  ;;  %v4155_v48 = vperm.slane %v5415_v23, 4  ;;  %v4200_v38 = vmax.f32 %v4184_v37, 0.0 }
 0x390   : > { %4218 = vst [vmem:[%s4912_s12 + $0x18] sm:$0xff] %v4210_v41  ;;  %v4186_v39 = vadd.f32 %v4154_v56, %v4134_v22  ;;  %v4135_v0 = vmul.f32 %v4103_v12, %v4083_v57  ;;  %v4156_v20 = vperm.slane %v5415_v23, 5  ;;  %v4136_v6 = vmul.f32 %v4104_v30, %v4084_v61 }
 0x391   : > { %v4201_v24 = vmax.f32 %v4185_v62, 0.0  ;;  %v4105_v58 = vperm.slane %v5411_v51, 6  ;;  %v4106_v7 = vperm.slane %v5411_v51, 7  ;;  %v4211_v8 = vpack.c.bf16 %v4200_v38, %v4199_v32 }
 0x392   : > { %v4202_v63 = vmax.f32 %v4186_v39, 0.0  ;;  %v4187_v9 = vadd.f32 %v4155_v48, %v4135_v0  ;;  %v4157_v10 = vperm.slane %v5415_v23, 6  ;;  %v4188_v40 = vadd.f32 %v4156_v20, %v4136_v6 }
 0x393   : > { %v4137_v13 = vmul.f32 %v4105_v58, %v4085_v1  ;;  %v4138_v46 = vmul.f32 %v4106_v7, %v4086_v5  ;;  %v4158_v14 = vperm.slane %v5415_v23, 7  ;;  %4219 = vst [vmem:[%s4912_s12 + $0x20] sm:$0xff] %v4211_v8 }
 0x394   : > { %v4212_v15 = vpack.c.bf16 %v4202_v63, %v4201_v24  ;;  %v4203_v45 = vmax.f32 %v4187_v9, 0.0  ;;  %v4204_v52 = vmax.f32 %v4188_v40, 0.0 }
 0x395   : > { %v4189_v16 = vadd.f32 %v4157_v10, %v4137_v13  ;;  %v4190_v17 = vadd.f32 %v4158_v14, %v4138_v46 }
 0x396   : > { %4220 = vst [vmem:[%s4912_s12 + $0x28] sm:$0xff] %v4212_v15  ;;  %v4213_v51 = vpack.c.bf16 %v4204_v52, %v4203_v45 }
 0x397   : > { %v4205_v18 = vmax.f32 %v4189_v16, 0.0  ;;  %v4206_v25 = vmax.f32 %v4190_v17, 0.0 }
 0x398   : > { %4221 = vst [vmem:[%s4912_s12 + $0x30] sm:$0xff] %v4213_v51 }
 0x399   : > { %v4214_v26 = vpack.c.bf16 %v4206_v25, %v4205_v18 }
 0x39b   : > { %4222 = vst [vmem:[%s4912_s12 + $0x38] sm:$0xff] %v4214_v26 }
 0x39c PF: > { %s20_s25 = sadd.s32 1, %s4690_s25   ;;  %s5507_s21 = sld [smem:[#allocation10_spill]] }
 0x39d   : > { %p17_p10 = scmp.ge.s32.totalorder %s20_s25, 6   ;;  %s5508_s17 = sld [smem:[#allocation15_spill]] }
 0x39e   : > { %s5509_s28 = sld [smem:[#allocation16_spill]]  ;;  %s5514_s15 = smov %s4654_s16 }
 0x39f   : > { %s5510_s11 = sld [smem:[#allocation11_spill]]  ;;  %s5516_s18 = smov %s4666_s19 }
 0x3a0   : > { %s5511_s22 = sld [smem:[#allocation12_spill]]  ;;  %s5517_s19 = smov %s4670_s20 }
 0x3a1   : > { %s5512_s23 = sld [smem:[#allocation13_spill]]  ;;  %19 = sbr.rel (!%p17_p10) target bundleno = 13 (0xd), region = 128 }
 0x3a2   : > { %s5513_s24 = sld [smem:[#allocation14_spill]]  ;;  %s5515_s16 = smov %s5507_s21 }
 0x3a4   : > { %s5518_s20 = smov %s5509_s28 }
 0x3a5   : > { %s5519_s21 = smov %s5510_s11 }
 0x3a6   :  { %4245 = vsyncpa [#allocation4], 1 }
 0x3a7   :  { %4247 = vsyncpa [#allocation4 + $0x1], 1 }
 0x3a8   :  { %4248 = vsyncpa [#allocation6], 1 }
 0x3a9   :  { %4250 = vsyncpa [#allocation6 + $0x1], 1 }

// kernel: classifier_forward.3
= control target key start
LH: loop header
LB: loop body
LE: loop exit
PB: predicated region body
PF: predicated region fallthrough
CT: control target
= control target key end

     0   :  { %s7454_s0 = inlined_call_operand.vmem [shape: bf16[8,4096], index: 0, kind: input, shape index: {}]   ;;  %s7455_s1 = inlined_call_operand.hbm [shape: s8[4096,4096], index: 1, kind: input, shape index: {}]   ;;  %s7456_s2 = inlined_call_operand.hbm [shape: f32[1,4096], index: 2, kind: input, shape index: {}]   ;;  %s7457_s3 = inlined_call_operand.hbm [shape: f32[1,4096], index: 3, kind: input, shape index: {}]   ;;  %s7458_s4 = inlined_call_operand.hbm [shape: bf16[4096,128], index: 4, kind: input, shape index: {}]   ;;  %s7459_s5 = inlined_call_operand.vmem [shape: f32[2,8,128], index: 5, kind: output, shape index: {}]  }
   0x1   :  { %7464 = sst [smem:[#allocation16_spill]] %s7455_s1 }
   0x2   :  { %7465 = sst [smem:[#allocation17_spill]] %s7456_s2 }
   0x3   :  { %7466 = sst [smem:[#allocation18_spill]] %s7457_s3 }
   0x4   :  { %10 = vsyncpa [#allocation4], 0 }
   0x5   :  { %12 = vsyncpa [#allocation4 + $0x1], 0 }
   0x6   :  { %13 = vsyncpa [#allocation6], 0 }
   0x7   :  { %15 = vsyncpa [#allocation6 + $0x1], 0 }
   0x8   :  { %16 = vsyncpa [#allocation9], 0 }
   0x9   :  { %18 = vsyncpa [#allocation9 + $0x1], 0  ;;  %s6650_s18 = smov 0   ;;  %s6652_s19 = smov 0  }
   0xa   :  { %s6654_s20 = smov 0   ;;  %s6656_s21 = smov 0  }
   0xb   :  { %s6658_s22 = smov 0   ;;  %s6660_s23 = smov 0  }
   0xc LB: > { %7467 = sst [smem:[#allocation13_spill]] %s6596_s20  ;;  %s7460_s24 = sadd.s32 4294967295, %s6608_s23   ;;  %s6608_s23 = sphi %s6660_s23, %s24_s23   ;;  %s6604_s22 = sphi %s6658_s22, %s7484_s22   ;;  %s6600_s21 = sphi %s6656_s21, %s7483_s21   ;;  %s6596_s20 = sphi %s6654_s20, %s7479_s20   ;;  %s6592_s19 = sphi %s6652_s19, %s7482_s19   ;;  %s6588_s18 = sphi %s6650_s18, %s7481_s18  }
   0xd   : > { %s36_s25 = sadd.s32 1, %s6604_s22  ;;  %s66_s26 = sadd.s32 1, %s6596_s20 }
   0xe   : > { %p38_p0 = scmp.ge.s32.totalorder %s36_s25, 2  ;;  %p73_p1 = scmp.ne.s32.totalorder %s6596_s20, %s6592_s19 }
   0xf   : > { %p74_p2 = scmp.eq.s32.totalorder %s6608_s23, 0  ;;  %p79_p4 = scmp.ne.s32.totalorder %s6592_s19, %s6588_s18 }
  0x10   : > { %s7486_s25 = smov (%p38_p0, %s36_s25), 0  ;;  %p80_p5 = scmp.eq.s32.totalorder %s7460_s24, 0 }
  0x11   : > { %7468 = sst [smem:[#allocation14_spill]] %s7486_s25  ;;  %p75_p3 = por %p74_p2, %p73_p1 }
  0x12   : > { %s62_s27 = ssub.s32 %s6604_s22, %s7486_s25  ;;  %p6691_p7 = por %p80_p5, %p79_p4 }
  0x13   : > { %p64_p6 = scmp.eq.s32.totalorder %s62_s27, 0  ;;  %p6363_p8 = scmp.lt.s32.totalorder %s6608_s23, 2 }
  0x14   : > { %s6700_s30 = sand.u32 1, %s6596_s20   ;;  %s235_s7 = sand.u32 1, %s6608_s23  }
  0x15   : > { %s6697_s29 = scalar_select %p64_p6, %s6596_s20, %s66_s26  }
  0x16   : > { %p6702_p9 = pnand %p6363_p8, %p75_p3  ;;  %s7461_s8 = sshll.u32 %s6700_s30, 4 }
  0x17   : > { %7470 = sst [smem:[#allocation15_spill]] %s6697_s29  ;;  %s5681_s9 = sshll.u32 %s6604_s22, 4 }
  0x18   : > { %s7472_s2 = sld [smem:[#allocation17_spill]]  ;;  %s239_s13 = scalar_lea.vmem [#allocation5], %s7461_s8 }
  0x19   : > { %s247_s14 = sshll.u32 %s239_s13, 4  ;;  %s236_s16 = scalar_lea.sflag [#allocation6], %s235_s7  ;;  %s248_s14 = int_to_ptr.vmem [resolvable:$true] %s247_s14 }
  0x1a   : > { %s7473_s3 = sld [smem:[#allocation18_spill]]  ;;  %p5687_p10 = scmp.ge.s32.totalorder %s6608_s23, 1 }
  0x1b   : > { %p293_p11 = scmp.lt.s32.totalorder %s6608_s23, 3  ;;  %s5677_s10 = sshll.u32 %s6700_s30, 14 }
  0x1c   : > { %s6211_s11 = sshll.u32 %s6604_s22, 7  ;;  %s7475_s1 = sld [smem:[#allocation16_spill]] }
  0x1d   : > { %p6721_p12 = pnand %p5687_p10, %p293_p11  ;;  %s211_s17 = scalar_lea.sflag [#allocation4], %s6700_s30 }
  0x1e   : > { %s243_s12 = scalar_lea.hbm %s7472_s2, %s5681_s9  ;;  %s6614_s18 = smov 4096  }
  0x1f   : > { %s245_s15 = sshll.u32 %s243_s12, 4  ;;  %s6615_s24 = smov 2048   ;;  %s246_s15 = int_to_ptr.hbm [resolvable:$true] %s245_s15 }
  0x20   : > { %6356 = dma.hbm_to_vmem [thread:$0]  (!%p6702_p9), %s246_s15, 256, %s248_s14, %s236_s16  }
  0x21   : > { %s262_s26 = scalar_lea.hbm %s7473_s3, %s5681_s9  ;;  %s214_s14 = scalar_lea.vmem [#allocation3], %s5677_s10 }
  0x22   : > { %s222_s7 = scalar_lea.hbm %s7475_s1, %s6211_s11  ;;  %s225_s15 = sshll.u32 %s214_s14, 4  ;;  %s226_s15 = int_to_ptr.vmem [resolvable:$true] %s225_s15 }
  0x23   : > { %s223_s9 = sshll.u32 %s222_s7, 4  ;;  %s6616_s8 = smov 128   ;;  %s224_s9 = int_to_ptr.hbm [resolvable:$true] %s223_s9 }
  0x24   : > { %6353 = dma.hbm_to_vmem [thread:$0]  (!%p6702_p9), %s224_s9, 262144, %s226_s15, %s211_s17, %s6614_s18, %s6615_s24, %s6616_s8  }
  0x25   : > { %s264_s2 = sshll.u32 %s262_s26, 4  ;;  %s7476_s3 = sshll.u32 %s6700_s30, 4  ;;  %s265_s2 = int_to_ptr.hbm [resolvable:$true] %s264_s2 }
  0x26   : > { %s258_s25 = scalar_lea.vmem [#allocation7], %s7476_s3  ;;  %s5684_s10 = sshll.u32 %s6700_s30, 10 }
  0x27   : > { %s266_s11 = sshll.u32 %s258_s25, 4  ;;  %s6212_s12 = sshll.u32 %s6604_s22, 10  ;;  %s267_s11 = int_to_ptr.vmem [resolvable:$true] %s266_s11 }
  0x28   : > { %6359 = dma.hbm_to_vmem [thread:$0]  (!%p6702_p9), %s265_s2, 256, %s267_s11, %s236_s16  }
  0x29   : > { %s282_s14 = scalar_lea.hbm %s7458_s4, %s6212_s12  ;;  %s277_s1 = scalar_lea.vmem [#allocation8], %s5684_s10 }
  0x2a   : > { %s285_s29 = sshll.u32 %s277_s1, 4  ;;  %s283_s20 = sshll.u32 %s282_s14, 4  ;;  %s286_s29 = int_to_ptr.vmem [resolvable:$true] %s285_s29  ;;  %s284_s20 = int_to_ptr.hbm [resolvable:$true] %s283_s20 }
  0x2b   : > { %s274_s24 = scalar_lea.sflag [#allocation9], %s6700_s30  ;;  %s6617_s8 = smov 64  }
  0x2c   : > { %s6618_s3 = smov 4   ;;  %297 = sbr.rel (%p6721_p12) target bundleno = 1111 (0x457), region = 40 }
  0x2d   : > { %6362 = dma.hbm_to_vmem [thread:$0]  (!%p6702_p9), %s284_s20, 16384, %s286_s29, %s274_s24, %s6617_s8, %s6617_s8, %s6618_s3  }
  0x2e   : > { %s299_s2 = sand.u32 (!%p6721_p12), 1, %s6592_s19  }
  0x2f   : > { %s5688_s25 = sshll.u32 (!%p6721_p12), %s299_s2, 14  ;;  %s300_s16 = scalar_lea.sflag (!%p6721_p12), [#allocation4], %s299_s2 }
  0x30   : > { %s6748_s26 = scalar_lea.vmem (!%p6721_p12), [#allocation3], %s5688_s25 }
  0x31   : > { %6575 = dma.done.wait (%p6691_p7), %s300_s16, 262144  }
  0x32   : > { %6577 = vsyncadd (%p6691_p7), %s300_s16, 4294705152  ;;  %s7477_s1 = sadd.s32 4294967295, %s6608_s23   ;;  %s5689_s20 = sshll.u32 %s299_s2, 4 }
  0x33   : > { %s309_s30 = sand.u32 1, %s7477_s1   ;;  %s6756_s6 = scalar_lea.vmem [#allocation5], %s5689_s20 }
  0x34   : > { %s310_s29 = scalar_lea.sflag [#allocation6], %s309_s30 }
  0x35   : > { %6579 = dma.done.wait (%p6691_p7), %s310_s29, 512  }
  0x36   : > { %6581 = vsyncadd (%p6691_p7), %s310_s29, 4294966784  ;;  %s5691_s27 = sshll.u32 %s299_s2, 10  ;;  %s6762_s15 = scalar_lea.vmem [#allocation7], %s5689_s20 }
  0x37   : > { %s330_s9 = scalar_lea.sflag [#allocation9], %s299_s2  ;;  %s6764_s17 = scalar_lea.vmem [#allocation8], %s5691_s27 }
  0x38   : > { %6583 = dma.done.wait (%p6691_p7), %s330_s9, 16384  }
  0x39   : > { %6585 = vsyncadd (%p6691_p7), %s330_s9, 4294950912  ;;  %p380_p13 = scmp.lt.s32.totalorder %s6600_s21, 1  ;;  %v6619_v0 = vmov 0.0   ;;  %s6777_s28 = smov 0  }
  0x3a   : > { %388 = vst [vmem:[#allocation2 + $0x30] sm:$0xff] %v6619_v0 }
  0x3b   : > { %s7488_s21 = smov (!%p380_p13, %s6600_s21), 1  ;;  %389 = vst [vmem:[#allocation2] sm:$0xff] %v6619_v0 }
  0x3c   : > { %390 = vst [vmem:[#allocation2 + $0x58] sm:$0xff] %v6619_v0  ;;  %s5692_s18 = sshll.u32 %s7488_s21, 3 }
  0x3d   : > { %391 = vst [vmem:[#allocation2 + $0x18] sm:$0xff] %v6619_v0  ;;  %s6775_s12 = scalar_lea.vmem %s7459_s5, %s5692_s18 }
  0x3e   : > { %392 = vst [vmem:[#allocation2 + $0x50] sm:$0xff] %v6619_v0 }
  0x3f   : > { %393 = vst [vmem:[#allocation2 + $0x68] sm:$0xff] %v6619_v0 }
  0x40   : > { %394 = vst [vmem:[#allocation2 + $0x8] sm:$0xff] %v6619_v0 }
  0x41   : > { %395 = vst [vmem:[#allocation2 + $0x48] sm:$0xff] %v6619_v0 }
  0x42   : > { %396 = vst [vmem:[#allocation2 + $0x40] sm:$0xff] %v6619_v0 }
  0x43   : > { %397 = vst [vmem:[#allocation2 + $0x20] sm:$0xff] %v6619_v0 }
  0x44   : > { %398 = vst [vmem:[#allocation2 + $0x10] sm:$0xff] %v6619_v0 }
  0x45   : > { %399 = vst [vmem:[#allocation2 + $0x38] sm:$0xff] %v6619_v0 }
  0x46   : > { %400 = vst [vmem:[#allocation2 + $0x60] sm:$0xff] %v6619_v0 }
  0x47   : > { %401 = vst [vmem:[#allocation2 + $0x70] sm:$0xff] %v6619_v0 }
  0x48   : > { %402 = vst [vmem:[#allocation2 + $0x78] sm:$0xff] %v6619_v0 }
  0x49   : > { %403 = vst [vmem:[#allocation2 + $0x28] sm:$0xff] %v6619_v0 }
  0x4a LB: >> { %s5693_s21 = sshll.u32 %s6612_s28, 9  ;;  %s409_s28 = sadd.s32 1, %s6612_s28   ;;  %s6612_s28 = sphi %s6777_s28, %s409_s28  }
  0x4b   : >> { %s419_s13 = sshra.s32 %s5693_s21, 5  ;;  %s6815_s24 = sshra.s32 %s5693_s21, 7 }
  0x4c   : >> { %s6213_s7 = sshll.u32 %s419_s13, 7  ;;  %s5694_s8 = sshll.u32 %s6815_s24, 2 }
  0x4d   : >> { %s6786_s14 = scalar_lea.vmem %s6748_s26, %s6213_s7 [#allocation3]  ;;  %s6824_s25 = scalar_lea.vmem %s7454_s0, %s5694_s8 }
  0x4e   : >> { %v472_v1 = vld [vmem:[%s6786_s14 + $0x180] sm:$0xff]  ;;  %p406_p0 = scmp.ge.s32.totalorder %s409_s28, 8  }
  0x4f   : >> { %v536_v2 = vld [vmem:[%s6786_s14 + $0x380] sm:$0xff]  ;;  %v904_v4 = vunpack.c.2.s8 %v472_v1  ;;  %v920_v5 = vunpack.c.3.s8 %v472_v1  ;;  %v872_v23 = vunpack.c.0.s8 %v472_v1  ;;  %v888_v24 = vunpack.c.1.s8 %v472_v1 }
  0x50   : >> { %v600_v3 = vld [vmem:[%s6786_s14 + $0x580] sm:$0xff]  ;;  %v1160_v6 = vunpack.c.2.s8 %v536_v2  ;;  %v1176_v7 = vunpack.c.3.s8 %v536_v2  ;;  %v1128_v27 = vunpack.c.0.s8 %v536_v2  ;;  %v1144_v28 = vunpack.c.1.s8 %v536_v2 }
  0x51   : >> { %v664_v8 = vld [vmem:[%s6786_s14 + $0x780] sm:$0xff]  ;;  %v1416_v9 = vunpack.c.2.s8 %v600_v3  ;;  %v1432_v10 = vunpack.c.3.s8 %v600_v3  ;;  %v1928_v13 = vcvt.s32.f32 %v904_v4  ;;  %v1944_v14 = vcvt.s32.f32 %v920_v5 }
  0x52   : >> { %v1672_v11 = vunpack.c.2.s8 %v664_v8  ;;  %v1688_v12 = vunpack.c.3.s8 %v664_v8  ;;  %v2184_v15 = vcvt.s32.f32 %v1160_v6  ;;  %v2200_v16 = vcvt.s32.f32 %v1176_v7  ;;  %v456_v29 = vld [vmem:[%s6786_s14 + $0x100] sm:$0xff] }
  0x53   : >> { %v2440_v17 = vcvt.s32.f32 %v1416_v9  ;;  %v2456_v18 = vcvt.s32.f32 %v1432_v10  ;;  %v2840_v21 = vpack.c.bf16 %v1944_v14, %v1928_v13  ;;  %v1896_v30 = vcvt.s32.f32 %v872_v23  ;;  %v520_v38 = vld [vmem:[%s6786_s14 + $0x300] sm:$0xff] }
  0x54   : >> { %v2696_v19 = vcvt.s32.f32 %v1672_v11  ;;  %v2712_v20 = vcvt.s32.f32 %v1688_v12  ;;  %v2968_v22 = vpack.c.bf16 %v2200_v16, %v2184_v15  ;;  %v1912_v31 = vcvt.s32.f32 %v888_v24  ;;  %v584_v43 = vld [vmem:[%s6786_s14 + $0x500] sm:$0xff] }
  0x55   : >> { %v3096_v25 = vpack.c.bf16 %v2456_v18, %v2440_v17  ;;  %3270 = vmatpush.bf16.msra.mxu0 %v2840_v21  ;;  %v1384_v32 = vunpack.c.0.s8 %v600_v3  ;;  %v1400_v33 = vunpack.c.1.s8 %v600_v3  ;;  %v2152_v34 = vcvt.s32.f32 %v1128_v27  ;;  %v648_v48 = vld [vmem:[%s6786_s14 + $0x700] sm:$0xff] }
  0x56   : >> { %v3224_v26 = vpack.c.bf16 %v2712_v20, %v2696_v19  ;;  %3283 = vmatpush.bf16.msra.mxu1 %v2968_v22  ;;  %v2168_v35 = vcvt.s32.f32 %v1144_v28  ;;  %v1640_v36 = vunpack.c.0.s8 %v664_v8  ;;  %v1656_v37 = vunpack.c.1.s8 %v664_v8  ;;  %v440_v9 = vld [vmem:[%s6786_s14 + $0x80] sm:$0xff] }
  0x57   : >> { %3296 = vmatpush.bf16.msra.mxu2 %v3096_v25  ;;  %v2824_v39 = vpack.c.bf16 %v1912_v31, %v1896_v30  ;;  %v2408_v40 = vcvt.s32.f32 %v1384_v32  ;;  %v2424_v41 = vcvt.s32.f32 %v1400_v33  ;;  %v840_v42 = vunpack.c.2.s8 %v456_v29  ;;  %v504_v18 = vld [vmem:[%s6786_s14 + $0x280] sm:$0xff] }
  0x58   : >> { %3309 = vmatpush.bf16.msra.mxu3 %v3224_v26  ;;  %v2952_v44 = vpack.c.bf16 %v2168_v35, %v2152_v34  ;;  %v2664_v45 = vcvt.s32.f32 %v1640_v36  ;;  %v2680_v46 = vcvt.s32.f32 %v1656_v37  ;;  %v856_v47 = vunpack.c.3.s8 %v456_v29  ;;  %v568_v23 = vld [vmem:[%s6786_s14 + $0x480] sm:$0xff] }
  0x59   : >> { %3271 = vmatpush.bf16.msra.mxu0 %v2824_v39  ;;  %v3080_v49 = vpack.c.bf16 %v2424_v41, %v2408_v40  ;;  %v1864_v50 = vcvt.s32.f32 %v840_v42  ;;  %v1096_v51 = vunpack.c.2.s8 %v520_v38  ;;  %v1112_v52 = vunpack.c.3.s8 %v520_v38  ;;  %v632_v28 = vld [vmem:[%s6786_s14 + $0x680] sm:$0xff] }
  0x5a   : >> { %3284 = vmatpush.bf16.msra.mxu1 %v2952_v44  ;;  %v3208_v53 = vpack.c.bf16 %v2680_v46, %v2664_v45  ;;  %v1880_v54 = vcvt.s32.f32 %v856_v47  ;;  %v1352_v55 = vunpack.c.2.s8 %v584_v43  ;;  %v1368_v56 = vunpack.c.3.s8 %v584_v43 }
  0x5b   : >> { %3297 = vmatpush.bf16.msra.mxu2 %v3080_v49  ;;  %v2120_v57 = vcvt.s32.f32 %v1096_v51  ;;  %v2136_v58 = vcvt.s32.f32 %v1112_v52  ;;  %v1608_v59 = vunpack.c.2.s8 %v648_v48  ;;  %v1624_v60 = vunpack.c.3.s8 %v648_v48 }
  0x5c   : >> { %3310 = vmatpush.bf16.msra.mxu3 %v3208_v53  ;;  %v2808_v61 = vpack.c.bf16 %v1880_v54, %v1864_v50  ;;  %v2376_v62 = vcvt.s32.f32 %v1352_v55  ;;  %v2392_v63 = vcvt.s32.f32 %v1368_v56  ;;  %v808_v0 = vunpack.c.0.s8 %v456_v29  ;;  %v424_v53 = vld [vmem:[%s6786_s14] sm:$0xff] }
  0x5d   : >> { %v2936_v1 = vpack.c.bf16 %v2136_v58, %v2120_v57  ;;  %v2632_v2 = vcvt.s32.f32 %v1608_v59  ;;  %v2648_v3 = vcvt.s32.f32 %v1624_v60  ;;  %v824_v4 = vunpack.c.1.s8 %v456_v29 }
  0x5e   : >> { %3272 = vmatpush.bf16.msra.mxu0 %v2808_v61  ;;  %v3064_v5 = vpack.c.bf16 %v2392_v63, %v2376_v62  ;;  %v1832_v6 = vcvt.s32.f32 %v808_v0  ;;  %v1064_v7 = vunpack.c.0.s8 %v520_v38  ;;  %v1080_v8 = vunpack.c.1.s8 %v520_v38  ;;  %v488_v62 = vld [vmem:[%s6786_s14 + $0x200] sm:$0xff] }
  0x5f   : >> { %3285 = vmatpush.bf16.msra.mxu1 %v2936_v1  ;;  %v3192_v10 = vpack.c.bf16 %v2648_v3, %v2632_v2  ;;  %v1848_v11 = vcvt.s32.f32 %v824_v4  ;;  %v1320_v12 = vunpack.c.0.s8 %v584_v43  ;;  %v1336_v13 = vunpack.c.1.s8 %v584_v43  ;;  %v552_v3 = vld [vmem:[%s6786_s14 + $0x400] sm:$0xff] }
  0x60   : >> { %3298 = vmatpush.bf16.msra.mxu2 %v3064_v5  ;;  %v2088_v14 = vcvt.s32.f32 %v1064_v7  ;;  %v2104_v15 = vcvt.s32.f32 %v1080_v8  ;;  %v1576_v16 = vunpack.c.0.s8 %v648_v48  ;;  %v1592_v17 = vunpack.c.1.s8 %v648_v48  ;;  %v616_v8 = vld [vmem:[%s6786_s14 + $0x600] sm:$0xff] }
  0x61   : >> { %3311 = vmatpush.bf16.msra.mxu3 %v3192_v10  ;;  %v2792_v19 = vpack.c.bf16 %v1848_v11, %v1832_v6  ;;  %v2344_v20 = vcvt.s32.f32 %v1320_v12  ;;  %v2360_v21 = vcvt.s32.f32 %v1336_v13  ;;  %v776_v22 = vunpack.c.2.s8 %v440_v9 }
  0x62   : >> { %v2920_v24 = vpack.c.bf16 %v2104_v15, %v2088_v14  ;;  %v2600_v25 = vcvt.s32.f32 %v1576_v16  ;;  %v2616_v26 = vcvt.s32.f32 %v1592_v17  ;;  %v792_v27 = vunpack.c.3.s8 %v440_v9 }
  0x63   : >> { %3273 = vmatpush.bf16.msra.mxu0 %v2792_v19  ;;  %v3048_v29 = vpack.c.bf16 %v2360_v21, %v2344_v20  ;;  %v1800_v30 = vcvt.s32.f32 %v776_v22  ;;  %v1032_v31 = vunpack.c.2.s8 %v504_v18  ;;  %v1048_v32 = vunpack.c.3.s8 %v504_v18 }
  0x64   : >> { %3286 = vmatpush.bf16.msra.mxu1 %v2920_v24  ;;  %v3176_v33 = vpack.c.bf16 %v2616_v26, %v2600_v25  ;;  %v1816_v34 = vcvt.s32.f32 %v792_v27  ;;  %v1288_v35 = vunpack.c.2.s8 %v568_v23  ;;  %v1304_v36 = vunpack.c.3.s8 %v568_v23 }
  0x65   : >> { %3299 = vmatpush.bf16.msra.mxu2 %v3048_v29  ;;  %v2056_v37 = vcvt.s32.f32 %v1032_v31  ;;  %v2072_v38 = vcvt.s32.f32 %v1048_v32  ;;  %v1544_v39 = vunpack.c.2.s8 %v632_v28  ;;  %v1560_v40 = vunpack.c.3.s8 %v632_v28 }
  0x66   : >> { %3312 = vmatpush.bf16.msra.mxu3 %v3176_v33  ;;  %v2776_v41 = vpack.c.bf16 %v1816_v34, %v1800_v30  ;;  %v2312_v42 = vcvt.s32.f32 %v1288_v35  ;;  %v2328_v43 = vcvt.s32.f32 %v1304_v36  ;;  %v744_v44 = vunpack.c.0.s8 %v440_v9  ;;  %v473_v33 = vld [vmem:[%s6786_s14 + $0x188] sm:$0xff] }
  0x67   : >> { %v2904_v45 = vpack.c.bf16 %v2072_v38, %v2056_v37  ;;  %v2568_v46 = vcvt.s32.f32 %v1544_v39  ;;  %v2584_v47 = vcvt.s32.f32 %v1560_v40  ;;  %v760_v48 = vunpack.c.1.s8 %v440_v9 }
  0x68   : >> { %3274 = vmatpush.bf16.msra.mxu0 %v2776_v41  ;;  %v3032_v49 = vpack.c.bf16 %v2328_v43, %v2312_v42  ;;  %v1768_v50 = vcvt.s32.f32 %v744_v44  ;;  %v1000_v51 = vunpack.c.0.s8 %v504_v18  ;;  %v1016_v52 = vunpack.c.1.s8 %v504_v18  ;;  %v537_v42 = vld [vmem:[%s6786_s14 + $0x388] sm:$0xff] }
  0x69   : >> { %3287 = vmatpush.bf16.msra.mxu1 %v2904_v45  ;;  %v3160_v54 = vpack.c.bf16 %v2584_v47, %v2568_v46  ;;  %v1784_v55 = vcvt.s32.f32 %v760_v48  ;;  %v1256_v56 = vunpack.c.0.s8 %v568_v23  ;;  %v1272_v57 = vunpack.c.1.s8 %v568_v23  ;;  %v601_v47 = vld [vmem:[%s6786_s14 + $0x588] sm:$0xff] }
  0x6a   : >> { %3300 = vmatpush.bf16.msra.mxu2 %v3032_v49  ;;  %v2024_v58 = vcvt.s32.f32 %v1000_v51  ;;  %v2040_v59 = vcvt.s32.f32 %v1016_v52  ;;  %v1512_v60 = vunpack.c.0.s8 %v632_v28  ;;  %v1528_v61 = vunpack.c.1.s8 %v632_v28  ;;  %v665_v52 = vld [vmem:[%s6786_s14 + $0x788] sm:$0xff] }
  0x6b   : >> { %3313 = vmatpush.bf16.msra.mxu3 %v3160_v54  ;;  %v2760_v63 = vpack.c.bf16 %v1784_v55, %v1768_v50  ;;  %v2280_v0 = vcvt.s32.f32 %v1256_v56  ;;  %v2296_v1 = vcvt.s32.f32 %v1272_v57  ;;  %v712_v2 = vunpack.c.2.s8 %v424_v53 }
  0x6c   : >> { %v2888_v4 = vpack.c.bf16 %v2040_v59, %v2024_v58  ;;  %v2536_v5 = vcvt.s32.f32 %v1512_v60  ;;  %v2552_v6 = vcvt.s32.f32 %v1528_v61  ;;  %v728_v7 = vunpack.c.3.s8 %v424_v53 }
  0x6d   : >> { %3275 = vmatpush.bf16.msra.mxu0 %v2760_v63  ;;  %v3016_v9 = vpack.c.bf16 %v2296_v1, %v2280_v0  ;;  %v1736_v10 = vcvt.s32.f32 %v712_v2  ;;  %v968_v11 = vunpack.c.2.s8 %v488_v62  ;;  %v984_v12 = vunpack.c.3.s8 %v488_v62 }
  0x6e   : >> { %3288 = vmatpush.bf16.msra.mxu1 %v2888_v4  ;;  %v3144_v13 = vpack.c.bf16 %v2552_v6, %v2536_v5  ;;  %v1752_v14 = vcvt.s32.f32 %v728_v7  ;;  %v1224_v15 = vunpack.c.2.s8 %v552_v3  ;;  %v1240_v16 = vunpack.c.3.s8 %v552_v3 }
  0x6f   : >> { %3301 = vmatpush.bf16.msra.mxu2 %v3016_v9  ;;  %v1992_v17 = vcvt.s32.f32 %v968_v11  ;;  %v2008_v18 = vcvt.s32.f32 %v984_v12  ;;  %v1480_v19 = vunpack.c.2.s8 %v616_v8  ;;  %v1496_v20 = vunpack.c.3.s8 %v616_v8 }
  0x70   : >> { %3314 = vmatpush.bf16.msra.mxu3 %v3144_v13  ;;  %v2744_v21 = vpack.c.bf16 %v1752_v14, %v1736_v10  ;;  %v2248_v22 = vcvt.s32.f32 %v1224_v15  ;;  %v2264_v23 = vcvt.s32.f32 %v1240_v16  ;;  %v680_v24 = vunpack.c.0.s8 %v424_v53  ;;  %v457_v13 = vld [vmem:[%s6786_s14 + $0x108] sm:$0xff] }
  0x71   : >> { %v2872_v25 = vpack.c.bf16 %v2008_v18, %v1992_v17  ;;  %v2504_v26 = vcvt.s32.f32 %v1480_v19  ;;  %v2520_v27 = vcvt.s32.f32 %v1496_v20  ;;  %v696_v28 = vunpack.c.1.s8 %v424_v53 }
  0x72   : >> { %3276 = vmatpush.bf16.msra.mxu0 %v2744_v21  ;;  %v3000_v29 = vpack.c.bf16 %v2264_v23, %v2248_v22  ;;  %v1704_v30 = vcvt.s32.f32 %v680_v24  ;;  %v936_v31 = vunpack.c.0.s8 %v488_v62  ;;  %v952_v32 = vunpack.c.1.s8 %v488_v62  ;;  %v521_v22 = vld [vmem:[%s6786_s14 + $0x308] sm:$0xff] }
  0x73   : >> { %3289 = vmatpush.bf16.msra.mxu1 %v2872_v25  ;;  %v3128_v34 = vpack.c.bf16 %v2520_v27, %v2504_v26  ;;  %v1720_v35 = vcvt.s32.f32 %v696_v28  ;;  %v1192_v36 = vunpack.c.0.s8 %v552_v3  ;;  %v1208_v37 = vunpack.c.1.s8 %v552_v3  ;;  %v585_v27 = vld [vmem:[%s6786_s14 + $0x508] sm:$0xff] }
  0x74   : >> { %3302 = vmatpush.bf16.msra.mxu2 %v3000_v29  ;;  %v1960_v38 = vcvt.s32.f32 %v936_v31  ;;  %v1976_v39 = vcvt.s32.f32 %v952_v32  ;;  %v1448_v40 = vunpack.c.0.s8 %v616_v8  ;;  %v1464_v41 = vunpack.c.1.s8 %v616_v8  ;;  %v649_v32 = vld [vmem:[%s6786_s14 + $0x708] sm:$0xff] }
  0x75   : >> { %3315 = vmatpush.bf16.msra.mxu3 %v3128_v34  ;;  %v2728_v43 = vpack.c.bf16 %v1720_v35, %v1704_v30  ;;  %v2216_v44 = vcvt.s32.f32 %v1192_v36  ;;  %v2232_v45 = vcvt.s32.f32 %v1208_v37  ;;  %v905_v46 = vunpack.c.2.s8 %v473_v33 }
  0x76   : >> { %v2856_v48 = vpack.c.bf16 %v1976_v39, %v1960_v38  ;;  %v2472_v49 = vcvt.s32.f32 %v1448_v40  ;;  %v2488_v50 = vcvt.s32.f32 %v1464_v41  ;;  %v921_v51 = vunpack.c.3.s8 %v473_v33 }
  0x77   : >> { %3277 = vmatpush.bf16.msra.mxu0 %v2728_v43  ;;  %v2984_v53 = vpack.c.bf16 %v2232_v45, %v2216_v44  ;;  %v1929_v54 = vcvt.s32.f32 %v905_v46  ;;  %v1161_v55 = vunpack.c.2.s8 %v537_v42  ;;  %v1177_v56 = vunpack.c.3.s8 %v537_v42 }
  0x78   : >> { %3290 = vmatpush.bf16.msra.mxu1 %v2856_v48  ;;  %v3112_v57 = vpack.c.bf16 %v2488_v50, %v2472_v49  ;;  %v1945_v58 = vcvt.s32.f32 %v921_v51  ;;  %v1417_v59 = vunpack.c.2.s8 %v601_v47  ;;  %v1433_v60 = vunpack.c.3.s8 %v601_v47 }
  0x79   : >> { %3303 = vmatpush.bf16.msra.mxu2 %v2984_v53  ;;  %v2185_v61 = vcvt.s32.f32 %v1161_v55  ;;  %v2201_v62 = vcvt.s32.f32 %v1177_v56  ;;  %v1673_v63 = vunpack.c.2.s8 %v665_v52  ;;  %v1689_v0 = vunpack.c.3.s8 %v665_v52 }
  0x7a   : >> { %3316 = vmatpush.bf16.msra.mxu3 %v3112_v57  ;;  %v2841_v1 = vpack.c.bf16 %v1945_v58, %v1929_v54  ;;  %v2441_v2 = vcvt.s32.f32 %v1417_v59  ;;  %v2457_v3 = vcvt.s32.f32 %v1433_v60  ;;  %v873_v4 = vunpack.c.0.s8 %v473_v33  ;;  %v441_v57 = vld [vmem:[%s6786_s14 + $0x88] sm:$0xff] }
  0x7b   : >> { %v2969_v5 = vpack.c.bf16 %v2201_v62, %v2185_v61  ;;  %v2697_v6 = vcvt.s32.f32 %v1673_v63  ;;  %v2713_v7 = vcvt.s32.f32 %v1689_v0  ;;  %v889_v8 = vunpack.c.1.s8 %v473_v33 }
  0x7c   : >> { %3322 = vmatpush.bf16.msrb.mxu0 %v2841_v1  ;;  %v3097_v9 = vpack.c.bf16 %v2457_v3, %v2441_v2  ;;  %v1897_v10 = vcvt.s32.f32 %v873_v4  ;;  %v1129_v11 = vunpack.c.0.s8 %v537_v42  ;;  %v1145_v12 = vunpack.c.1.s8 %v537_v42  ;;  %v505_v2 = vld [vmem:[%s6786_s14 + $0x288] sm:$0xff] }
  0x7d   : >> { %3335 = vmatpush.bf16.msrb.mxu1 %v2969_v5  ;;  %v3225_v14 = vpack.c.bf16 %v2713_v7, %v2697_v6  ;;  %v1913_v15 = vcvt.s32.f32 %v889_v8  ;;  %v1385_v16 = vunpack.c.0.s8 %v601_v47  ;;  %v1401_v17 = vunpack.c.1.s8 %v601_v47  ;;  %v569_v7 = vld [vmem:[%s6786_s14 + $0x488] sm:$0xff] }
  0x7e   : >> { %3348 = vmatpush.bf16.msrb.mxu2 %v3097_v9  ;;  %v2153_v18 = vcvt.s32.f32 %v1129_v11  ;;  %v2169_v19 = vcvt.s32.f32 %v1145_v12  ;;  %v1641_v20 = vunpack.c.0.s8 %v665_v52  ;;  %v1657_v21 = vunpack.c.1.s8 %v665_v52  ;;  %v633_v12 = vld [vmem:[%s6786_s14 + $0x688] sm:$0xff] }
  0x7f   : >> { %3361 = vmatpush.bf16.msrb.mxu3 %v3225_v14  ;;  %v2825_v23 = vpack.c.bf16 %v1913_v15, %v1897_v10  ;;  %v2409_v24 = vcvt.s32.f32 %v1385_v16  ;;  %v2425_v25 = vcvt.s32.f32 %v1401_v17  ;;  %v841_v26 = vunpack.c.2.s8 %v457_v13 }
  0x80   : >> { %v2953_v28 = vpack.c.bf16 %v2169_v19, %v2153_v18  ;;  %v2665_v29 = vcvt.s32.f32 %v1641_v20  ;;  %v2681_v30 = vcvt.s32.f32 %v1657_v21  ;;  %v857_v31 = vunpack.c.3.s8 %v457_v13 }
  0x81   : >> { %3323 = vmatpush.bf16.msrb.mxu0 %v2825_v23  ;;  %v3081_v33 = vpack.c.bf16 %v2425_v25, %v2409_v24  ;;  %v1865_v34 = vcvt.s32.f32 %v841_v26  ;;  %v1097_v35 = vunpack.c.2.s8 %v521_v22  ;;  %v1113_v36 = vunpack.c.3.s8 %v521_v22 }
  0x82   : >> { %3336 = vmatpush.bf16.msrb.mxu1 %v2953_v28  ;;  %v3209_v37 = vpack.c.bf16 %v2681_v30, %v2665_v29  ;;  %v1881_v38 = vcvt.s32.f32 %v857_v31  ;;  %v1353_v39 = vunpack.c.2.s8 %v585_v27  ;;  %v1369_v40 = vunpack.c.3.s8 %v585_v27 }
  0x83   : >> { %3349 = vmatpush.bf16.msrb.mxu2 %v3081_v33  ;;  %v2121_v41 = vcvt.s32.f32 %v1097_v35  ;;  %v2137_v42 = vcvt.s32.f32 %v1113_v36  ;;  %v1609_v43 = vunpack.c.2.s8 %v649_v32  ;;  %v1625_v44 = vunpack.c.3.s8 %v649_v32 }
  0x84   : >> { %3362 = vmatpush.bf16.msrb.mxu3 %v3209_v37  ;;  %v2809_v45 = vpack.c.bf16 %v1881_v38, %v1865_v34  ;;  %v2377_v46 = vcvt.s32.f32 %v1353_v39  ;;  %v2393_v47 = vcvt.s32.f32 %v1369_v40  ;;  %v809_v48 = vunpack.c.0.s8 %v457_v13  ;;  %v418_v37 = vld [vmem:[%s6824_s25 + $0x8] sm:$0xff] }
  0x85   : >> { %v2937_v49 = vpack.c.bf16 %v2137_v42, %v2121_v41  ;;  %v2633_v50 = vcvt.s32.f32 %v1609_v43  ;;  %v2649_v51 = vcvt.s32.f32 %v1625_v44  ;;  %v825_v52 = vunpack.c.1.s8 %v457_v13 }
  0x86   : >> { %3324 = vmatpush.bf16.msrb.mxu0 %v2809_v45  ;;  %v3065_v53 = vpack.c.bf16 %v2393_v47, %v2377_v46  ;;  %v1833_v54 = vcvt.s32.f32 %v809_v48  ;;  %v1065_v55 = vunpack.c.0.s8 %v521_v22  ;;  %v1081_v56 = vunpack.c.1.s8 %v521_v22  ;;  %v425_v46 = vld [vmem:[%s6786_s14 + $0x8] sm:$0xff] }
  0x87   : >> { %3337 = vmatpush.bf16.msrb.mxu1 %v2937_v49  ;;  %v3193_v58 = vpack.c.bf16 %v2649_v51, %v2633_v50  ;;  %v1849_v59 = vcvt.s32.f32 %v825_v52  ;;  %v1321_v60 = vunpack.c.0.s8 %v585_v27  ;;  %v1337_v61 = vunpack.c.1.s8 %v585_v27  ;;  %v489_v51 = vld [vmem:[%s6786_s14 + $0x208] sm:$0xff] }
  0x88   : >> { %3350 = vmatpush.bf16.msrb.mxu2 %v3065_v53  ;;  %v2089_v62 = vcvt.s32.f32 %v1065_v55  ;;  %v2105_v63 = vcvt.s32.f32 %v1081_v56  ;;  %v1577_v0 = vunpack.c.0.s8 %v649_v32  ;;  %v1593_v1 = vunpack.c.1.s8 %v649_v32  ;;  %v553_v56 = vld [vmem:[%s6786_s14 + $0x408] sm:$0xff] }
  0x89   : >> { %3363 = vmatpush.bf16.msrb.mxu3 %v3193_v58  ;;  %v2793_v3 = vpack.c.bf16 %v1849_v59, %v1833_v54  ;;  %v2345_v4 = vcvt.s32.f32 %v1321_v60  ;;  %v2361_v5 = vcvt.s32.f32 %v1337_v61  ;;  %v777_v6 = vunpack.c.2.s8 %v441_v57  ;;  %v617_v61 = vld [vmem:[%s6786_s14 + $0x608] sm:$0xff] }
  0x8a   : >> { %v2921_v8 = vpack.c.bf16 %v2105_v63, %v2089_v62  ;;  %v2601_v9 = vcvt.s32.f32 %v1577_v0  ;;  %v2617_v10 = vcvt.s32.f32 %v1593_v1  ;;  %v793_v11 = vunpack.c.3.s8 %v441_v57 }
  0x8b   : >> { %3325 = vmatpush.bf16.msrb.mxu0 %v2793_v3  ;;  %v3049_v13 = vpack.c.bf16 %v2361_v5, %v2345_v4  ;;  %v1801_v14 = vcvt.s32.f32 %v777_v6  ;;  %v1033_v15 = vunpack.c.2.s8 %v505_v2  ;;  %v1049_v16 = vunpack.c.3.s8 %v505_v2 }
  0x8c   : >> { %3338 = vmatpush.bf16.msrb.mxu1 %v2921_v8  ;;  %v3177_v17 = vpack.c.bf16 %v2617_v10, %v2601_v9  ;;  %v1817_v18 = vcvt.s32.f32 %v793_v11  ;;  %v1289_v19 = vunpack.c.2.s8 %v569_v7  ;;  %v1305_v20 = vunpack.c.3.s8 %v569_v7 }
  0x8d   : >> { %3351 = vmatpush.bf16.msrb.mxu2 %v3049_v13  ;;  %v2057_v21 = vcvt.s32.f32 %v1033_v15  ;;  %v2073_v22 = vcvt.s32.f32 %v1049_v16  ;;  %v1545_v23 = vunpack.c.2.s8 %v633_v12  ;;  %v1561_v24 = vunpack.c.3.s8 %v633_v12 }
  0x8e   : >> { %3364 = vmatpush.bf16.msrb.mxu3 %v3177_v17  ;;  %v2777_v25 = vpack.c.bf16 %v1817_v18, %v1801_v14  ;;  %v2313_v26 = vcvt.s32.f32 %v1289_v19  ;;  %v2329_v27 = vcvt.s32.f32 %v1305_v20  ;;  %v745_v28 = vunpack.c.0.s8 %v441_v57 }
  0x8f   : >> { %v2905_v29 = vpack.c.bf16 %v2073_v22, %v2057_v21  ;;  %v2569_v30 = vcvt.s32.f32 %v1545_v23  ;;  %v2585_v31 = vcvt.s32.f32 %v1561_v24  ;;  %v761_v32 = vunpack.c.1.s8 %v441_v57 }
  0x90   : >> { %3326 = vmatpush.bf16.msrb.mxu0 %v2777_v25  ;;  %v3033_v33 = vpack.c.bf16 %v2329_v27, %v2313_v26  ;;  %v1769_v34 = vcvt.s32.f32 %v745_v28  ;;  %v1001_v35 = vunpack.c.0.s8 %v505_v2  ;;  %v1017_v36 = vunpack.c.1.s8 %v505_v2  ;;  %v417_v2 = vld [vmem:[%s6824_s25] sm:$0xff]  ;;  %v474_v27 = vld [vmem:[%s6786_s14 + $0x190] sm:$0xff] }
  0x91   : >> { %3339 = vmatpush.bf16.msrb.mxu1 %v2905_v29  ;;  %v3161_v38 = vpack.c.bf16 %v2585_v31, %v2569_v30  ;;  %v1785_v39 = vcvt.s32.f32 %v761_v32  ;;  %v1257_v40 = vunpack.c.0.s8 %v569_v7  ;;  %v1273_v41 = vunpack.c.1.s8 %v569_v7 }
  0x92   : >> { %3352 = vmatpush.bf16.msrb.mxu2 %v3033_v33  ;;  %v2025_v42 = vcvt.s32.f32 %v1001_v35  ;;  %v2041_v43 = vcvt.s32.f32 %v1017_v36  ;;  %v1513_v44 = vunpack.c.0.s8 %v633_v12  ;;  %v1529_v45 = vunpack.c.1.s8 %v633_v12  ;;  %v538_v36 = vld [vmem:[%s6786_s14 + $0x390] sm:$0xff] }
  0x93   : >> { %3365 = vmatpush.bf16.msrb.mxu3 %v3161_v38  ;;  %v2761_v47 = vpack.c.bf16 %v1785_v39, %v1769_v34  ;;  %v2281_v48 = vcvt.s32.f32 %v1257_v40  ;;  %v2297_v49 = vcvt.s32.f32 %v1273_v41  ;;  %v3260_v50 = vunpack.c.l.b16 %v418_v37  ;;  %v602_v41 = vld [vmem:[%s6786_s14 + $0x590] sm:$0xff] }
  0x94   : >> { %v2889_v52 = vpack.c.bf16 %v2041_v43, %v2025_v42  ;;  %v2537_v53 = vcvt.s32.f32 %v1513_v44  ;;  %v2553_v54 = vcvt.s32.f32 %v1529_v45  ;;  %v3261_v55 = vunpack.c.h.b16 %v418_v37 }
  0x95   : >> { %3327 = vmatpush.bf16.msrb.mxu0 %v2761_v47  ;;  %v3017_v57 = vpack.c.bf16 %v2297_v49, %v2281_v48  ;;  %v6830_v58 = vpack.c.b16 %v3260_v50, %v3260_v50  ;;  %v713_v59 = vunpack.c.2.s8 %v425_v46  ;;  %v729_v60 = vunpack.c.3.s8 %v425_v46 }
  0x96   : >> { %3340 = vmatpush.bf16.msrb.mxu1 %v2889_v52  ;;  %v3145_v62 = vpack.c.bf16 %v2553_v54, %v2537_v53  ;;  %v6833_v63 = vpack.c.b16 %v3261_v55, %v3261_v55  ;;  %v969_v0 = vunpack.c.2.s8 %v489_v51  ;;  %v985_v1 = vunpack.c.3.s8 %v489_v51 }
  0x97   : >> { %3353 = vmatpush.bf16.msrb.mxu2 %v3017_v57  ;;  %v1737_v3 = vcvt.s32.f32 %v713_v59  ;;  %v1753_v4 = vcvt.s32.f32 %v729_v60  ;;  %v1225_v5 = vunpack.c.2.s8 %v553_v56  ;;  %v1241_v6 = vunpack.c.3.s8 %v553_v56 }
  0x98   : >> { %3366 = vmatpush.bf16.msrb.mxu3 %v3145_v62  ;;  %3304 = vmatmul.bf16.vlgmr.msra.gmra.mxu2 %v6830_v58  ;;  %v1993_v7 = vcvt.s32.f32 %v969_v0  ;;  %v2009_v8 = vcvt.s32.f32 %v985_v1  ;;  %v1481_v9 = vunpack.c.2.s8 %v617_v61  ;;  %v1497_v10 = vunpack.c.3.s8 %v617_v61 }
  0x99   : >> { %3317 = vmatmul.bf16.vlgmr.msra.gmra.mxu3 %v6833_v63  ;;  %v2745_v11 = vpack.c.bf16 %v1753_v4, %v1737_v3  ;;  %v2249_v12 = vcvt.s32.f32 %v1225_v5  ;;  %v2265_v13 = vcvt.s32.f32 %v1241_v6  ;;  %v3258_v14 = vunpack.c.l.b16 %v417_v2 }
  0x9a   : >> { %v2873_v15 = vpack.c.bf16 %v2009_v8, %v1993_v7  ;;  %v2505_v16 = vcvt.s32.f32 %v1481_v9  ;;  %v2521_v17 = vcvt.s32.f32 %v1497_v10  ;;  %v3259_v18 = vunpack.c.h.b16 %v417_v2  ;;  %v458_v9 = vld [vmem:[%s6786_s14 + $0x110] sm:$0xff] }
  0x9b   : >> { %3328 = vmatpush.bf16.msrb.mxu0 %v2745_v11  ;;  %v3001_v19 = vpack.c.bf16 %v2265_v13, %v2249_v12  ;;  %v6838_v20 = vpack.c.b16 %v3258_v14, %v3258_v14  ;;  %v681_v21 = vunpack.c.0.s8 %v425_v46  ;;  %v697_v22 = vunpack.c.1.s8 %v425_v46  ;;  %v666_v46 = vld [vmem:[%s6786_s14 + $0x790] sm:$0xff] }
  0x9c   : >> { %3341 = vmatpush.bf16.msrb.mxu1 %v2873_v15  ;;  %v3129_v23 = vpack.c.bf16 %v2521_v17, %v2505_v16  ;;  %v6840_v24 = vpack.c.b16 %v3259_v18, %v3259_v18  ;;  %v937_v25 = vunpack.c.0.s8 %v489_v51  ;;  %v953_v26 = vunpack.c.1.s8 %v489_v51  ;;  %v522_v18 = vld [vmem:[%s6786_s14 + $0x310] sm:$0xff] }
  0x9d   : >> { %3354 = vmatpush.bf16.msrb.mxu2 %v3001_v19  ;;  %3278 = vmatmul.bf16.vlgmr.msra.gmra.mxu0 %v6838_v20  ;;  %v1705_v28 = vcvt.s32.f32 %v681_v21  ;;  %v1721_v29 = vcvt.s32.f32 %v697_v22  ;;  %v1193_v30 = vunpack.c.0.s8 %v553_v56  ;;  %v1209_v31 = vunpack.c.1.s8 %v553_v56 }
  0x9e   : >> { %3367 = vmatpush.bf16.msrb.mxu3 %v3129_v23  ;;  %3291 = vmatmul.bf16.vlgmr.msra.gmra.mxu1 %v6840_v24  ;;  %v1961_v32 = vcvt.s32.f32 %v937_v25  ;;  %v1977_v33 = vcvt.s32.f32 %v953_v26  ;;  %v1449_v34 = vunpack.c.0.s8 %v617_v61  ;;  %v1465_v35 = vunpack.c.1.s8 %v617_v61  ;;  %v586_v25 = vld [vmem:[%s6786_s14 + $0x510] sm:$0xff] }
  0x9f   : >> { %v2729_v37 = vpack.c.bf16 %v1721_v29, %v1705_v28  ;;  %v2217_v38 = vcvt.s32.f32 %v1193_v30  ;;  %v2233_v39 = vcvt.s32.f32 %v1209_v31  ;;  %v906_v40 = vunpack.c.2.s8 %v474_v27  ;;  %v650_v30 = vld [vmem:[%s6786_s14 + $0x710] sm:$0xff] }
  0xa0   : >> { %v2857_v42 = vpack.c.bf16 %v1977_v33, %v1961_v32  ;;  %v2473_v43 = vcvt.s32.f32 %v1449_v34  ;;  %v2489_v44 = vcvt.s32.f32 %v1465_v35  ;;  %v922_v45 = vunpack.c.3.s8 %v474_v27 }
  0xa1   : >> { %3329 = vmatpush.bf16.msrb.mxu0 %v2729_v37  ;;  %v2985_v47 = vpack.c.bf16 %v2233_v39, %v2217_v38  ;;  %v1930_v48 = vcvt.s32.f32 %v906_v40  ;;  %v1162_v49 = vunpack.c.2.s8 %v538_v36  ;;  %v1178_v50 = vunpack.c.3.s8 %v538_v36 }
  0xa2   : >> { %3342 = vmatpush.bf16.msrb.mxu1 %v2857_v42  ;;  %v3113_v51 = vpack.c.bf16 %v2489_v44, %v2473_v43  ;;  %v1946_v52 = vcvt.s32.f32 %v922_v45  ;;  %v1418_v53 = vunpack.c.2.s8 %v602_v41  ;;  %v1434_v54 = vunpack.c.3.s8 %v602_v41 }
  0xa3   : >> { %3355 = vmatpush.bf16.msrb.mxu2 %v2985_v47  ;;  %v2186_v55 = vcvt.s32.f32 %v1162_v49  ;;  %v2202_v56 = vcvt.s32.f32 %v1178_v50  ;;  %v1674_v57 = vunpack.c.2.s8 %v666_v46  ;;  %v1690_v59 = vunpack.c.3.s8 %v666_v46 }
  0xa4   : >> { %3368 = vmatpush.bf16.msrb.mxu3 %v3113_v51  ;;  %v2842_v60 = vpack.c.bf16 %v1946_v52, %v1930_v48  ;;  %v2442_v61 = vcvt.s32.f32 %v1418_v53  ;;  %v2458_v62 = vcvt.s32.f32 %v1434_v54  ;;  %v874_v0 = vunpack.c.0.s8 %v474_v27 }
  0xa5   : >> { %v2970_v1 = vpack.c.bf16 %v2202_v56, %v2186_v55  ;;  %v2698_v2 = vcvt.s32.f32 %v1674_v57  ;;  %v2714_v3 = vcvt.s32.f32 %v1690_v59  ;;  %v890_v4 = vunpack.c.1.s8 %v474_v27  ;;  %v442_v55 = vld [vmem:[%s6786_s14 + $0x90] sm:$0xff] }
  0xa6   : >> { %3374 = vmatpush.bf16.msra.mxu0 %v2842_v60  ;;  %v3098_v5 = vpack.c.bf16 %v2458_v62, %v2442_v61  ;;  %v1898_v6 = vcvt.s32.f32 %v874_v0  ;;  %v1130_v7 = vunpack.c.0.s8 %v538_v36  ;;  %v1146_v8 = vunpack.c.1.s8 %v538_v36 }
  0xa7   : >> { %3387 = vmatpush.bf16.msra.mxu1 %v2970_v1  ;;  %v3226_v10 = vpack.c.bf16 %v2714_v3, %v2698_v2  ;;  %v1914_v11 = vcvt.s32.f32 %v890_v4  ;;  %v1386_v12 = vunpack.c.0.s8 %v602_v41  ;;  %v1402_v13 = vunpack.c.1.s8 %v602_v41  ;;  %v506_v2 = vld [vmem:[%s6786_s14 + $0x290] sm:$0xff] }
  0xa8   : >> { %3400 = vmatpush.bf16.msra.mxu2 %v3098_v5  ;;  %v2154_v14 = vcvt.s32.f32 %v1130_v7  ;;  %v2170_v15 = vcvt.s32.f32 %v1146_v8  ;;  %v1642_v16 = vunpack.c.0.s8 %v666_v46  ;;  %v1658_v17 = vunpack.c.1.s8 %v666_v46  ;;  %v570_v7 = vld [vmem:[%s6786_s14 + $0x490] sm:$0xff] }
  0xa9   : >> { %3413 = vmatpush.bf16.msra.mxu3 %v3226_v10  ;;  %v2826_v19 = vpack.c.bf16 %v1914_v11, %v1898_v6  ;;  %v2410_v21 = vcvt.s32.f32 %v1386_v12  ;;  %v2426_v22 = vcvt.s32.f32 %v1402_v13  ;;  %v842_v23 = vunpack.c.2.s8 %v458_v9  ;;  %3356 = vmatmul.bf16.vlgmr.msrb.gmra.mxu2 %v6830_v58  ;;  %v634_v12 = vld [vmem:[%s6786_s14 + $0x690] sm:$0xff] }
  0xaa   : >> { %v2954_v26 = vpack.c.bf16 %v2170_v15, %v2154_v14  ;;  %v2666_v27 = vcvt.s32.f32 %v1642_v16  ;;  %v2682_v28 = vcvt.s32.f32 %v1658_v17  ;;  %v858_v29 = vunpack.c.3.s8 %v458_v9  ;;  %3369 = vmatmul.bf16.vlgmr.msrb.gmra.mxu3 %v6833_v63 }
  0xab   : >> { %3375 = vmatpush.bf16.msra.mxu0 %v2826_v19  ;;  %v3082_v31 = vpack.c.bf16 %v2426_v22, %v2410_v21  ;;  %v1866_v32 = vcvt.s32.f32 %v842_v23  ;;  %v1098_v33 = vunpack.c.2.s8 %v522_v18  ;;  %v1114_v34 = vunpack.c.3.s8 %v522_v18 }
  0xac   : >> { %3388 = vmatpush.bf16.msra.mxu1 %v2954_v26  ;;  %v3210_v35 = vpack.c.bf16 %v2682_v28, %v2666_v27  ;;  %v1882_v36 = vcvt.s32.f32 %v858_v29  ;;  %v1354_v37 = vunpack.c.2.s8 %v586_v25  ;;  %v1370_v38 = vunpack.c.3.s8 %v586_v25 }
  0xad   : >> { %3401 = vmatpush.bf16.msra.mxu2 %v3082_v31  ;;  %v2122_v39 = vcvt.s32.f32 %v1098_v33  ;;  %v2138_v40 = vcvt.s32.f32 %v1114_v34  ;;  %v1610_v41 = vunpack.c.2.s8 %v650_v30  ;;  %v1626_v42 = vunpack.c.3.s8 %v650_v30  ;;  %3330 = vmatmul.bf16.vlgmr.msrb.gmra.mxu0 %v6838_v20 }
  0xae   : >> { %3414 = vmatpush.bf16.msra.mxu3 %v3210_v35  ;;  %v2810_v43 = vpack.c.bf16 %v1882_v36, %v1866_v32  ;;  %v2378_v44 = vcvt.s32.f32 %v1354_v37  ;;  %v2394_v45 = vcvt.s32.f32 %v1370_v38  ;;  %v810_v46 = vunpack.c.0.s8 %v458_v9  ;;  %3343 = vmatmul.bf16.vlgmr.msrb.gmra.mxu1 %v6840_v24 }
  0xaf   : >> { %v2938_v47 = vpack.c.bf16 %v2138_v40, %v2122_v39  ;;  %v2634_v48 = vcvt.s32.f32 %v1610_v41  ;;  %v2650_v49 = vcvt.s32.f32 %v1626_v42  ;;  %v826_v50 = vunpack.c.1.s8 %v458_v9  ;;  %v426_v39 = vld [vmem:[%s6786_s14 + $0x10] sm:$0xff] }
  0xb0   : >> { %3376 = vmatpush.bf16.msra.mxu0 %v2810_v43  ;;  %v3066_v51 = vpack.c.bf16 %v2394_v45, %v2378_v44  ;;  %v1834_v52 = vcvt.s32.f32 %v810_v46  ;;  %v1066_v53 = vunpack.c.0.s8 %v522_v18  ;;  %v1082_v54 = vunpack.c.1.s8 %v522_v18 }
  0xb1   : >> { %3389 = vmatpush.bf16.msra.mxu1 %v2938_v47  ;;  %v3194_v56 = vpack.c.bf16 %v2650_v49, %v2634_v48  ;;  %v1850_v57 = vcvt.s32.f32 %v826_v50  ;;  %v1322_v59 = vunpack.c.0.s8 %v586_v25  ;;  %v1338_v60 = vunpack.c.1.s8 %v586_v25  ;;  %v490_v48 = vld [vmem:[%s6786_s14 + $0x210] sm:$0xff] }
  0xb2   : >> { %3402 = vmatpush.bf16.msra.mxu2 %v3066_v51  ;;  %v2090_v61 = vcvt.s32.f32 %v1066_v53  ;;  %v2106_v62 = vcvt.s32.f32 %v1082_v54  ;;  %v1578_v0 = vunpack.c.0.s8 %v650_v30  ;;  %v1594_v1 = vunpack.c.1.s8 %v650_v30  ;;  %v554_v53 = vld [vmem:[%s6786_s14 + $0x410] sm:$0xff] }
  0xb3   : >> { %3415 = vmatpush.bf16.msra.mxu3 %v3194_v56  ;;  %v2794_v3 = vpack.c.bf16 %v1850_v57, %v1834_v52  ;;  %v2346_v4 = vcvt.s32.f32 %v1322_v59  ;;  %v2362_v5 = vcvt.s32.f32 %v1338_v60  ;;  %v778_v6 = vunpack.c.2.s8 %v442_v55  ;;  %v618_v59 = vld [vmem:[%s6786_s14 + $0x610] sm:$0xff] }
  0xb4   : >> { %v2922_v8 = vpack.c.bf16 %v2106_v62, %v2090_v61  ;;  %v2602_v9 = vcvt.s32.f32 %v1578_v0  ;;  %v2618_v10 = vcvt.s32.f32 %v1594_v1  ;;  %v794_v11 = vunpack.c.3.s8 %v442_v55 }
  0xb5   : >> { %3377 = vmatpush.bf16.msra.mxu0 %v2794_v3  ;;  %v3050_v13 = vpack.c.bf16 %v2362_v5, %v2346_v4  ;;  %v1802_v14 = vcvt.s32.f32 %v778_v6  ;;  %v1034_v15 = vunpack.c.2.s8 %v506_v2  ;;  %v1050_v16 = vunpack.c.3.s8 %v506_v2 }
  0xb6   : >> { %3390 = vmatpush.bf16.msra.mxu1 %v2922_v8  ;;  %v3178_v17 = vpack.c.bf16 %v2618_v10, %v2602_v9  ;;  %v1818_v18 = vcvt.s32.f32 %v794_v11  ;;  %v1290_v19 = vunpack.c.2.s8 %v570_v7  ;;  %v1306_v21 = vunpack.c.3.s8 %v570_v7 }
  0xb7   : >> { %3403 = vmatpush.bf16.msra.mxu2 %v3050_v13  ;;  %v2058_v22 = vcvt.s32.f32 %v1034_v15  ;;  %v2074_v23 = vcvt.s32.f32 %v1050_v16  ;;  %v1546_v25 = vunpack.c.2.s8 %v634_v12  ;;  %v1562_v26 = vunpack.c.3.s8 %v634_v12 }
  0xb8   : >> { %3416 = vmatpush.bf16.msra.mxu3 %v3178_v17  ;;  %v2778_v27 = vpack.c.bf16 %v1818_v18, %v1802_v14  ;;  %v2314_v28 = vcvt.s32.f32 %v1290_v19  ;;  %v2330_v29 = vcvt.s32.f32 %v1306_v21  ;;  %v746_v30 = vunpack.c.0.s8 %v442_v55 }
  0xb9   : >> { %v2906_v31 = vpack.c.bf16 %v2074_v23, %v2058_v22  ;;  %v2570_v32 = vcvt.s32.f32 %v1546_v25  ;;  %v2586_v33 = vcvt.s32.f32 %v1562_v26  ;;  %v762_v34 = vunpack.c.1.s8 %v442_v55  ;;  %v475_v22 = vld [vmem:[%s6786_s14 + $0x198] sm:$0xff] }
  0xba   : >> { %3378 = vmatpush.bf16.msra.mxu0 %v2778_v27  ;;  %v3034_v35 = vpack.c.bf16 %v2330_v29, %v2314_v28  ;;  %v1770_v36 = vcvt.s32.f32 %v746_v30  ;;  %v1002_v37 = vunpack.c.0.s8 %v506_v2  ;;  %v1018_v38 = vunpack.c.1.s8 %v506_v2 }
  0xbb   : >> { %3391 = vmatpush.bf16.msra.mxu1 %v2906_v31  ;;  %v3162_v40 = vpack.c.bf16 %v2586_v33, %v2570_v32  ;;  %v1786_v41 = vcvt.s32.f32 %v762_v34  ;;  %v1258_v42 = vunpack.c.0.s8 %v570_v7  ;;  %v1274_v43 = vunpack.c.1.s8 %v570_v7  ;;  %v539_v32 = vld [vmem:[%s6786_s14 + $0x398] sm:$0xff] }
  0xbc   : >> { %3404 = vmatpush.bf16.msra.mxu2 %v3034_v35  ;;  %v2026_v44 = vcvt.s32.f32 %v1002_v37  ;;  %v2042_v45 = vcvt.s32.f32 %v1018_v38  ;;  %v1514_v46 = vunpack.c.0.s8 %v634_v12  ;;  %v1530_v47 = vunpack.c.1.s8 %v634_v12  ;;  %v603_v37 = vld [vmem:[%s6786_s14 + $0x598] sm:$0xff] }
  0xbd   : >> { %3417 = vmatpush.bf16.msra.mxu3 %v3162_v40  ;;  %v2762_v49 = vpack.c.bf16 %v1786_v41, %v1770_v36  ;;  %v2282_v50 = vcvt.s32.f32 %v1258_v42  ;;  %v2298_v51 = vcvt.s32.f32 %v1274_v43  ;;  %v714_v52 = vunpack.c.2.s8 %v426_v39  ;;  %v667_v42 = vld [vmem:[%s6786_s14 + $0x798] sm:$0xff] }
  0xbe   : >> { %v2890_v54 = vpack.c.bf16 %v2042_v45, %v2026_v44  ;;  %v2538_v55 = vcvt.s32.f32 %v1514_v46  ;;  %v2554_v56 = vcvt.s32.f32 %v1530_v47  ;;  %v730_v57 = vunpack.c.3.s8 %v426_v39 }
  0xbf   : >> { %3379 = vmatpush.bf16.msra.mxu0 %v2762_v49  ;;  %v3018_v60 = vpack.c.bf16 %v2298_v51, %v2282_v50  ;;  %v1738_v61 = vcvt.s32.f32 %v714_v52  ;;  %v970_v62 = vunpack.c.2.s8 %v490_v48  ;;  %v986_v0 = vunpack.c.3.s8 %v490_v48 }
  0xc0   : >> { %3392 = vmatpush.bf16.msra.mxu1 %v2890_v54  ;;  %v3146_v1 = vpack.c.bf16 %v2554_v56, %v2538_v55  ;;  %v1754_v2 = vcvt.s32.f32 %v730_v57  ;;  %v1226_v3 = vunpack.c.2.s8 %v554_v53  ;;  %v1242_v4 = vunpack.c.3.s8 %v554_v53 }
  0xc1   : >> { %3405 = vmatpush.bf16.msra.mxu2 %v3018_v60  ;;  %v1994_v5 = vcvt.s32.f32 %v970_v62  ;;  %v2010_v6 = vcvt.s32.f32 %v986_v0  ;;  %v1482_v7 = vunpack.c.2.s8 %v618_v59  ;;  %v1498_v8 = vunpack.c.3.s8 %v618_v59 }
  0xc2   : >> { %3418 = vmatpush.bf16.msra.mxu3 %v3146_v1  ;;  %v2746_v9 = vpack.c.bf16 %v1754_v2, %v1738_v61  ;;  %v2250_v10 = vcvt.s32.f32 %v1226_v3  ;;  %v2266_v11 = vcvt.s32.f32 %v1242_v4  ;;  %v682_v12 = vunpack.c.0.s8 %v426_v39 }
  0xc3   : >> { %v2874_v13 = vpack.c.bf16 %v2010_v6, %v1994_v5  ;;  %v2506_v14 = vcvt.s32.f32 %v1482_v7  ;;  %v2522_v15 = vcvt.s32.f32 %v1498_v8  ;;  %v698_v16 = vunpack.c.1.s8 %v426_v39  ;;  %v459_v5 = vld [vmem:[%s6786_s14 + $0x118] sm:$0xff] }
  0xc4   : >> { %3380 = vmatpush.bf16.msra.mxu0 %v2746_v9  ;;  %v3002_v17 = vpack.c.bf16 %v2266_v11, %v2250_v10  ;;  %v1706_v18 = vcvt.s32.f32 %v682_v12  ;;  %v938_v19 = vunpack.c.0.s8 %v490_v48  ;;  %v954_v21 = vunpack.c.1.s8 %v490_v48 }
  0xc5   : >> { %3393 = vmatpush.bf16.msra.mxu1 %v2874_v13  ;;  %v3130_v23 = vpack.c.bf16 %v2522_v15, %v2506_v14  ;;  %v1722_v25 = vcvt.s32.f32 %v698_v16  ;;  %v1194_v26 = vunpack.c.0.s8 %v554_v53  ;;  %v1210_v27 = vunpack.c.1.s8 %v554_v53  ;;  %v523_v14 = vld [vmem:[%s6786_s14 + $0x318] sm:$0xff] }
  0xc6   : >> { %3406 = vmatpush.bf16.msra.mxu2 %v3002_v17  ;;  %v1962_v28 = vcvt.s32.f32 %v938_v19  ;;  %v1978_v29 = vcvt.s32.f32 %v954_v21  ;;  %v1450_v30 = vunpack.c.0.s8 %v618_v59  ;;  %v1466_v31 = vunpack.c.1.s8 %v618_v59  ;;  %v587_v19 = vld [vmem:[%s6786_s14 + $0x518] sm:$0xff] }
  0xc7   : >> { %3419 = vmatpush.bf16.msra.mxu3 %v3130_v23  ;;  %v2730_v33 = vpack.c.bf16 %v1722_v25, %v1706_v18  ;;  %v2218_v34 = vcvt.s32.f32 %v1194_v26  ;;  %v2234_v35 = vcvt.s32.f32 %v1210_v27  ;;  %v907_v36 = vunpack.c.2.s8 %v475_v22  ;;  %v651_v26 = vld [vmem:[%s6786_s14 + $0x718] sm:$0xff] }
  0xc8   : >> { %v2858_v38 = vpack.c.bf16 %v1978_v29, %v1962_v28  ;;  %v2474_v39 = vcvt.s32.f32 %v1450_v30  ;;  %v2490_v40 = vcvt.s32.f32 %v1466_v31  ;;  %v923_v41 = vunpack.c.3.s8 %v475_v22 }
  0xc9   : >> { %3381 = vmatpush.bf16.msra.mxu0 %v2730_v33  ;;  %v2986_v43 = vpack.c.bf16 %v2234_v35, %v2218_v34  ;;  %v1931_v44 = vcvt.s32.f32 %v907_v36  ;;  %v1163_v45 = vunpack.c.2.s8 %v539_v32  ;;  %v1179_v46 = vunpack.c.3.s8 %v539_v32 }
  0xca   : >> { %3394 = vmatpush.bf16.msra.mxu1 %v2858_v38  ;;  %v3114_v47 = vpack.c.bf16 %v2490_v40, %v2474_v39  ;;  %v1947_v48 = vcvt.s32.f32 %v923_v41  ;;  %v1419_v49 = vunpack.c.2.s8 %v603_v37  ;;  %v1435_v50 = vunpack.c.3.s8 %v603_v37 }
  0xcb   : >> { %3407 = vmatpush.bf16.msra.mxu2 %v2986_v43  ;;  %v2187_v51 = vcvt.s32.f32 %v1163_v45  ;;  %v2203_v52 = vcvt.s32.f32 %v1179_v46  ;;  %v1675_v53 = vunpack.c.2.s8 %v667_v42  ;;  %v1691_v54 = vunpack.c.3.s8 %v667_v42 }
  0xcc   : >> { %3420 = vmatpush.bf16.msra.mxu3 %v3114_v47  ;;  %v2843_v55 = vpack.c.bf16 %v1947_v48, %v1931_v44  ;;  %v2443_v56 = vcvt.s32.f32 %v1419_v49  ;;  %v2459_v57 = vcvt.s32.f32 %v1435_v50  ;;  %v875_v59 = vunpack.c.0.s8 %v475_v22  ;;  %3382 = vmatmul.bf16.vlgmr.msra.gmra.mxu0 %v6838_v20 }
  0xcd   : >> { %v2971_v60 = vpack.c.bf16 %v2203_v52, %v2187_v51  ;;  %v2699_v61 = vcvt.s32.f32 %v1675_v53  ;;  %v2715_v62 = vcvt.s32.f32 %v1691_v54  ;;  %v891_v0 = vunpack.c.1.s8 %v475_v22  ;;  %3395 = vmatmul.bf16.vlgmr.msra.gmra.mxu1 %v6840_v24  ;;  %v443_v51 = vld [vmem:[%s6786_s14 + $0x98] sm:$0xff] }
  0xce   : >> { %3426 = vmatpush.bf16.msrb.mxu0 %v2843_v55  ;;  %v3099_v1 = vpack.c.bf16 %v2459_v57, %v2443_v56  ;;  %v1899_v2 = vcvt.s32.f32 %v875_v59  ;;  %v1131_v3 = vunpack.c.0.s8 %v539_v32  ;;  %v1147_v4 = vunpack.c.1.s8 %v539_v32  ;;  %3408 = vmatmul.bf16.vlgmr.msra.gmra.mxu2 %v6830_v58 }
  0xcf   : >> { %3439 = vmatpush.bf16.msrb.mxu1 %v2971_v60  ;;  %v3227_v6 = vpack.c.bf16 %v2715_v62, %v2699_v61  ;;  %v1915_v7 = vcvt.s32.f32 %v891_v0  ;;  %v1387_v8 = vunpack.c.0.s8 %v603_v37  ;;  %v1403_v9 = vunpack.c.1.s8 %v603_v37  ;;  %3421 = vmatmul.bf16.vlgmr.msra.gmra.mxu3 %v6833_v63  ;;  %v507_v61 = vld [vmem:[%s6786_s14 + $0x298] sm:$0xff] }
  0xd0   : >> { %3452 = vmatpush.bf16.msrb.mxu2 %v3099_v1  ;;  %v2155_v10 = vcvt.s32.f32 %v1131_v3  ;;  %v2171_v11 = vcvt.s32.f32 %v1147_v4  ;;  %v1643_v12 = vunpack.c.0.s8 %v667_v42  ;;  %v1659_v13 = vunpack.c.1.s8 %v667_v42  ;;  %v571_v3 = vld [vmem:[%s6786_s14 + $0x498] sm:$0xff] }
  0xd1   : >> { %3465 = vmatpush.bf16.msrb.mxu3 %v3227_v6  ;;  %v2827_v15 = vpack.c.bf16 %v1915_v7, %v1899_v2  ;;  %v2411_v16 = vcvt.s32.f32 %v1387_v8  ;;  %v2427_v17 = vcvt.s32.f32 %v1403_v9  ;;  %v843_v18 = vunpack.c.2.s8 %v459_v5  ;;  %v635_v8 = vld [vmem:[%s6786_s14 + $0x698] sm:$0xff] }
  0xd2   : >> { %v2955_v21 = vpack.c.bf16 %v2171_v11, %v2155_v10  ;;  %v2667_v22 = vcvt.s32.f32 %v1643_v12  ;;  %v2683_v23 = vcvt.s32.f32 %v1659_v13  ;;  %v859_v25 = vunpack.c.3.s8 %v459_v5 }
  0xd3   : >> { %3427 = vmatpush.bf16.msrb.mxu0 %v2827_v15  ;;  %v3083_v27 = vpack.c.bf16 %v2427_v17, %v2411_v16  ;;  %v1867_v28 = vcvt.s32.f32 %v843_v18  ;;  %v1099_v29 = vunpack.c.2.s8 %v523_v14  ;;  %v1115_v30 = vunpack.c.3.s8 %v523_v14 }
  0xd4   : >> { %3440 = vmatpush.bf16.msrb.mxu1 %v2955_v21  ;;  %v3211_v31 = vpack.c.bf16 %v2683_v23, %v2667_v22  ;;  %v1883_v32 = vcvt.s32.f32 %v859_v25  ;;  %v1355_v33 = vunpack.c.2.s8 %v587_v19  ;;  %v1371_v34 = vunpack.c.3.s8 %v587_v19 }
  0xd5   : >> { %3453 = vmatpush.bf16.msrb.mxu2 %v3083_v27  ;;  %v2123_v35 = vcvt.s32.f32 %v1099_v29  ;;  %v2139_v36 = vcvt.s32.f32 %v1115_v30  ;;  %v1611_v37 = vunpack.c.2.s8 %v651_v26  ;;  %v1627_v38 = vunpack.c.3.s8 %v651_v26 }
  0xd6   : >> { %3466 = vmatpush.bf16.msrb.mxu3 %v3211_v31  ;;  %v2811_v39 = vpack.c.bf16 %v1883_v32, %v1867_v28  ;;  %v2379_v40 = vcvt.s32.f32 %v1355_v33  ;;  %v2395_v41 = vcvt.s32.f32 %v1371_v34  ;;  %v811_v42 = vunpack.c.0.s8 %v459_v5 }
  0xd7   : >> { %v2939_v43 = vpack.c.bf16 %v2139_v36, %v2123_v35  ;;  %v2635_v44 = vcvt.s32.f32 %v1611_v37  ;;  %v2651_v45 = vcvt.s32.f32 %v1627_v38  ;;  %v827_v46 = vunpack.c.1.s8 %v459_v5  ;;  %v427_v35 = vld [vmem:[%s6786_s14 + $0x18] sm:$0xff] }
  0xd8   : >> { %3428 = vmatpush.bf16.msrb.mxu0 %v2811_v39  ;;  %v3067_v47 = vpack.c.bf16 %v2395_v41, %v2379_v40  ;;  %v1835_v48 = vcvt.s32.f32 %v811_v42  ;;  %v1067_v49 = vunpack.c.0.s8 %v523_v14  ;;  %v1083_v50 = vunpack.c.1.s8 %v523_v14 }
  0xd9   : >> { %3441 = vmatpush.bf16.msrb.mxu1 %v2939_v43  ;;  %v3195_v52 = vpack.c.bf16 %v2651_v45, %v2635_v44  ;;  %v1851_v53 = vcvt.s32.f32 %v827_v46  ;;  %v1323_v54 = vunpack.c.0.s8 %v587_v19  ;;  %v1339_v55 = vunpack.c.1.s8 %v587_v19  ;;  %v491_v44 = vld [vmem:[%s6786_s14 + $0x218] sm:$0xff] }
  0xda   : >> { %3454 = vmatpush.bf16.msrb.mxu2 %v3067_v47  ;;  %v2091_v56 = vcvt.s32.f32 %v1067_v49  ;;  %v2107_v57 = vcvt.s32.f32 %v1083_v50  ;;  %v1579_v59 = vunpack.c.0.s8 %v651_v26  ;;  %v1595_v60 = vunpack.c.1.s8 %v651_v26  ;;  %v555_v49 = vld [vmem:[%s6786_s14 + $0x418] sm:$0xff] }
  0xdb   : >> { %3467 = vmatpush.bf16.msrb.mxu3 %v3195_v52  ;;  %v2795_v62 = vpack.c.bf16 %v1851_v53, %v1835_v48  ;;  %v2347_v0 = vcvt.s32.f32 %v1323_v54  ;;  %v2363_v1 = vcvt.s32.f32 %v1339_v55  ;;  %v779_v2 = vunpack.c.2.s8 %v443_v51  ;;  %v619_v54 = vld [vmem:[%s6786_s14 + $0x618] sm:$0xff] }
  0xdc   : >> { %v2923_v4 = vpack.c.bf16 %v2107_v57, %v2091_v56  ;;  %v2603_v5 = vcvt.s32.f32 %v1579_v59  ;;  %v2619_v6 = vcvt.s32.f32 %v1595_v60  ;;  %v795_v7 = vunpack.c.3.s8 %v443_v51 }
  0xdd   : >> { %3429 = vmatpush.bf16.msrb.mxu0 %v2795_v62  ;;  %v3051_v9 = vpack.c.bf16 %v2363_v1, %v2347_v0  ;;  %v1803_v10 = vcvt.s32.f32 %v779_v2  ;;  %v1035_v11 = vunpack.c.2.s8 %v507_v61  ;;  %v1051_v12 = vunpack.c.3.s8 %v507_v61 }
  0xde   : >> { %3442 = vmatpush.bf16.msrb.mxu1 %v2923_v4  ;;  %v3179_v13 = vpack.c.bf16 %v2619_v6, %v2603_v5  ;;  %v1819_v14 = vcvt.s32.f32 %v795_v7  ;;  %v1291_v15 = vunpack.c.2.s8 %v571_v3  ;;  %v1307_v16 = vunpack.c.3.s8 %v571_v3 }
  0xdf   : >> { %3455 = vmatpush.bf16.msrb.mxu2 %v3051_v9  ;;  %v2059_v17 = vcvt.s32.f32 %v1035_v11  ;;  %v2075_v18 = vcvt.s32.f32 %v1051_v12  ;;  %v1547_v19 = vunpack.c.2.s8 %v635_v8  ;;  %v1563_v21 = vunpack.c.3.s8 %v635_v8 }
  0xe0   : >> { %3468 = vmatpush.bf16.msrb.mxu3 %v3179_v13  ;;  %v2779_v22 = vpack.c.bf16 %v1819_v14, %v1803_v10  ;;  %v2315_v23 = vcvt.s32.f32 %v1291_v15  ;;  %v2331_v25 = vcvt.s32.f32 %v1307_v16  ;;  %v747_v26 = vunpack.c.0.s8 %v443_v51 }
  0xe1   : >> { %v2907_v27 = vpack.c.bf16 %v2075_v18, %v2059_v17  ;;  %v2571_v28 = vcvt.s32.f32 %v1547_v19  ;;  %v2587_v29 = vcvt.s32.f32 %v1563_v21  ;;  %v763_v30 = vunpack.c.1.s8 %v443_v51  ;;  %v476_v17 = vld [vmem:[%s6786_s14 + $0x1a0] sm:$0xff] }
  0xe2   : >> { %3430 = vmatpush.bf16.msrb.mxu0 %v2779_v22  ;;  %v3035_v31 = vpack.c.bf16 %v2331_v25, %v2315_v23  ;;  %v1771_v32 = vcvt.s32.f32 %v747_v26  ;;  %v1003_v33 = vunpack.c.0.s8 %v507_v61  ;;  %v1019_v34 = vunpack.c.1.s8 %v507_v61 }
  0xe3   : >> { %3443 = vmatpush.bf16.msrb.mxu1 %v2907_v27  ;;  %v3163_v36 = vpack.c.bf16 %v2587_v29, %v2571_v28  ;;  %v1787_v37 = vcvt.s32.f32 %v763_v30  ;;  %v1259_v38 = vunpack.c.0.s8 %v571_v3  ;;  %v1275_v39 = vunpack.c.1.s8 %v571_v3  ;;  %v540_v28 = vld [vmem:[%s6786_s14 + $0x3a0] sm:$0xff] }
  0xe4   : >> { %3456 = vmatpush.bf16.msrb.mxu2 %v3035_v31  ;;  %v2027_v40 = vcvt.s32.f32 %v1003_v33  ;;  %v2043_v41 = vcvt.s32.f32 %v1019_v34  ;;  %v1515_v42 = vunpack.c.0.s8 %v635_v8  ;;  %v1531_v43 = vunpack.c.1.s8 %v635_v8  ;;  %v604_v33 = vld [vmem:[%s6786_s14 + $0x5a0] sm:$0xff] }
  0xe5   : >> { %3469 = vmatpush.bf16.msrb.mxu3 %v3163_v36  ;;  %v2763_v45 = vpack.c.bf16 %v1787_v37, %v1771_v32  ;;  %v2283_v46 = vcvt.s32.f32 %v1259_v38  ;;  %v2299_v47 = vcvt.s32.f32 %v1275_v39  ;;  %v715_v48 = vunpack.c.2.s8 %v427_v35  ;;  %v668_v38 = vld [vmem:[%s6786_s14 + $0x7a0] sm:$0xff] }
  0xe6   : >> { %v2891_v50 = vpack.c.bf16 %v2043_v41, %v2027_v40  ;;  %v2539_v51 = vcvt.s32.f32 %v1515_v42  ;;  %v2555_v52 = vcvt.s32.f32 %v1531_v43  ;;  %v731_v53 = vunpack.c.3.s8 %v427_v35 }
  0xe7   : >> { %3431 = vmatpush.bf16.msrb.mxu0 %v2763_v45  ;;  %v3019_v55 = vpack.c.bf16 %v2299_v47, %v2283_v46  ;;  %v1739_v56 = vcvt.s32.f32 %v715_v48  ;;  %v971_v57 = vunpack.c.2.s8 %v491_v44  ;;  %v987_v59 = vunpack.c.3.s8 %v491_v44 }
  0xe8   : >> { %3444 = vmatpush.bf16.msrb.mxu1 %v2891_v50  ;;  %v3147_v60 = vpack.c.bf16 %v2555_v52, %v2539_v51  ;;  %v1755_v61 = vcvt.s32.f32 %v731_v53  ;;  %v1227_v62 = vunpack.c.2.s8 %v555_v49  ;;  %v1243_v0 = vunpack.c.3.s8 %v555_v49 }
  0xe9   : >> { %3457 = vmatpush.bf16.msrb.mxu2 %v3019_v55  ;;  %v1995_v1 = vcvt.s32.f32 %v971_v57  ;;  %v2011_v2 = vcvt.s32.f32 %v987_v59  ;;  %v1483_v3 = vunpack.c.2.s8 %v619_v54  ;;  %v1499_v4 = vunpack.c.3.s8 %v619_v54 }
  0xea   : >> { %3470 = vmatpush.bf16.msrb.mxu3 %v3147_v60  ;;  %v2747_v5 = vpack.c.bf16 %v1755_v61, %v1739_v56  ;;  %v2251_v6 = vcvt.s32.f32 %v1227_v62  ;;  %v2267_v7 = vcvt.s32.f32 %v1243_v0  ;;  %v683_v8 = vunpack.c.0.s8 %v427_v35 }
  0xeb   : >> { %v2875_v9 = vpack.c.bf16 %v2011_v2, %v1995_v1  ;;  %v2507_v10 = vcvt.s32.f32 %v1483_v3  ;;  %v2523_v11 = vcvt.s32.f32 %v1499_v4  ;;  %v699_v12 = vunpack.c.1.s8 %v427_v35  ;;  %v460_v1 = vld [vmem:[%s6786_s14 + $0x120] sm:$0xff] }
  0xec   : >> { %3432 = vmatpush.bf16.msrb.mxu0 %v2747_v5  ;;  %v3003_v13 = vpack.c.bf16 %v2267_v7, %v2251_v6  ;;  %v1707_v14 = vcvt.s32.f32 %v683_v8  ;;  %v939_v15 = vunpack.c.0.s8 %v491_v44  ;;  %v955_v16 = vunpack.c.1.s8 %v491_v44 }
  0xed   : >> { %3445 = vmatpush.bf16.msrb.mxu1 %v2875_v9  ;;  %v3131_v18 = vpack.c.bf16 %v2523_v11, %v2507_v10  ;;  %v1723_v19 = vcvt.s32.f32 %v699_v12  ;;  %v1195_v21 = vunpack.c.0.s8 %v555_v49  ;;  %v1211_v22 = vunpack.c.1.s8 %v555_v49  ;;  %v524_v10 = vld [vmem:[%s6786_s14 + $0x320] sm:$0xff] }
  0xee   : >> { %3458 = vmatpush.bf16.msrb.mxu2 %v3003_v13  ;;  %v1963_v23 = vcvt.s32.f32 %v939_v15  ;;  %v1979_v25 = vcvt.s32.f32 %v955_v16  ;;  %v1451_v26 = vunpack.c.0.s8 %v619_v54  ;;  %v1467_v27 = vunpack.c.1.s8 %v619_v54  ;;  %v588_v15 = vld [vmem:[%s6786_s14 + $0x520] sm:$0xff] }
  0xef   : >> { %3471 = vmatpush.bf16.msrb.mxu3 %v3131_v18  ;;  %v2731_v29 = vpack.c.bf16 %v1723_v19, %v1707_v14  ;;  %v2219_v30 = vcvt.s32.f32 %v1195_v21  ;;  %v2235_v31 = vcvt.s32.f32 %v1211_v22  ;;  %v908_v32 = vunpack.c.2.s8 %v476_v17  ;;  %v652_v21 = vld [vmem:[%s6786_s14 + $0x720] sm:$0xff] }
  0xf0   : >> { %v2859_v34 = vpack.c.bf16 %v1979_v25, %v1963_v23  ;;  %v2475_v35 = vcvt.s32.f32 %v1451_v26  ;;  %v2491_v36 = vcvt.s32.f32 %v1467_v27  ;;  %v924_v37 = vunpack.c.3.s8 %v476_v17 }
  0xf1   : >> { %3433 = vmatpush.bf16.msrb.mxu0 %v2731_v29  ;;  %v2987_v39 = vpack.c.bf16 %v2235_v31, %v2219_v30  ;;  %v1932_v40 = vcvt.s32.f32 %v908_v32  ;;  %v1164_v41 = vunpack.c.2.s8 %v540_v28  ;;  %v1180_v42 = vunpack.c.3.s8 %v540_v28 }
  0xf2   : >> { %3446 = vmatpush.bf16.msrb.mxu1 %v2859_v34  ;;  %v3115_v43 = vpack.c.bf16 %v2491_v36, %v2475_v35  ;;  %v1948_v44 = vcvt.s32.f32 %v924_v37  ;;  %v1420_v45 = vunpack.c.2.s8 %v604_v33  ;;  %v1436_v46 = vunpack.c.3.s8 %v604_v33 }
  0xf3   : >> { %3459 = vmatpush.bf16.msrb.mxu2 %v2987_v39  ;;  %v2188_v47 = vcvt.s32.f32 %v1164_v41  ;;  %v2204_v48 = vcvt.s32.f32 %v1180_v42  ;;  %v1676_v49 = vunpack.c.2.s8 %v668_v38  ;;  %v1692_v50 = vunpack.c.3.s8 %v668_v38 }
  0xf4   : >> { %3472 = vmatpush.bf16.msrb.mxu3 %v3115_v43  ;;  %v2844_v51 = vpack.c.bf16 %v1948_v44, %v1932_v40  ;;  %v2444_v52 = vcvt.s32.f32 %v1420_v45  ;;  %v2460_v53 = vcvt.s32.f32 %v1436_v46  ;;  %v876_v54 = vunpack.c.0.s8 %v476_v17  ;;  %3434 = vmatmul.bf16.vlgmr.msrb.gmra.mxu0 %v6838_v20 }
  0xf5   : >> { %v2972_v55 = vpack.c.bf16 %v2204_v48, %v2188_v47  ;;  %v2700_v56 = vcvt.s32.f32 %v1676_v49  ;;  %v2716_v57 = vcvt.s32.f32 %v1692_v50  ;;  %v892_v59 = vunpack.c.1.s8 %v476_v17  ;;  %3447 = vmatmul.bf16.vlgmr.msrb.gmra.mxu1 %v6840_v24  ;;  %v444_v47 = vld [vmem:[%s6786_s14 + $0xa0] sm:$0xff] }
  0xf6   : >> { %3478 = vmatpush.bf16.msra.mxu0 %v2844_v51  ;;  %v3100_v60 = vpack.c.bf16 %v2460_v53, %v2444_v52  ;;  %v1900_v61 = vcvt.s32.f32 %v876_v54  ;;  %v1132_v62 = vunpack.c.0.s8 %v540_v28  ;;  %v1148_v0 = vunpack.c.1.s8 %v540_v28  ;;  %3460 = vmatmul.bf16.vlgmr.msrb.gmra.mxu2 %v6830_v58 }
  0xf7   : >> { %3491 = vmatpush.bf16.msra.mxu1 %v2972_v55  ;;  %v3228_v2 = vpack.c.bf16 %v2716_v57, %v2700_v56  ;;  %v1916_v3 = vcvt.s32.f32 %v892_v59  ;;  %v1388_v4 = vunpack.c.0.s8 %v604_v33  ;;  %v1404_v5 = vunpack.c.1.s8 %v604_v33  ;;  %3473 = vmatmul.bf16.vlgmr.msrb.gmra.mxu3 %v6833_v63  ;;  %v508_v56 = vld [vmem:[%s6786_s14 + $0x2a0] sm:$0xff] }
  0xf8   : >> { %3504 = vmatpush.bf16.msra.mxu2 %v3100_v60  ;;  %v2156_v6 = vcvt.s32.f32 %v1132_v62  ;;  %v2172_v7 = vcvt.s32.f32 %v1148_v0  ;;  %v1644_v8 = vunpack.c.0.s8 %v668_v38  ;;  %v1660_v9 = vunpack.c.1.s8 %v668_v38  ;;  %v572_v62 = vld [vmem:[%s6786_s14 + $0x4a0] sm:$0xff] }
  0xf9   : >> { %3517 = vmatpush.bf16.msra.mxu3 %v3228_v2  ;;  %v2828_v11 = vpack.c.bf16 %v1916_v3, %v1900_v61  ;;  %v2412_v12 = vcvt.s32.f32 %v1388_v4  ;;  %v2428_v13 = vcvt.s32.f32 %v1404_v5  ;;  %v844_v14 = vunpack.c.2.s8 %v460_v1  ;;  %v636_v4 = vld [vmem:[%s6786_s14 + $0x6a0] sm:$0xff] }
  0xfa   : >> { %v2956_v16 = vpack.c.bf16 %v2172_v7, %v2156_v6  ;;  %v2668_v17 = vcvt.s32.f32 %v1644_v8  ;;  %v2684_v18 = vcvt.s32.f32 %v1660_v9  ;;  %v860_v19 = vunpack.c.3.s8 %v460_v1 }
  0xfb   : >> { %3479 = vmatpush.bf16.msra.mxu0 %v2828_v11  ;;  %v3084_v22 = vpack.c.bf16 %v2428_v13, %v2412_v12  ;;  %v1868_v23 = vcvt.s32.f32 %v844_v14  ;;  %v1100_v25 = vunpack.c.2.s8 %v524_v10  ;;  %v1116_v26 = vunpack.c.3.s8 %v524_v10 }
  0xfc   : >> { %3492 = vmatpush.bf16.msra.mxu1 %v2956_v16  ;;  %v3212_v27 = vpack.c.bf16 %v2684_v18, %v2668_v17  ;;  %v1884_v28 = vcvt.s32.f32 %v860_v19  ;;  %v1356_v29 = vunpack.c.2.s8 %v588_v15  ;;  %v1372_v30 = vunpack.c.3.s8 %v588_v15 }
  0xfd   : >> { %3505 = vmatpush.bf16.msra.mxu2 %v3084_v22  ;;  %v2124_v31 = vcvt.s32.f32 %v1100_v25  ;;  %v2140_v32 = vcvt.s32.f32 %v1116_v26  ;;  %v1612_v33 = vunpack.c.2.s8 %v652_v21  ;;  %v1628_v34 = vunpack.c.3.s8 %v652_v21 }
  0xfe   : >> { %3518 = vmatpush.bf16.msra.mxu3 %v3212_v27  ;;  %v2812_v35 = vpack.c.bf16 %v1884_v28, %v1868_v23  ;;  %v2380_v36 = vcvt.s32.f32 %v1356_v29  ;;  %v2396_v37 = vcvt.s32.f32 %v1372_v30  ;;  %v812_v38 = vunpack.c.0.s8 %v460_v1 }
  0xff   : >> { %v2940_v39 = vpack.c.bf16 %v2140_v32, %v2124_v31  ;;  %v2636_v40 = vcvt.s32.f32 %v1612_v33  ;;  %v2652_v41 = vcvt.s32.f32 %v1628_v34  ;;  %v828_v42 = vunpack.c.1.s8 %v460_v1  ;;  %v428_v31 = vld [vmem:[%s6786_s14 + $0x20] sm:$0xff] }
 0x100   : >> { %3480 = vmatpush.bf16.msra.mxu0 %v2812_v35  ;;  %v3068_v43 = vpack.c.bf16 %v2396_v37, %v2380_v36  ;;  %v1836_v44 = vcvt.s32.f32 %v812_v38  ;;  %v1068_v45 = vunpack.c.0.s8 %v524_v10  ;;  %v1084_v46 = vunpack.c.1.s8 %v524_v10 }
 0x101   : >> { %3493 = vmatpush.bf16.msra.mxu1 %v2940_v39  ;;  %v3196_v48 = vpack.c.bf16 %v2652_v41, %v2636_v40  ;;  %v1852_v49 = vcvt.s32.f32 %v828_v42  ;;  %v1324_v50 = vunpack.c.0.s8 %v588_v15  ;;  %v1340_v51 = vunpack.c.1.s8 %v588_v15  ;;  %v492_v40 = vld [vmem:[%s6786_s14 + $0x220] sm:$0xff] }
 0x102   : >> { %3506 = vmatpush.bf16.msra.mxu2 %v3068_v43  ;;  %v2092_v52 = vcvt.s32.f32 %v1068_v45  ;;  %v2108_v53 = vcvt.s32.f32 %v1084_v46  ;;  %v1580_v54 = vunpack.c.0.s8 %v652_v21  ;;  %v1596_v55 = vunpack.c.1.s8 %v652_v21  ;;  %v556_v45 = vld [vmem:[%s6786_s14 + $0x420] sm:$0xff] }
 0x103   : >> { %3519 = vmatpush.bf16.msra.mxu3 %v3196_v48  ;;  %v2796_v57 = vpack.c.bf16 %v1852_v49, %v1836_v44  ;;  %v2348_v59 = vcvt.s32.f32 %v1324_v50  ;;  %v2364_v60 = vcvt.s32.f32 %v1340_v51  ;;  %v780_v61 = vunpack.c.2.s8 %v444_v47  ;;  %v620_v50 = vld [vmem:[%s6786_s14 + $0x620] sm:$0xff] }
 0x104   : >> { %v2924_v0 = vpack.c.bf16 %v2108_v53, %v2092_v52  ;;  %v2604_v1 = vcvt.s32.f32 %v1580_v54  ;;  %v2620_v2 = vcvt.s32.f32 %v1596_v55  ;;  %v796_v3 = vunpack.c.3.s8 %v444_v47 }
 0x105   : >> { %3481 = vmatpush.bf16.msra.mxu0 %v2796_v57  ;;  %v3052_v5 = vpack.c.bf16 %v2364_v60, %v2348_v59  ;;  %v1804_v6 = vcvt.s32.f32 %v780_v61  ;;  %v1036_v7 = vunpack.c.2.s8 %v508_v56  ;;  %v1052_v8 = vunpack.c.3.s8 %v508_v56 }
 0x106   : >> { %3494 = vmatpush.bf16.msra.mxu1 %v2924_v0  ;;  %v3180_v9 = vpack.c.bf16 %v2620_v2, %v2604_v1  ;;  %v1820_v10 = vcvt.s32.f32 %v796_v3  ;;  %v1292_v11 = vunpack.c.2.s8 %v572_v62  ;;  %v1308_v12 = vunpack.c.3.s8 %v572_v62 }
 0x107   : >> { %3507 = vmatpush.bf16.msra.mxu2 %v3052_v5  ;;  %v2060_v13 = vcvt.s32.f32 %v1036_v7  ;;  %v2076_v14 = vcvt.s32.f32 %v1052_v8  ;;  %v1548_v15 = vunpack.c.2.s8 %v636_v4  ;;  %v1564_v16 = vunpack.c.3.s8 %v636_v4 }
 0x108   : >> { %3520 = vmatpush.bf16.msra.mxu3 %v3180_v9  ;;  %v2780_v17 = vpack.c.bf16 %v1820_v10, %v1804_v6  ;;  %v2316_v18 = vcvt.s32.f32 %v1292_v11  ;;  %v2332_v19 = vcvt.s32.f32 %v1308_v12  ;;  %v748_v21 = vunpack.c.0.s8 %v444_v47 }
 0x109   : >> { %v2908_v22 = vpack.c.bf16 %v2076_v14, %v2060_v13  ;;  %v2572_v23 = vcvt.s32.f32 %v1548_v15  ;;  %v2588_v25 = vcvt.s32.f32 %v1564_v16  ;;  %v764_v26 = vunpack.c.1.s8 %v444_v47  ;;  %v477_v13 = vld [vmem:[%s6786_s14 + $0x1a8] sm:$0xff] }
 0x10a   : >> { %3482 = vmatpush.bf16.msra.mxu0 %v2780_v17  ;;  %v3036_v27 = vpack.c.bf16 %v2332_v19, %v2316_v18  ;;  %v1772_v28 = vcvt.s32.f32 %v748_v21  ;;  %v1004_v29 = vunpack.c.0.s8 %v508_v56  ;;  %v1020_v30 = vunpack.c.1.s8 %v508_v56 }
 0x10b   : >> { %3495 = vmatpush.bf16.msra.mxu1 %v2908_v22  ;;  %v3164_v32 = vpack.c.bf16 %v2588_v25, %v2572_v23  ;;  %v1788_v33 = vcvt.s32.f32 %v764_v26  ;;  %v1260_v34 = vunpack.c.0.s8 %v572_v62  ;;  %v1276_v35 = vunpack.c.1.s8 %v572_v62  ;;  %v541_v23 = vld [vmem:[%s6786_s14 + $0x3a8] sm:$0xff] }
 0x10c   : >> { %3508 = vmatpush.bf16.msra.mxu2 %v3036_v27  ;;  %v2028_v36 = vcvt.s32.f32 %v1004_v29  ;;  %v2044_v37 = vcvt.s32.f32 %v1020_v30  ;;  %v1516_v38 = vunpack.c.0.s8 %v636_v4  ;;  %v1532_v39 = vunpack.c.1.s8 %v636_v4  ;;  %v605_v29 = vld [vmem:[%s6786_s14 + $0x5a8] sm:$0xff] }
 0x10d   : >> { %3521 = vmatpush.bf16.msra.mxu3 %v3164_v32  ;;  %v2764_v41 = vpack.c.bf16 %v1788_v33, %v1772_v28  ;;  %v2284_v42 = vcvt.s32.f32 %v1260_v34  ;;  %v2300_v43 = vcvt.s32.f32 %v1276_v35  ;;  %v716_v44 = vunpack.c.2.s8 %v428_v31  ;;  %v669_v34 = vld [vmem:[%s6786_s14 + $0x7a8] sm:$0xff] }
 0x10e   : >> { %v2892_v46 = vpack.c.bf16 %v2044_v37, %v2028_v36  ;;  %v2540_v47 = vcvt.s32.f32 %v1516_v38  ;;  %v2556_v48 = vcvt.s32.f32 %v1532_v39  ;;  %v732_v49 = vunpack.c.3.s8 %v428_v31 }
 0x10f   : >> { %3483 = vmatpush.bf16.msra.mxu0 %v2764_v41  ;;  %v3020_v51 = vpack.c.bf16 %v2300_v43, %v2284_v42  ;;  %v1740_v52 = vcvt.s32.f32 %v716_v44  ;;  %v972_v53 = vunpack.c.2.s8 %v492_v40  ;;  %v988_v54 = vunpack.c.3.s8 %v492_v40 }
 0x110   : >> { %3496 = vmatpush.bf16.msra.mxu1 %v2892_v46  ;;  %v3148_v55 = vpack.c.bf16 %v2556_v48, %v2540_v47  ;;  %v1756_v56 = vcvt.s32.f32 %v732_v49  ;;  %v1228_v57 = vunpack.c.2.s8 %v556_v45  ;;  %v1244_v59 = vunpack.c.3.s8 %v556_v45 }
 0x111   : >> { %3509 = vmatpush.bf16.msra.mxu2 %v3020_v51  ;;  %v1996_v60 = vcvt.s32.f32 %v972_v53  ;;  %v2012_v61 = vcvt.s32.f32 %v988_v54  ;;  %v1484_v62 = vunpack.c.2.s8 %v620_v50  ;;  %v1500_v0 = vunpack.c.3.s8 %v620_v50 }
 0x112   : >> { %3522 = vmatpush.bf16.msra.mxu3 %v3148_v55  ;;  %v2748_v1 = vpack.c.bf16 %v1756_v56, %v1740_v52  ;;  %v2252_v2 = vcvt.s32.f32 %v1228_v57  ;;  %v2268_v3 = vcvt.s32.f32 %v1244_v59  ;;  %v684_v4 = vunpack.c.0.s8 %v428_v31 }
 0x113   : >> { %v2876_v5 = vpack.c.bf16 %v2012_v61, %v1996_v60  ;;  %v2508_v6 = vcvt.s32.f32 %v1484_v62  ;;  %v2524_v7 = vcvt.s32.f32 %v1500_v0  ;;  %v700_v8 = vunpack.c.1.s8 %v428_v31  ;;  %v461_v60 = vld [vmem:[%s6786_s14 + $0x128] sm:$0xff] }
 0x114   : >> { %3484 = vmatpush.bf16.msra.mxu0 %v2748_v1  ;;  %v3004_v9 = vpack.c.bf16 %v2268_v3, %v2252_v2  ;;  %v1708_v10 = vcvt.s32.f32 %v684_v4  ;;  %v940_v11 = vunpack.c.0.s8 %v492_v40  ;;  %v956_v12 = vunpack.c.1.s8 %v492_v40 }
 0x115   : >> { %3497 = vmatpush.bf16.msra.mxu1 %v2876_v5  ;;  %v3132_v14 = vpack.c.bf16 %v2524_v7, %v2508_v6  ;;  %v1724_v15 = vcvt.s32.f32 %v700_v8  ;;  %v1196_v16 = vunpack.c.0.s8 %v556_v45  ;;  %v1212_v17 = vunpack.c.1.s8 %v556_v45  ;;  %v525_v6 = vld [vmem:[%s6786_s14 + $0x328] sm:$0xff] }
 0x116   : >> { %3510 = vmatpush.bf16.msra.mxu2 %v3004_v9  ;;  %v1964_v18 = vcvt.s32.f32 %v940_v11  ;;  %v1980_v19 = vcvt.s32.f32 %v956_v12  ;;  %v1452_v21 = vunpack.c.0.s8 %v620_v50  ;;  %v1468_v22 = vunpack.c.1.s8 %v620_v50  ;;  %v589_v11 = vld [vmem:[%s6786_s14 + $0x528] sm:$0xff] }
 0x117   : >> { %3523 = vmatpush.bf16.msra.mxu3 %v3132_v14  ;;  %v2732_v25 = vpack.c.bf16 %v1724_v15, %v1708_v10  ;;  %v2220_v26 = vcvt.s32.f32 %v1196_v16  ;;  %v2236_v27 = vcvt.s32.f32 %v1212_v17  ;;  %v909_v28 = vunpack.c.2.s8 %v477_v13  ;;  %v653_v16 = vld [vmem:[%s6786_s14 + $0x728] sm:$0xff] }
 0x118   : >> { %v2860_v30 = vpack.c.bf16 %v1980_v19, %v1964_v18  ;;  %v2476_v31 = vcvt.s32.f32 %v1452_v21  ;;  %v2492_v32 = vcvt.s32.f32 %v1468_v22  ;;  %v925_v33 = vunpack.c.3.s8 %v477_v13 }
 0x119   : >> { %3485 = vmatpush.bf16.msra.mxu0 %v2732_v25  ;;  %v2988_v35 = vpack.c.bf16 %v2236_v27, %v2220_v26  ;;  %v1933_v36 = vcvt.s32.f32 %v909_v28  ;;  %v1165_v37 = vunpack.c.2.s8 %v541_v23  ;;  %v1181_v38 = vunpack.c.3.s8 %v541_v23 }
 0x11a   : >> { %3498 = vmatpush.bf16.msra.mxu1 %v2860_v30  ;;  %v3116_v39 = vpack.c.bf16 %v2492_v32, %v2476_v31  ;;  %v1949_v40 = vcvt.s32.f32 %v925_v33  ;;  %v1421_v41 = vunpack.c.2.s8 %v605_v29  ;;  %v1437_v42 = vunpack.c.3.s8 %v605_v29 }
 0x11b   : >> { %3511 = vmatpush.bf16.msra.mxu2 %v2988_v35  ;;  %v2189_v43 = vcvt.s32.f32 %v1165_v37  ;;  %v2205_v44 = vcvt.s32.f32 %v1181_v38  ;;  %v1677_v45 = vunpack.c.2.s8 %v669_v34  ;;  %v1693_v46 = vunpack.c.3.s8 %v669_v34 }
 0x11c   : >> { %3524 = vmatpush.bf16.msra.mxu3 %v3116_v39  ;;  %v2845_v47 = vpack.c.bf16 %v1949_v40, %v1933_v36  ;;  %v2445_v48 = vcvt.s32.f32 %v1421_v41  ;;  %v2461_v49 = vcvt.s32.f32 %v1437_v42  ;;  %v877_v50 = vunpack.c.0.s8 %v477_v13  ;;  %3486 = vmatmul.bf16.vlgmr.msra.gmra.mxu0 %v6838_v20 }
 0x11d   : >> { %v2973_v51 = vpack.c.bf16 %v2205_v44, %v2189_v43  ;;  %v2701_v52 = vcvt.s32.f32 %v1677_v45  ;;  %v2717_v53 = vcvt.s32.f32 %v1693_v46  ;;  %v893_v54 = vunpack.c.1.s8 %v477_v13  ;;  %3499 = vmatmul.bf16.vlgmr.msra.gmra.mxu1 %v6840_v24  ;;  %v445_v43 = vld [vmem:[%s6786_s14 + $0xa8] sm:$0xff] }
 0x11e   : >> { %3530 = vmatpush.bf16.msrb.mxu0 %v2845_v47  ;;  %v3101_v55 = vpack.c.bf16 %v2461_v49, %v2445_v48  ;;  %v1901_v56 = vcvt.s32.f32 %v877_v50  ;;  %v1133_v57 = vunpack.c.0.s8 %v541_v23  ;;  %v1149_v59 = vunpack.c.1.s8 %v541_v23  ;;  %3512 = vmatmul.bf16.vlgmr.msra.gmra.mxu2 %v6830_v58 }
 0x11f   : >> { %3543 = vmatpush.bf16.msrb.mxu1 %v2973_v51  ;;  %v3229_v61 = vpack.c.bf16 %v2717_v53, %v2701_v52  ;;  %v1917_v62 = vcvt.s32.f32 %v893_v54  ;;  %v1389_v0 = vunpack.c.0.s8 %v605_v29  ;;  %v1405_v1 = vunpack.c.1.s8 %v605_v29  ;;  %3525 = vmatmul.bf16.vlgmr.msra.gmra.mxu3 %v6833_v63  ;;  %v509_v52 = vld [vmem:[%s6786_s14 + $0x2a8] sm:$0xff] }
 0x120   : >> { %3556 = vmatpush.bf16.msrb.mxu2 %v3101_v55  ;;  %v2157_v2 = vcvt.s32.f32 %v1133_v57  ;;  %v2173_v3 = vcvt.s32.f32 %v1149_v59  ;;  %v1645_v4 = vunpack.c.0.s8 %v669_v34  ;;  %v1661_v5 = vunpack.c.1.s8 %v669_v34  ;;  %v573_v57 = vld [vmem:[%s6786_s14 + $0x4a8] sm:$0xff] }
 0x121   : >> { %3569 = vmatpush.bf16.msrb.mxu3 %v3229_v61  ;;  %v2829_v7 = vpack.c.bf16 %v1917_v62, %v1901_v56  ;;  %v2413_v8 = vcvt.s32.f32 %v1389_v0  ;;  %v2429_v9 = vcvt.s32.f32 %v1405_v1  ;;  %v845_v10 = vunpack.c.2.s8 %v461_v60  ;;  %v637_v0 = vld [vmem:[%s6786_s14 + $0x6a8] sm:$0xff] }
 0x122   : >> { %v2957_v12 = vpack.c.bf16 %v2173_v3, %v2157_v2  ;;  %v2669_v13 = vcvt.s32.f32 %v1645_v4  ;;  %v2685_v14 = vcvt.s32.f32 %v1661_v5  ;;  %v861_v15 = vunpack.c.3.s8 %v461_v60 }
 0x123   : >> { %3531 = vmatpush.bf16.msrb.mxu0 %v2829_v7  ;;  %v3085_v17 = vpack.c.bf16 %v2429_v9, %v2413_v8  ;;  %v1869_v18 = vcvt.s32.f32 %v845_v10  ;;  %v1101_v19 = vunpack.c.2.s8 %v525_v6  ;;  %v1117_v21 = vunpack.c.3.s8 %v525_v6  ;;  %v6920_v9 = vpop.f32.mrf.mxu0  ;;  %v6922_v10 = vpop.f32.mrf.mxu1 }
 0x124   : >> { %3544 = vmatpush.bf16.msrb.mxu1 %v2957_v12  ;;  %v3213_v22 = vpack.c.bf16 %v2685_v14, %v2669_v13  ;;  %v1885_v23 = vcvt.s32.f32 %v861_v15  ;;  %v1357_v25 = vunpack.c.2.s8 %v589_v11  ;;  %v1373_v26 = vunpack.c.3.s8 %v589_v11  ;;  %v6924_v15 = vpop.f32.mrf.mxu2 }
 0x125   : >> { %3557 = vmatpush.bf16.msrb.mxu2 %v3085_v17  ;;  %v2125_v27 = vcvt.s32.f32 %v1101_v19  ;;  %v2141_v28 = vcvt.s32.f32 %v1117_v21  ;;  %v1613_v29 = vunpack.c.2.s8 %v653_v16  ;;  %v1629_v30 = vunpack.c.3.s8 %v653_v16 }
 0x126   : >> { %3570 = vmatpush.bf16.msrb.mxu3 %v3213_v22  ;;  %v2813_v31 = vpack.c.bf16 %v1885_v23, %v1869_v18  ;;  %v2381_v32 = vcvt.s32.f32 %v1357_v25  ;;  %v2397_v33 = vcvt.s32.f32 %v1373_v26  ;;  %v813_v34 = vunpack.c.0.s8 %v461_v60 }
 0x127   : >> { %v2941_v35 = vpack.c.bf16 %v2141_v28, %v2125_v27  ;;  %v2637_v36 = vcvt.s32.f32 %v1613_v29  ;;  %v2653_v37 = vcvt.s32.f32 %v1629_v30  ;;  %v829_v38 = vunpack.c.1.s8 %v461_v60 }
 0x128   : >> { %3532 = vmatpush.bf16.msrb.mxu0 %v2813_v31  ;;  %v3069_v39 = vpack.c.bf16 %v2397_v33, %v2381_v32  ;;  %v1837_v40 = vcvt.s32.f32 %v813_v34  ;;  %v1069_v41 = vunpack.c.0.s8 %v525_v6  ;;  %v1085_v42 = vunpack.c.1.s8 %v525_v6  ;;  %v429_v31 = vld [vmem:[%s6786_s14 + $0x28] sm:$0xff] }
 0x129   : >> { %3545 = vmatpush.bf16.msrb.mxu1 %v2941_v35  ;;  %v3197_v44 = vpack.c.bf16 %v2653_v37, %v2637_v36  ;;  %v1853_v45 = vcvt.s32.f32 %v829_v38  ;;  %v1325_v46 = vunpack.c.0.s8 %v589_v11  ;;  %v1341_v47 = vunpack.c.1.s8 %v589_v11 }
 0x12a   : >> { %3558 = vmatpush.bf16.msrb.mxu2 %v3069_v39  ;;  %v2093_v48 = vcvt.s32.f32 %v1069_v41  ;;  %v2109_v49 = vcvt.s32.f32 %v1085_v42  ;;  %v1581_v50 = vunpack.c.0.s8 %v653_v16  ;;  %v1597_v51 = vunpack.c.1.s8 %v653_v16  ;;  %v6926_v16 = vpop.f32.mrf.mxu3 }
 0x12b   : >> { %3571 = vmatpush.bf16.msrb.mxu3 %v3197_v44  ;;  %v2797_v53 = vpack.c.bf16 %v1853_v45, %v1837_v40  ;;  %v2349_v54 = vcvt.s32.f32 %v1325_v46  ;;  %v2365_v55 = vcvt.s32.f32 %v1341_v47  ;;  %v781_v56 = vunpack.c.2.s8 %v445_v43  ;;  %v493_v40 = vld [vmem:[%s6786_s14 + $0x228] sm:$0xff] }
 0x12c   : >> { %v2925_v59 = vpack.c.bf16 %v2109_v49, %v2093_v48  ;;  %v2605_v60 = vcvt.s32.f32 %v1581_v50  ;;  %v2621_v61 = vcvt.s32.f32 %v1597_v51  ;;  %v797_v62 = vunpack.c.3.s8 %v445_v43  ;;  %v557_v45 = vld [vmem:[%s6786_s14 + $0x428] sm:$0xff]  ;;  %v3281_v51 = vpop.f32.mrf.mxu0 }
 0x12d   : >> { %3533 = vmatpush.bf16.msrb.mxu0 %v2797_v53  ;;  %v3053_v1 = vpack.c.bf16 %v2365_v55, %v2349_v54  ;;  %v1805_v2 = vcvt.s32.f32 %v781_v56  ;;  %v1037_v3 = vunpack.c.2.s8 %v509_v52  ;;  %v1053_v4 = vunpack.c.3.s8 %v509_v52  ;;  %v621_v50 = vld [vmem:[%s6786_s14 + $0x628] sm:$0xff] }
 0x12e   : >> { %3546 = vmatpush.bf16.msrb.mxu1 %v2925_v59  ;;  %v3181_v5 = vpack.c.bf16 %v2621_v61, %v2605_v60  ;;  %v1821_v6 = vcvt.s32.f32 %v797_v62  ;;  %v1293_v7 = vunpack.c.2.s8 %v573_v57  ;;  %v1309_v8 = vunpack.c.3.s8 %v573_v57 }
 0x12f   : >> { %3559 = vmatpush.bf16.msrb.mxu2 %v3053_v1  ;;  %v2061_v11 = vcvt.s32.f32 %v1037_v3  ;;  %v2077_v12 = vcvt.s32.f32 %v1053_v4  ;;  %v1549_v13 = vunpack.c.2.s8 %v637_v0  ;;  %v1565_v14 = vunpack.c.3.s8 %v637_v0 }
 0x130   : >> { %3572 = vmatpush.bf16.msrb.mxu3 %v3181_v5  ;;  %v2781_v17 = vpack.c.bf16 %v1821_v6, %v1805_v2  ;;  %v2317_v18 = vcvt.s32.f32 %v1293_v7  ;;  %v2333_v19 = vcvt.s32.f32 %v1309_v8  ;;  %v749_v21 = vunpack.c.0.s8 %v445_v43 }
 0x131   : >> { %v2909_v22 = vpack.c.bf16 %v2077_v12, %v2061_v11  ;;  %v2573_v23 = vcvt.s32.f32 %v1549_v13  ;;  %v2589_v25 = vcvt.s32.f32 %v1565_v14  ;;  %v765_v26 = vunpack.c.1.s8 %v445_v43 }
 0x132   : >> { %3534 = vmatpush.bf16.msrb.mxu0 %v2781_v17  ;;  %v3037_v27 = vpack.c.bf16 %v2333_v19, %v2317_v18  ;;  %v1773_v28 = vcvt.s32.f32 %v749_v21  ;;  %v1005_v29 = vunpack.c.0.s8 %v509_v52  ;;  %v1021_v30 = vunpack.c.1.s8 %v509_v52  ;;  %v3294_v52 = vpop.f32.mrf.mxu1  ;;  %v3320_v59 = vpop.f32.mrf.mxu3 }
 0x133   : >> { %3547 = vmatpush.bf16.msrb.mxu1 %v2909_v22  ;;  %v3165_v32 = vpack.c.bf16 %v2589_v25, %v2573_v23  ;;  %v1789_v33 = vcvt.s32.f32 %v765_v26  ;;  %v1261_v34 = vunpack.c.0.s8 %v573_v57  ;;  %v1277_v35 = vunpack.c.1.s8 %v573_v57  ;;  %v3307_v57 = vpop.f32.mrf.mxu2  ;;  %v478_v22 = vld [vmem:[%s6786_s14 + $0x1b0] sm:$0xff] }
 0x134   : >> { %3560 = vmatpush.bf16.msrb.mxu2 %v3037_v27  ;;  %v2029_v36 = vcvt.s32.f32 %v1005_v29  ;;  %v2045_v37 = vcvt.s32.f32 %v1021_v30  ;;  %v1517_v38 = vunpack.c.0.s8 %v637_v0  ;;  %v1533_v39 = vunpack.c.1.s8 %v637_v0 }
 0x135   : >> { %3573 = vmatpush.bf16.msrb.mxu3 %v3165_v32  ;;  %v2765_v41 = vpack.c.bf16 %v1789_v33, %v1773_v28  ;;  %v2285_v42 = vcvt.s32.f32 %v1261_v34  ;;  %v2301_v43 = vcvt.s32.f32 %v1277_v35  ;;  %v717_v44 = vunpack.c.2.s8 %v429_v31 }
 0x136   : >> { %v2893_v46 = vpack.c.bf16 %v2045_v37, %v2029_v36  ;;  %v2541_v47 = vcvt.s32.f32 %v1517_v38  ;;  %v2557_v48 = vcvt.s32.f32 %v1533_v39  ;;  %v733_v49 = vunpack.c.3.s8 %v429_v31  ;;  %v606_v37 = vld [vmem:[%s6786_s14 + $0x5b0] sm:$0xff] }
 0x137   : >> { %3535 = vmatpush.bf16.msrb.mxu0 %v2765_v41  ;;  %v3021_v53 = vpack.c.bf16 %v2301_v43, %v2285_v42  ;;  %v1741_v54 = vcvt.s32.f32 %v717_v44  ;;  %v973_v55 = vunpack.c.2.s8 %v493_v40  ;;  %v989_v56 = vunpack.c.3.s8 %v493_v40  ;;  %v670_v42 = vld [vmem:[%s6786_s14 + $0x7b0] sm:$0xff] }
 0x138   : >> { %3548 = vmatpush.bf16.msrb.mxu1 %v2893_v46  ;;  %v3149_v60 = vpack.c.bf16 %v2557_v48, %v2541_v47  ;;  %v1757_v61 = vcvt.s32.f32 %v733_v49  ;;  %v1229_v62 = vunpack.c.2.s8 %v557_v45  ;;  %v1245_v0 = vunpack.c.3.s8 %v557_v45 }
 0x139   : >> { %3561 = vmatpush.bf16.msrb.mxu2 %v3021_v53  ;;  %v1997_v1 = vcvt.s32.f32 %v973_v55  ;;  %v2013_v2 = vcvt.s32.f32 %v989_v56  ;;  %v1485_v3 = vunpack.c.2.s8 %v621_v50  ;;  %v1501_v4 = vunpack.c.3.s8 %v621_v50 }
 0x13a   : >> { %3574 = vmatpush.bf16.msrb.mxu3 %v3149_v60  ;;  %v2749_v5 = vpack.c.bf16 %v1757_v61, %v1741_v54  ;;  %v2253_v6 = vcvt.s32.f32 %v1229_v62  ;;  %v2269_v7 = vcvt.s32.f32 %v1245_v0  ;;  %v685_v8 = vunpack.c.0.s8 %v429_v31 }
 0x13b   : >> { %v2877_v11 = vpack.c.bf16 %v2013_v2, %v1997_v1  ;;  %v2509_v12 = vcvt.s32.f32 %v1485_v3  ;;  %v2525_v13 = vcvt.s32.f32 %v1501_v4  ;;  %v701_v14 = vunpack.c.1.s8 %v429_v31  ;;  %v542_v31 = vld [vmem:[%s6786_s14 + $0x3b0] sm:$0xff] }
 0x13c   : >> { %3536 = vmatpush.bf16.msrb.mxu0 %v2749_v5  ;;  %v3005_v17 = vpack.c.bf16 %v2269_v7, %v2253_v6  ;;  %v1709_v18 = vcvt.s32.f32 %v685_v8  ;;  %v941_v19 = vunpack.c.0.s8 %v493_v40  ;;  %v957_v21 = vunpack.c.1.s8 %v493_v40 }
 0x13d   : >> { %3549 = vmatpush.bf16.msrb.mxu1 %v2877_v11  ;;  %v3133_v23 = vpack.c.bf16 %v2525_v13, %v2509_v12  ;;  %v1725_v25 = vcvt.s32.f32 %v701_v14  ;;  %v1197_v26 = vunpack.c.0.s8 %v557_v45  ;;  %v1213_v27 = vunpack.c.1.s8 %v557_v45  ;;  %v462_v11 = vld [vmem:[%s6786_s14 + $0x130] sm:$0xff] }
 0x13e   : >> { %3562 = vmatpush.bf16.msrb.mxu2 %v3005_v17  ;;  %v1965_v28 = vcvt.s32.f32 %v941_v19  ;;  %v1981_v29 = vcvt.s32.f32 %v957_v21  ;;  %v1453_v30 = vunpack.c.0.s8 %v621_v50  ;;  %v1469_v32 = vunpack.c.1.s8 %v621_v50 }
 0x13f   : >> { %3575 = vmatpush.bf16.msrb.mxu3 %v3133_v23  ;;  %v2733_v33 = vpack.c.bf16 %v1725_v25, %v1709_v18  ;;  %v2221_v34 = vcvt.s32.f32 %v1197_v26  ;;  %v2237_v35 = vcvt.s32.f32 %v1213_v27  ;;  %v910_v36 = vunpack.c.2.s8 %v478_v22  ;;  %v526_v18 = vld [vmem:[%s6786_s14 + $0x330] sm:$0xff] }
 0x140   : >> { %v2861_v38 = vpack.c.bf16 %v1981_v29, %v1965_v28  ;;  %v2477_v39 = vcvt.s32.f32 %v1453_v30  ;;  %v2493_v40 = vcvt.s32.f32 %v1469_v32  ;;  %v926_v41 = vunpack.c.3.s8 %v478_v22  ;;  %v590_v25 = vld [vmem:[%s6786_s14 + $0x530] sm:$0xff] }
 0x141   : >> { %3537 = vmatpush.bf16.msrb.mxu0 %v2733_v33  ;;  %v2989_v43 = vpack.c.bf16 %v2237_v35, %v2221_v34  ;;  %v1934_v44 = vcvt.s32.f32 %v910_v36  ;;  %v1166_v45 = vunpack.c.2.s8 %v542_v31  ;;  %v1182_v46 = vunpack.c.3.s8 %v542_v31  ;;  %v654_v34 = vld [vmem:[%s6786_s14 + $0x730] sm:$0xff] }
 0x142   : >> { %3550 = vmatpush.bf16.msrb.mxu1 %v2861_v38  ;;  %v3117_v47 = vpack.c.bf16 %v2493_v40, %v2477_v39  ;;  %v1950_v48 = vcvt.s32.f32 %v926_v41  ;;  %v1422_v49 = vunpack.c.2.s8 %v606_v37  ;;  %v1438_v50 = vunpack.c.3.s8 %v606_v37  ;;  %v3240_v36 = vld [vmem:[#allocation2 + $0x30] sm:$0xff] }
 0x143   : >> { %3563 = vmatpush.bf16.msrb.mxu2 %v2989_v43  ;;  %v2190_v51 = vcvt.s32.f32 %v1166_v45  ;;  %v2206_v52 = vcvt.s32.f32 %v1182_v46  ;;  %v1678_v53 = vunpack.c.2.s8 %v670_v42  ;;  %v1694_v54 = vunpack.c.3.s8 %v670_v42 }
 0x144   : >> { %3576 = vmatpush.bf16.msrb.mxu3 %v3117_v47  ;;  %v2846_v55 = vpack.c.bf16 %v1950_v48, %v1934_v44  ;;  %v2446_v56 = vcvt.s32.f32 %v1422_v49  ;;  %v2462_v57 = vcvt.s32.f32 %v1438_v50  ;;  %v878_v59 = vunpack.c.0.s8 %v478_v22  ;;  %3538 = vmatmul.bf16.vlgmr.msrb.gmra.mxu0 %v6838_v20 }
 0x145   : >> { %v2974_v60 = vpack.c.bf16 %v2206_v52, %v2190_v51  ;;  %v2702_v61 = vcvt.s32.f32 %v1678_v53  ;;  %v2718_v62 = vcvt.s32.f32 %v1694_v54  ;;  %v894_v0 = vunpack.c.1.s8 %v478_v22  ;;  %3551 = vmatmul.bf16.vlgmr.msrb.gmra.mxu1 %v6840_v24 }
 0x146   : >> { %3582 = vmatpush.bf16.msra.mxu0 %v2846_v55  ;;  %v3102_v1 = vpack.c.bf16 %v2462_v57, %v2446_v56  ;;  %v1902_v2 = vcvt.s32.f32 %v878_v59  ;;  %v1134_v3 = vunpack.c.0.s8 %v542_v31  ;;  %v1150_v4 = vunpack.c.1.s8 %v542_v31  ;;  %3564 = vmatmul.bf16.vlgmr.msrb.gmra.mxu2 %v6830_v58  ;;  %v446_v56 = vld [vmem:[%s6786_s14 + $0xb0] sm:$0xff] }
 0x147   : >> { %3595 = vmatpush.bf16.msra.mxu1 %v2974_v60  ;;  %v3230_v5 = vpack.c.bf16 %v2718_v62, %v2702_v61  ;;  %v1918_v6 = vcvt.s32.f32 %v894_v0  ;;  %v1390_v7 = vunpack.c.0.s8 %v606_v37  ;;  %v1406_v8 = vunpack.c.1.s8 %v606_v37  ;;  %3577 = vmatmul.bf16.vlgmr.msrb.gmra.mxu3 %v6833_v63 }
 0x148   : >> { %3608 = vmatpush.bf16.msra.mxu2 %v3102_v1  ;;  %v2158_v12 = vcvt.s32.f32 %v1134_v3  ;;  %v2174_v13 = vcvt.s32.f32 %v1150_v4  ;;  %v1646_v14 = vunpack.c.0.s8 %v670_v42  ;;  %v1662_v17 = vunpack.c.1.s8 %v670_v42  ;;  %v510_v3 = vld [vmem:[%s6786_s14 + $0x2b0] sm:$0xff] }
 0x149   : >> { %3621 = vmatpush.bf16.msra.mxu3 %v3230_v5  ;;  %v2830_v19 = vpack.c.bf16 %v1918_v6, %v1902_v2  ;;  %v2414_v21 = vcvt.s32.f32 %v1390_v7  ;;  %v2430_v22 = vcvt.s32.f32 %v1406_v8  ;;  %v3293_v23 = vadd.f32 %v6922_v10, %v6920_v9  ;;  %v574_v8 = vld [vmem:[%s6786_s14 + $0x4b0] sm:$0xff] }
 0x14a   : >> { %v2958_v26 = vpack.c.bf16 %v2174_v13, %v2158_v12  ;;  %v2670_v27 = vcvt.s32.f32 %v1646_v14  ;;  %v2686_v28 = vcvt.s32.f32 %v1662_v17  ;;  %v846_v29 = vunpack.c.2.s8 %v462_v11  ;;  %v638_v17 = vld [vmem:[%s6786_s14 + $0x6b0] sm:$0xff] }
 0x14b   : >> { %3583 = vmatpush.bf16.msra.mxu0 %v2830_v19  ;;  %v3086_v30 = vpack.c.bf16 %v2430_v22, %v2414_v21  ;;  %v3306_v32 = vadd.f32 %v6924_v15, %v3293_v23  ;;  %v862_v31 = vunpack.c.3.s8 %v462_v11  ;;  %v1102_v33 = vunpack.c.2.s8 %v526_v18 }
 0x14c   : >> { %3596 = vmatpush.bf16.msra.mxu1 %v2958_v26  ;;  %v3214_v35 = vpack.c.bf16 %v2686_v28, %v2670_v27  ;;  %v1870_v37 = vcvt.s32.f32 %v846_v29  ;;  %v1118_v38 = vunpack.c.3.s8 %v526_v18  ;;  %v1358_v39 = vunpack.c.2.s8 %v590_v25  ;;  %v6952_v28 = vpop.f32.mrf.mxu0  ;;  %v6954_v29 = vpop.f32.mrf.mxu1 }
 0x14d   : >> { %3609 = vmatpush.bf16.msra.mxu2 %v3086_v30  ;;  %v3319_v9 = vadd.f32 %v6926_v16, %v3306_v32  ;;  %v1886_v10 = vcvt.s32.f32 %v862_v31  ;;  %v2126_v40 = vcvt.s32.f32 %v1102_v33  ;;  %v1374_v41 = vunpack.c.3.s8 %v590_v25 }
 0x14e   : >> { %3622 = vmatpush.bf16.msra.mxu3 %v3214_v35  ;;  %v2142_v42 = vcvt.s32.f32 %v1118_v38  ;;  %v2382_v43 = vcvt.s32.f32 %v1358_v39  ;;  %v1614_v44 = vunpack.c.2.s8 %v654_v34  ;;  %v1630_v15 = vunpack.c.3.s8 %v654_v34  ;;  %v6958_v35 = vpop.f32.mrf.mxu3 }
 0x14f   : >> { %v4102_v45 = vadd.f32 %v3319_v9, %v3240_v36  ;;  %v2814_v46 = vpack.c.bf16 %v1886_v10, %v1870_v37  ;;  %v2398_v47 = vcvt.s32.f32 %v1374_v41  ;;  %v814_v48 = vunpack.c.0.s8 %v462_v11 }
 0x150   : >> { %v2942_v49 = vpack.c.bf16 %v2142_v42, %v2126_v40  ;;  %v2638_v50 = vcvt.s32.f32 %v1614_v44  ;;  %v2654_v51 = vcvt.s32.f32 %v1630_v15  ;;  %v830_v52 = vunpack.c.1.s8 %v462_v11 }
 0x151   : >> { %4118 = vst [vmem:[#allocation2 + $0x30] sm:$0xff] %v4102_v45  ;;  %3584 = vmatpush.bf16.msra.mxu0 %v2814_v46  ;;  %v3070_v16 = vpack.c.bf16 %v2398_v47, %v2382_v43  ;;  %v1838_v53 = vcvt.s32.f32 %v814_v48  ;;  %v1070_v54 = vunpack.c.0.s8 %v526_v18  ;;  %v1086_v55 = vunpack.c.1.s8 %v526_v18  ;;  %v430_v45 = vld [vmem:[%s6786_s14 + $0x30] sm:$0xff] }
 0x152   : >> { %3597 = vmatpush.bf16.msra.mxu1 %v2942_v49  ;;  %v3198_v57 = vpack.c.bf16 %v2654_v51, %v2638_v50  ;;  %v1854_v59 = vcvt.s32.f32 %v830_v52  ;;  %v1326_v60 = vunpack.c.0.s8 %v590_v25  ;;  %v1342_v61 = vunpack.c.1.s8 %v590_v25 }
 0x153   : >> { %3610 = vmatpush.bf16.msra.mxu2 %v3070_v16  ;;  %v2094_v62 = vcvt.s32.f32 %v1070_v54  ;;  %v2110_v0 = vcvt.s32.f32 %v1086_v55  ;;  %v1582_v1 = vunpack.c.0.s8 %v654_v34  ;;  %v1598_v2 = vunpack.c.1.s8 %v654_v34  ;;  %v6956_v34 = vpop.f32.mrf.mxu2 }
 0x154   : >> { %3623 = vmatpush.bf16.msra.mxu3 %v3198_v57  ;;  %v2798_v4 = vpack.c.bf16 %v1854_v59, %v1838_v53  ;;  %v2350_v5 = vcvt.s32.f32 %v1326_v60  ;;  %v2366_v6 = vcvt.s32.f32 %v1342_v61  ;;  %v782_v7 = vunpack.c.2.s8 %v446_v56  ;;  %v494_v53 = vld [vmem:[%s6786_s14 + $0x230] sm:$0xff] }
 0x155   : >> { %v2926_v11 = vpack.c.bf16 %v2110_v0, %v2094_v62  ;;  %v2606_v12 = vcvt.s32.f32 %v1582_v1  ;;  %v2622_v13 = vcvt.s32.f32 %v1598_v2  ;;  %v798_v14 = vunpack.c.3.s8 %v446_v56  ;;  %v558_v59 = vld [vmem:[%s6786_s14 + $0x430] sm:$0xff]  ;;  %v3333_v2 = vpop.f32.mrf.mxu0 }
 0x156   : >> { %3585 = vmatpush.bf16.msra.mxu0 %v2798_v4  ;;  %v3054_v18 = vpack.c.bf16 %v2366_v6, %v2350_v5  ;;  %v1806_v19 = vcvt.s32.f32 %v782_v7  ;;  %v1038_v21 = vunpack.c.2.s8 %v510_v3  ;;  %v1054_v22 = vunpack.c.3.s8 %v510_v3  ;;  %v622_v1 = vld [vmem:[%s6786_s14 + $0x630] sm:$0xff] }
 0x157   : >> { %3598 = vmatpush.bf16.msra.mxu1 %v2926_v11  ;;  %v3182_v23 = vpack.c.bf16 %v2622_v13, %v2606_v12  ;;  %v1822_v25 = vcvt.s32.f32 %v798_v14  ;;  %v1294_v26 = vunpack.c.2.s8 %v574_v8  ;;  %v1310_v27 = vunpack.c.3.s8 %v574_v8  ;;  %v3372_v11 = vpop.f32.mrf.mxu3 }
 0x158   : >> { %3611 = vmatpush.bf16.msra.mxu2 %v3054_v18  ;;  %v2062_v30 = vcvt.s32.f32 %v1038_v21  ;;  %v2078_v32 = vcvt.s32.f32 %v1054_v22  ;;  %v1550_v31 = vunpack.c.2.s8 %v638_v17  ;;  %v1566_v33 = vunpack.c.3.s8 %v638_v17 }
 0x159   : >> { %3624 = vmatpush.bf16.msra.mxu3 %v3182_v23  ;;  %v2782_v36 = vpack.c.bf16 %v1822_v25, %v1806_v19  ;;  %v2318_v37 = vcvt.s32.f32 %v1294_v26  ;;  %v2334_v38 = vcvt.s32.f32 %v1310_v27  ;;  %v750_v39 = vunpack.c.0.s8 %v446_v56 }
 0x15a   : >> { %v2910_v9 = vpack.c.bf16 %v2078_v32, %v2062_v30  ;;  %v2574_v10 = vcvt.s32.f32 %v1550_v31  ;;  %v2590_v40 = vcvt.s32.f32 %v1566_v33  ;;  %v766_v41 = vunpack.c.1.s8 %v446_v56 }
 0x15b   : >> { %3586 = vmatpush.bf16.msra.mxu0 %v2782_v36  ;;  %v3038_v42 = vpack.c.bf16 %v2334_v38, %v2318_v37  ;;  %v1774_v43 = vcvt.s32.f32 %v750_v39  ;;  %v1006_v44 = vunpack.c.0.s8 %v510_v3  ;;  %v1022_v15 = vunpack.c.1.s8 %v510_v3  ;;  %v3346_v3 = vpop.f32.mrf.mxu1 }
 0x15c   : >> { %3599 = vmatpush.bf16.msra.mxu1 %v2910_v9  ;;  %v3166_v46 = vpack.c.bf16 %v2590_v40, %v2574_v10  ;;  %v1790_v47 = vcvt.s32.f32 %v766_v41  ;;  %v1262_v48 = vunpack.c.0.s8 %v574_v8  ;;  %v1278_v49 = vunpack.c.1.s8 %v574_v8  ;;  %v3359_v8 = vpop.f32.mrf.mxu2  ;;  %v479_v9 = vld [vmem:[%s6786_s14 + $0x1b8] sm:$0xff] }
 0x15d   : >> { %3612 = vmatpush.bf16.msra.mxu2 %v3038_v42  ;;  %v2030_v50 = vcvt.s32.f32 %v1006_v44  ;;  %v2046_v51 = vcvt.s32.f32 %v1022_v15  ;;  %v1518_v52 = vunpack.c.0.s8 %v638_v17  ;;  %v1534_v16 = vunpack.c.1.s8 %v638_v17 }
 0x15e   : >> { %3625 = vmatpush.bf16.msra.mxu3 %v3166_v46  ;;  %v2766_v54 = vpack.c.bf16 %v1790_v47, %v1774_v43  ;;  %v2286_v55 = vcvt.s32.f32 %v1262_v48  ;;  %v2302_v56 = vcvt.s32.f32 %v1278_v49  ;;  %v718_v57 = vunpack.c.2.s8 %v430_v45 }
 0x15f   : >> { %v2894_v60 = vpack.c.bf16 %v2046_v51, %v2030_v50  ;;  %v2542_v61 = vcvt.s32.f32 %v1518_v52  ;;  %v2558_v62 = vcvt.s32.f32 %v1534_v16  ;;  %v734_v0 = vunpack.c.3.s8 %v430_v45  ;;  %v607_v51 = vld [vmem:[%s6786_s14 + $0x5b8] sm:$0xff] }
 0x160   : >> { %3587 = vmatpush.bf16.msra.mxu0 %v2766_v54  ;;  %v3022_v4 = vpack.c.bf16 %v2302_v56, %v2286_v55  ;;  %v1742_v5 = vcvt.s32.f32 %v718_v57  ;;  %v974_v6 = vunpack.c.2.s8 %v494_v53  ;;  %v990_v7 = vunpack.c.3.s8 %v494_v53  ;;  %v671_v55 = vld [vmem:[%s6786_s14 + $0x7b8] sm:$0xff] }
 0x161   : >> { %3600 = vmatpush.bf16.msra.mxu1 %v2894_v60  ;;  %v3150_v12 = vpack.c.bf16 %v2558_v62, %v2542_v61  ;;  %v1758_v13 = vcvt.s32.f32 %v734_v0  ;;  %v1230_v14 = vunpack.c.2.s8 %v558_v59  ;;  %v1246_v17 = vunpack.c.3.s8 %v558_v59 }
 0x162   : >> { %3613 = vmatpush.bf16.msra.mxu2 %v3022_v4  ;;  %v1998_v18 = vcvt.s32.f32 %v974_v6  ;;  %v2014_v19 = vcvt.s32.f32 %v990_v7  ;;  %v1486_v21 = vunpack.c.2.s8 %v622_v1  ;;  %v1502_v22 = vunpack.c.3.s8 %v622_v1 }
 0x163   : >> { %3626 = vmatpush.bf16.msra.mxu3 %v3150_v12  ;;  %v2750_v23 = vpack.c.bf16 %v1758_v13, %v1742_v5  ;;  %v2254_v25 = vcvt.s32.f32 %v1230_v14  ;;  %v2270_v26 = vcvt.s32.f32 %v1246_v17  ;;  %v686_v27 = vunpack.c.0.s8 %v430_v45 }
 0x164   : >> { %v2878_v30 = vpack.c.bf16 %v2014_v19, %v1998_v18  ;;  %v2510_v32 = vcvt.s32.f32 %v1486_v21  ;;  %v2526_v31 = vcvt.s32.f32 %v1502_v22  ;;  %v702_v33 = vunpack.c.1.s8 %v430_v45  ;;  %v543_v45 = vld [vmem:[%s6786_s14 + $0x3b8] sm:$0xff] }
 0x165   : >> { %3588 = vmatpush.bf16.msra.mxu0 %v2750_v23  ;;  %v3006_v36 = vpack.c.bf16 %v2270_v26, %v2254_v25  ;;  %v1710_v37 = vcvt.s32.f32 %v686_v27  ;;  %v942_v38 = vunpack.c.0.s8 %v494_v53  ;;  %v958_v39 = vunpack.c.1.s8 %v494_v53 }
 0x166   : >> { %3601 = vmatpush.bf16.msra.mxu1 %v2878_v30  ;;  %v3134_v10 = vpack.c.bf16 %v2526_v31, %v2510_v32  ;;  %v1726_v40 = vcvt.s32.f32 %v702_v33  ;;  %v1198_v41 = vunpack.c.0.s8 %v558_v59  ;;  %v1214_v42 = vunpack.c.1.s8 %v558_v59  ;;  %v463_v30 = vld [vmem:[%s6786_s14 + $0x138] sm:$0xff] }
 0x167   : >> { %3614 = vmatpush.bf16.msra.mxu2 %v3006_v36  ;;  %v1966_v43 = vcvt.s32.f32 %v942_v38  ;;  %v1982_v44 = vcvt.s32.f32 %v958_v39  ;;  %v1454_v15 = vunpack.c.0.s8 %v622_v1  ;;  %v1470_v46 = vunpack.c.1.s8 %v622_v1 }
 0x168   : >> { %3627 = vmatpush.bf16.msra.mxu3 %v3134_v10  ;;  %v2734_v47 = vpack.c.bf16 %v1726_v40, %v1710_v37  ;;  %v2222_v48 = vcvt.s32.f32 %v1198_v41  ;;  %v2238_v49 = vcvt.s32.f32 %v1214_v42  ;;  %v911_v50 = vunpack.c.2.s8 %v479_v9  ;;  %v527_v37 = vld [vmem:[%s6786_s14 + $0x338] sm:$0xff] }
 0x169   : >> { %v2862_v52 = vpack.c.bf16 %v1982_v44, %v1966_v43  ;;  %v2478_v16 = vcvt.s32.f32 %v1454_v15  ;;  %v2494_v53 = vcvt.s32.f32 %v1470_v46  ;;  %v927_v54 = vunpack.c.3.s8 %v479_v9  ;;  %v591_v40 = vld [vmem:[%s6786_s14 + $0x538] sm:$0xff] }
 0x16a   : >> { %3589 = vmatpush.bf16.msra.mxu0 %v2734_v47  ;;  %v2990_v56 = vpack.c.bf16 %v2238_v49, %v2222_v48  ;;  %v1935_v57 = vcvt.s32.f32 %v911_v50  ;;  %v1167_v59 = vunpack.c.2.s8 %v543_v45  ;;  %v1183_v60 = vunpack.c.3.s8 %v543_v45  ;;  %v655_v48 = vld [vmem:[%s6786_s14 + $0x738] sm:$0xff]  ;;  %v3241_v50 = vld [vmem:[#allocation2] sm:$0xff] }
 0x16b   : >> { %3602 = vmatpush.bf16.msra.mxu1 %v2862_v52  ;;  %v3118_v61 = vpack.c.bf16 %v2494_v53, %v2478_v16  ;;  %v1951_v62 = vcvt.s32.f32 %v927_v54  ;;  %v1423_v0 = vunpack.c.2.s8 %v607_v51  ;;  %v1439_v1 = vunpack.c.3.s8 %v607_v51 }
 0x16c   : >> { %3615 = vmatpush.bf16.msra.mxu2 %v2990_v56  ;;  %v2191_v2 = vcvt.s32.f32 %v1167_v59  ;;  %v2207_v3 = vcvt.s32.f32 %v1183_v60  ;;  %v1679_v4 = vunpack.c.2.s8 %v671_v55  ;;  %v1695_v5 = vunpack.c.3.s8 %v671_v55 }
 0x16d   : >> { %3628 = vmatpush.bf16.msra.mxu3 %v3118_v61  ;;  %v2847_v6 = vpack.c.bf16 %v1951_v62, %v1935_v57  ;;  %v2447_v7 = vcvt.s32.f32 %v1423_v0  ;;  %v2463_v8 = vcvt.s32.f32 %v1439_v1  ;;  %v879_v11 = vunpack.c.0.s8 %v479_v9  ;;  %3590 = vmatmul.bf16.vlgmr.msra.gmra.mxu0 %v6838_v20 }
 0x16e   : >> { %v2975_v12 = vpack.c.bf16 %v2207_v3, %v2191_v2  ;;  %v2703_v13 = vcvt.s32.f32 %v1679_v4  ;;  %v2719_v14 = vcvt.s32.f32 %v1695_v5  ;;  %v895_v17 = vunpack.c.1.s8 %v479_v9  ;;  %3603 = vmatmul.bf16.vlgmr.msra.gmra.mxu1 %v6840_v24 }
 0x16f   : >> { %3634 = vmatpush.bf16.msrb.mxu0 %v2847_v6  ;;  %v3103_v18 = vpack.c.bf16 %v2463_v8, %v2447_v7  ;;  %v1903_v19 = vcvt.s32.f32 %v879_v11  ;;  %v1135_v21 = vunpack.c.0.s8 %v543_v45  ;;  %v1151_v22 = vunpack.c.1.s8 %v543_v45  ;;  %3616 = vmatmul.bf16.vlgmr.msra.gmra.mxu2 %v6830_v58  ;;  %v447_v7 = vld [vmem:[%s6786_s14 + $0xb8] sm:$0xff] }
 0x170   : >> { %3647 = vmatpush.bf16.msrb.mxu1 %v2975_v12  ;;  %v3231_v23 = vpack.c.bf16 %v2719_v14, %v2703_v13  ;;  %v1919_v25 = vcvt.s32.f32 %v895_v17  ;;  %v1391_v26 = vunpack.c.0.s8 %v607_v51  ;;  %v1407_v27 = vunpack.c.1.s8 %v607_v51  ;;  %3629 = vmatmul.bf16.vlgmr.msra.gmra.mxu3 %v6833_v63 }
 0x171   : >> { %3660 = vmatpush.bf16.msrb.mxu2 %v3103_v18  ;;  %v2159_v32 = vcvt.s32.f32 %v1135_v21  ;;  %v2175_v31 = vcvt.s32.f32 %v1151_v22  ;;  %v1647_v33 = vunpack.c.0.s8 %v671_v55  ;;  %v1663_v36 = vunpack.c.1.s8 %v671_v55  ;;  %v511_v21 = vld [vmem:[%s6786_s14 + $0x2b8] sm:$0xff] }
 0x172   : >> { %3673 = vmatpush.bf16.msrb.mxu3 %v3231_v23  ;;  %v2831_v38 = vpack.c.bf16 %v1919_v25, %v1903_v19  ;;  %v2415_v39 = vcvt.s32.f32 %v1391_v26  ;;  %v2431_v9 = vcvt.s32.f32 %v1407_v27  ;;  %v3345_v10 = vadd.f32 %v6954_v29, %v6952_v28  ;;  %v575_v27 = vld [vmem:[%s6786_s14 + $0x4b8] sm:$0xff] }
 0x173   : >> { %v2959_v41 = vpack.c.bf16 %v2175_v31, %v2159_v32  ;;  %v2671_v42 = vcvt.s32.f32 %v1647_v33  ;;  %v2687_v43 = vcvt.s32.f32 %v1663_v36  ;;  %v847_v44 = vunpack.c.2.s8 %v463_v30  ;;  %v639_v36 = vld [vmem:[%s6786_s14 + $0x6b8] sm:$0xff] }
 0x174   : >> { %3635 = vmatpush.bf16.msrb.mxu0 %v2831_v38  ;;  %v3087_v15 = vpack.c.bf16 %v2431_v9, %v2415_v39  ;;  %v3358_v46 = vadd.f32 %v6956_v34, %v3345_v10  ;;  %v863_v45 = vunpack.c.3.s8 %v463_v30  ;;  %v1103_v47 = vunpack.c.2.s8 %v527_v37 }
 0x175   : >> { %3648 = vmatpush.bf16.msrb.mxu1 %v2959_v41  ;;  %v3215_v49 = vpack.c.bf16 %v2687_v43, %v2671_v42  ;;  %v1871_v51 = vcvt.s32.f32 %v847_v44  ;;  %v1119_v52 = vunpack.c.3.s8 %v527_v37  ;;  %v1359_v16 = vunpack.c.2.s8 %v591_v40  ;;  %v6984_v43 = vpop.f32.mrf.mxu0  ;;  %v6986_v44 = vpop.f32.mrf.mxu1 }
 0x176   : >> { %3661 = vmatpush.bf16.msrb.mxu2 %v3087_v15  ;;  %v3371_v28 = vadd.f32 %v6958_v35, %v3358_v46  ;;  %v1887_v29 = vcvt.s32.f32 %v863_v45  ;;  %v2127_v53 = vcvt.s32.f32 %v1103_v47  ;;  %v1375_v54 = vunpack.c.3.s8 %v591_v40 }
 0x177   : >> { %3674 = vmatpush.bf16.msrb.mxu3 %v3215_v49  ;;  %v2143_v55 = vcvt.s32.f32 %v1119_v52  ;;  %v2383_v56 = vcvt.s32.f32 %v1359_v16  ;;  %v1615_v57 = vunpack.c.2.s8 %v655_v48  ;;  %v1631_v34 = vunpack.c.3.s8 %v655_v48  ;;  %v6990_v49 = vpop.f32.mrf.mxu3 }
 0x178   : >> { %v4103_v59 = vadd.f32 %v3371_v28, %v3241_v50  ;;  %v2815_v60 = vpack.c.bf16 %v1887_v29, %v1871_v51  ;;  %v2399_v61 = vcvt.s32.f32 %v1375_v54  ;;  %v815_v62 = vunpack.c.0.s8 %v463_v30 }
 0x179   : >> { %v2943_v0 = vpack.c.bf16 %v2143_v55, %v2127_v53  ;;  %v2639_v1 = vcvt.s32.f32 %v1615_v57  ;;  %v2655_v2 = vcvt.s32.f32 %v1631_v34  ;;  %v831_v3 = vunpack.c.1.s8 %v463_v30 }
 0x17a   : >> { %4119 = vst [vmem:[#allocation2] sm:$0xff] %v4103_v59  ;;  %3636 = vmatpush.bf16.msrb.mxu0 %v2815_v60  ;;  %v3071_v35 = vpack.c.bf16 %v2399_v61, %v2383_v56  ;;  %v1839_v4 = vcvt.s32.f32 %v815_v62  ;;  %v1071_v5 = vunpack.c.0.s8 %v527_v37  ;;  %v1087_v6 = vunpack.c.1.s8 %v527_v37  ;;  %v431_v59 = vld [vmem:[%s6786_s14 + $0x38] sm:$0xff] }
 0x17b   : >> { %3649 = vmatpush.bf16.msrb.mxu1 %v2943_v0  ;;  %v3199_v8 = vpack.c.bf16 %v2655_v2, %v2639_v1  ;;  %v1855_v11 = vcvt.s32.f32 %v831_v3  ;;  %v1327_v12 = vunpack.c.0.s8 %v591_v40  ;;  %v1343_v13 = vunpack.c.1.s8 %v591_v40 }
 0x17c   : >> { %3662 = vmatpush.bf16.msrb.mxu2 %v3071_v35  ;;  %v2095_v14 = vcvt.s32.f32 %v1071_v5  ;;  %v2111_v17 = vcvt.s32.f32 %v1087_v6  ;;  %v1583_v18 = vunpack.c.0.s8 %v655_v48  ;;  %v1599_v19 = vunpack.c.1.s8 %v655_v48  ;;  %v6988_v48 = vpop.f32.mrf.mxu2 }
 0x17d   : >> { %3675 = vmatpush.bf16.msrb.mxu3 %v3199_v8  ;;  %v2799_v22 = vpack.c.bf16 %v1855_v11, %v1839_v4  ;;  %v2351_v23 = vcvt.s32.f32 %v1327_v12  ;;  %v2367_v25 = vcvt.s32.f32 %v1343_v13  ;;  %v783_v26 = vunpack.c.2.s8 %v447_v7  ;;  %v495_v4 = vld [vmem:[%s6786_s14 + $0x238] sm:$0xff] }
 0x17e   : >> { %v2927_v30 = vpack.c.bf16 %v2111_v17, %v2095_v14  ;;  %v2607_v32 = vcvt.s32.f32 %v1583_v18  ;;  %v2623_v31 = vcvt.s32.f32 %v1599_v19  ;;  %v799_v33 = vunpack.c.3.s8 %v447_v7  ;;  %v559_v11 = vld [vmem:[%s6786_s14 + $0x438] sm:$0xff]  ;;  %v3385_v19 = vpop.f32.mrf.mxu0 }
 0x17f   : >> { %3637 = vmatpush.bf16.msrb.mxu0 %v2799_v22  ;;  %v3055_v37 = vpack.c.bf16 %v2367_v25, %v2351_v23  ;;  %v1807_v38 = vcvt.s32.f32 %v783_v26  ;;  %v1039_v39 = vunpack.c.2.s8 %v511_v21  ;;  %v1055_v9 = vunpack.c.3.s8 %v511_v21  ;;  %v623_v18 = vld [vmem:[%s6786_s14 + $0x638] sm:$0xff] }
 0x180   : >> { %3650 = vmatpush.bf16.msrb.mxu1 %v2927_v30  ;;  %v3183_v10 = vpack.c.bf16 %v2623_v31, %v2607_v32  ;;  %v1823_v40 = vcvt.s32.f32 %v799_v33  ;;  %v1295_v41 = vunpack.c.2.s8 %v575_v27  ;;  %v1311_v42 = vunpack.c.3.s8 %v575_v27  ;;  %v3424_v30 = vpop.f32.mrf.mxu3 }
 0x181   : >> { %3663 = vmatpush.bf16.msrb.mxu2 %v3055_v37  ;;  %v2063_v15 = vcvt.s32.f32 %v1039_v39  ;;  %v2079_v46 = vcvt.s32.f32 %v1055_v9  ;;  %v1551_v45 = vunpack.c.2.s8 %v639_v36  ;;  %v1567_v47 = vunpack.c.3.s8 %v639_v36 }
 0x182   : >> { %3676 = vmatpush.bf16.msrb.mxu3 %v3183_v10  ;;  %v2783_v50 = vpack.c.bf16 %v1823_v40, %v1807_v38  ;;  %v2319_v51 = vcvt.s32.f32 %v1295_v41  ;;  %v2335_v52 = vcvt.s32.f32 %v1311_v42  ;;  %v751_v16 = vunpack.c.0.s8 %v447_v7 }
 0x183   : >> { %v2911_v28 = vpack.c.bf16 %v2079_v46, %v2063_v15  ;;  %v2575_v29 = vcvt.s32.f32 %v1551_v45  ;;  %v2591_v53 = vcvt.s32.f32 %v1567_v47  ;;  %v767_v54 = vunpack.c.1.s8 %v447_v7 }
 0x184   : >> { %3638 = vmatpush.bf16.msrb.mxu0 %v2783_v50  ;;  %v3039_v55 = vpack.c.bf16 %v2335_v52, %v2319_v51  ;;  %v1775_v56 = vcvt.s32.f32 %v751_v16  ;;  %v1007_v57 = vunpack.c.0.s8 %v511_v21  ;;  %v1023_v34 = vunpack.c.1.s8 %v511_v21  ;;  %v3398_v21 = vpop.f32.mrf.mxu1 }
 0x185   : >> { %3651 = vmatpush.bf16.msrb.mxu1 %v2911_v28  ;;  %v3167_v60 = vpack.c.bf16 %v2591_v53, %v2575_v29  ;;  %v1791_v61 = vcvt.s32.f32 %v767_v54  ;;  %v1263_v62 = vunpack.c.0.s8 %v575_v27  ;;  %v1279_v0 = vunpack.c.1.s8 %v575_v27  ;;  %v3411_v27 = vpop.f32.mrf.mxu2  ;;  %v480_v28 = vld [vmem:[%s6786_s14 + $0x1c0] sm:$0xff] }
 0x186   : >> { %3664 = vmatpush.bf16.msrb.mxu2 %v3039_v55  ;;  %v2031_v1 = vcvt.s32.f32 %v1007_v57  ;;  %v2047_v2 = vcvt.s32.f32 %v1023_v34  ;;  %v1519_v3 = vunpack.c.0.s8 %v639_v36  ;;  %v1535_v35 = vunpack.c.1.s8 %v639_v36 }
 0x187   : >> { %3677 = vmatpush.bf16.msrb.mxu3 %v3167_v60  ;;  %v2767_v5 = vpack.c.bf16 %v1791_v61, %v1775_v56  ;;  %v2287_v6 = vcvt.s32.f32 %v1263_v62  ;;  %v2303_v7 = vcvt.s32.f32 %v1279_v0  ;;  %v719_v8 = vunpack.c.2.s8 %v431_v59 }
 0x188   : >> { %v2895_v12 = vpack.c.bf16 %v2047_v2, %v2031_v1  ;;  %v2543_v13 = vcvt.s32.f32 %v1519_v3  ;;  %v2559_v14 = vcvt.s32.f32 %v1535_v35  ;;  %v735_v17 = vunpack.c.3.s8 %v431_v59  ;;  %v608_v2 = vld [vmem:[%s6786_s14 + $0x5c0] sm:$0xff] }
 0x189   : >> { %3639 = vmatpush.bf16.msrb.mxu0 %v2767_v5  ;;  %v3023_v22 = vpack.c.bf16 %v2303_v7, %v2287_v6  ;;  %v1743_v23 = vcvt.s32.f32 %v719_v8  ;;  %v975_v25 = vunpack.c.2.s8 %v495_v4  ;;  %v991_v26 = vunpack.c.3.s8 %v495_v4  ;;  %v672_v6 = vld [vmem:[%s6786_s14 + $0x7c0] sm:$0xff] }
 0x18a   : >> { %3652 = vmatpush.bf16.msrb.mxu1 %v2895_v12  ;;  %v3151_v32 = vpack.c.bf16 %v2559_v14, %v2543_v13  ;;  %v1759_v31 = vcvt.s32.f32 %v735_v17  ;;  %v1231_v33 = vunpack.c.2.s8 %v559_v11  ;;  %v1247_v36 = vunpack.c.3.s8 %v559_v11 }
 0x18b   : >> { %3665 = vmatpush.bf16.msrb.mxu2 %v3023_v22  ;;  %v1999_v37 = vcvt.s32.f32 %v975_v25  ;;  %v2015_v38 = vcvt.s32.f32 %v991_v26  ;;  %v1487_v39 = vunpack.c.2.s8 %v623_v18  ;;  %v1503_v9 = vunpack.c.3.s8 %v623_v18 }
 0x18c   : >> { %3678 = vmatpush.bf16.msrb.mxu3 %v3151_v32  ;;  %v2751_v10 = vpack.c.bf16 %v1759_v31, %v1743_v23  ;;  %v2255_v40 = vcvt.s32.f32 %v1231_v33  ;;  %v2271_v41 = vcvt.s32.f32 %v1247_v36  ;;  %v687_v42 = vunpack.c.0.s8 %v431_v59 }
 0x18d   : >> { %v2879_v15 = vpack.c.bf16 %v2015_v38, %v1999_v37  ;;  %v2511_v46 = vcvt.s32.f32 %v1487_v39  ;;  %v2527_v45 = vcvt.s32.f32 %v1503_v9  ;;  %v703_v47 = vunpack.c.1.s8 %v431_v59  ;;  %v544_v59 = vld [vmem:[%s6786_s14 + $0x3c0] sm:$0xff] }
 0x18e   : >> { %3640 = vmatpush.bf16.msrb.mxu0 %v2751_v10  ;;  %v3007_v50 = vpack.c.bf16 %v2271_v41, %v2255_v40  ;;  %v1711_v51 = vcvt.s32.f32 %v687_v42  ;;  %v943_v52 = vunpack.c.0.s8 %v495_v4  ;;  %v959_v16 = vunpack.c.1.s8 %v495_v4 }
 0x18f   : >> { %3653 = vmatpush.bf16.msrb.mxu1 %v2879_v15  ;;  %v3135_v29 = vpack.c.bf16 %v2527_v45, %v2511_v46  ;;  %v1727_v53 = vcvt.s32.f32 %v703_v47  ;;  %v1199_v54 = vunpack.c.0.s8 %v559_v11  ;;  %v1215_v55 = vunpack.c.1.s8 %v559_v11  ;;  %v464_v15 = vld [vmem:[%s6786_s14 + $0x140] sm:$0xff] }
 0x190   : >> { %3666 = vmatpush.bf16.msrb.mxu2 %v3007_v50  ;;  %v1967_v56 = vcvt.s32.f32 %v943_v52  ;;  %v1983_v57 = vcvt.s32.f32 %v959_v16  ;;  %v1455_v34 = vunpack.c.0.s8 %v623_v18  ;;  %v1471_v60 = vunpack.c.1.s8 %v623_v18 }
 0x191   : >> { %3679 = vmatpush.bf16.msrb.mxu3 %v3135_v29  ;;  %v2735_v61 = vpack.c.bf16 %v1727_v53, %v1711_v51  ;;  %v2223_v62 = vcvt.s32.f32 %v1199_v54  ;;  %v2239_v0 = vcvt.s32.f32 %v1215_v55  ;;  %v912_v1 = vunpack.c.2.s8 %v480_v28  ;;  %v528_v51 = vld [vmem:[%s6786_s14 + $0x340] sm:$0xff] }
 0x192   : >> { %v2863_v3 = vpack.c.bf16 %v1983_v57, %v1967_v56  ;;  %v2479_v35 = vcvt.s32.f32 %v1455_v34  ;;  %v2495_v4 = vcvt.s32.f32 %v1471_v60  ;;  %v928_v5 = vunpack.c.3.s8 %v480_v28  ;;  %v592_v53 = vld [vmem:[%s6786_s14 + $0x540] sm:$0xff] }
 0x193   : >> { %3641 = vmatpush.bf16.msrb.mxu0 %v2735_v61  ;;  %v2991_v7 = vpack.c.bf16 %v2239_v0, %v2223_v62  ;;  %v1936_v8 = vcvt.s32.f32 %v912_v1  ;;  %v1168_v11 = vunpack.c.2.s8 %v544_v59  ;;  %v1184_v12 = vunpack.c.3.s8 %v544_v59  ;;  %v656_v62 = vld [vmem:[%s6786_s14 + $0x740] sm:$0xff]  ;;  %v3242_v1 = vld [vmem:[#allocation2 + $0x58] sm:$0xff] }
 0x194   : >> { %3654 = vmatpush.bf16.msrb.mxu1 %v2863_v3  ;;  %v3119_v13 = vpack.c.bf16 %v2495_v4, %v2479_v35  ;;  %v1952_v14 = vcvt.s32.f32 %v928_v5  ;;  %v1424_v17 = vunpack.c.2.s8 %v608_v2  ;;  %v1440_v18 = vunpack.c.3.s8 %v608_v2 }
 0x195   : >> { %3667 = vmatpush.bf16.msrb.mxu2 %v2991_v7  ;;  %v2192_v19 = vcvt.s32.f32 %v1168_v11  ;;  %v2208_v21 = vcvt.s32.f32 %v1184_v12  ;;  %v1680_v22 = vunpack.c.2.s8 %v672_v6  ;;  %v1696_v23 = vunpack.c.3.s8 %v672_v6 }
 0x196   : >> { %3680 = vmatpush.bf16.msrb.mxu3 %v3119_v13  ;;  %v2848_v25 = vpack.c.bf16 %v1952_v14, %v1936_v8  ;;  %v2448_v26 = vcvt.s32.f32 %v1424_v17  ;;  %v2464_v27 = vcvt.s32.f32 %v1440_v18  ;;  %v880_v30 = vunpack.c.0.s8 %v480_v28  ;;  %3642 = vmatmul.bf16.vlgmr.msrb.gmra.mxu0 %v6838_v20 }
 0x197   : >> { %v2976_v32 = vpack.c.bf16 %v2208_v21, %v2192_v19  ;;  %v2704_v31 = vcvt.s32.f32 %v1680_v22  ;;  %v2720_v33 = vcvt.s32.f32 %v1696_v23  ;;  %v896_v36 = vunpack.c.1.s8 %v480_v28  ;;  %3655 = vmatmul.bf16.vlgmr.msrb.gmra.mxu1 %v6840_v24 }
 0x198   : >> { %3686 = vmatpush.bf16.msra.mxu0 %v2848_v25  ;;  %v3104_v37 = vpack.c.bf16 %v2464_v27, %v2448_v26  ;;  %v1904_v38 = vcvt.s32.f32 %v880_v30  ;;  %v1136_v39 = vunpack.c.0.s8 %v544_v59  ;;  %v1152_v9 = vunpack.c.1.s8 %v544_v59  ;;  %3668 = vmatmul.bf16.vlgmr.msrb.gmra.mxu2 %v6830_v58  ;;  %v448_v26 = vld [vmem:[%s6786_s14 + $0xc0] sm:$0xff] }
 0x199   : >> { %3699 = vmatpush.bf16.msra.mxu1 %v2976_v32  ;;  %v3232_v10 = vpack.c.bf16 %v2720_v33, %v2704_v31  ;;  %v1920_v40 = vcvt.s32.f32 %v896_v36  ;;  %v1392_v41 = vunpack.c.0.s8 %v608_v2  ;;  %v1408_v42 = vunpack.c.1.s8 %v608_v2  ;;  %3681 = vmatmul.bf16.vlgmr.msrb.gmra.mxu3 %v6833_v63 }
 0x19a   : >> { %3712 = vmatpush.bf16.msra.mxu2 %v3104_v37  ;;  %v2160_v46 = vcvt.s32.f32 %v1136_v39  ;;  %v2176_v45 = vcvt.s32.f32 %v1152_v9  ;;  %v1648_v47 = vunpack.c.0.s8 %v672_v6  ;;  %v1664_v50 = vunpack.c.1.s8 %v672_v6  ;;  %v512_v39 = vld [vmem:[%s6786_s14 + $0x2c0] sm:$0xff] }
 0x19b   : >> { %3725 = vmatpush.bf16.msra.mxu3 %v3232_v10  ;;  %v2832_v52 = vpack.c.bf16 %v1920_v40, %v1904_v38  ;;  %v2416_v16 = vcvt.s32.f32 %v1392_v41  ;;  %v2432_v28 = vcvt.s32.f32 %v1408_v42  ;;  %v3397_v29 = vadd.f32 %v6986_v44, %v6984_v43  ;;  %v576_v42 = vld [vmem:[%s6786_s14 + $0x4c0] sm:$0xff] }
 0x19c   : >> { %v2960_v54 = vpack.c.bf16 %v2176_v45, %v2160_v46  ;;  %v2672_v55 = vcvt.s32.f32 %v1648_v47  ;;  %v2688_v56 = vcvt.s32.f32 %v1664_v50  ;;  %v848_v57 = vunpack.c.2.s8 %v464_v15  ;;  %v640_v50 = vld [vmem:[%s6786_s14 + $0x6c0] sm:$0xff] }
 0x19d   : >> { %3687 = vmatpush.bf16.msra.mxu0 %v2832_v52  ;;  %v3088_v34 = vpack.c.bf16 %v2432_v28, %v2416_v16  ;;  %v3410_v60 = vadd.f32 %v6988_v48, %v3397_v29  ;;  %v864_v59 = vunpack.c.3.s8 %v464_v15  ;;  %v1104_v61 = vunpack.c.2.s8 %v528_v51 }
 0x19e   : >> { %3700 = vmatpush.bf16.msra.mxu1 %v2960_v54  ;;  %v3216_v0 = vpack.c.bf16 %v2688_v56, %v2672_v55  ;;  %v1872_v2 = vcvt.s32.f32 %v848_v57  ;;  %v1120_v3 = vunpack.c.3.s8 %v528_v51  ;;  %v1360_v35 = vunpack.c.2.s8 %v592_v53  ;;  %v7016_v56 = vpop.f32.mrf.mxu0  ;;  %v7018_v57 = vpop.f32.mrf.mxu1 }
 0x19f   : >> { %3713 = vmatpush.bf16.msra.mxu2 %v3088_v34  ;;  %v3423_v43 = vadd.f32 %v6990_v49, %v3410_v60  ;;  %v1888_v44 = vcvt.s32.f32 %v864_v59  ;;  %v2128_v4 = vcvt.s32.f32 %v1104_v61  ;;  %v1376_v5 = vunpack.c.3.s8 %v592_v53 }
 0x1a0   : >> { %3726 = vmatpush.bf16.msra.mxu3 %v3216_v0  ;;  %v2144_v6 = vcvt.s32.f32 %v1120_v3  ;;  %v2384_v7 = vcvt.s32.f32 %v1360_v35  ;;  %v1616_v8 = vunpack.c.2.s8 %v656_v62  ;;  %v1632_v48 = vunpack.c.3.s8 %v656_v62  ;;  %v7022_v0 = vpop.f32.mrf.mxu3 }
 0x1a1   : >> { %v4104_v11 = vadd.f32 %v3423_v43, %v3242_v1  ;;  %v2816_v12 = vpack.c.bf16 %v1888_v44, %v1872_v2  ;;  %v2400_v13 = vcvt.s32.f32 %v1376_v5  ;;  %v816_v14 = vunpack.c.0.s8 %v464_v15 }
 0x1a2   : >> { %v2944_v17 = vpack.c.bf16 %v2144_v6, %v2128_v4  ;;  %v2640_v18 = vcvt.s32.f32 %v1616_v8  ;;  %v2656_v19 = vcvt.s32.f32 %v1632_v48  ;;  %v832_v21 = vunpack.c.1.s8 %v464_v15 }
 0x1a3   : >> { %4120 = vst [vmem:[#allocation2 + $0x58] sm:$0xff] %v4104_v11  ;;  %3688 = vmatpush.bf16.msra.mxu0 %v2816_v12  ;;  %v3072_v49 = vpack.c.bf16 %v2400_v13, %v2384_v7  ;;  %v1840_v22 = vcvt.s32.f32 %v816_v14  ;;  %v1072_v23 = vunpack.c.0.s8 %v528_v51  ;;  %v1088_v25 = vunpack.c.1.s8 %v528_v51  ;;  %v432_v11 = vld [vmem:[%s6786_s14 + $0x40] sm:$0xff] }
 0x1a4   : >> { %3701 = vmatpush.bf16.msra.mxu1 %v2944_v17  ;;  %v3200_v27 = vpack.c.bf16 %v2656_v19, %v2640_v18  ;;  %v1856_v30 = vcvt.s32.f32 %v832_v21  ;;  %v1328_v32 = vunpack.c.0.s8 %v592_v53  ;;  %v1344_v31 = vunpack.c.1.s8 %v592_v53 }
 0x1a5   : >> { %3714 = vmatpush.bf16.msra.mxu2 %v3072_v49  ;;  %v2096_v33 = vcvt.s32.f32 %v1072_v23  ;;  %v2112_v36 = vcvt.s32.f32 %v1088_v25  ;;  %v1584_v37 = vunpack.c.0.s8 %v656_v62  ;;  %v1600_v38 = vunpack.c.1.s8 %v656_v62  ;;  %v7020_v62 = vpop.f32.mrf.mxu2 }
 0x1a6   : >> { %3727 = vmatpush.bf16.msra.mxu3 %v3200_v27  ;;  %v2800_v9 = vpack.c.bf16 %v1856_v30, %v1840_v22  ;;  %v2352_v10 = vcvt.s32.f32 %v1328_v32  ;;  %v2368_v40 = vcvt.s32.f32 %v1344_v31  ;;  %v784_v41 = vunpack.c.2.s8 %v448_v26  ;;  %v496_v22 = vld [vmem:[%s6786_s14 + $0x240] sm:$0xff] }
 0x1a7   : >> { %v2928_v15 = vpack.c.bf16 %v2112_v36, %v2096_v33  ;;  %v2608_v46 = vcvt.s32.f32 %v1584_v37  ;;  %v2624_v45 = vcvt.s32.f32 %v1600_v38  ;;  %v800_v47 = vunpack.c.3.s8 %v448_v26  ;;  %v560_v30 = vld [vmem:[%s6786_s14 + $0x440] sm:$0xff]  ;;  %v3437_v38 = vpop.f32.mrf.mxu0 }
 0x1a8   : >> { %3689 = vmatpush.bf16.msra.mxu0 %v2800_v9  ;;  %v3056_v51 = vpack.c.bf16 %v2368_v40, %v2352_v10  ;;  %v1808_v52 = vcvt.s32.f32 %v784_v41  ;;  %v1040_v16 = vunpack.c.2.s8 %v512_v39  ;;  %v1056_v28 = vunpack.c.3.s8 %v512_v39  ;;  %v624_v37 = vld [vmem:[%s6786_s14 + $0x640] sm:$0xff] }
 0x1a9   : >> { %3702 = vmatpush.bf16.msra.mxu1 %v2928_v15  ;;  %v3184_v29 = vpack.c.bf16 %v2624_v45, %v2608_v46  ;;  %v1824_v53 = vcvt.s32.f32 %v800_v47  ;;  %v1296_v54 = vunpack.c.2.s8 %v576_v42  ;;  %v1312_v55 = vunpack.c.3.s8 %v576_v42  ;;  %v3476_v15 = vpop.f32.mrf.mxu3 }
 0x1aa   : >> { %3715 = vmatpush.bf16.msra.mxu2 %v3056_v51  ;;  %v2064_v34 = vcvt.s32.f32 %v1040_v16  ;;  %v2080_v60 = vcvt.s32.f32 %v1056_v28  ;;  %v1552_v59 = vunpack.c.2.s8 %v640_v50  ;;  %v1568_v61 = vunpack.c.3.s8 %v640_v50 }
 0x1ab   : >> { %3728 = vmatpush.bf16.msra.mxu3 %v3184_v29  ;;  %v2784_v1 = vpack.c.bf16 %v1824_v53, %v1808_v52  ;;  %v2320_v2 = vcvt.s32.f32 %v1296_v54  ;;  %v2336_v3 = vcvt.s32.f32 %v1312_v55  ;;  %v752_v35 = vunpack.c.0.s8 %v448_v26 }
 0x1ac   : >> { %v2912_v43 = vpack.c.bf16 %v2080_v60, %v2064_v34  ;;  %v2576_v44 = vcvt.s32.f32 %v1552_v59  ;;  %v2592_v4 = vcvt.s32.f32 %v1568_v61  ;;  %v768_v5 = vunpack.c.1.s8 %v448_v26 }
 0x1ad   : >> { %3690 = vmatpush.bf16.msra.mxu0 %v2784_v1  ;;  %v3040_v6 = vpack.c.bf16 %v2336_v3, %v2320_v2  ;;  %v1776_v7 = vcvt.s32.f32 %v752_v35  ;;  %v1008_v8 = vunpack.c.0.s8 %v512_v39  ;;  %v1024_v48 = vunpack.c.1.s8 %v512_v39  ;;  %v3450_v39 = vpop.f32.mrf.mxu1 }
 0x1ae   : >> { %3703 = vmatpush.bf16.msra.mxu1 %v2912_v43  ;;  %v3168_v12 = vpack.c.bf16 %v2592_v4, %v2576_v44  ;;  %v1792_v13 = vcvt.s32.f32 %v768_v5  ;;  %v1264_v14 = vunpack.c.0.s8 %v576_v42  ;;  %v1280_v17 = vunpack.c.1.s8 %v576_v42  ;;  %v3463_v42 = vpop.f32.mrf.mxu2  ;;  %v481_v43 = vld [vmem:[%s6786_s14 + $0x1c8] sm:$0xff] }
 0x1af   : >> { %3716 = vmatpush.bf16.msra.mxu2 %v3040_v6  ;;  %v2032_v18 = vcvt.s32.f32 %v1008_v8  ;;  %v2048_v19 = vcvt.s32.f32 %v1024_v48  ;;  %v1520_v21 = vunpack.c.0.s8 %v640_v50  ;;  %v1536_v49 = vunpack.c.1.s8 %v640_v50 }
 0x1b0   : >> { %3729 = vmatpush.bf16.msra.mxu3 %v3168_v12  ;;  %v2768_v23 = vpack.c.bf16 %v1792_v13, %v1776_v7  ;;  %v2288_v25 = vcvt.s32.f32 %v1264_v14  ;;  %v2304_v26 = vcvt.s32.f32 %v1280_v17  ;;  %v720_v27 = vunpack.c.2.s8 %v432_v11 }
 0x1b1   : >> { %v2896_v32 = vpack.c.bf16 %v2048_v19, %v2032_v18  ;;  %v2544_v31 = vcvt.s32.f32 %v1520_v21  ;;  %v2560_v33 = vcvt.s32.f32 %v1536_v49  ;;  %v736_v36 = vunpack.c.3.s8 %v432_v11  ;;  %v609_v19 = vld [vmem:[%s6786_s14 + $0x5c8] sm:$0xff] }
 0x1b2   : >> { %3691 = vmatpush.bf16.msra.mxu0 %v2768_v23  ;;  %v3024_v9 = vpack.c.bf16 %v2304_v26, %v2288_v25  ;;  %v1744_v10 = vcvt.s32.f32 %v720_v27  ;;  %v976_v40 = vunpack.c.2.s8 %v496_v22  ;;  %v992_v41 = vunpack.c.3.s8 %v496_v22  ;;  %v673_v25 = vld [vmem:[%s6786_s14 + $0x7c8] sm:$0xff] }
 0x1b3   : >> { %3704 = vmatpush.bf16.msra.mxu1 %v2896_v32  ;;  %v3152_v46 = vpack.c.bf16 %v2560_v33, %v2544_v31  ;;  %v1760_v45 = vcvt.s32.f32 %v736_v36  ;;  %v1232_v47 = vunpack.c.2.s8 %v560_v30  ;;  %v1248_v50 = vunpack.c.3.s8 %v560_v30 }
 0x1b4   : >> { %3717 = vmatpush.bf16.msra.mxu2 %v3024_v9  ;;  %v2000_v51 = vcvt.s32.f32 %v976_v40  ;;  %v2016_v52 = vcvt.s32.f32 %v992_v41  ;;  %v1488_v16 = vunpack.c.2.s8 %v624_v37  ;;  %v1504_v28 = vunpack.c.3.s8 %v624_v37 }
 0x1b5   : >> { %3730 = vmatpush.bf16.msra.mxu3 %v3152_v46  ;;  %v2752_v29 = vpack.c.bf16 %v1760_v45, %v1744_v10  ;;  %v2256_v53 = vcvt.s32.f32 %v1232_v47  ;;  %v2272_v54 = vcvt.s32.f32 %v1248_v50  ;;  %v688_v55 = vunpack.c.0.s8 %v432_v11 }
 0x1b6   : >> { %v2880_v34 = vpack.c.bf16 %v2016_v52, %v2000_v51  ;;  %v2512_v60 = vcvt.s32.f32 %v1488_v16  ;;  %v2528_v59 = vcvt.s32.f32 %v1504_v28  ;;  %v704_v61 = vunpack.c.1.s8 %v432_v11  ;;  %v545_v11 = vld [vmem:[%s6786_s14 + $0x3c8] sm:$0xff] }
 0x1b7   : >> { %3692 = vmatpush.bf16.msra.mxu0 %v2752_v29  ;;  %v3008_v1 = vpack.c.bf16 %v2272_v54, %v2256_v53  ;;  %v1712_v2 = vcvt.s32.f32 %v688_v55  ;;  %v944_v3 = vunpack.c.0.s8 %v496_v22  ;;  %v960_v35 = vunpack.c.1.s8 %v496_v22 }
 0x1b8   : >> { %3705 = vmatpush.bf16.msra.mxu1 %v2880_v34  ;;  %v3136_v44 = vpack.c.bf16 %v2528_v59, %v2512_v60  ;;  %v1728_v4 = vcvt.s32.f32 %v704_v61  ;;  %v1200_v5 = vunpack.c.0.s8 %v560_v30  ;;  %v1216_v6 = vunpack.c.1.s8 %v560_v30  ;;  %v465_v34 = vld [vmem:[%s6786_s14 + $0x148] sm:$0xff] }
 0x1b9   : >> { %3718 = vmatpush.bf16.msra.mxu2 %v3008_v1  ;;  %v1968_v7 = vcvt.s32.f32 %v944_v3  ;;  %v1984_v8 = vcvt.s32.f32 %v960_v35  ;;  %v1456_v48 = vunpack.c.0.s8 %v624_v37  ;;  %v1472_v12 = vunpack.c.1.s8 %v624_v37 }
 0x1ba   : >> { %3731 = vmatpush.bf16.msra.mxu3 %v3136_v44  ;;  %v2736_v13 = vpack.c.bf16 %v1728_v4, %v1712_v2  ;;  %v2224_v14 = vcvt.s32.f32 %v1200_v5  ;;  %v2240_v17 = vcvt.s32.f32 %v1216_v6  ;;  %v913_v18 = vunpack.c.2.s8 %v481_v43  ;;  %v529_v2 = vld [vmem:[%s6786_s14 + $0x348] sm:$0xff] }
 0x1bb   : >> { %v2864_v21 = vpack.c.bf16 %v1984_v8, %v1968_v7  ;;  %v2480_v49 = vcvt.s32.f32 %v1456_v48  ;;  %v2496_v22 = vcvt.s32.f32 %v1472_v12  ;;  %v929_v23 = vunpack.c.3.s8 %v481_v43  ;;  %v593_v4 = vld [vmem:[%s6786_s14 + $0x548] sm:$0xff] }
 0x1bc   : >> { %3693 = vmatpush.bf16.msra.mxu0 %v2736_v13  ;;  %v2992_v26 = vpack.c.bf16 %v2240_v17, %v2224_v14  ;;  %v1937_v27 = vcvt.s32.f32 %v913_v18  ;;  %v1169_v30 = vunpack.c.2.s8 %v545_v11  ;;  %v1185_v32 = vunpack.c.3.s8 %v545_v11  ;;  %v657_v14 = vld [vmem:[%s6786_s14 + $0x748] sm:$0xff]  ;;  %v3243_v18 = vld [vmem:[#allocation2 + $0x18] sm:$0xff] }
 0x1bd   : >> { %3706 = vmatpush.bf16.msra.mxu1 %v2864_v21  ;;  %v3120_v31 = vpack.c.bf16 %v2496_v22, %v2480_v49  ;;  %v1953_v33 = vcvt.s32.f32 %v929_v23  ;;  %v1425_v36 = vunpack.c.2.s8 %v609_v19  ;;  %v1441_v37 = vunpack.c.3.s8 %v609_v19 }
 0x1be   : >> { %3719 = vmatpush.bf16.msra.mxu2 %v2992_v26  ;;  %v2193_v38 = vcvt.s32.f32 %v1169_v30  ;;  %v2209_v39 = vcvt.s32.f32 %v1185_v32  ;;  %v1681_v9 = vunpack.c.2.s8 %v673_v25  ;;  %v1697_v10 = vunpack.c.3.s8 %v673_v25 }
 0x1bf   : >> { %3732 = vmatpush.bf16.msra.mxu3 %v3120_v31  ;;  %v2849_v40 = vpack.c.bf16 %v1953_v33, %v1937_v27  ;;  %v2449_v41 = vcvt.s32.f32 %v1425_v36  ;;  %v2465_v42 = vcvt.s32.f32 %v1441_v37  ;;  %v881_v15 = vunpack.c.0.s8 %v481_v43  ;;  %3694 = vmatmul.bf16.vlgmr.msra.gmra.mxu0 %v6838_v20 }
 0x1c0   : >> { %v2977_v46 = vpack.c.bf16 %v2209_v39, %v2193_v38  ;;  %v2705_v45 = vcvt.s32.f32 %v1681_v9  ;;  %v2721_v47 = vcvt.s32.f32 %v1697_v10  ;;  %v897_v50 = vunpack.c.1.s8 %v481_v43  ;;  %3707 = vmatmul.bf16.vlgmr.msra.gmra.mxu1 %v6840_v24 }
 0x1c1   : >> { %3738 = vmatpush.bf16.msrb.mxu0 %v2849_v40  ;;  %v3105_v51 = vpack.c.bf16 %v2465_v42, %v2449_v41  ;;  %v1905_v52 = vcvt.s32.f32 %v881_v15  ;;  %v1137_v16 = vunpack.c.0.s8 %v545_v11  ;;  %v1153_v28 = vunpack.c.1.s8 %v545_v11  ;;  %3720 = vmatmul.bf16.vlgmr.msra.gmra.mxu2 %v6830_v58  ;;  %v449_v41 = vld [vmem:[%s6786_s14 + $0xc8] sm:$0xff] }
 0x1c2   : >> { %3751 = vmatpush.bf16.msrb.mxu1 %v2977_v46  ;;  %v3233_v29 = vpack.c.bf16 %v2721_v47, %v2705_v45  ;;  %v1921_v53 = vcvt.s32.f32 %v897_v50  ;;  %v1393_v54 = vunpack.c.0.s8 %v609_v19  ;;  %v1409_v55 = vunpack.c.1.s8 %v609_v19  ;;  %3733 = vmatmul.bf16.vlgmr.msra.gmra.mxu3 %v6833_v63 }
 0x1c3   : >> { %3764 = vmatpush.bf16.msrb.mxu2 %v3105_v51  ;;  %v2161_v60 = vcvt.s32.f32 %v1137_v16  ;;  %v2177_v59 = vcvt.s32.f32 %v1153_v28  ;;  %v1649_v61 = vunpack.c.0.s8 %v673_v25  ;;  %v1665_v1 = vunpack.c.1.s8 %v673_v25  ;;  %v513_v16 = vld [vmem:[%s6786_s14 + $0x2c8] sm:$0xff] }
 0x1c4   : >> { %3777 = vmatpush.bf16.msrb.mxu3 %v3233_v29  ;;  %v2833_v3 = vpack.c.bf16 %v1921_v53, %v1905_v52  ;;  %v2417_v35 = vcvt.s32.f32 %v1393_v54  ;;  %v2433_v43 = vcvt.s32.f32 %v1409_v55  ;;  %v3449_v44 = vadd.f32 %v7018_v57, %v7016_v56  ;;  %v577_v55 = vld [vmem:[%s6786_s14 + $0x4c8] sm:$0xff] }
 0x1c5   : >> { %v2961_v5 = vpack.c.bf16 %v2177_v59, %v2161_v60  ;;  %v2673_v6 = vcvt.s32.f32 %v1649_v61  ;;  %v2689_v7 = vcvt.s32.f32 %v1665_v1  ;;  %v849_v8 = vunpack.c.2.s8 %v465_v34  ;;  %v641_v1 = vld [vmem:[%s6786_s14 + $0x6c8] sm:$0xff] }
 0x1c6   : >> { %3739 = vmatpush.bf16.msrb.mxu0 %v2833_v3  ;;  %v3089_v48 = vpack.c.bf16 %v2433_v43, %v2417_v35  ;;  %v3462_v12 = vadd.f32 %v7020_v62, %v3449_v44  ;;  %v865_v11 = vunpack.c.3.s8 %v465_v34  ;;  %v1105_v13 = vunpack.c.2.s8 %v529_v2 }
 0x1c7   : >> { %3752 = vmatpush.bf16.msrb.mxu1 %v2961_v5  ;;  %v3217_v17 = vpack.c.bf16 %v2689_v7, %v2673_v6  ;;  %v1873_v19 = vcvt.s32.f32 %v849_v8  ;;  %v1121_v21 = vunpack.c.3.s8 %v529_v2  ;;  %v1361_v49 = vunpack.c.2.s8 %v593_v4  ;;  %v7048_v7 = vpop.f32.mrf.mxu0  ;;  %v7050_v8 = vpop.f32.mrf.mxu1 }
 0x1c8   : >> { %3765 = vmatpush.bf16.msrb.mxu2 %v3089_v48  ;;  %v3475_v56 = vadd.f32 %v7022_v0, %v3462_v12  ;;  %v1889_v57 = vcvt.s32.f32 %v865_v11  ;;  %v2129_v22 = vcvt.s32.f32 %v1105_v13  ;;  %v1377_v23 = vunpack.c.3.s8 %v593_v4 }
 0x1c9   : >> { %3778 = vmatpush.bf16.msrb.mxu3 %v3217_v17  ;;  %v2145_v25 = vcvt.s32.f32 %v1121_v21  ;;  %v2385_v26 = vcvt.s32.f32 %v1361_v49  ;;  %v1617_v27 = vunpack.c.2.s8 %v657_v14  ;;  %v1633_v62 = vunpack.c.3.s8 %v657_v14  ;;  %v7054_v17 = vpop.f32.mrf.mxu3 }
 0x1ca   : >> { %v4105_v30 = vadd.f32 %v3475_v56, %v3243_v18  ;;  %v2817_v32 = vpack.c.bf16 %v1889_v57, %v1873_v19  ;;  %v2401_v31 = vcvt.s32.f32 %v1377_v23  ;;  %v817_v33 = vunpack.c.0.s8 %v465_v34 }
 0x1cb   : >> { %v2945_v36 = vpack.c.bf16 %v2145_v25, %v2129_v22  ;;  %v2641_v37 = vcvt.s32.f32 %v1617_v27  ;;  %v2657_v38 = vcvt.s32.f32 %v1633_v62  ;;  %v833_v39 = vunpack.c.1.s8 %v465_v34 }
 0x1cc   : >> { %4121 = vst [vmem:[#allocation2 + $0x18] sm:$0xff] %v4105_v30  ;;  %3740 = vmatpush.bf16.msrb.mxu0 %v2817_v32  ;;  %v3073_v0 = vpack.c.bf16 %v2401_v31, %v2385_v26  ;;  %v1841_v9 = vcvt.s32.f32 %v817_v33  ;;  %v1073_v10 = vunpack.c.0.s8 %v529_v2  ;;  %v1089_v40 = vunpack.c.1.s8 %v529_v2  ;;  %v433_v30 = vld [vmem:[%s6786_s14 + $0x48] sm:$0xff] }
 0x1cd   : >> { %3753 = vmatpush.bf16.msrb.mxu1 %v2945_v36  ;;  %v3201_v42 = vpack.c.bf16 %v2657_v38, %v2641_v37  ;;  %v1857_v15 = vcvt.s32.f32 %v833_v39  ;;  %v1329_v46 = vunpack.c.0.s8 %v593_v4  ;;  %v1345_v45 = vunpack.c.1.s8 %v593_v4 }
 0x1ce   : >> { %3766 = vmatpush.bf16.msrb.mxu2 %v3073_v0  ;;  %v2097_v47 = vcvt.s32.f32 %v1073_v10  ;;  %v2113_v50 = vcvt.s32.f32 %v1089_v40  ;;  %v1585_v51 = vunpack.c.0.s8 %v657_v14  ;;  %v1601_v52 = vunpack.c.1.s8 %v657_v14  ;;  %v7052_v14 = vpop.f32.mrf.mxu2 }
 0x1cf   : >> { %3779 = vmatpush.bf16.msrb.mxu3 %v3201_v42  ;;  %v2801_v28 = vpack.c.bf16 %v1857_v15, %v1841_v9  ;;  %v2353_v29 = vcvt.s32.f32 %v1329_v46  ;;  %v2369_v53 = vcvt.s32.f32 %v1345_v45  ;;  %v785_v54 = vunpack.c.2.s8 %v449_v41  ;;  %v497_v9 = vld [vmem:[%s6786_s14 + $0x248] sm:$0xff] }
 0x1d0   : >> { %v2929_v34 = vpack.c.bf16 %v2113_v50, %v2097_v47  ;;  %v2609_v60 = vcvt.s32.f32 %v1585_v51  ;;  %v2625_v59 = vcvt.s32.f32 %v1601_v52  ;;  %v801_v61 = vunpack.c.3.s8 %v449_v41  ;;  %v561_v15 = vld [vmem:[%s6786_s14 + $0x448] sm:$0xff]  ;;  %v3489_v52 = vpop.f32.mrf.mxu0 }
 0x1d1   : >> { %3741 = vmatpush.bf16.msrb.mxu0 %v2801_v28  ;;  %v3057_v2 = vpack.c.bf16 %v2369_v53, %v2353_v29  ;;  %v1809_v3 = vcvt.s32.f32 %v785_v54  ;;  %v1041_v35 = vunpack.c.2.s8 %v513_v16  ;;  %v1057_v43 = vunpack.c.3.s8 %v513_v16  ;;  %v625_v51 = vld [vmem:[%s6786_s14 + $0x648] sm:$0xff] }
 0x1d2   : >> { %3754 = vmatpush.bf16.msrb.mxu1 %v2929_v34  ;;  %v3185_v44 = vpack.c.bf16 %v2625_v59, %v2609_v60  ;;  %v1825_v4 = vcvt.s32.f32 %v801_v61  ;;  %v1297_v5 = vunpack.c.2.s8 %v577_v55  ;;  %v1313_v6 = vunpack.c.3.s8 %v577_v55  ;;  %v3528_v34 = vpop.f32.mrf.mxu3 }
 0x1d3   : >> { %3767 = vmatpush.bf16.msrb.mxu2 %v3057_v2  ;;  %v2065_v48 = vcvt.s32.f32 %v1041_v35  ;;  %v2081_v12 = vcvt.s32.f32 %v1057_v43  ;;  %v1553_v11 = vunpack.c.2.s8 %v641_v1  ;;  %v1569_v13 = vunpack.c.3.s8 %v641_v1 }
 0x1d4   : >> { %3780 = vmatpush.bf16.msrb.mxu3 %v3185_v44  ;;  %v2785_v18 = vpack.c.bf16 %v1825_v4, %v1809_v3  ;;  %v2321_v19 = vcvt.s32.f32 %v1297_v5  ;;  %v2337_v21 = vcvt.s32.f32 %v1313_v6  ;;  %v753_v49 = vunpack.c.0.s8 %v449_v41 }
 0x1d5   : >> { %v2913_v56 = vpack.c.bf16 %v2081_v12, %v2065_v48  ;;  %v2577_v57 = vcvt.s32.f32 %v1553_v11  ;;  %v2593_v22 = vcvt.s32.f32 %v1569_v13  ;;  %v769_v23 = vunpack.c.1.s8 %v449_v41 }
 0x1d6   : >> { %3742 = vmatpush.bf16.msrb.mxu0 %v2785_v18  ;;  %v3041_v25 = vpack.c.bf16 %v2337_v21, %v2321_v19  ;;  %v1777_v26 = vcvt.s32.f32 %v753_v49  ;;  %v1009_v27 = vunpack.c.0.s8 %v513_v16  ;;  %v1025_v62 = vunpack.c.1.s8 %v513_v16  ;;  %v3502_v16 = vpop.f32.mrf.mxu1 }
 0x1d7   : >> { %3755 = vmatpush.bf16.msrb.mxu1 %v2913_v56  ;;  %v3169_v32 = vpack.c.bf16 %v2593_v22, %v2577_v57  ;;  %v1793_v31 = vcvt.s32.f32 %v769_v23  ;;  %v1265_v33 = vunpack.c.0.s8 %v577_v55  ;;  %v1281_v36 = vunpack.c.1.s8 %v577_v55  ;;  %v3515_v55 = vpop.f32.mrf.mxu2  ;;  %v482_v56 = vld [vmem:[%s6786_s14 + $0x1d0] sm:$0xff] }
 0x1d8   : >> { %3768 = vmatpush.bf16.msrb.mxu2 %v3041_v25  ;;  %v2033_v37 = vcvt.s32.f32 %v1009_v27  ;;  %v2049_v38 = vcvt.s32.f32 %v1025_v62  ;;  %v1521_v39 = vunpack.c.0.s8 %v641_v1  ;;  %v1537_v0 = vunpack.c.1.s8 %v641_v1 }
 0x1d9   : >> { %3781 = vmatpush.bf16.msrb.mxu3 %v3169_v32  ;;  %v2769_v10 = vpack.c.bf16 %v1793_v31, %v1777_v26  ;;  %v2289_v40 = vcvt.s32.f32 %v1265_v33  ;;  %v2305_v41 = vcvt.s32.f32 %v1281_v36  ;;  %v721_v42 = vunpack.c.2.s8 %v433_v30 }
 0x1da   : >> { %v2897_v46 = vpack.c.bf16 %v2049_v38, %v2033_v37  ;;  %v2545_v45 = vcvt.s32.f32 %v1521_v39  ;;  %v2561_v47 = vcvt.s32.f32 %v1537_v0  ;;  %v737_v50 = vunpack.c.3.s8 %v433_v30  ;;  %v610_v38 = vld [vmem:[%s6786_s14 + $0x5d0] sm:$0xff] }
 0x1db   : >> { %3743 = vmatpush.bf16.msrb.mxu0 %v2769_v10  ;;  %v3025_v28 = vpack.c.bf16 %v2305_v41, %v2289_v40  ;;  %v1745_v29 = vcvt.s32.f32 %v721_v42  ;;  %v977_v53 = vunpack.c.2.s8 %v497_v9  ;;  %v993_v54 = vunpack.c.3.s8 %v497_v9  ;;  %v674_v40 = vld [vmem:[%s6786_s14 + $0x7d0] sm:$0xff] }
 0x1dc   : >> { %3756 = vmatpush.bf16.msrb.mxu1 %v2897_v46  ;;  %v3153_v60 = vpack.c.bf16 %v2561_v47, %v2545_v45  ;;  %v1761_v59 = vcvt.s32.f32 %v737_v50  ;;  %v1233_v61 = vunpack.c.2.s8 %v561_v15  ;;  %v1249_v1 = vunpack.c.3.s8 %v561_v15 }
 0x1dd   : >> { %3769 = vmatpush.bf16.msrb.mxu2 %v3025_v28  ;;  %v2001_v2 = vcvt.s32.f32 %v977_v53  ;;  %v2017_v3 = vcvt.s32.f32 %v993_v54  ;;  %v1489_v35 = vunpack.c.2.s8 %v625_v51  ;;  %v1505_v43 = vunpack.c.3.s8 %v625_v51 }
 0x1de   : >> { %3782 = vmatpush.bf16.msrb.mxu3 %v3153_v60  ;;  %v2753_v44 = vpack.c.bf16 %v1761_v59, %v1745_v29  ;;  %v2257_v4 = vcvt.s32.f32 %v1233_v61  ;;  %v2273_v5 = vcvt.s32.f32 %v1249_v1  ;;  %v689_v6 = vunpack.c.0.s8 %v433_v30 }
 0x1df   : >> { %v2881_v48 = vpack.c.bf16 %v2017_v3, %v2001_v2  ;;  %v2513_v12 = vcvt.s32.f32 %v1489_v35  ;;  %v2529_v11 = vcvt.s32.f32 %v1505_v43  ;;  %v705_v13 = vunpack.c.1.s8 %v433_v30  ;;  %v546_v30 = vld [vmem:[%s6786_s14 + $0x3d0] sm:$0xff] }
 0x1e0   : >> { %3744 = vmatpush.bf16.msrb.mxu0 %v2753_v44  ;;  %v3009_v18 = vpack.c.bf16 %v2273_v5, %v2257_v4  ;;  %v1713_v19 = vcvt.s32.f32 %v689_v6  ;;  %v945_v21 = vunpack.c.0.s8 %v497_v9  ;;  %v961_v49 = vunpack.c.1.s8 %v497_v9 }
 0x1e1   : >> { %3757 = vmatpush.bf16.msrb.mxu1 %v2881_v48  ;;  %v3137_v57 = vpack.c.bf16 %v2529_v11, %v2513_v12  ;;  %v1729_v22 = vcvt.s32.f32 %v705_v13  ;;  %v1201_v23 = vunpack.c.0.s8 %v561_v15  ;;  %v1217_v25 = vunpack.c.1.s8 %v561_v15  ;;  %v466_v48 = vld [vmem:[%s6786_s14 + $0x150] sm:$0xff] }
 0x1e2   : >> { %3770 = vmatpush.bf16.msrb.mxu2 %v3009_v18  ;;  %v1969_v26 = vcvt.s32.f32 %v945_v21  ;;  %v1985_v27 = vcvt.s32.f32 %v961_v49  ;;  %v1457_v62 = vunpack.c.0.s8 %v625_v51  ;;  %v1473_v32 = vunpack.c.1.s8 %v625_v51 }
 0x1e3   : >> { %3783 = vmatpush.bf16.msrb.mxu3 %v3137_v57  ;;  %v2737_v31 = vpack.c.bf16 %v1729_v22, %v1713_v19  ;;  %v2225_v33 = vcvt.s32.f32 %v1201_v23  ;;  %v2241_v36 = vcvt.s32.f32 %v1217_v25  ;;  %v914_v37 = vunpack.c.2.s8 %v482_v56  ;;  %v530_v19 = vld [vmem:[%s6786_s14 + $0x350] sm:$0xff] }
 0x1e4   : >> { %v2865_v39 = vpack.c.bf16 %v1985_v27, %v1969_v26  ;;  %v2481_v0 = vcvt.s32.f32 %v1457_v62  ;;  %v2497_v9 = vcvt.s32.f32 %v1473_v32  ;;  %v930_v10 = vunpack.c.3.s8 %v482_v56  ;;  %v594_v22 = vld [vmem:[%s6786_s14 + $0x550] sm:$0xff] }
 0x1e5   : >> { %3745 = vmatpush.bf16.msrb.mxu0 %v2737_v31  ;;  %v2993_v41 = vpack.c.bf16 %v2241_v36, %v2225_v33  ;;  %v1938_v42 = vcvt.s32.f32 %v914_v37  ;;  %v1170_v15 = vunpack.c.2.s8 %v546_v30  ;;  %v1186_v46 = vunpack.c.3.s8 %v546_v30  ;;  %v658_v33 = vld [vmem:[%s6786_s14 + $0x750] sm:$0xff] }
 0x1e6   : >> { %3758 = vmatpush.bf16.msrb.mxu1 %v2865_v39  ;;  %v3121_v45 = vpack.c.bf16 %v2497_v9, %v2481_v0  ;;  %v1954_v47 = vcvt.s32.f32 %v930_v10  ;;  %v1426_v50 = vunpack.c.2.s8 %v610_v38  ;;  %v1442_v51 = vunpack.c.3.s8 %v610_v38  ;;  %v3244_v37 = vld [vmem:[#allocation2 + $0x50] sm:$0xff] }
 0x1e7   : >> { %3771 = vmatpush.bf16.msrb.mxu2 %v2993_v41  ;;  %v2194_v52 = vcvt.s32.f32 %v1170_v15  ;;  %v2210_v16 = vcvt.s32.f32 %v1186_v46  ;;  %v1682_v28 = vunpack.c.2.s8 %v674_v40  ;;  %v1698_v29 = vunpack.c.3.s8 %v674_v40 }
 0x1e8   : >> { %3784 = vmatpush.bf16.msrb.mxu3 %v3121_v45  ;;  %v2850_v53 = vpack.c.bf16 %v1954_v47, %v1938_v42  ;;  %v2450_v54 = vcvt.s32.f32 %v1426_v50  ;;  %v2466_v55 = vcvt.s32.f32 %v1442_v51  ;;  %v882_v34 = vunpack.c.0.s8 %v482_v56  ;;  %3746 = vmatmul.bf16.vlgmr.msrb.gmra.mxu0 %v6838_v20 }
 0x1e9   : >> { %v2978_v60 = vpack.c.bf16 %v2210_v16, %v2194_v52  ;;  %v2706_v59 = vcvt.s32.f32 %v1682_v28  ;;  %v2722_v61 = vcvt.s32.f32 %v1698_v29  ;;  %v898_v1 = vunpack.c.1.s8 %v482_v56  ;;  %3759 = vmatmul.bf16.vlgmr.msrb.gmra.mxu1 %v6840_v24 }
 0x1ea   : >> { %3790 = vmatpush.bf16.msra.mxu0 %v2850_v53  ;;  %v3106_v2 = vpack.c.bf16 %v2466_v55, %v2450_v54  ;;  %v1906_v3 = vcvt.s32.f32 %v882_v34  ;;  %v1138_v35 = vunpack.c.0.s8 %v546_v30  ;;  %v1154_v43 = vunpack.c.1.s8 %v546_v30  ;;  %3772 = vmatmul.bf16.vlgmr.msrb.gmra.mxu2 %v6830_v58  ;;  %v450_v54 = vld [vmem:[%s6786_s14 + $0xd0] sm:$0xff] }
 0x1eb   : >> { %3803 = vmatpush.bf16.msra.mxu1 %v2978_v60  ;;  %v3234_v44 = vpack.c.bf16 %v2722_v61, %v2706_v59  ;;  %v1922_v4 = vcvt.s32.f32 %v898_v1  ;;  %v1394_v5 = vunpack.c.0.s8 %v610_v38  ;;  %v1410_v6 = vunpack.c.1.s8 %v610_v38  ;;  %3785 = vmatmul.bf16.vlgmr.msrb.gmra.mxu3 %v6833_v63 }
 0x1ec   : >> { %3816 = vmatpush.bf16.msra.mxu2 %v3106_v2  ;;  %v2162_v12 = vcvt.s32.f32 %v1138_v35  ;;  %v2178_v11 = vcvt.s32.f32 %v1154_v43  ;;  %v1650_v13 = vunpack.c.0.s8 %v674_v40  ;;  %v1666_v18 = vunpack.c.1.s8 %v674_v40  ;;  %v514_v35 = vld [vmem:[%s6786_s14 + $0x2d0] sm:$0xff] }
 0x1ed   : >> { %3829 = vmatpush.bf16.msra.mxu3 %v3234_v44  ;;  %v2834_v21 = vpack.c.bf16 %v1922_v4, %v1906_v3  ;;  %v2418_v49 = vcvt.s32.f32 %v1394_v5  ;;  %v2434_v56 = vcvt.s32.f32 %v1410_v6  ;;  %v3501_v57 = vadd.f32 %v7050_v8, %v7048_v7  ;;  %v578_v6 = vld [vmem:[%s6786_s14 + $0x4d0] sm:$0xff] }
 0x1ee   : >> { %v2962_v23 = vpack.c.bf16 %v2178_v11, %v2162_v12  ;;  %v2674_v25 = vcvt.s32.f32 %v1650_v13  ;;  %v2690_v26 = vcvt.s32.f32 %v1666_v18  ;;  %v850_v27 = vunpack.c.2.s8 %v466_v48  ;;  %v642_v18 = vld [vmem:[%s6786_s14 + $0x6d0] sm:$0xff] }
 0x1ef   : >> { %3791 = vmatpush.bf16.msra.mxu0 %v2834_v21  ;;  %v3090_v62 = vpack.c.bf16 %v2434_v56, %v2418_v49  ;;  %v3514_v32 = vadd.f32 %v7052_v14, %v3501_v57  ;;  %v866_v30 = vunpack.c.3.s8 %v466_v48  ;;  %v1106_v31 = vunpack.c.2.s8 %v530_v19 }
 0x1f0   : >> { %3804 = vmatpush.bf16.msra.mxu1 %v2962_v23  ;;  %v3218_v36 = vpack.c.bf16 %v2690_v26, %v2674_v25  ;;  %v1874_v38 = vcvt.s32.f32 %v850_v27  ;;  %v1122_v39 = vunpack.c.3.s8 %v530_v19  ;;  %v1362_v0 = vunpack.c.2.s8 %v594_v22  ;;  %v7080_v26 = vpop.f32.mrf.mxu0  ;;  %v7082_v27 = vpop.f32.mrf.mxu1 }
 0x1f1   : >> { %3817 = vmatpush.bf16.msra.mxu2 %v3090_v62  ;;  %v3527_v7 = vadd.f32 %v7054_v17, %v3514_v32  ;;  %v1890_v8 = vcvt.s32.f32 %v866_v30  ;;  %v2130_v9 = vcvt.s32.f32 %v1106_v31  ;;  %v1378_v10 = vunpack.c.3.s8 %v594_v22 }
 0x1f2   : >> { %3830 = vmatpush.bf16.msra.mxu3 %v3218_v36  ;;  %v2146_v40 = vcvt.s32.f32 %v1122_v39  ;;  %v2386_v41 = vcvt.s32.f32 %v1362_v0  ;;  %v1618_v42 = vunpack.c.2.s8 %v658_v33  ;;  %v1634_v14 = vunpack.c.3.s8 %v658_v33  ;;  %v7086_v36 = vpop.f32.mrf.mxu3 }
 0x1f3   : >> { %v4106_v15 = vadd.f32 %v3527_v7, %v3244_v37  ;;  %v2818_v46 = vpack.c.bf16 %v1890_v8, %v1874_v38  ;;  %v2402_v45 = vcvt.s32.f32 %v1378_v10  ;;  %v818_v47 = vunpack.c.0.s8 %v466_v48 }
 0x1f4   : >> { %v2946_v50 = vpack.c.bf16 %v2146_v40, %v2130_v9  ;;  %v2642_v51 = vcvt.s32.f32 %v1618_v42  ;;  %v2658_v52 = vcvt.s32.f32 %v1634_v14  ;;  %v834_v16 = vunpack.c.1.s8 %v466_v48 }
 0x1f5   : >> { %4122 = vst [vmem:[#allocation2 + $0x50] sm:$0xff] %v4106_v15  ;;  %3792 = vmatpush.bf16.msra.mxu0 %v2818_v46  ;;  %v3074_v17 = vpack.c.bf16 %v2402_v45, %v2386_v41  ;;  %v1842_v28 = vcvt.s32.f32 %v818_v47  ;;  %v1074_v29 = vunpack.c.0.s8 %v530_v19  ;;  %v1090_v53 = vunpack.c.1.s8 %v530_v19  ;;  %v434_v15 = vld [vmem:[%s6786_s14 + $0x50] sm:$0xff] }
 0x1f6   : >> { %3805 = vmatpush.bf16.msra.mxu1 %v2946_v50  ;;  %v3202_v55 = vpack.c.bf16 %v2658_v52, %v2642_v51  ;;  %v1858_v34 = vcvt.s32.f32 %v834_v16  ;;  %v1330_v60 = vunpack.c.0.s8 %v594_v22  ;;  %v1346_v59 = vunpack.c.1.s8 %v594_v22 }
 0x1f7   : >> { %3818 = vmatpush.bf16.msra.mxu2 %v3074_v17  ;;  %v2098_v61 = vcvt.s32.f32 %v1074_v29  ;;  %v2114_v1 = vcvt.s32.f32 %v1090_v53  ;;  %v1586_v2 = vunpack.c.0.s8 %v658_v33  ;;  %v1602_v3 = vunpack.c.1.s8 %v658_v33  ;;  %v7084_v33 = vpop.f32.mrf.mxu2 }
 0x1f8   : >> { %3831 = vmatpush.bf16.msra.mxu3 %v3202_v55  ;;  %v2802_v43 = vpack.c.bf16 %v1858_v34, %v1842_v28  ;;  %v2354_v44 = vcvt.s32.f32 %v1330_v60  ;;  %v2370_v4 = vcvt.s32.f32 %v1346_v59  ;;  %v786_v5 = vunpack.c.2.s8 %v450_v54  ;;  %v498_v28 = vld [vmem:[%s6786_s14 + $0x250] sm:$0xff] }
 0x1f9   : >> { %v2930_v48 = vpack.c.bf16 %v2114_v1, %v2098_v61  ;;  %v2610_v12 = vcvt.s32.f32 %v1586_v2  ;;  %v2626_v11 = vcvt.s32.f32 %v1602_v3  ;;  %v802_v13 = vunpack.c.3.s8 %v450_v54  ;;  %v562_v34 = vld [vmem:[%s6786_s14 + $0x450] sm:$0xff]  ;;  %v3541_v3 = vpop.f32.mrf.mxu0 }
 0x1fa   : >> { %3793 = vmatpush.bf16.msra.mxu0 %v2802_v43  ;;  %v3058_v19 = vpack.c.bf16 %v2370_v4, %v2354_v44  ;;  %v1810_v21 = vcvt.s32.f32 %v786_v5  ;;  %v1042_v49 = vunpack.c.2.s8 %v514_v35  ;;  %v1058_v56 = vunpack.c.3.s8 %v514_v35  ;;  %v626_v2 = vld [vmem:[%s6786_s14 + $0x650] sm:$0xff] }
 0x1fb   : >> { %3806 = vmatpush.bf16.msra.mxu1 %v2930_v48  ;;  %v3186_v57 = vpack.c.bf16 %v2626_v11, %v2610_v12  ;;  %v1826_v22 = vcvt.s32.f32 %v802_v13  ;;  %v1298_v23 = vunpack.c.2.s8 %v578_v6  ;;  %v1314_v25 = vunpack.c.3.s8 %v578_v6  ;;  %v3580_v48 = vpop.f32.mrf.mxu3 }
 0x1fc   : >> { %3819 = vmatpush.bf16.msra.mxu2 %v3058_v19  ;;  %v2066_v62 = vcvt.s32.f32 %v1042_v49  ;;  %v2082_v32 = vcvt.s32.f32 %v1058_v56  ;;  %v1554_v30 = vunpack.c.2.s8 %v642_v18  ;;  %v1570_v31 = vunpack.c.3.s8 %v642_v18 }
 0x1fd   : >> { %3832 = vmatpush.bf16.msra.mxu3 %v3186_v57  ;;  %v2786_v37 = vpack.c.bf16 %v1826_v22, %v1810_v21  ;;  %v2322_v38 = vcvt.s32.f32 %v1298_v23  ;;  %v2338_v39 = vcvt.s32.f32 %v1314_v25  ;;  %v754_v0 = vunpack.c.0.s8 %v450_v54 }
 0x1fe   : >> { %v2914_v7 = vpack.c.bf16 %v2082_v32, %v2066_v62  ;;  %v2578_v8 = vcvt.s32.f32 %v1554_v30  ;;  %v2594_v9 = vcvt.s32.f32 %v1570_v31  ;;  %v770_v10 = vunpack.c.1.s8 %v450_v54 }
 0x1ff   : >> { %3794 = vmatpush.bf16.msra.mxu0 %v2786_v37  ;;  %v3042_v40 = vpack.c.bf16 %v2338_v39, %v2322_v38  ;;  %v1778_v41 = vcvt.s32.f32 %v754_v0  ;;  %v1010_v42 = vunpack.c.0.s8 %v514_v35  ;;  %v1026_v14 = vunpack.c.1.s8 %v514_v35  ;;  %v3554_v35 = vpop.f32.mrf.mxu1 }
 0x200   : >> { %3807 = vmatpush.bf16.msra.mxu1 %v2914_v7  ;;  %v3170_v46 = vpack.c.bf16 %v2594_v9, %v2578_v8  ;;  %v1794_v45 = vcvt.s32.f32 %v770_v10  ;;  %v1266_v47 = vunpack.c.0.s8 %v578_v6  ;;  %v1282_v50 = vunpack.c.1.s8 %v578_v6  ;;  %v3567_v6 = vpop.f32.mrf.mxu2  ;;  %v483_v7 = vld [vmem:[%s6786_s14 + $0x1d8] sm:$0xff] }
 0x201   : >> { %3820 = vmatpush.bf16.msra.mxu2 %v3042_v40  ;;  %v2034_v51 = vcvt.s32.f32 %v1010_v42  ;;  %v2050_v52 = vcvt.s32.f32 %v1026_v14  ;;  %v1522_v16 = vunpack.c.0.s8 %v642_v18  ;;  %v1538_v17 = vunpack.c.1.s8 %v642_v18 }
 0x202   : >> { %3833 = vmatpush.bf16.msra.mxu3 %v3170_v46  ;;  %v2770_v29 = vpack.c.bf16 %v1794_v45, %v1778_v41  ;;  %v2290_v53 = vcvt.s32.f32 %v1266_v47  ;;  %v2306_v54 = vcvt.s32.f32 %v1282_v50  ;;  %v722_v55 = vunpack.c.2.s8 %v434_v15 }
 0x203   : >> { %v2898_v60 = vpack.c.bf16 %v2050_v52, %v2034_v51  ;;  %v2546_v59 = vcvt.s32.f32 %v1522_v16  ;;  %v2562_v61 = vcvt.s32.f32 %v1538_v17  ;;  %v738_v1 = vunpack.c.3.s8 %v434_v15  ;;  %v611_v52 = vld [vmem:[%s6786_s14 + $0x5d8] sm:$0xff] }
 0x204   : >> { %3795 = vmatpush.bf16.msra.mxu0 %v2770_v29  ;;  %v3026_v43 = vpack.c.bf16 %v2306_v54, %v2290_v53  ;;  %v1746_v44 = vcvt.s32.f32 %v722_v55  ;;  %v978_v4 = vunpack.c.2.s8 %v498_v28  ;;  %v994_v5 = vunpack.c.3.s8 %v498_v28  ;;  %v675_v53 = vld [vmem:[%s6786_s14 + $0x7d8] sm:$0xff] }
 0x205   : >> { %3808 = vmatpush.bf16.msra.mxu1 %v2898_v60  ;;  %v3154_v12 = vpack.c.bf16 %v2562_v61, %v2546_v59  ;;  %v1762_v11 = vcvt.s32.f32 %v738_v1  ;;  %v1234_v13 = vunpack.c.2.s8 %v562_v34  ;;  %v1250_v18 = vunpack.c.3.s8 %v562_v34 }
 0x206   : >> { %3821 = vmatpush.bf16.msra.mxu2 %v3026_v43  ;;  %v2002_v19 = vcvt.s32.f32 %v978_v4  ;;  %v2018_v21 = vcvt.s32.f32 %v994_v5  ;;  %v1490_v49 = vunpack.c.2.s8 %v626_v2  ;;  %v1506_v56 = vunpack.c.3.s8 %v626_v2 }
 0x207   : >> { %3834 = vmatpush.bf16.msra.mxu3 %v3154_v12  ;;  %v2754_v57 = vpack.c.bf16 %v1762_v11, %v1746_v44  ;;  %v2258_v22 = vcvt.s32.f32 %v1234_v13  ;;  %v2274_v23 = vcvt.s32.f32 %v1250_v18  ;;  %v690_v25 = vunpack.c.0.s8 %v434_v15 }
 0x208   : >> { %v2882_v62 = vpack.c.bf16 %v2018_v21, %v2002_v19  ;;  %v2514_v32 = vcvt.s32.f32 %v1490_v49  ;;  %v2530_v30 = vcvt.s32.f32 %v1506_v56  ;;  %v706_v31 = vunpack.c.1.s8 %v434_v15  ;;  %v547_v15 = vld [vmem:[%s6786_s14 + $0x3d8] sm:$0xff] }
 0x209   : >> { %3796 = vmatpush.bf16.msra.mxu0 %v2754_v57  ;;  %v3010_v37 = vpack.c.bf16 %v2274_v23, %v2258_v22  ;;  %v1714_v38 = vcvt.s32.f32 %v690_v25  ;;  %v946_v39 = vunpack.c.0.s8 %v498_v28  ;;  %v962_v0 = vunpack.c.1.s8 %v498_v28 }
 0x20a   : >> { %3809 = vmatpush.bf16.msra.mxu1 %v2882_v62  ;;  %v3138_v8 = vpack.c.bf16 %v2530_v30, %v2514_v32  ;;  %v1730_v9 = vcvt.s32.f32 %v706_v31  ;;  %v1202_v10 = vunpack.c.0.s8 %v562_v34  ;;  %v1218_v40 = vunpack.c.1.s8 %v562_v34  ;;  %v467_v62 = vld [vmem:[%s6786_s14 + $0x158] sm:$0xff] }
 0x20b   : >> { %3822 = vmatpush.bf16.msra.mxu2 %v3010_v37  ;;  %v1970_v41 = vcvt.s32.f32 %v946_v39  ;;  %v1986_v42 = vcvt.s32.f32 %v962_v0  ;;  %v1458_v14 = vunpack.c.0.s8 %v626_v2  ;;  %v1474_v46 = vunpack.c.1.s8 %v626_v2 }
 0x20c   : >> { %3835 = vmatpush.bf16.msra.mxu3 %v3138_v8  ;;  %v2738_v45 = vpack.c.bf16 %v1730_v9, %v1714_v38  ;;  %v2226_v47 = vcvt.s32.f32 %v1202_v10  ;;  %v2242_v50 = vcvt.s32.f32 %v1218_v40  ;;  %v915_v51 = vunpack.c.2.s8 %v483_v7  ;;  %v531_v38 = vld [vmem:[%s6786_s14 + $0x358] sm:$0xff] }
 0x20d   : >> { %v2866_v16 = vpack.c.bf16 %v1986_v42, %v1970_v41  ;;  %v2482_v17 = vcvt.s32.f32 %v1458_v14  ;;  %v2498_v28 = vcvt.s32.f32 %v1474_v46  ;;  %v931_v29 = vunpack.c.3.s8 %v483_v7  ;;  %v595_v9 = vld [vmem:[%s6786_s14 + $0x558] sm:$0xff] }
 0x20e   : >> { %3797 = vmatpush.bf16.msra.mxu0 %v2738_v45  ;;  %v2994_v54 = vpack.c.bf16 %v2242_v50, %v2226_v47  ;;  %v1939_v55 = vcvt.s32.f32 %v915_v51  ;;  %v1171_v34 = vunpack.c.2.s8 %v547_v15  ;;  %v1187_v60 = vunpack.c.3.s8 %v547_v15  ;;  %v659_v47 = vld [vmem:[%s6786_s14 + $0x758] sm:$0xff]  ;;  %v3245_v51 = vld [vmem:[#allocation2 + $0x68] sm:$0xff] }
 0x20f   : >> { %3810 = vmatpush.bf16.msra.mxu1 %v2866_v16  ;;  %v3122_v59 = vpack.c.bf16 %v2498_v28, %v2482_v17  ;;  %v1955_v61 = vcvt.s32.f32 %v931_v29  ;;  %v1427_v1 = vunpack.c.2.s8 %v611_v52  ;;  %v1443_v2 = vunpack.c.3.s8 %v611_v52 }
 0x210   : >> { %3823 = vmatpush.bf16.msra.mxu2 %v2994_v54  ;;  %v2195_v3 = vcvt.s32.f32 %v1171_v34  ;;  %v2211_v35 = vcvt.s32.f32 %v1187_v60  ;;  %v1683_v43 = vunpack.c.2.s8 %v675_v53  ;;  %v1699_v44 = vunpack.c.3.s8 %v675_v53 }
 0x211   : >> { %3836 = vmatpush.bf16.msra.mxu3 %v3122_v59  ;;  %v2851_v4 = vpack.c.bf16 %v1955_v61, %v1939_v55  ;;  %v2451_v5 = vcvt.s32.f32 %v1427_v1  ;;  %v2467_v6 = vcvt.s32.f32 %v1443_v2  ;;  %v883_v48 = vunpack.c.0.s8 %v483_v7  ;;  %3798 = vmatmul.bf16.vlgmr.msra.gmra.mxu0 %v6838_v20 }
 0x212   : >> { %v2979_v12 = vpack.c.bf16 %v2211_v35, %v2195_v3  ;;  %v2707_v11 = vcvt.s32.f32 %v1683_v43  ;;  %v2723_v13 = vcvt.s32.f32 %v1699_v44  ;;  %v899_v18 = vunpack.c.1.s8 %v483_v7  ;;  %3811 = vmatmul.bf16.vlgmr.msra.gmra.mxu1 %v6840_v24 }
 0x213   : >> { %3842 = vmatpush.bf16.msrb.mxu0 %v2851_v4  ;;  %v3107_v19 = vpack.c.bf16 %v2467_v6, %v2451_v5  ;;  %v1907_v21 = vcvt.s32.f32 %v883_v48  ;;  %v1139_v49 = vunpack.c.0.s8 %v547_v15  ;;  %v1155_v56 = vunpack.c.1.s8 %v547_v15  ;;  %3824 = vmatmul.bf16.vlgmr.msra.gmra.mxu2 %v6830_v58  ;;  %v451_v5 = vld [vmem:[%s6786_s14 + $0xd8] sm:$0xff] }
 0x214   : >> { %3855 = vmatpush.bf16.msrb.mxu1 %v2979_v12  ;;  %v3235_v57 = vpack.c.bf16 %v2723_v13, %v2707_v11  ;;  %v1923_v22 = vcvt.s32.f32 %v899_v18  ;;  %v1395_v23 = vunpack.c.0.s8 %v611_v52  ;;  %v1411_v25 = vunpack.c.1.s8 %v611_v52  ;;  %3837 = vmatmul.bf16.vlgmr.msra.gmra.mxu3 %v6833_v63 }
 0x215   : >> { %3868 = vmatpush.bf16.msrb.mxu2 %v3107_v19  ;;  %v2163_v32 = vcvt.s32.f32 %v1139_v49  ;;  %v2179_v30 = vcvt.s32.f32 %v1155_v56  ;;  %v1651_v31 = vunpack.c.0.s8 %v675_v53  ;;  %v1667_v37 = vunpack.c.1.s8 %v675_v53  ;;  %v515_v49 = vld [vmem:[%s6786_s14 + $0x2d8] sm:$0xff] }
 0x216   : >> { %3881 = vmatpush.bf16.msrb.mxu3 %v3235_v57  ;;  %v2835_v39 = vpack.c.bf16 %v1923_v22, %v1907_v21  ;;  %v2419_v0 = vcvt.s32.f32 %v1395_v23  ;;  %v2435_v7 = vcvt.s32.f32 %v1411_v25  ;;  %v3553_v8 = vadd.f32 %v7082_v27, %v7080_v26  ;;  %v579_v25 = vld [vmem:[%s6786_s14 + $0x4d8] sm:$0xff] }
 0x217   : >> { %v2963_v10 = vpack.c.bf16 %v2179_v30, %v2163_v32  ;;  %v2675_v40 = vcvt.s32.f32 %v1651_v31  ;;  %v2691_v41 = vcvt.s32.f32 %v1667_v37  ;;  %v851_v42 = vunpack.c.2.s8 %v467_v62  ;;  %v643_v37 = vld [vmem:[%s6786_s14 + $0x6d8] sm:$0xff] }
 0x218   : >> { %3843 = vmatpush.bf16.msrb.mxu0 %v2835_v39  ;;  %v3091_v14 = vpack.c.bf16 %v2435_v7, %v2419_v0  ;;  %v3566_v46 = vadd.f32 %v7084_v33, %v3553_v8  ;;  %v867_v15 = vunpack.c.3.s8 %v467_v62  ;;  %v1107_v45 = vunpack.c.2.s8 %v531_v38 }
 0x219   : >> { %3856 = vmatpush.bf16.msrb.mxu1 %v2963_v10  ;;  %v3219_v50 = vpack.c.bf16 %v2691_v41, %v2675_v40  ;;  %v1875_v52 = vcvt.s32.f32 %v851_v42  ;;  %v1123_v16 = vunpack.c.3.s8 %v531_v38  ;;  %v1363_v17 = vunpack.c.2.s8 %v595_v9  ;;  %v7112_v41 = vpop.f32.mrf.mxu0  ;;  %v7114_v42 = vpop.f32.mrf.mxu1 }
 0x21a   : >> { %3869 = vmatpush.bf16.msrb.mxu2 %v3091_v14  ;;  %v3579_v26 = vadd.f32 %v7086_v36, %v3566_v46  ;;  %v1891_v27 = vcvt.s32.f32 %v867_v15  ;;  %v2131_v28 = vcvt.s32.f32 %v1107_v45  ;;  %v1379_v29 = vunpack.c.3.s8 %v595_v9 }
 0x21b   : >> { %3882 = vmatpush.bf16.msrb.mxu3 %v3219_v50  ;;  %v2147_v53 = vcvt.s32.f32 %v1123_v16  ;;  %v2387_v54 = vcvt.s32.f32 %v1363_v17  ;;  %v1619_v55 = vunpack.c.2.s8 %v659_v47  ;;  %v1635_v33 = vunpack.c.3.s8 %v659_v47  ;;  %v7118_v50 = vpop.f32.mrf.mxu3 }
 0x21c   : >> { %v4107_v34 = vadd.f32 %v3579_v26, %v3245_v51  ;;  %v2819_v60 = vpack.c.bf16 %v1891_v27, %v1875_v52  ;;  %v2403_v59 = vcvt.s32.f32 %v1379_v29  ;;  %v819_v61 = vunpack.c.0.s8 %v467_v62 }
 0x21d   : >> { %v2947_v1 = vpack.c.bf16 %v2147_v53, %v2131_v28  ;;  %v2643_v2 = vcvt.s32.f32 %v1619_v55  ;;  %v2659_v3 = vcvt.s32.f32 %v1635_v33  ;;  %v835_v35 = vunpack.c.1.s8 %v467_v62 }
 0x21e   : >> { %4123 = vst [vmem:[#allocation2 + $0x68] sm:$0xff] %v4107_v34  ;;  %3844 = vmatpush.bf16.msrb.mxu0 %v2819_v60  ;;  %v3075_v36 = vpack.c.bf16 %v2403_v59, %v2387_v54  ;;  %v1843_v43 = vcvt.s32.f32 %v819_v61  ;;  %v1075_v44 = vunpack.c.0.s8 %v531_v38  ;;  %v1091_v4 = vunpack.c.1.s8 %v531_v38  ;;  %v435_v34 = vld [vmem:[%s6786_s14 + $0x58] sm:$0xff] }
 0x21f   : >> { %3857 = vmatpush.bf16.msrb.mxu1 %v2947_v1  ;;  %v3203_v6 = vpack.c.bf16 %v2659_v3, %v2643_v2  ;;  %v1859_v48 = vcvt.s32.f32 %v835_v35  ;;  %v1331_v12 = vunpack.c.0.s8 %v595_v9  ;;  %v1347_v11 = vunpack.c.1.s8 %v595_v9 }
 0x220   : >> { %3870 = vmatpush.bf16.msrb.mxu2 %v3075_v36  ;;  %v2099_v13 = vcvt.s32.f32 %v1075_v44  ;;  %v2115_v18 = vcvt.s32.f32 %v1091_v4  ;;  %v1587_v19 = vunpack.c.0.s8 %v659_v47  ;;  %v1603_v21 = vunpack.c.1.s8 %v659_v47  ;;  %v7116_v47 = vpop.f32.mrf.mxu2 }
 0x221   : >> { %3883 = vmatpush.bf16.msrb.mxu3 %v3203_v6  ;;  %v2803_v56 = vpack.c.bf16 %v1859_v48, %v1843_v43  ;;  %v2355_v57 = vcvt.s32.f32 %v1331_v12  ;;  %v2371_v22 = vcvt.s32.f32 %v1347_v11  ;;  %v787_v23 = vunpack.c.2.s8 %v451_v5  ;;  %v499_v43 = vld [vmem:[%s6786_s14 + $0x258] sm:$0xff] }
 0x222   : >> { %v2931_v62 = vpack.c.bf16 %v2115_v18, %v2099_v13  ;;  %v2611_v32 = vcvt.s32.f32 %v1587_v19  ;;  %v2627_v30 = vcvt.s32.f32 %v1603_v21  ;;  %v803_v31 = vunpack.c.3.s8 %v451_v5  ;;  %v563_v48 = vld [vmem:[%s6786_s14 + $0x458] sm:$0xff]  ;;  %v3593_v21 = vpop.f32.mrf.mxu0 }
 0x223   : >> { %3845 = vmatpush.bf16.msrb.mxu0 %v2803_v56  ;;  %v3059_v38 = vpack.c.bf16 %v2371_v22, %v2355_v57  ;;  %v1811_v39 = vcvt.s32.f32 %v787_v23  ;;  %v1043_v0 = vunpack.c.2.s8 %v515_v49  ;;  %v1059_v7 = vunpack.c.3.s8 %v515_v49  ;;  %v627_v19 = vld [vmem:[%s6786_s14 + $0x658] sm:$0xff] }
 0x224   : >> { %3858 = vmatpush.bf16.msrb.mxu1 %v2931_v62  ;;  %v3187_v8 = vpack.c.bf16 %v2627_v30, %v2611_v32  ;;  %v1827_v9 = vcvt.s32.f32 %v803_v31  ;;  %v1299_v10 = vunpack.c.2.s8 %v579_v25  ;;  %v1315_v40 = vunpack.c.3.s8 %v579_v25  ;;  %v3632_v62 = vpop.f32.mrf.mxu3 }
 0x225   : >> { %3871 = vmatpush.bf16.msrb.mxu2 %v3059_v38  ;;  %v2067_v14 = vcvt.s32.f32 %v1043_v0  ;;  %v2083_v46 = vcvt.s32.f32 %v1059_v7  ;;  %v1555_v15 = vunpack.c.2.s8 %v643_v37  ;;  %v1571_v45 = vunpack.c.3.s8 %v643_v37 }
 0x226   : >> { %3884 = vmatpush.bf16.msrb.mxu3 %v3187_v8  ;;  %v2787_v51 = vpack.c.bf16 %v1827_v9, %v1811_v39  ;;  %v2323_v52 = vcvt.s32.f32 %v1299_v10  ;;  %v2339_v16 = vcvt.s32.f32 %v1315_v40  ;;  %v755_v17 = vunpack.c.0.s8 %v451_v5 }
 0x227   : >> { %v2915_v26 = vpack.c.bf16 %v2083_v46, %v2067_v14  ;;  %v2579_v27 = vcvt.s32.f32 %v1555_v15  ;;  %v2595_v28 = vcvt.s32.f32 %v1571_v45  ;;  %v771_v29 = vunpack.c.1.s8 %v451_v5 }
 0x228   : >> { %3846 = vmatpush.bf16.msrb.mxu0 %v2787_v51  ;;  %v3043_v53 = vpack.c.bf16 %v2339_v16, %v2323_v52  ;;  %v1779_v54 = vcvt.s32.f32 %v755_v17  ;;  %v1011_v55 = vunpack.c.0.s8 %v515_v49  ;;  %v1027_v33 = vunpack.c.1.s8 %v515_v49  ;;  %v3606_v49 = vpop.f32.mrf.mxu1 }
 0x229   : >> { %3859 = vmatpush.bf16.msrb.mxu1 %v2915_v26  ;;  %v3171_v60 = vpack.c.bf16 %v2595_v28, %v2579_v27  ;;  %v1795_v59 = vcvt.s32.f32 %v771_v29  ;;  %v1267_v61 = vunpack.c.0.s8 %v579_v25  ;;  %v1283_v1 = vunpack.c.1.s8 %v579_v25  ;;  %v3619_v25 = vpop.f32.mrf.mxu2  ;;  %v484_v26 = vld [vmem:[%s6786_s14 + $0x1e0] sm:$0xff] }
 0x22a   : >> { %3872 = vmatpush.bf16.msrb.mxu2 %v3043_v53  ;;  %v2035_v2 = vcvt.s32.f32 %v1011_v55  ;;  %v2051_v3 = vcvt.s32.f32 %v1027_v33  ;;  %v1523_v35 = vunpack.c.0.s8 %v643_v37  ;;  %v1539_v36 = vunpack.c.1.s8 %v643_v37 }
 0x22b   : >> { %3885 = vmatpush.bf16.msrb.mxu3 %v3171_v60  ;;  %v2771_v44 = vpack.c.bf16 %v1795_v59, %v1779_v54  ;;  %v2291_v4 = vcvt.s32.f32 %v1267_v61  ;;  %v2307_v5 = vcvt.s32.f32 %v1283_v1  ;;  %v723_v6 = vunpack.c.2.s8 %v435_v34 }
 0x22c   : >> { %v2899_v12 = vpack.c.bf16 %v2051_v3, %v2035_v2  ;;  %v2547_v11 = vcvt.s32.f32 %v1523_v35  ;;  %v2563_v13 = vcvt.s32.f32 %v1539_v36  ;;  %v739_v18 = vunpack.c.3.s8 %v435_v34  ;;  %v612_v3 = vld [vmem:[%s6786_s14 + $0x5e0] sm:$0xff] }
 0x22d   : >> { %3847 = vmatpush.bf16.msrb.mxu0 %v2771_v44  ;;  %v3027_v56 = vpack.c.bf16 %v2307_v5, %v2291_v4  ;;  %v1747_v57 = vcvt.s32.f32 %v723_v6  ;;  %v979_v22 = vunpack.c.2.s8 %v499_v43  ;;  %v995_v23 = vunpack.c.3.s8 %v499_v43  ;;  %v676_v4 = vld [vmem:[%s6786_s14 + $0x7e0] sm:$0xff] }
 0x22e   : >> { %3860 = vmatpush.bf16.msrb.mxu1 %v2899_v12  ;;  %v3155_v32 = vpack.c.bf16 %v2563_v13, %v2547_v11  ;;  %v1763_v30 = vcvt.s32.f32 %v739_v18  ;;  %v1235_v31 = vunpack.c.2.s8 %v563_v48  ;;  %v1251_v37 = vunpack.c.3.s8 %v563_v48 }
 0x22f   : >> { %3873 = vmatpush.bf16.msrb.mxu2 %v3027_v56  ;;  %v2003_v38 = vcvt.s32.f32 %v979_v22  ;;  %v2019_v39 = vcvt.s32.f32 %v995_v23  ;;  %v1491_v0 = vunpack.c.2.s8 %v627_v19  ;;  %v1507_v7 = vunpack.c.3.s8 %v627_v19 }
 0x230   : >> { %3886 = vmatpush.bf16.msrb.mxu3 %v3155_v32  ;;  %v2755_v8 = vpack.c.bf16 %v1763_v30, %v1747_v57  ;;  %v2259_v9 = vcvt.s32.f32 %v1235_v31  ;;  %v2275_v10 = vcvt.s32.f32 %v1251_v37  ;;  %v691_v40 = vunpack.c.0.s8 %v435_v34 }
 0x231   : >> { %v2883_v14 = vpack.c.bf16 %v2019_v39, %v2003_v38  ;;  %v2515_v46 = vcvt.s32.f32 %v1491_v0  ;;  %v2531_v15 = vcvt.s32.f32 %v1507_v7  ;;  %v707_v45 = vunpack.c.1.s8 %v435_v34  ;;  %v548_v34 = vld [vmem:[%s6786_s14 + $0x3e0] sm:$0xff] }
 0x232   : >> { %3848 = vmatpush.bf16.msrb.mxu0 %v2755_v8  ;;  %v3011_v51 = vpack.c.bf16 %v2275_v10, %v2259_v9  ;;  %v1715_v52 = vcvt.s32.f32 %v691_v40  ;;  %v947_v16 = vunpack.c.0.s8 %v499_v43  ;;  %v963_v17 = vunpack.c.1.s8 %v499_v43 }
 0x233   : >> { %3861 = vmatpush.bf16.msrb.mxu1 %v2883_v14  ;;  %v3139_v27 = vpack.c.bf16 %v2531_v15, %v2515_v46  ;;  %v1731_v28 = vcvt.s32.f32 %v707_v45  ;;  %v1203_v29 = vunpack.c.0.s8 %v563_v48  ;;  %v1219_v53 = vunpack.c.1.s8 %v563_v48  ;;  %v468_v14 = vld [vmem:[%s6786_s14 + $0x160] sm:$0xff] }
 0x234   : >> { %3874 = vmatpush.bf16.msrb.mxu2 %v3011_v51  ;;  %v1971_v54 = vcvt.s32.f32 %v947_v16  ;;  %v1987_v55 = vcvt.s32.f32 %v963_v17  ;;  %v1459_v33 = vunpack.c.0.s8 %v627_v19  ;;  %v1475_v60 = vunpack.c.1.s8 %v627_v19 }
 0x235   : >> { %3887 = vmatpush.bf16.msrb.mxu3 %v3139_v27  ;;  %v2739_v59 = vpack.c.bf16 %v1731_v28, %v1715_v52  ;;  %v2227_v61 = vcvt.s32.f32 %v1203_v29  ;;  %v2243_v1 = vcvt.s32.f32 %v1219_v53  ;;  %v916_v2 = vunpack.c.2.s8 %v484_v26  ;;  %v532_v52 = vld [vmem:[%s6786_s14 + $0x360] sm:$0xff] }
 0x236   : >> { %v2867_v35 = vpack.c.bf16 %v1987_v55, %v1971_v54  ;;  %v2483_v36 = vcvt.s32.f32 %v1459_v33  ;;  %v2499_v43 = vcvt.s32.f32 %v1475_v60  ;;  %v932_v44 = vunpack.c.3.s8 %v484_v26  ;;  %v596_v28 = vld [vmem:[%s6786_s14 + $0x560] sm:$0xff] }
 0x237   : >> { %3849 = vmatpush.bf16.msrb.mxu0 %v2739_v59  ;;  %v2995_v5 = vpack.c.bf16 %v2243_v1, %v2227_v61  ;;  %v1940_v6 = vcvt.s32.f32 %v916_v2  ;;  %v1172_v48 = vunpack.c.2.s8 %v548_v34  ;;  %v1188_v12 = vunpack.c.3.s8 %v548_v34  ;;  %v660_v61 = vld [vmem:[%s6786_s14 + $0x760] sm:$0xff]  ;;  %v3246_v2 = vld [vmem:[#allocation2 + $0x8] sm:$0xff] }
 0x238   : >> { %3862 = vmatpush.bf16.msrb.mxu1 %v2867_v35  ;;  %v3123_v11 = vpack.c.bf16 %v2499_v43, %v2483_v36  ;;  %v1956_v13 = vcvt.s32.f32 %v932_v44  ;;  %v1428_v18 = vunpack.c.2.s8 %v612_v3  ;;  %v1444_v19 = vunpack.c.3.s8 %v612_v3 }
 0x239   : >> { %3875 = vmatpush.bf16.msrb.mxu2 %v2995_v5  ;;  %v2196_v21 = vcvt.s32.f32 %v1172_v48  ;;  %v2212_v49 = vcvt.s32.f32 %v1188_v12  ;;  %v1684_v56 = vunpack.c.2.s8 %v676_v4  ;;  %v1700_v57 = vunpack.c.3.s8 %v676_v4 }
 0x23a   : >> { %3888 = vmatpush.bf16.msrb.mxu3 %v3123_v11  ;;  %v2852_v22 = vpack.c.bf16 %v1956_v13, %v1940_v6  ;;  %v2452_v23 = vcvt.s32.f32 %v1428_v18  ;;  %v2468_v25 = vcvt.s32.f32 %v1444_v19  ;;  %v884_v62 = vunpack.c.0.s8 %v484_v26  ;;  %3850 = vmatmul.bf16.vlgmr.msrb.gmra.mxu0 %v6838_v20 }
 0x23b   : >> { %v2980_v32 = vpack.c.bf16 %v2212_v49, %v2196_v21  ;;  %v2708_v30 = vcvt.s32.f32 %v1684_v56  ;;  %v2724_v31 = vcvt.s32.f32 %v1700_v57  ;;  %v900_v37 = vunpack.c.1.s8 %v484_v26  ;;  %3863 = vmatmul.bf16.vlgmr.msrb.gmra.mxu1 %v6840_v24 }
 0x23c   : >> { %3894 = vmatpush.bf16.msra.mxu0 %v2852_v22  ;;  %v3108_v38 = vpack.c.bf16 %v2468_v25, %v2452_v23  ;;  %v1908_v39 = vcvt.s32.f32 %v884_v62  ;;  %v1140_v0 = vunpack.c.0.s8 %v548_v34  ;;  %v1156_v7 = vunpack.c.1.s8 %v548_v34  ;;  %3876 = vmatmul.bf16.vlgmr.msrb.gmra.mxu2 %v6830_v58  ;;  %v452_v23 = vld [vmem:[%s6786_s14 + $0xe0] sm:$0xff] }
 0x23d   : >> { %3907 = vmatpush.bf16.msra.mxu1 %v2980_v32  ;;  %v3236_v8 = vpack.c.bf16 %v2724_v31, %v2708_v30  ;;  %v1924_v9 = vcvt.s32.f32 %v900_v37  ;;  %v1396_v10 = vunpack.c.0.s8 %v612_v3  ;;  %v1412_v40 = vunpack.c.1.s8 %v612_v3  ;;  %3889 = vmatmul.bf16.vlgmr.msrb.gmra.mxu3 %v6833_v63 }
 0x23e   : >> { %3920 = vmatpush.bf16.msra.mxu2 %v3108_v38  ;;  %v2164_v46 = vcvt.s32.f32 %v1140_v0  ;;  %v2180_v15 = vcvt.s32.f32 %v1156_v7  ;;  %v1652_v45 = vunpack.c.0.s8 %v676_v4  ;;  %v1668_v51 = vunpack.c.1.s8 %v676_v4  ;;  %v516_v0 = vld [vmem:[%s6786_s14 + $0x2e0] sm:$0xff] }
 0x23f   : >> { %3933 = vmatpush.bf16.msra.mxu3 %v3236_v8  ;;  %v2836_v16 = vpack.c.bf16 %v1924_v9, %v1908_v39  ;;  %v2420_v17 = vcvt.s32.f32 %v1396_v10  ;;  %v2436_v26 = vcvt.s32.f32 %v1412_v40  ;;  %v3605_v27 = vadd.f32 %v7114_v42, %v7112_v41  ;;  %v580_v40 = vld [vmem:[%s6786_s14 + $0x4e0] sm:$0xff] }
 0x240   : >> { %v2964_v29 = vpack.c.bf16 %v2180_v15, %v2164_v46  ;;  %v2676_v53 = vcvt.s32.f32 %v1652_v45  ;;  %v2692_v54 = vcvt.s32.f32 %v1668_v51  ;;  %v852_v55 = vunpack.c.2.s8 %v468_v14  ;;  %v644_v51 = vld [vmem:[%s6786_s14 + $0x6e0] sm:$0xff] }
 0x241   : >> { %3895 = vmatpush.bf16.msra.mxu0 %v2836_v16  ;;  %v3092_v33 = vpack.c.bf16 %v2436_v26, %v2420_v17  ;;  %v3618_v60 = vadd.f32 %v7116_v47, %v3605_v27  ;;  %v868_v34 = vunpack.c.3.s8 %v468_v14  ;;  %v1108_v59 = vunpack.c.2.s8 %v532_v52 }
 0x242   : >> { %3908 = vmatpush.bf16.msra.mxu1 %v2964_v29  ;;  %v3220_v1 = vpack.c.bf16 %v2692_v54, %v2676_v53  ;;  %v1876_v3 = vcvt.s32.f32 %v852_v55  ;;  %v1124_v35 = vunpack.c.3.s8 %v532_v52  ;;  %v1364_v36 = vunpack.c.2.s8 %v596_v28  ;;  %v7144_v54 = vpop.f32.mrf.mxu0  ;;  %v7146_v55 = vpop.f32.mrf.mxu1 }
 0x243   : >> { %3921 = vmatpush.bf16.msra.mxu2 %v3092_v33  ;;  %v3631_v41 = vadd.f32 %v7118_v50, %v3618_v60  ;;  %v1892_v42 = vcvt.s32.f32 %v868_v34  ;;  %v2132_v43 = vcvt.s32.f32 %v1108_v59  ;;  %v1380_v44 = vunpack.c.3.s8 %v596_v28 }
 0x244   : >> { %3934 = vmatpush.bf16.msra.mxu3 %v3220_v1  ;;  %v2148_v4 = vcvt.s32.f32 %v1124_v35  ;;  %v2388_v5 = vcvt.s32.f32 %v1364_v36  ;;  %v1620_v6 = vunpack.c.2.s8 %v660_v61  ;;  %v1636_v47 = vunpack.c.3.s8 %v660_v61  ;;  %v7150_v1 = vpop.f32.mrf.mxu3 }
 0x245   : >> { %v4108_v48 = vadd.f32 %v3631_v41, %v3246_v2  ;;  %v2820_v12 = vpack.c.bf16 %v1892_v42, %v1876_v3  ;;  %v2404_v11 = vcvt.s32.f32 %v1380_v44  ;;  %v820_v13 = vunpack.c.0.s8 %v468_v14 }
 0x246   : >> { %v2948_v18 = vpack.c.bf16 %v2148_v4, %v2132_v43  ;;  %v2644_v19 = vcvt.s32.f32 %v1620_v6  ;;  %v2660_v21 = vcvt.s32.f32 %v1636_v47  ;;  %v836_v49 = vunpack.c.1.s8 %v468_v14 }
 0x247   : >> { %4124 = vst [vmem:[#allocation2 + $0x8] sm:$0xff] %v4108_v48  ;;  %3896 = vmatpush.bf16.msra.mxu0 %v2820_v12  ;;  %v3076_v50 = vpack.c.bf16 %v2404_v11, %v2388_v5  ;;  %v1844_v56 = vcvt.s32.f32 %v820_v13  ;;  %v1076_v57 = vunpack.c.0.s8 %v532_v52  ;;  %v1092_v22 = vunpack.c.1.s8 %v532_v52  ;;  %v436_v48 = vld [vmem:[%s6786_s14 + $0x60] sm:$0xff] }
 0x248   : >> { %3909 = vmatpush.bf16.msra.mxu1 %v2948_v18  ;;  %v3204_v25 = vpack.c.bf16 %v2660_v21, %v2644_v19  ;;  %v1860_v62 = vcvt.s32.f32 %v836_v49  ;;  %v1332_v32 = vunpack.c.0.s8 %v596_v28  ;;  %v1348_v30 = vunpack.c.1.s8 %v596_v28 }
 0x249   : >> { %3922 = vmatpush.bf16.msra.mxu2 %v3076_v50  ;;  %v2100_v31 = vcvt.s32.f32 %v1076_v57  ;;  %v2116_v37 = vcvt.s32.f32 %v1092_v22  ;;  %v1588_v38 = vunpack.c.0.s8 %v660_v61  ;;  %v1604_v39 = vunpack.c.1.s8 %v660_v61  ;;  %v7148_v61 = vpop.f32.mrf.mxu2 }
 0x24a   : >> { %3935 = vmatpush.bf16.msra.mxu3 %v3204_v25  ;;  %v2804_v7 = vpack.c.bf16 %v1860_v62, %v1844_v56  ;;  %v2356_v8 = vcvt.s32.f32 %v1332_v32  ;;  %v2372_v9 = vcvt.s32.f32 %v1348_v30  ;;  %v788_v10 = vunpack.c.2.s8 %v452_v23  ;;  %v500_v56 = vld [vmem:[%s6786_s14 + $0x260] sm:$0xff] }
 0x24b   : >> { %v2932_v14 = vpack.c.bf16 %v2116_v37, %v2100_v31  ;;  %v2612_v46 = vcvt.s32.f32 %v1588_v38  ;;  %v2628_v15 = vcvt.s32.f32 %v1604_v39  ;;  %v804_v45 = vunpack.c.3.s8 %v452_v23  ;;  %v564_v62 = vld [vmem:[%s6786_s14 + $0x460] sm:$0xff]  ;;  %v3645_v39 = vpop.f32.mrf.mxu0 }
 0x24c   : >> { %3897 = vmatpush.bf16.msra.mxu0 %v2804_v7  ;;  %v3060_v52 = vpack.c.bf16 %v2372_v9, %v2356_v8  ;;  %v1812_v16 = vcvt.s32.f32 %v788_v10  ;;  %v1044_v17 = vunpack.c.2.s8 %v516_v0  ;;  %v1060_v26 = vunpack.c.3.s8 %v516_v0  ;;  %v628_v38 = vld [vmem:[%s6786_s14 + $0x660] sm:$0xff] }
 0x24d   : >> { %3910 = vmatpush.bf16.msra.mxu1 %v2932_v14  ;;  %v3188_v27 = vpack.c.bf16 %v2628_v15, %v2612_v46  ;;  %v1828_v28 = vcvt.s32.f32 %v804_v45  ;;  %v1300_v29 = vunpack.c.2.s8 %v580_v40  ;;  %v1316_v53 = vunpack.c.3.s8 %v580_v40  ;;  %v3684_v14 = vpop.f32.mrf.mxu3 }
 0x24e   : >> { %3923 = vmatpush.bf16.msra.mxu2 %v3060_v52  ;;  %v2068_v33 = vcvt.s32.f32 %v1044_v17  ;;  %v2084_v60 = vcvt.s32.f32 %v1060_v26  ;;  %v1556_v34 = vunpack.c.2.s8 %v644_v51  ;;  %v1572_v59 = vunpack.c.3.s8 %v644_v51 }
 0x24f   : >> { %3936 = vmatpush.bf16.msra.mxu3 %v3188_v27  ;;  %v2788_v2 = vpack.c.bf16 %v1828_v28, %v1812_v16  ;;  %v2324_v3 = vcvt.s32.f32 %v1300_v29  ;;  %v2340_v35 = vcvt.s32.f32 %v1316_v53  ;;  %v756_v36 = vunpack.c.0.s8 %v452_v23 }
 0x250   : >> { %v2916_v41 = vpack.c.bf16 %v2084_v60, %v2068_v33  ;;  %v2580_v42 = vcvt.s32.f32 %v1556_v34  ;;  %v2596_v43 = vcvt.s32.f32 %v1572_v59  ;;  %v772_v44 = vunpack.c.1.s8 %v452_v23 }
 0x251   : >> { %3898 = vmatpush.bf16.msra.mxu0 %v2788_v2  ;;  %v3044_v4 = vpack.c.bf16 %v2340_v35, %v2324_v3  ;;  %v1780_v5 = vcvt.s32.f32 %v756_v36  ;;  %v1012_v6 = vunpack.c.0.s8 %v516_v0  ;;  %v1028_v47 = vunpack.c.1.s8 %v516_v0  ;;  %v3658_v0 = vpop.f32.mrf.mxu1 }
 0x252   : >> { %3911 = vmatpush.bf16.msra.mxu1 %v2916_v41  ;;  %v3172_v12 = vpack.c.bf16 %v2596_v43, %v2580_v42  ;;  %v1796_v11 = vcvt.s32.f32 %v772_v44  ;;  %v1268_v13 = vunpack.c.0.s8 %v580_v40  ;;  %v1284_v18 = vunpack.c.1.s8 %v580_v40  ;;  %v3671_v40 = vpop.f32.mrf.mxu2  ;;  %v485_v41 = vld [vmem:[%s6786_s14 + $0x1e8] sm:$0xff] }
 0x253   : >> { %3924 = vmatpush.bf16.msra.mxu2 %v3044_v4  ;;  %v2036_v19 = vcvt.s32.f32 %v1012_v6  ;;  %v2052_v21 = vcvt.s32.f32 %v1028_v47  ;;  %v1524_v49 = vunpack.c.0.s8 %v644_v51  ;;  %v1540_v50 = vunpack.c.1.s8 %v644_v51 }
 0x254   : >> { %3937 = vmatpush.bf16.msra.mxu3 %v3172_v12  ;;  %v2772_v57 = vpack.c.bf16 %v1796_v11, %v1780_v5  ;;  %v2292_v22 = vcvt.s32.f32 %v1268_v13  ;;  %v2308_v23 = vcvt.s32.f32 %v1284_v18  ;;  %v724_v25 = vunpack.c.2.s8 %v436_v48 }
 0x255   : >> { %v2900_v32 = vpack.c.bf16 %v2052_v21, %v2036_v19  ;;  %v2548_v30 = vcvt.s32.f32 %v1524_v49  ;;  %v2564_v31 = vcvt.s32.f32 %v1540_v50  ;;  %v740_v37 = vunpack.c.3.s8 %v436_v48  ;;  %v613_v21 = vld [vmem:[%s6786_s14 + $0x5e8] sm:$0xff] }
 0x256   : >> { %3899 = vmatpush.bf16.msra.mxu0 %v2772_v57  ;;  %v3028_v7 = vpack.c.bf16 %v2308_v23, %v2292_v22  ;;  %v1748_v8 = vcvt.s32.f32 %v724_v25  ;;  %v980_v9 = vunpack.c.2.s8 %v500_v56  ;;  %v996_v10 = vunpack.c.3.s8 %v500_v56  ;;  %v677_v22 = vld [vmem:[%s6786_s14 + $0x7e8] sm:$0xff] }
 0x257   : >> { %3912 = vmatpush.bf16.msra.mxu1 %v2900_v32  ;;  %v3156_v46 = vpack.c.bf16 %v2564_v31, %v2548_v30  ;;  %v1764_v15 = vcvt.s32.f32 %v740_v37  ;;  %v1236_v45 = vunpack.c.2.s8 %v564_v62  ;;  %v1252_v51 = vunpack.c.3.s8 %v564_v62 }
 0x258   : >> { %3925 = vmatpush.bf16.msra.mxu2 %v3028_v7  ;;  %v2004_v52 = vcvt.s32.f32 %v980_v9  ;;  %v2020_v16 = vcvt.s32.f32 %v996_v10  ;;  %v1492_v17 = vunpack.c.2.s8 %v628_v38  ;;  %v1508_v26 = vunpack.c.3.s8 %v628_v38 }
 0x259   : >> { %3938 = vmatpush.bf16.msra.mxu3 %v3156_v46  ;;  %v2756_v27 = vpack.c.bf16 %v1764_v15, %v1748_v8  ;;  %v2260_v28 = vcvt.s32.f32 %v1236_v45  ;;  %v2276_v29 = vcvt.s32.f32 %v1252_v51  ;;  %v692_v53 = vunpack.c.0.s8 %v436_v48 }
 0x25a   : >> { %v2884_v33 = vpack.c.bf16 %v2020_v16, %v2004_v52  ;;  %v2516_v60 = vcvt.s32.f32 %v1492_v17  ;;  %v2532_v34 = vcvt.s32.f32 %v1508_v26  ;;  %v708_v59 = vunpack.c.1.s8 %v436_v48  ;;  %v549_v48 = vld [vmem:[%s6786_s14 + $0x3e8] sm:$0xff] }
 0x25b   : >> { %3900 = vmatpush.bf16.msra.mxu0 %v2756_v27  ;;  %v3012_v2 = vpack.c.bf16 %v2276_v29, %v2260_v28  ;;  %v1716_v3 = vcvt.s32.f32 %v692_v53  ;;  %v948_v35 = vunpack.c.0.s8 %v500_v56  ;;  %v964_v36 = vunpack.c.1.s8 %v500_v56 }
 0x25c   : >> { %3913 = vmatpush.bf16.msra.mxu1 %v2884_v33  ;;  %v3140_v42 = vpack.c.bf16 %v2532_v34, %v2516_v60  ;;  %v1732_v43 = vcvt.s32.f32 %v708_v59  ;;  %v1204_v44 = vunpack.c.0.s8 %v564_v62  ;;  %v1220_v4 = vunpack.c.1.s8 %v564_v62  ;;  %v469_v33 = vld [vmem:[%s6786_s14 + $0x168] sm:$0xff] }
 0x25d   : >> { %3926 = vmatpush.bf16.msra.mxu2 %v3012_v2  ;;  %v1972_v5 = vcvt.s32.f32 %v948_v35  ;;  %v1988_v6 = vcvt.s32.f32 %v964_v36  ;;  %v1460_v47 = vunpack.c.0.s8 %v628_v38  ;;  %v1476_v12 = vunpack.c.1.s8 %v628_v38 }
 0x25e   : >> { %3939 = vmatpush.bf16.msra.mxu3 %v3140_v42  ;;  %v2740_v11 = vpack.c.bf16 %v1732_v43, %v1716_v3  ;;  %v2228_v13 = vcvt.s32.f32 %v1204_v44  ;;  %v2244_v18 = vcvt.s32.f32 %v1220_v4  ;;  %v917_v19 = vunpack.c.2.s8 %v485_v41  ;;  %v533_v3 = vld [vmem:[%s6786_s14 + $0x368] sm:$0xff] }
 0x25f   : >> { %v2868_v49 = vpack.c.bf16 %v1988_v6, %v1972_v5  ;;  %v2484_v50 = vcvt.s32.f32 %v1460_v47  ;;  %v2500_v56 = vcvt.s32.f32 %v1476_v12  ;;  %v933_v57 = vunpack.c.3.s8 %v485_v41  ;;  %v597_v43 = vld [vmem:[%s6786_s14 + $0x568] sm:$0xff] }
 0x260   : >> { %3901 = vmatpush.bf16.msra.mxu0 %v2740_v11  ;;  %v2996_v23 = vpack.c.bf16 %v2244_v18, %v2228_v13  ;;  %v1941_v25 = vcvt.s32.f32 %v917_v19  ;;  %v1173_v62 = vunpack.c.2.s8 %v549_v48  ;;  %v1189_v32 = vunpack.c.3.s8 %v549_v48  ;;  %v661_v13 = vld [vmem:[%s6786_s14 + $0x768] sm:$0xff] }
 0x261   : >> { %3914 = vmatpush.bf16.msra.mxu1 %v2868_v49  ;;  %v3124_v30 = vpack.c.bf16 %v2500_v56, %v2484_v50  ;;  %v1957_v31 = vcvt.s32.f32 %v933_v57  ;;  %v1429_v37 = vunpack.c.2.s8 %v613_v21  ;;  %v1445_v38 = vunpack.c.3.s8 %v613_v21  ;;  %v3247_v19 = vld [vmem:[#allocation2 + $0x48] sm:$0xff] }
 0x262   : >> { %3927 = vmatpush.bf16.msra.mxu2 %v2996_v23  ;;  %v2197_v39 = vcvt.s32.f32 %v1173_v62  ;;  %v2213_v0 = vcvt.s32.f32 %v1189_v32  ;;  %v1685_v7 = vunpack.c.2.s8 %v677_v22  ;;  %v1701_v8 = vunpack.c.3.s8 %v677_v22 }
 0x263   : >> { %3940 = vmatpush.bf16.msra.mxu3 %v3124_v30  ;;  %v2853_v9 = vpack.c.bf16 %v1957_v31, %v1941_v25  ;;  %v2453_v10 = vcvt.s32.f32 %v1429_v37  ;;  %v2469_v40 = vcvt.s32.f32 %v1445_v38  ;;  %v885_v14 = vunpack.c.0.s8 %v485_v41  ;;  %3902 = vmatmul.bf16.vlgmr.msra.gmra.mxu0 %v6838_v20 }
 0x264   : >> { %v2981_v46 = vpack.c.bf16 %v2213_v0, %v2197_v39  ;;  %v2709_v15 = vcvt.s32.f32 %v1685_v7  ;;  %v2725_v45 = vcvt.s32.f32 %v1701_v8  ;;  %v901_v51 = vunpack.c.1.s8 %v485_v41  ;;  %3915 = vmatmul.bf16.vlgmr.msra.gmra.mxu1 %v6840_v24 }
 0x265   : >> { %3946 = vmatpush.bf16.msrb.mxu0 %v2853_v9  ;;  %v3109_v52 = vpack.c.bf16 %v2469_v40, %v2453_v10  ;;  %v1909_v16 = vcvt.s32.f32 %v885_v14  ;;  %v1141_v17 = vunpack.c.0.s8 %v549_v48  ;;  %v1157_v26 = vunpack.c.1.s8 %v549_v48  ;;  %3928 = vmatmul.bf16.vlgmr.msra.gmra.mxu2 %v6830_v58  ;;  %v453_v10 = vld [vmem:[%s6786_s14 + $0xe8] sm:$0xff] }
 0x266   : >> { %3959 = vmatpush.bf16.msrb.mxu1 %v2981_v46  ;;  %v3237_v27 = vpack.c.bf16 %v2725_v45, %v2709_v15  ;;  %v1925_v28 = vcvt.s32.f32 %v901_v51  ;;  %v1397_v29 = vunpack.c.0.s8 %v613_v21  ;;  %v1413_v53 = vunpack.c.1.s8 %v613_v21  ;;  %3941 = vmatmul.bf16.vlgmr.msra.gmra.mxu3 %v6833_v63 }
 0x267   : >> { %3972 = vmatpush.bf16.msrb.mxu2 %v3109_v52  ;;  %v2165_v60 = vcvt.s32.f32 %v1141_v17  ;;  %v2181_v34 = vcvt.s32.f32 %v1157_v26  ;;  %v1653_v59 = vunpack.c.0.s8 %v677_v22  ;;  %v1669_v2 = vunpack.c.1.s8 %v677_v22  ;;  %v517_v17 = vld [vmem:[%s6786_s14 + $0x2e8] sm:$0xff] }
 0x268   : >> { %3985 = vmatpush.bf16.msrb.mxu3 %v3237_v27  ;;  %v2837_v35 = vpack.c.bf16 %v1925_v28, %v1909_v16  ;;  %v2421_v36 = vcvt.s32.f32 %v1397_v29  ;;  %v2437_v41 = vcvt.s32.f32 %v1413_v53  ;;  %v3657_v42 = vadd.f32 %v7146_v55, %v7144_v54  ;;  %v581_v53 = vld [vmem:[%s6786_s14 + $0x4e8] sm:$0xff] }
 0x269   : >> { %v2965_v44 = vpack.c.bf16 %v2181_v34, %v2165_v60  ;;  %v2677_v4 = vcvt.s32.f32 %v1653_v59  ;;  %v2693_v5 = vcvt.s32.f32 %v1669_v2  ;;  %v853_v6 = vunpack.c.2.s8 %v469_v33  ;;  %v645_v2 = vld [vmem:[%s6786_s14 + $0x6e8] sm:$0xff] }
 0x26a   : >> { %3947 = vmatpush.bf16.msrb.mxu0 %v2837_v35  ;;  %v3093_v47 = vpack.c.bf16 %v2437_v41, %v2421_v36  ;;  %v3670_v12 = vadd.f32 %v7148_v61, %v3657_v42  ;;  %v869_v48 = vunpack.c.3.s8 %v469_v33  ;;  %v1109_v11 = vunpack.c.2.s8 %v533_v3 }
 0x26b   : >> { %3960 = vmatpush.bf16.msrb.mxu1 %v2965_v44  ;;  %v3221_v18 = vpack.c.bf16 %v2693_v5, %v2677_v4  ;;  %v1877_v21 = vcvt.s32.f32 %v853_v6  ;;  %v1125_v49 = vunpack.c.3.s8 %v533_v3  ;;  %v1365_v50 = vunpack.c.2.s8 %v597_v43  ;;  %v7176_v5 = vpop.f32.mrf.mxu0  ;;  %v7178_v6 = vpop.f32.mrf.mxu1 }
 0x26c   : >> { %3973 = vmatpush.bf16.msrb.mxu2 %v3093_v47  ;;  %v3683_v54 = vadd.f32 %v7150_v1, %v3670_v12  ;;  %v1893_v55 = vcvt.s32.f32 %v869_v48  ;;  %v2133_v56 = vcvt.s32.f32 %v1109_v11  ;;  %v1381_v57 = vunpack.c.3.s8 %v597_v43 }
 0x26d   : >> { %3986 = vmatpush.bf16.msrb.mxu3 %v3221_v18  ;;  %v2149_v22 = vcvt.s32.f32 %v1125_v49  ;;  %v2389_v23 = vcvt.s32.f32 %v1365_v50  ;;  %v1621_v25 = vunpack.c.2.s8 %v661_v13  ;;  %v1637_v61 = vunpack.c.3.s8 %v661_v13  ;;  %v7182_v18 = vpop.f32.mrf.mxu3 }
 0x26e   : >> { %v4109_v62 = vadd.f32 %v3683_v54, %v3247_v19  ;;  %v2821_v32 = vpack.c.bf16 %v1893_v55, %v1877_v21  ;;  %v2405_v30 = vcvt.s32.f32 %v1381_v57  ;;  %v821_v31 = vunpack.c.0.s8 %v469_v33 }
 0x26f   : >> { %v2949_v37 = vpack.c.bf16 %v2149_v22, %v2133_v56  ;;  %v2645_v38 = vcvt.s32.f32 %v1621_v25  ;;  %v2661_v39 = vcvt.s32.f32 %v1637_v61  ;;  %v837_v0 = vunpack.c.1.s8 %v469_v33 }
 0x270   : >> { %4125 = vst [vmem:[#allocation2 + $0x48] sm:$0xff] %v4109_v62  ;;  %3948 = vmatpush.bf16.msrb.mxu0 %v2821_v32  ;;  %v3077_v1 = vpack.c.bf16 %v2405_v30, %v2389_v23  ;;  %v1845_v7 = vcvt.s32.f32 %v821_v31  ;;  %v1077_v8 = vunpack.c.0.s8 %v533_v3  ;;  %v1093_v9 = vunpack.c.1.s8 %v533_v3  ;;  %v437_v62 = vld [vmem:[%s6786_s14 + $0x68] sm:$0xff] }
 0x271   : >> { %3961 = vmatpush.bf16.msrb.mxu1 %v2949_v37  ;;  %v3205_v40 = vpack.c.bf16 %v2661_v39, %v2645_v38  ;;  %v1861_v14 = vcvt.s32.f32 %v837_v0  ;;  %v1333_v46 = vunpack.c.0.s8 %v597_v43  ;;  %v1349_v15 = vunpack.c.1.s8 %v597_v43 }
 0x272   : >> { %3974 = vmatpush.bf16.msrb.mxu2 %v3077_v1  ;;  %v2101_v45 = vcvt.s32.f32 %v1077_v8  ;;  %v2117_v51 = vcvt.s32.f32 %v1093_v9  ;;  %v1589_v52 = vunpack.c.0.s8 %v661_v13  ;;  %v1605_v16 = vunpack.c.1.s8 %v661_v13  ;;  %v7180_v13 = vpop.f32.mrf.mxu2 }
 0x273   : >> { %3987 = vmatpush.bf16.msrb.mxu3 %v3205_v40  ;;  %v2805_v26 = vpack.c.bf16 %v1861_v14, %v1845_v7  ;;  %v2357_v27 = vcvt.s32.f32 %v1333_v46  ;;  %v2373_v28 = vcvt.s32.f32 %v1349_v15  ;;  %v789_v29 = vunpack.c.2.s8 %v453_v10  ;;  %v501_v7 = vld [vmem:[%s6786_s14 + $0x268] sm:$0xff] }
 0x274   : >> { %v2933_v33 = vpack.c.bf16 %v2117_v51, %v2101_v45  ;;  %v2613_v60 = vcvt.s32.f32 %v1589_v52  ;;  %v2629_v34 = vcvt.s32.f32 %v1605_v16  ;;  %v805_v59 = vunpack.c.3.s8 %v453_v10  ;;  %v565_v14 = vld [vmem:[%s6786_s14 + $0x468] sm:$0xff]  ;;  %v3697_v16 = vpop.f32.mrf.mxu0 }
 0x275   : >> { %3949 = vmatpush.bf16.msrb.mxu0 %v2805_v26  ;;  %v3061_v3 = vpack.c.bf16 %v2373_v28, %v2357_v27  ;;  %v1813_v35 = vcvt.s32.f32 %v789_v29  ;;  %v1045_v36 = vunpack.c.2.s8 %v517_v17  ;;  %v1061_v41 = vunpack.c.3.s8 %v517_v17  ;;  %v629_v52 = vld [vmem:[%s6786_s14 + $0x668] sm:$0xff] }
 0x276   : >> { %3962 = vmatpush.bf16.msrb.mxu1 %v2933_v33  ;;  %v3189_v42 = vpack.c.bf16 %v2629_v34, %v2613_v60  ;;  %v1829_v43 = vcvt.s32.f32 %v805_v59  ;;  %v1301_v44 = vunpack.c.2.s8 %v581_v53  ;;  %v1317_v4 = vunpack.c.3.s8 %v581_v53  ;;  %v3736_v33 = vpop.f32.mrf.mxu3 }
 0x277   : >> { %3975 = vmatpush.bf16.msrb.mxu2 %v3061_v3  ;;  %v2069_v47 = vcvt.s32.f32 %v1045_v36  ;;  %v2085_v12 = vcvt.s32.f32 %v1061_v41  ;;  %v1557_v48 = vunpack.c.2.s8 %v645_v2  ;;  %v1573_v11 = vunpack.c.3.s8 %v645_v2 }
 0x278   : >> { %3988 = vmatpush.bf16.msrb.mxu3 %v3189_v42  ;;  %v2789_v19 = vpack.c.bf16 %v1829_v43, %v1813_v35  ;;  %v2325_v21 = vcvt.s32.f32 %v1301_v44  ;;  %v2341_v49 = vcvt.s32.f32 %v1317_v4  ;;  %v757_v50 = vunpack.c.0.s8 %v453_v10 }
 0x279   : >> { %v2917_v54 = vpack.c.bf16 %v2085_v12, %v2069_v47  ;;  %v2581_v55 = vcvt.s32.f32 %v1557_v48  ;;  %v2597_v56 = vcvt.s32.f32 %v1573_v11  ;;  %v773_v57 = vunpack.c.1.s8 %v453_v10 }
 0x27a   : >> { %3950 = vmatpush.bf16.msrb.mxu0 %v2789_v19  ;;  %v3045_v22 = vpack.c.bf16 %v2341_v49, %v2325_v21  ;;  %v1781_v23 = vcvt.s32.f32 %v757_v50  ;;  %v1013_v25 = vunpack.c.0.s8 %v517_v17  ;;  %v1029_v61 = vunpack.c.1.s8 %v517_v17  ;;  %v3710_v17 = vpop.f32.mrf.mxu1 }
 0x27b   : >> { %3963 = vmatpush.bf16.msrb.mxu1 %v2917_v54  ;;  %v3173_v32 = vpack.c.bf16 %v2597_v56, %v2581_v55  ;;  %v1797_v30 = vcvt.s32.f32 %v773_v57  ;;  %v1269_v31 = vunpack.c.0.s8 %v581_v53  ;;  %v1285_v37 = vunpack.c.1.s8 %v581_v53  ;;  %v3723_v53 = vpop.f32.mrf.mxu2  ;;  %v486_v54 = vld [vmem:[%s6786_s14 + $0x1f0] sm:$0xff] }
 0x27c   : >> { %3976 = vmatpush.bf16.msrb.mxu2 %v3045_v22  ;;  %v2037_v38 = vcvt.s32.f32 %v1013_v25  ;;  %v2053_v39 = vcvt.s32.f32 %v1029_v61  ;;  %v1525_v0 = vunpack.c.0.s8 %v645_v2  ;;  %v1541_v1 = vunpack.c.1.s8 %v645_v2 }
 0x27d   : >> { %3989 = vmatpush.bf16.msrb.mxu3 %v3173_v32  ;;  %v2773_v8 = vpack.c.bf16 %v1797_v30, %v1781_v23  ;;  %v2293_v9 = vcvt.s32.f32 %v1269_v31  ;;  %v2309_v10 = vcvt.s32.f32 %v1285_v37  ;;  %v725_v40 = vunpack.c.2.s8 %v437_v62 }
 0x27e   : >> { %v2901_v46 = vpack.c.bf16 %v2053_v39, %v2037_v38  ;;  %v2549_v15 = vcvt.s32.f32 %v1525_v0  ;;  %v2565_v45 = vcvt.s32.f32 %v1541_v1  ;;  %v741_v51 = vunpack.c.3.s8 %v437_v62  ;;  %v614_v39 = vld [vmem:[%s6786_s14 + $0x5f0] sm:$0xff] }
 0x27f   : >> { %3951 = vmatpush.bf16.msrb.mxu0 %v2773_v8  ;;  %v3029_v26 = vpack.c.bf16 %v2309_v10, %v2293_v9  ;;  %v1749_v27 = vcvt.s32.f32 %v725_v40  ;;  %v981_v28 = vunpack.c.2.s8 %v501_v7  ;;  %v997_v29 = vunpack.c.3.s8 %v501_v7  ;;  %v678_v9 = vld [vmem:[%s6786_s14 + $0x7f0] sm:$0xff] }
 0x280   : >> { %3964 = vmatpush.bf16.msrb.mxu1 %v2901_v46  ;;  %v3157_v60 = vpack.c.bf16 %v2565_v45, %v2549_v15  ;;  %v1765_v34 = vcvt.s32.f32 %v741_v51  ;;  %v1237_v59 = vunpack.c.2.s8 %v565_v14  ;;  %v1253_v2 = vunpack.c.3.s8 %v565_v14 }
 0x281   : >> { %3977 = vmatpush.bf16.msrb.mxu2 %v3029_v26  ;;  %v2005_v3 = vcvt.s32.f32 %v981_v28  ;;  %v2021_v35 = vcvt.s32.f32 %v997_v29  ;;  %v1493_v36 = vunpack.c.2.s8 %v629_v52  ;;  %v1509_v41 = vunpack.c.3.s8 %v629_v52 }
 0x282   : >> { %3990 = vmatpush.bf16.msrb.mxu3 %v3157_v60  ;;  %v2757_v42 = vpack.c.bf16 %v1765_v34, %v1749_v27  ;;  %v2261_v43 = vcvt.s32.f32 %v1237_v59  ;;  %v2277_v44 = vcvt.s32.f32 %v1253_v2  ;;  %v693_v4 = vunpack.c.0.s8 %v437_v62 }
 0x283   : >> { %v2885_v47 = vpack.c.bf16 %v2021_v35, %v2005_v3  ;;  %v2517_v12 = vcvt.s32.f32 %v1493_v36  ;;  %v2533_v48 = vcvt.s32.f32 %v1509_v41  ;;  %v709_v11 = vunpack.c.1.s8 %v437_v62  ;;  %v550_v62 = vld [vmem:[%s6786_s14 + $0x3f0] sm:$0xff] }
 0x284   : >> { %3952 = vmatpush.bf16.msrb.mxu0 %v2757_v42  ;;  %v3013_v19 = vpack.c.bf16 %v2277_v44, %v2261_v43  ;;  %v1717_v21 = vcvt.s32.f32 %v693_v4  ;;  %v949_v49 = vunpack.c.0.s8 %v501_v7  ;;  %v965_v50 = vunpack.c.1.s8 %v501_v7 }
 0x285   : >> { %3965 = vmatpush.bf16.msrb.mxu1 %v2885_v47  ;;  %v3141_v55 = vpack.c.bf16 %v2533_v48, %v2517_v12  ;;  %v1733_v56 = vcvt.s32.f32 %v709_v11  ;;  %v1205_v57 = vunpack.c.0.s8 %v565_v14  ;;  %v1221_v22 = vunpack.c.1.s8 %v565_v14  ;;  %v470_v47 = vld [vmem:[%s6786_s14 + $0x170] sm:$0xff] }
 0x286   : >> { %3978 = vmatpush.bf16.msrb.mxu2 %v3013_v19  ;;  %v1973_v23 = vcvt.s32.f32 %v949_v49  ;;  %v1989_v25 = vcvt.s32.f32 %v965_v50  ;;  %v1461_v61 = vunpack.c.0.s8 %v629_v52  ;;  %v1477_v32 = vunpack.c.1.s8 %v629_v52 }
 0x287   : >> { %3991 = vmatpush.bf16.msrb.mxu3 %v3141_v55  ;;  %v2741_v30 = vpack.c.bf16 %v1733_v56, %v1717_v21  ;;  %v2229_v31 = vcvt.s32.f32 %v1205_v57  ;;  %v2245_v37 = vcvt.s32.f32 %v1221_v22  ;;  %v918_v38 = vunpack.c.2.s8 %v486_v54  ;;  %v534_v21 = vld [vmem:[%s6786_s14 + $0x370] sm:$0xff] }
 0x288   : >> { %v2869_v0 = vpack.c.bf16 %v1989_v25, %v1973_v23  ;;  %v2485_v1 = vcvt.s32.f32 %v1461_v61  ;;  %v2501_v7 = vcvt.s32.f32 %v1477_v32  ;;  %v934_v8 = vunpack.c.3.s8 %v486_v54  ;;  %v598_v56 = vld [vmem:[%s6786_s14 + $0x570] sm:$0xff] }
 0x289   : >> { %3953 = vmatpush.bf16.msrb.mxu0 %v2741_v30  ;;  %v2997_v10 = vpack.c.bf16 %v2245_v37, %v2229_v31  ;;  %v1942_v40 = vcvt.s32.f32 %v918_v38  ;;  %v1174_v14 = vunpack.c.2.s8 %v550_v62  ;;  %v1190_v46 = vunpack.c.3.s8 %v550_v62  ;;  %v662_v31 = vld [vmem:[%s6786_s14 + $0x770] sm:$0xff]  ;;  %v3248_v38 = vld [vmem:[#allocation2 + $0x40] sm:$0xff] }
 0x28a   : >> { %3966 = vmatpush.bf16.msrb.mxu1 %v2869_v0  ;;  %v3125_v15 = vpack.c.bf16 %v2501_v7, %v2485_v1  ;;  %v1958_v45 = vcvt.s32.f32 %v934_v8  ;;  %v1430_v51 = vunpack.c.2.s8 %v614_v39  ;;  %v1446_v52 = vunpack.c.3.s8 %v614_v39 }
 0x28b   : >> { %3979 = vmatpush.bf16.msrb.mxu2 %v2997_v10  ;;  %v2198_v16 = vcvt.s32.f32 %v1174_v14  ;;  %v2214_v17 = vcvt.s32.f32 %v1190_v46  ;;  %v1686_v26 = vunpack.c.2.s8 %v678_v9  ;;  %v1702_v27 = vunpack.c.3.s8 %v678_v9 }
 0x28c   : >> { %3992 = vmatpush.bf16.msrb.mxu3 %v3125_v15  ;;  %v2854_v28 = vpack.c.bf16 %v1958_v45, %v1942_v40  ;;  %v2454_v29 = vcvt.s32.f32 %v1430_v51  ;;  %v2470_v53 = vcvt.s32.f32 %v1446_v52  ;;  %v886_v33 = vunpack.c.0.s8 %v486_v54  ;;  %3954 = vmatmul.bf16.vlgmr.msrb.gmra.mxu0 %v6838_v20 }
 0x28d   : >> { %v2982_v60 = vpack.c.bf16 %v2214_v17, %v2198_v16  ;;  %v2710_v34 = vcvt.s32.f32 %v1686_v26  ;;  %v2726_v59 = vcvt.s32.f32 %v1702_v27  ;;  %v902_v2 = vunpack.c.1.s8 %v486_v54  ;;  %3967 = vmatmul.bf16.vlgmr.msrb.gmra.mxu1 %v6840_v24 }
 0x28e   : >> { %3998 = vmatpush.bf16.msra.mxu0 %v2854_v28  ;;  %v3110_v3 = vpack.c.bf16 %v2470_v53, %v2454_v29  ;;  %v1910_v35 = vcvt.s32.f32 %v886_v33  ;;  %v1142_v36 = vunpack.c.0.s8 %v550_v62  ;;  %v1158_v41 = vunpack.c.1.s8 %v550_v62  ;;  %3980 = vmatmul.bf16.vlgmr.msrb.gmra.mxu2 %v6830_v58  ;;  %v454_v29 = vld [vmem:[%s6786_s14 + $0xf0] sm:$0xff] }
 0x28f   : >> { %4011 = vmatpush.bf16.msra.mxu1 %v2982_v60  ;;  %v3238_v42 = vpack.c.bf16 %v2726_v59, %v2710_v34  ;;  %v1926_v43 = vcvt.s32.f32 %v902_v2  ;;  %v1398_v44 = vunpack.c.0.s8 %v614_v39  ;;  %v1414_v4 = vunpack.c.1.s8 %v614_v39  ;;  %3993 = vmatmul.bf16.vlgmr.msrb.gmra.mxu3 %v6833_v63 }
 0x290   : >> { %4024 = vmatpush.bf16.msra.mxu2 %v3110_v3  ;;  %v2166_v12 = vcvt.s32.f32 %v1142_v36  ;;  %v2182_v48 = vcvt.s32.f32 %v1158_v41  ;;  %v1654_v11 = vunpack.c.0.s8 %v678_v9  ;;  %v1670_v19 = vunpack.c.1.s8 %v678_v9  ;;  %v518_v36 = vld [vmem:[%s6786_s14 + $0x2f0] sm:$0xff] }
 0x291   : >> { %4037 = vmatpush.bf16.msra.mxu3 %v3238_v42  ;;  %v2838_v49 = vpack.c.bf16 %v1926_v43, %v1910_v35  ;;  %v2422_v50 = vcvt.s32.f32 %v1398_v44  ;;  %v2438_v54 = vcvt.s32.f32 %v1414_v4  ;;  %v3709_v55 = vadd.f32 %v7178_v6, %v7176_v5  ;;  %v582_v4 = vld [vmem:[%s6786_s14 + $0x4f0] sm:$0xff] }
 0x292   : >> { %v2966_v57 = vpack.c.bf16 %v2182_v48, %v2166_v12  ;;  %v2678_v22 = vcvt.s32.f32 %v1654_v11  ;;  %v2694_v23 = vcvt.s32.f32 %v1670_v19  ;;  %v854_v25 = vunpack.c.2.s8 %v470_v47  ;;  %v646_v19 = vld [vmem:[%s6786_s14 + $0x6f0] sm:$0xff] }
 0x293   : >> { %3999 = vmatpush.bf16.msra.mxu0 %v2838_v49  ;;  %v3094_v61 = vpack.c.bf16 %v2438_v54, %v2422_v50  ;;  %v3722_v32 = vadd.f32 %v7180_v13, %v3709_v55  ;;  %v870_v62 = vunpack.c.3.s8 %v470_v47  ;;  %v1110_v30 = vunpack.c.2.s8 %v534_v21 }
 0x294   : >> { %4012 = vmatpush.bf16.msra.mxu1 %v2966_v57  ;;  %v3222_v37 = vpack.c.bf16 %v2694_v23, %v2678_v22  ;;  %v1878_v39 = vcvt.s32.f32 %v854_v25  ;;  %v1126_v0 = vunpack.c.3.s8 %v534_v21  ;;  %v1366_v1 = vunpack.c.2.s8 %v598_v56  ;;  %v7208_v23 = vpop.f32.mrf.mxu0  ;;  %v7210_v25 = vpop.f32.mrf.mxu1 }
 0x295   : >> { %4025 = vmatpush.bf16.msra.mxu2 %v3094_v61  ;;  %v3735_v5 = vadd.f32 %v7182_v18, %v3722_v32  ;;  %v1894_v6 = vcvt.s32.f32 %v870_v62  ;;  %v2134_v7 = vcvt.s32.f32 %v1110_v30  ;;  %v1382_v8 = vunpack.c.3.s8 %v598_v56 }
 0x296   : >> { %4038 = vmatpush.bf16.msra.mxu3 %v3222_v37  ;;  %v2150_v9 = vcvt.s32.f32 %v1126_v0  ;;  %v2390_v10 = vcvt.s32.f32 %v1366_v1  ;;  %v1622_v40 = vunpack.c.2.s8 %v662_v31  ;;  %v1638_v13 = vunpack.c.3.s8 %v662_v31  ;;  %v7214_v37 = vpop.f32.mrf.mxu3 }
 0x297   : >> { %v4110_v14 = vadd.f32 %v3735_v5, %v3248_v38  ;;  %v2822_v46 = vpack.c.bf16 %v1894_v6, %v1878_v39  ;;  %v2406_v15 = vcvt.s32.f32 %v1382_v8  ;;  %v822_v45 = vunpack.c.0.s8 %v470_v47 }
 0x298   : >> { %v2950_v51 = vpack.c.bf16 %v2150_v9, %v2134_v7  ;;  %v2646_v52 = vcvt.s32.f32 %v1622_v40  ;;  %v2662_v16 = vcvt.s32.f32 %v1638_v13  ;;  %v838_v17 = vunpack.c.1.s8 %v470_v47 }
 0x299   : >> { %4126 = vst [vmem:[#allocation2 + $0x40] sm:$0xff] %v4110_v14  ;;  %4000 = vmatpush.bf16.msra.mxu0 %v2822_v46  ;;  %v3078_v18 = vpack.c.bf16 %v2406_v15, %v2390_v10  ;;  %v1846_v26 = vcvt.s32.f32 %v822_v45  ;;  %v1078_v27 = vunpack.c.0.s8 %v534_v21  ;;  %v1094_v28 = vunpack.c.1.s8 %v534_v21  ;;  %v438_v14 = vld [vmem:[%s6786_s14 + $0x70] sm:$0xff] }
 0x29a   : >> { %4013 = vmatpush.bf16.msra.mxu1 %v2950_v51  ;;  %v3206_v53 = vpack.c.bf16 %v2662_v16, %v2646_v52  ;;  %v1862_v33 = vcvt.s32.f32 %v838_v17  ;;  %v1334_v60 = vunpack.c.0.s8 %v598_v56  ;;  %v1350_v34 = vunpack.c.1.s8 %v598_v56 }
 0x29b   : >> { %4026 = vmatpush.bf16.msra.mxu2 %v3078_v18  ;;  %v2102_v59 = vcvt.s32.f32 %v1078_v27  ;;  %v2118_v2 = vcvt.s32.f32 %v1094_v28  ;;  %v1590_v3 = vunpack.c.0.s8 %v662_v31  ;;  %v1606_v35 = vunpack.c.1.s8 %v662_v31  ;;  %v7212_v31 = vpop.f32.mrf.mxu2 }
 0x29c   : >> { %4039 = vmatpush.bf16.msra.mxu3 %v3206_v53  ;;  %v2806_v41 = vpack.c.bf16 %v1862_v33, %v1846_v26  ;;  %v2358_v42 = vcvt.s32.f32 %v1334_v60  ;;  %v2374_v43 = vcvt.s32.f32 %v1350_v34  ;;  %v790_v44 = vunpack.c.2.s8 %v454_v29  ;;  %v502_v26 = vld [vmem:[%s6786_s14 + $0x270] sm:$0xff] }
 0x29d   : >> { %v2934_v47 = vpack.c.bf16 %v2118_v2, %v2102_v59  ;;  %v2614_v12 = vcvt.s32.f32 %v1590_v3  ;;  %v2630_v48 = vcvt.s32.f32 %v1606_v35  ;;  %v806_v11 = vunpack.c.3.s8 %v454_v29  ;;  %v566_v33 = vld [vmem:[%s6786_s14 + $0x470] sm:$0xff]  ;;  %v3749_v35 = vpop.f32.mrf.mxu0 }
 0x29e   : >> { %4001 = vmatpush.bf16.msra.mxu0 %v2806_v41  ;;  %v3062_v21 = vpack.c.bf16 %v2374_v43, %v2358_v42  ;;  %v1814_v49 = vcvt.s32.f32 %v790_v44  ;;  %v1046_v50 = vunpack.c.2.s8 %v518_v36  ;;  %v1062_v54 = vunpack.c.3.s8 %v518_v36  ;;  %v630_v3 = vld [vmem:[%s6786_s14 + $0x670] sm:$0xff] }
 0x29f   : >> { %4014 = vmatpush.bf16.msra.mxu1 %v2934_v47  ;;  %v3190_v55 = vpack.c.bf16 %v2630_v48, %v2614_v12  ;;  %v1830_v56 = vcvt.s32.f32 %v806_v11  ;;  %v1302_v57 = vunpack.c.2.s8 %v582_v4  ;;  %v1318_v22 = vunpack.c.3.s8 %v582_v4  ;;  %v3788_v47 = vpop.f32.mrf.mxu3 }
 0x2a0   : >> { %4027 = vmatpush.bf16.msra.mxu2 %v3062_v21  ;;  %v2070_v61 = vcvt.s32.f32 %v1046_v50  ;;  %v2086_v32 = vcvt.s32.f32 %v1062_v54  ;;  %v1558_v62 = vunpack.c.2.s8 %v646_v19  ;;  %v1574_v30 = vunpack.c.3.s8 %v646_v19 }
 0x2a1   : >> { %4040 = vmatpush.bf16.msra.mxu3 %v3190_v55  ;;  %v2790_v38 = vpack.c.bf16 %v1830_v56, %v1814_v49  ;;  %v2326_v39 = vcvt.s32.f32 %v1302_v57  ;;  %v2342_v0 = vcvt.s32.f32 %v1318_v22  ;;  %v758_v1 = vunpack.c.0.s8 %v454_v29 }
 0x2a2   : >> { %v2918_v5 = vpack.c.bf16 %v2086_v32, %v2070_v61  ;;  %v2582_v6 = vcvt.s32.f32 %v1558_v62  ;;  %v2598_v7 = vcvt.s32.f32 %v1574_v30  ;;  %v774_v8 = vunpack.c.1.s8 %v454_v29 }
 0x2a3   : >> { %4002 = vmatpush.bf16.msra.mxu0 %v2790_v38  ;;  %v3046_v9 = vpack.c.bf16 %v2342_v0, %v2326_v39  ;;  %v1782_v10 = vcvt.s32.f32 %v758_v1  ;;  %v1014_v40 = vunpack.c.0.s8 %v518_v36  ;;  %v1030_v13 = vunpack.c.1.s8 %v518_v36  ;;  %v3762_v36 = vpop.f32.mrf.mxu1 }
 0x2a4   : >> { %4015 = vmatpush.bf16.msra.mxu1 %v2918_v5  ;;  %v3174_v46 = vpack.c.bf16 %v2598_v7, %v2582_v6  ;;  %v1798_v15 = vcvt.s32.f32 %v774_v8  ;;  %v1270_v45 = vunpack.c.0.s8 %v582_v4  ;;  %v1286_v51 = vunpack.c.1.s8 %v582_v4  ;;  %v3775_v4 = vpop.f32.mrf.mxu2  ;;  %v487_v5 = vld [vmem:[%s6786_s14 + $0x1f8] sm:$0xff] }
 0x2a5   : >> { %4028 = vmatpush.bf16.msra.mxu2 %v3046_v9  ;;  %v2038_v52 = vcvt.s32.f32 %v1014_v40  ;;  %v2054_v16 = vcvt.s32.f32 %v1030_v13  ;;  %v1526_v17 = vunpack.c.0.s8 %v646_v19  ;;  %v1542_v18 = vunpack.c.1.s8 %v646_v19 }
 0x2a6   : >> { %4041 = vmatpush.bf16.msra.mxu3 %v3174_v46  ;;  %v2774_v27 = vpack.c.bf16 %v1798_v15, %v1782_v10  ;;  %v2294_v28 = vcvt.s32.f32 %v1270_v45  ;;  %v2310_v29 = vcvt.s32.f32 %v1286_v51  ;;  %v726_v53 = vunpack.c.2.s8 %v438_v14 }
 0x2a7   : >> { %v2902_v60 = vpack.c.bf16 %v2054_v16, %v2038_v52  ;;  %v2550_v34 = vcvt.s32.f32 %v1526_v17  ;;  %v2566_v59 = vcvt.s32.f32 %v1542_v18  ;;  %v742_v2 = vunpack.c.3.s8 %v438_v14  ;;  %v615_v16 = vld [vmem:[%s6786_s14 + $0x5f8] sm:$0xff] }
 0x2a8   : >> { %4003 = vmatpush.bf16.msra.mxu0 %v2774_v27  ;;  %v3030_v41 = vpack.c.bf16 %v2310_v29, %v2294_v28  ;;  %v1750_v42 = vcvt.s32.f32 %v726_v53  ;;  %v982_v43 = vunpack.c.2.s8 %v502_v26  ;;  %v998_v44 = vunpack.c.3.s8 %v502_v26  ;;  %v679_v28 = vld [vmem:[%s6786_s14 + $0x7f8] sm:$0xff] }
 0x2a9   : >> { %4016 = vmatpush.bf16.msra.mxu1 %v2902_v60  ;;  %v3158_v12 = vpack.c.bf16 %v2566_v59, %v2550_v34  ;;  %v1766_v48 = vcvt.s32.f32 %v742_v2  ;;  %v1238_v11 = vunpack.c.2.s8 %v566_v33  ;;  %v1254_v19 = vunpack.c.3.s8 %v566_v33 }
 0x2aa   : >> { %4029 = vmatpush.bf16.msra.mxu2 %v3030_v41  ;;  %v2006_v21 = vcvt.s32.f32 %v982_v43  ;;  %v2022_v49 = vcvt.s32.f32 %v998_v44  ;;  %v1494_v50 = vunpack.c.2.s8 %v630_v3  ;;  %v1510_v54 = vunpack.c.3.s8 %v630_v3 }
 0x2ab   : >> { %4042 = vmatpush.bf16.msra.mxu3 %v3158_v12  ;;  %v2758_v55 = vpack.c.bf16 %v1766_v48, %v1750_v42  ;;  %v2262_v56 = vcvt.s32.f32 %v1238_v11  ;;  %v2278_v57 = vcvt.s32.f32 %v1254_v19  ;;  %v694_v22 = vunpack.c.0.s8 %v438_v14 }
 0x2ac   : >> { %v2886_v61 = vpack.c.bf16 %v2022_v49, %v2006_v21  ;;  %v2518_v32 = vcvt.s32.f32 %v1494_v50  ;;  %v2534_v62 = vcvt.s32.f32 %v1510_v54  ;;  %v710_v30 = vunpack.c.1.s8 %v438_v14  ;;  %v551_v14 = vld [vmem:[%s6786_s14 + $0x3f8] sm:$0xff] }
 0x2ad   : >> { %4004 = vmatpush.bf16.msra.mxu0 %v2758_v55  ;;  %v3014_v38 = vpack.c.bf16 %v2278_v57, %v2262_v56  ;;  %v1718_v39 = vcvt.s32.f32 %v694_v22  ;;  %v950_v0 = vunpack.c.0.s8 %v502_v26  ;;  %v966_v1 = vunpack.c.1.s8 %v502_v26 }
 0x2ae   : >> { %4017 = vmatpush.bf16.msra.mxu1 %v2886_v61  ;;  %v3142_v6 = vpack.c.bf16 %v2534_v62, %v2518_v32  ;;  %v1734_v7 = vcvt.s32.f32 %v710_v30  ;;  %v1206_v8 = vunpack.c.0.s8 %v566_v33  ;;  %v1222_v9 = vunpack.c.1.s8 %v566_v33  ;;  %v471_v61 = vld [vmem:[%s6786_s14 + $0x178] sm:$0xff] }
 0x2af   : >> { %4030 = vmatpush.bf16.msra.mxu2 %v3014_v38  ;;  %v1974_v10 = vcvt.s32.f32 %v950_v0  ;;  %v1990_v40 = vcvt.s32.f32 %v966_v1  ;;  %v1462_v13 = vunpack.c.0.s8 %v630_v3  ;;  %v1478_v46 = vunpack.c.1.s8 %v630_v3 }
 0x2b0   : >> { %4043 = vmatpush.bf16.msra.mxu3 %v3142_v6  ;;  %v2742_v15 = vpack.c.bf16 %v1734_v7, %v1718_v39  ;;  %v2230_v45 = vcvt.s32.f32 %v1206_v8  ;;  %v2246_v51 = vcvt.s32.f32 %v1222_v9  ;;  %v919_v52 = vunpack.c.2.s8 %v487_v5  ;;  %v535_v39 = vld [vmem:[%s6786_s14 + $0x378] sm:$0xff] }
 0x2b1   : >> { %v2870_v17 = vpack.c.bf16 %v1990_v40, %v1974_v10  ;;  %v2486_v18 = vcvt.s32.f32 %v1462_v13  ;;  %v2502_v26 = vcvt.s32.f32 %v1478_v46  ;;  %v935_v27 = vunpack.c.3.s8 %v487_v5  ;;  %v599_v7 = vld [vmem:[%s6786_s14 + $0x578] sm:$0xff] }
 0x2b2   : >> { %4005 = vmatpush.bf16.msra.mxu0 %v2742_v15  ;;  %v2998_v29 = vpack.c.bf16 %v2246_v51, %v2230_v45  ;;  %v1943_v53 = vcvt.s32.f32 %v919_v52  ;;  %v1175_v33 = vunpack.c.2.s8 %v551_v14  ;;  %v1191_v60 = vunpack.c.3.s8 %v551_v14  ;;  %v663_v45 = vld [vmem:[%s6786_s14 + $0x778] sm:$0xff]  ;;  %v3249_v52 = vld [vmem:[#allocation2 + $0x20] sm:$0xff] }
 0x2b3   : >> { %4018 = vmatpush.bf16.msra.mxu1 %v2870_v17  ;;  %v3126_v34 = vpack.c.bf16 %v2502_v26, %v2486_v18  ;;  %v1959_v59 = vcvt.s32.f32 %v935_v27  ;;  %v1431_v2 = vunpack.c.2.s8 %v615_v16  ;;  %v1447_v3 = vunpack.c.3.s8 %v615_v16 }
 0x2b4   : >> { %4031 = vmatpush.bf16.msra.mxu2 %v2998_v29  ;;  %v2199_v35 = vcvt.s32.f32 %v1175_v33  ;;  %v2215_v36 = vcvt.s32.f32 %v1191_v60  ;;  %v1687_v41 = vunpack.c.2.s8 %v679_v28  ;;  %v1703_v42 = vunpack.c.3.s8 %v679_v28 }
 0x2b5   : >> { %4044 = vmatpush.bf16.msra.mxu3 %v3126_v34  ;;  %v2855_v43 = vpack.c.bf16 %v1959_v59, %v1943_v53  ;;  %v2455_v44 = vcvt.s32.f32 %v1431_v2  ;;  %v2471_v4 = vcvt.s32.f32 %v1447_v3  ;;  %v887_v47 = vunpack.c.0.s8 %v487_v5  ;;  %4006 = vmatmul.bf16.vlgmr.msra.gmra.mxu0 %v6838_v20 }
 0x2b6   : >> { %v2983_v12 = vpack.c.bf16 %v2215_v36, %v2199_v35  ;;  %v2711_v48 = vcvt.s32.f32 %v1687_v41  ;;  %v2727_v11 = vcvt.s32.f32 %v1703_v42  ;;  %v903_v19 = vunpack.c.1.s8 %v487_v5  ;;  %4019 = vmatmul.bf16.vlgmr.msra.gmra.mxu1 %v6840_v24  ;;  %v7236_v41 = vpop.f32.mrf.mxu0 }
 0x2b7   : >> { %4050 = vmatpush.bf16.msrb.mxu0 %v2855_v43  ;;  %v3111_v21 = vpack.c.bf16 %v2471_v4, %v2455_v44  ;;  %v1911_v49 = vcvt.s32.f32 %v887_v47  ;;  %v1143_v50 = vunpack.c.0.s8 %v551_v14  ;;  %v1159_v54 = vunpack.c.1.s8 %v551_v14  ;;  %4032 = vmatmul.bf16.vlgmr.msra.gmra.mxu2 %v6830_v58  ;;  %v455_v47 = vld [vmem:[%s6786_s14 + $0xf8] sm:$0xff] }
 0x2b8   : >> { %4063 = vmatpush.bf16.msrb.mxu1 %v2983_v12  ;;  %v3239_v55 = vpack.c.bf16 %v2727_v11, %v2711_v48  ;;  %v1927_v56 = vcvt.s32.f32 %v903_v19  ;;  %v1399_v57 = vunpack.c.0.s8 %v615_v16  ;;  %v1415_v22 = vunpack.c.1.s8 %v615_v16  ;;  %4045 = vmatmul.bf16.vlgmr.msra.gmra.mxu3 %v6833_v63  ;;  %v7241_v12 = vpop.f32.mrf.mxu2  ;;  %v7243_v48 = vpop.f32.mrf.mxu3 }
 0x2b9   : >> { %4076 = vmatpush.bf16.msrb.mxu2 %v3111_v21  ;;  %v2167_v32 = vcvt.s32.f32 %v1143_v50  ;;  %v2183_v62 = vcvt.s32.f32 %v1159_v54  ;;  %v1655_v30 = vunpack.c.0.s8 %v679_v28  ;;  %v1671_v38 = vunpack.c.1.s8 %v679_v28 }
 0x2ba   : >> { %4089 = vmatpush.bf16.msrb.mxu3 %v3239_v55  ;;  %v2839_v0 = vpack.c.bf16 %v1927_v56, %v1911_v49  ;;  %v2423_v1 = vcvt.s32.f32 %v1399_v57  ;;  %v2439_v5 = vcvt.s32.f32 %v1415_v22  ;;  %v3761_v6 = vadd.f32 %v7210_v25, %v7208_v23  ;;  %v519_v57 = vld [vmem:[%s6786_s14 + $0x2f8] sm:$0xff] }
 0x2bb   : >> { %v2967_v8 = vpack.c.bf16 %v2183_v62, %v2167_v32  ;;  %v2679_v9 = vcvt.s32.f32 %v1655_v30  ;;  %v2695_v10 = vcvt.s32.f32 %v1671_v38  ;;  %v855_v40 = vunpack.c.2.s8 %v471_v61  ;;  %v583_v30 = vld [vmem:[%s6786_s14 + $0x4f8] sm:$0xff] }
 0x2bc   : >> { %4051 = vmatpush.bf16.msrb.mxu0 %v2839_v0  ;;  %v3095_v13 = vpack.c.bf16 %v2439_v5, %v2423_v1  ;;  %v3774_v46 = vadd.f32 %v7212_v31, %v3761_v6  ;;  %v871_v14 = vunpack.c.3.s8 %v471_v61  ;;  %v1111_v15 = vunpack.c.2.s8 %v535_v39  ;;  %v647_v5 = vld [vmem:[%s6786_s14 + $0x6f8] sm:$0xff] }
 0x2bd   : >> { %4064 = vmatpush.bf16.msrb.mxu1 %v2967_v8  ;;  %v3223_v51 = vpack.c.bf16 %v2695_v10, %v2679_v9  ;;  %v1879_v16 = vcvt.s32.f32 %v855_v40  ;;  %v1127_v17 = vunpack.c.3.s8 %v535_v39  ;;  %v1367_v18 = vunpack.c.2.s8 %v599_v7 }
 0x2be   : >> { %4077 = vmatpush.bf16.msrb.mxu2 %v3095_v13  ;;  %v3787_v23 = vadd.f32 %v7214_v37, %v3774_v46  ;;  %v1895_v25 = vcvt.s32.f32 %v871_v14  ;;  %v2135_v26 = vcvt.s32.f32 %v1111_v15  ;;  %v1383_v27 = vunpack.c.3.s8 %v599_v7  ;;  %v7238_v37 = vpop.f32.mrf.mxu1 }
 0x2bf   : >> { %4090 = vmatpush.bf16.msrb.mxu3 %v3223_v51  ;;  %v2151_v28 = vcvt.s32.f32 %v1127_v17  ;;  %v2391_v29 = vcvt.s32.f32 %v1367_v18  ;;  %v1623_v53 = vunpack.c.2.s8 %v663_v45  ;;  %v1639_v31 = vunpack.c.3.s8 %v663_v45 }
 0x2c0   : >> { %v4111_v33 = vadd.f32 %v3787_v23, %v3249_v52  ;;  %v2823_v60 = vpack.c.bf16 %v1895_v25, %v1879_v16  ;;  %v2407_v34 = vcvt.s32.f32 %v1383_v27  ;;  %v823_v59 = vunpack.c.0.s8 %v471_v61  ;;  %v3801_v52 = vpop.f32.mrf.mxu0  ;;  %v3840_v27 = vpop.f32.mrf.mxu3 }
 0x2c1   : >> { %v2951_v2 = vpack.c.bf16 %v2151_v28, %v2135_v26  ;;  %v2647_v3 = vcvt.s32.f32 %v1623_v53  ;;  %v2663_v35 = vcvt.s32.f32 %v1639_v31  ;;  %v839_v36 = vunpack.c.1.s8 %v471_v61  ;;  %v3827_v26 = vpop.f32.mrf.mxu2 }
 0x2c2   : >> { %4127 = vst [vmem:[#allocation2 + $0x20] sm:$0xff] %v4111_v33  ;;  %4052 = vmatpush.bf16.msrb.mxu0 %v2823_v60  ;;  %v3079_v42 = vpack.c.bf16 %v2407_v34, %v2391_v29  ;;  %v1847_v43 = vcvt.s32.f32 %v823_v59  ;;  %v1079_v44 = vunpack.c.0.s8 %v535_v39  ;;  %v1095_v4 = vunpack.c.1.s8 %v535_v39 }
 0x2c3   : >> { %4065 = vmatpush.bf16.msrb.mxu1 %v2951_v2  ;;  %v3207_v11 = vpack.c.bf16 %v2663_v35, %v2647_v3  ;;  %v1863_v19 = vcvt.s32.f32 %v839_v36  ;;  %v1335_v21 = vunpack.c.0.s8 %v599_v7  ;;  %v1351_v49 = vunpack.c.1.s8 %v599_v7  ;;  %v439_v2 = vld [vmem:[%s6786_s14 + $0x78] sm:$0xff] }
 0x2c4   : >> { %4078 = vmatpush.bf16.msrb.mxu2 %v3079_v42  ;;  %v2103_v50 = vcvt.s32.f32 %v1079_v44  ;;  %v2119_v54 = vcvt.s32.f32 %v1095_v4  ;;  %v1591_v55 = vunpack.c.0.s8 %v663_v45  ;;  %v1607_v56 = vunpack.c.1.s8 %v663_v45 }
 0x2c5   : >> { %4091 = vmatpush.bf16.msrb.mxu3 %v3207_v11  ;;  %v2807_v22 = vpack.c.bf16 %v1863_v19, %v1847_v43  ;;  %v2359_v61 = vcvt.s32.f32 %v1335_v21  ;;  %v2375_v32 = vcvt.s32.f32 %v1351_v49  ;;  %v791_v62 = vunpack.c.2.s8 %v455_v47 }
 0x2c6   : >> { %v2935_v38 = vpack.c.bf16 %v2119_v54, %v2103_v50  ;;  %v2615_v39 = vcvt.s32.f32 %v1591_v55  ;;  %v2631_v0 = vcvt.s32.f32 %v1607_v56  ;;  %v807_v1 = vunpack.c.3.s8 %v455_v47  ;;  %v3814_v16 = vpop.f32.mrf.mxu1  ;;  %v567_v54 = vld [vmem:[%s6786_s14 + $0x478] sm:$0xff] }
 0x2c7   : >> { %4053 = vmatpush.bf16.msrb.mxu0 %v2807_v22  ;;  %v3063_v6 = vpack.c.bf16 %v2375_v32, %v2359_v61  ;;  %v1815_v7 = vcvt.s32.f32 %v791_v62  ;;  %v1047_v8 = vunpack.c.2.s8 %v519_v57  ;;  %v1063_v9 = vunpack.c.3.s8 %v519_v57  ;;  %v631_v61 = vld [vmem:[%s6786_s14 + $0x678] sm:$0xff] }
 0x2c8   : >> { %4066 = vmatpush.bf16.msrb.mxu1 %v2935_v38  ;;  %v3191_v10 = vpack.c.bf16 %v2631_v0, %v2615_v39  ;;  %v1831_v40 = vcvt.s32.f32 %v807_v1  ;;  %v1303_v13 = vunpack.c.2.s8 %v583_v30  ;;  %v1319_v46 = vunpack.c.3.s8 %v583_v30  ;;  %v3851_v39 = vpop.f32.mrf.mxu0 }
 0x2c9   : >> { %4079 = vmatpush.bf16.msrb.mxu2 %v3063_v6  ;;  %v2071_v14 = vcvt.s32.f32 %v1047_v8  ;;  %v2087_v15 = vcvt.s32.f32 %v1063_v9  ;;  %v1559_v45 = vunpack.c.2.s8 %v647_v5  ;;  %v1575_v51 = vunpack.c.3.s8 %v647_v5  ;;  %v3877_v8 = vpop.f32.mrf.mxu2  ;;  %v3890_v9 = vpop.f32.mrf.mxu3 }
 0x2ca   : >> { %4092 = vmatpush.bf16.msrb.mxu3 %v3191_v10  ;;  %v2791_v17 = vpack.c.bf16 %v1831_v40, %v1815_v7  ;;  %v2327_v18 = vcvt.s32.f32 %v1303_v13  ;;  %v2343_v23 = vcvt.s32.f32 %v1319_v46  ;;  %v759_v25 = vunpack.c.0.s8 %v455_v47 }
 0x2cb   : >> { %v2919_v28 = vpack.c.bf16 %v2087_v15, %v2071_v14  ;;  %v2583_v29 = vcvt.s32.f32 %v1559_v45  ;;  %v2599_v53 = vcvt.s32.f32 %v1575_v51  ;;  %v775_v31 = vunpack.c.1.s8 %v455_v47  ;;  %v503_v47 = vld [vmem:[%s6786_s14 + $0x278] sm:$0xff] }
 0x2cc   : >> { %4054 = vmatpush.bf16.msrb.mxu0 %v2791_v17  ;;  %v3047_v33 = vpack.c.bf16 %v2343_v23, %v2327_v18  ;;  %v1783_v60 = vcvt.s32.f32 %v759_v25  ;;  %v1015_v34 = vunpack.c.0.s8 %v519_v57  ;;  %v1031_v59 = vunpack.c.1.s8 %v519_v57 }
 0x2cd   : >> { %4067 = vmatpush.bf16.msrb.mxu1 %v2919_v28  ;;  %v3175_v3 = vpack.c.bf16 %v2599_v53, %v2583_v29  ;;  %v1799_v35 = vcvt.s32.f32 %v775_v31  ;;  %v1271_v36 = vunpack.c.0.s8 %v583_v30  ;;  %v1287_v42 = vunpack.c.1.s8 %v583_v30 }
 0x2ce   : >> { %4080 = vmatpush.bf16.msrb.mxu2 %v3047_v33  ;;  %v2039_v43 = vcvt.s32.f32 %v1015_v34  ;;  %v2055_v44 = vcvt.s32.f32 %v1031_v59  ;;  %v1527_v4 = vunpack.c.0.s8 %v647_v5  ;;  %v1543_v11 = vunpack.c.1.s8 %v647_v5  ;;  %v3864_v0 = vpop.f32.mrf.mxu1 }
 0x2cf   : >> { %4093 = vmatpush.bf16.msrb.mxu3 %v3175_v3  ;;  %v2775_v19 = vpack.c.bf16 %v1799_v35, %v1783_v60  ;;  %v2295_v21 = vcvt.s32.f32 %v1271_v36  ;;  %v2311_v49 = vcvt.s32.f32 %v1287_v42  ;;  %v727_v50 = vunpack.c.2.s8 %v439_v2 }
 0x2d0   : >> { %v2903_v55 = vpack.c.bf16 %v2055_v44, %v2039_v43  ;;  %v2551_v56 = vcvt.s32.f32 %v1527_v4  ;;  %v2567_v57 = vcvt.s32.f32 %v1543_v11  ;;  %v743_v22 = vunpack.c.3.s8 %v439_v2  ;;  %v3853_v42 = vpop.f32.mrf.mxu0 }
 0x2d1   : >> { %4055 = vmatpush.bf16.msrb.mxu0 %v2775_v19  ;;  %v3031_v32 = vpack.c.bf16 %v2311_v49, %v2295_v21  ;;  %v1751_v62 = vcvt.s32.f32 %v727_v50  ;;  %v983_v30 = vunpack.c.2.s8 %v503_v47  ;;  %v999_v38 = vunpack.c.3.s8 %v503_v47  ;;  %v3879_v19 = vpop.f32.mrf.mxu2  ;;  %v3892_v21 = vpop.f32.mrf.mxu3 }
 0x2d2   : >> { %4068 = vmatpush.bf16.msrb.mxu1 %v2903_v55  ;;  %v3159_v1 = vpack.c.bf16 %v2567_v57, %v2551_v56  ;;  %v1767_v5 = vcvt.s32.f32 %v743_v22  ;;  %v1239_v6 = vunpack.c.2.s8 %v567_v54  ;;  %v1255_v7 = vunpack.c.3.s8 %v567_v54  ;;  %v3250_v55 = vld [vmem:[#allocation2 + $0x10] sm:$0xff]  ;;  %v6221_v19 = vld [vmem:[%s6764_s17 + $0x38] sm:$0xff] (%p406_p0) }
 0x2d3   : >> { %4081 = vmatpush.bf16.msrb.mxu2 %v3031_v32  ;;  %v2007_v10 = vcvt.s32.f32 %v983_v30  ;;  %v2023_v40 = vcvt.s32.f32 %v999_v38  ;;  %v1495_v13 = vunpack.c.2.s8 %v631_v61  ;;  %v1511_v46 = vunpack.c.3.s8 %v631_v61  ;;  %v6229_v21 = vld [vmem:[%s6764_s17 + $0x78] sm:$0xff] (%p406_p0) }
 0x2d4   : >> { %4094 = vmatpush.bf16.msrb.mxu3 %v3159_v1  ;;  %v2759_v14 = vpack.c.bf16 %v1767_v5, %v1751_v62  ;;  %v2263_v15 = vcvt.s32.f32 %v1239_v6  ;;  %v2279_v45 = vcvt.s32.f32 %v1255_v7  ;;  %v695_v51 = vunpack.c.0.s8 %v439_v2 }
 0x2d5   : >> { %v2887_v52 = vpack.c.bf16 %v2023_v40, %v2007_v10  ;;  %v2519_v16 = vcvt.s32.f32 %v1495_v13  ;;  %v2535_v17 = vcvt.s32.f32 %v1511_v46  ;;  %v711_v18 = vunpack.c.1.s8 %v439_v2  ;;  %v3253_v46 = vld [vmem:[#allocation2 + $0x70] sm:$0xff] }
 0x2d6   : >> { %4056 = vmatpush.bf16.msrb.mxu0 %v2759_v14  ;;  %v3015_v23 = vpack.c.bf16 %v2279_v45, %v2263_v15  ;;  %v1719_v25 = vcvt.s32.f32 %v695_v51  ;;  %v951_v26 = vunpack.c.0.s8 %v503_v47  ;;  %v967_v27 = vunpack.c.1.s8 %v503_v47  ;;  %v3866_v43 = vpop.f32.mrf.mxu1 }
 0x2d7   : >> { %4069 = vmatpush.bf16.msrb.mxu1 %v2887_v52  ;;  %v3143_v28 = vpack.c.bf16 %v2535_v17, %v2519_v16  ;;  %v1735_v29 = vcvt.s32.f32 %v711_v18  ;;  %v1207_v53 = vunpack.c.0.s8 %v567_v54  ;;  %v1223_v31 = vunpack.c.1.s8 %v567_v54  ;;  %v3255_v43 = vld [vmem:[#allocation2 + $0x28] sm:$0xff] }
 0x2d8   : >> { %4082 = vmatpush.bf16.msrb.mxu2 %v3015_v23  ;;  %v1975_v33 = vcvt.s32.f32 %v951_v26  ;;  %v1991_v60 = vcvt.s32.f32 %v967_v27  ;;  %v1463_v34 = vunpack.c.0.s8 %v631_v61  ;;  %v1479_v59 = vunpack.c.1.s8 %v631_v61 }
 0x2d9   : >> { %4095 = vmatpush.bf16.msrb.mxu3 %v3143_v28  ;;  %v2743_v3 = vpack.c.bf16 %v1735_v29, %v1719_v25  ;;  %v2231_v35 = vcvt.s32.f32 %v1207_v53  ;;  %v2247_v36 = vcvt.s32.f32 %v1223_v31  ;;  %v3813_v2 = vadd.f32 %v7238_v37, %v7236_v41  ;;  %v3251_v41 = vld [vmem:[#allocation2 + $0x38] sm:$0xff] }
 0x2da   : >> { %v2871_v44 = vpack.c.bf16 %v1991_v60, %v1975_v33  ;;  %v2487_v4 = vcvt.s32.f32 %v1463_v34  ;;  %v2503_v11 = vcvt.s32.f32 %v1479_v59  ;;  %v3865_v47 = vadd.f32 %v3864_v0, %v3851_v39  ;;  %v3252_v0 = vld [vmem:[#allocation2 + $0x60] sm:$0xff]  ;;  %v3254_v28 = vld [vmem:[#allocation2 + $0x78] sm:$0xff] }
 0x2db   : >> { %4057 = vmatpush.bf16.msrb.mxu0 %v2743_v3  ;;  %v2999_v49 = vpack.c.bf16 %v2247_v36, %v2231_v35  ;;  %v3826_v50 = vadd.f32 %v7241_v12, %v3813_v2 }
 0x2dc   : >> { %4070 = vmatpush.bf16.msrb.mxu1 %v2871_v44  ;;  %v3127_v54 = vpack.c.bf16 %v2503_v11, %v2487_v4  ;;  %v3878_v56 = vadd.f32 %v3877_v8, %v3865_v47 }
 0x2dd   : >> { %4083 = vmatpush.bf16.msrb.mxu2 %v2999_v49  ;;  %v3839_v57 = vadd.f32 %v7243_v48, %v3826_v50  ;;  %v6237_v49 = vld [vmem:[%s6764_s17 + $0xb8] sm:$0xff] (%p406_p0) }
 0x2de   : >> { %4096 = vmatpush.bf16.msrb.mxu3 %v3127_v54  ;;  %4058 = vmatmul.bf16.vlgmr.msrb.gmra.mxu0 %v6838_v20  ;;  %v3891_v37 = vadd.f32 %v3890_v9, %v3878_v56  ;;  %v6245_v50 = vld [vmem:[%s6764_s17 + $0xf8] sm:$0xff] (%p406_p0)  ;;  %v6220_v54 = vld [vmem:[%s6764_s17 + $0x30] sm:$0xff] (%p406_p0) }
 0x2df   : >> { %4071 = vmatmul.bf16.vlgmr.msrb.gmra.mxu1 %v6840_v24  ;;  %v4112_v22 = vadd.f32 %v3839_v57, %v3250_v55  ;;  %5313 = vmatpush.bf16.msra.mxu0 (%p406_p0), %v6221_v19  ;;  %v6228_v55 = vld [vmem:[%s6764_s17 + $0x70] sm:$0xff] (%p406_p0) }
 0x2e0   : >> { %4084 = vmatmul.bf16.vlgmr.msrb.gmra.mxu2 %v6830_v58  ;;  %v4113_v61 = vadd.f32 %v3891_v37, %v3251_v41  ;;  %v3903_v12 = vpop.f32.mrf.mxu0  ;;  %5326 = vmatpush.bf16.msra.mxu1 (%p406_p0), %v6229_v21  ;;  %v6236_v56 = vld [vmem:[%s6764_s17 + $0xb0] sm:$0xff] (%p406_p0)  ;;  %v6219_v41 = vld [vmem:[%s6764_s17 + $0x28] sm:$0xff] (%p406_p0) }
 0x2e1   : >> { %4097 = vmatmul.bf16.vlgmr.msrb.gmra.mxu3 %v6833_v63  ;;  %4128 = vst [vmem:[#allocation2 + $0x10] sm:$0xff] %v4112_v22  ;;  %v3916_v32 = vpop.f32.mrf.mxu1  ;;  %5339 = vmatpush.bf16.msra.mxu2 (%p406_p0), %v6237_v49  ;;  %v6244_v57 = vld [vmem:[%s6764_s17 + $0xf0] sm:$0xff] (%p406_p0)  ;;  %v6227_v37 = vld [vmem:[%s6764_s17 + $0x68] sm:$0xff] (%p406_p0) }
 0x2e2   : >> { %4129 = vst [vmem:[#allocation2 + $0x38] sm:$0xff] %v4113_v61  ;;  %v3917_v62 = vadd.f32 %v3916_v32, %v3903_v12  ;;  %5352 = vmatpush.bf16.msra.mxu3 (%p406_p0), %v6245_v50  ;;  %v6235_v22 = vld [vmem:[%s6764_s17 + $0xa8] sm:$0xff] (%p406_p0)  ;;  %v6218_v12 = vld [vmem:[%s6764_s17 + $0x20] sm:$0xff] (%p406_p0)  ;;  %v6252_v49 = vld [vmem:[%s6764_s17 + $0x130] sm:$0xff] (%p406_p0) }
 0x2e3   : > { %5314 = vmatpush.bf16.msra.mxu0 (%p406_p0), %v6220_v54  ;;  %v6243_v61 = vld [vmem:[%s6764_s17 + $0xe8] sm:$0xff] (%p406_p0)  ;;  %v6226_v32 = vld [vmem:[%s6764_s17 + $0x60] sm:$0xff] (%p406_p0)  ;;  %v6260_v50 = vld [vmem:[%s6764_s17 + $0x170] sm:$0xff] (%p406_p0) }
 0x2e4   : > { %5327 = vmatpush.bf16.msra.mxu1 (%p406_p0), %v6228_v55  ;;  %v6268_v54 = vld [vmem:[%s6764_s17 + $0x1b0] sm:$0xff] (%p406_p0) }
 0x2e5   : > { %5340 = vmatpush.bf16.msra.mxu2 (%p406_p0), %v6236_v56  ;;  %v6276_v55 = vld [vmem:[%s6764_s17 + $0x1f0] sm:$0xff] (%p406_p0)  ;;  %v6251_v56 = vld [vmem:[%s6764_s17 + $0x128] sm:$0xff] (%p406_p0) }
 0x2e6   : > { %5353 = vmatpush.bf16.msra.mxu3 (%p406_p0), %v6244_v57  ;;  %v6259_v57 = vld [vmem:[%s6764_s17 + $0x168] sm:$0xff] (%p406_p0) }
 0x2e7   : > { %5315 = vmatpush.bf16.msra.mxu0 (%p406_p0), %v6219_v41  ;;  %v6267_v41 = vld [vmem:[%s6764_s17 + $0x1a8] sm:$0xff] (%p406_p0) }
 0x2e8   : >> { %v3929_v30 = vpop.f32.mrf.mxu2  ;;  %v3905_v39 = vpop.f32.mrf.mxu0  ;;  %5328 = vmatpush.bf16.msra.mxu1 (%p406_p0), %v6227_v37  ;;  %v6275_v37 = vld [vmem:[%s6764_s17 + $0x1e8] sm:$0xff] (%p406_p0) }
 0x2e9   : >> { %v3930_v48 = vadd.f32 %v3929_v30, %v3917_v62  ;;  %v3942_v38 = vpop.f32.mrf.mxu3  ;;  %v3918_v20 = vpop.f32.mrf.mxu1  ;;  %5341 = vmatpush.bf16.msra.mxu2 (%p406_p0), %v6235_v22  ;;  %v6234_v62 = vld [vmem:[%s6764_s17 + $0xa0] sm:$0xff] (%p406_p0)  ;;  %v6233_v39 = vld [vmem:[%s6764_s17 + $0x98] sm:$0xff] (%p406_p0) }
 0x2ea   : > { %5354 = vmatpush.bf16.msra.mxu3 (%p406_p0), %v6243_v61  ;;  %v6242_v30 = vld [vmem:[%s6764_s17 + $0xe0] sm:$0xff] (%p406_p0)  ;;  %v6216_v20 = vld [vmem:[%s6764_s17 + $0x10] sm:$0xff] (%p406_p0) }
 0x2eb   : >> { %v3943_v1 = vadd.f32 %v3942_v38, %v3930_v48  ;;  %5316 = vmatpush.bf16.msra.mxu0 (%p406_p0), %v6218_v12  ;;  %v6217_v48 = vld [vmem:[%s6764_s17 + $0x18] sm:$0xff] (%p406_p0)  ;;  %v6250_v22 = vld [vmem:[%s6764_s17 + $0x120] sm:$0xff] (%p406_p0) }
 0x2ec   : > { %5329 = vmatpush.bf16.msra.mxu1 (%p406_p0), %v6226_v32  ;;  %v6225_v38 = vld [vmem:[%s6764_s17 + $0x58] sm:$0xff] (%p406_p0)  ;;  %v6258_v61 = vld [vmem:[%s6764_s17 + $0x160] sm:$0xff] (%p406_p0) }
 0x2ed   : >> { %v4114_v5 = vadd.f32 %v3943_v1, %v3252_v0  ;;  %5342 = vmatpush.bf16.msra.mxu2 (%p406_p0), %v6234_v62  ;;  %v6241_v0 = vld [vmem:[%s6764_s17 + $0xd8] sm:$0xff] (%p406_p0)  ;;  %v6266_v12 = vld [vmem:[%s6764_s17 + $0x1a0] sm:$0xff] (%p406_p0) }
 0x2ee   : > { %5355 = vmatpush.bf16.msra.mxu3 (%p406_p0), %v6242_v30  ;;  %v4139_v1 = vld [vmem:[#allocation2 + $0x58] sm:$0xff] (%p406_p0)  ;;  %v6274_v32 = vld [vmem:[%s6764_s17 + $0x1e0] sm:$0xff] (%p406_p0) }
 0x2ef   : >> { %4130 = vst [vmem:[#allocation2 + $0x60] sm:$0xff] %v4114_v5  ;;  %v7285_v5 = vld [vmem:[%s6756_s6] sm:$0xff] (%p406_p0)  ;;  %5317 = vmatpush.bf16.msra.mxu0 (%p406_p0), %v6217_v48  ;;  %v6249_v62 = vld [vmem:[%s6764_s17 + $0x118] sm:$0xff] (%p406_p0) }
 0x2f0   : >> { %v3931_v24 = vpop.f32.mrf.mxu2  ;;  %5330 = vmatpush.bf16.msra.mxu1 (%p406_p0), %v6225_v38  ;;  %v6257_v30 = vld [vmem:[%s6764_s17 + $0x158] sm:$0xff] (%p406_p0)  ;;  %v4163_v38 = vperm.slane (%p406_p0), %v7285_v5, 6 }
 0x2f1   : >> { %v3944_v6 = vpop.f32.mrf.mxu3  ;;  %v6224_v24 = vld [vmem:[%s6764_s17 + $0x50] sm:$0xff] (%p406_p0)  ;;  %5343 = vmatpush.bf16.msra.mxu2 (%p406_p0), %v6233_v39  ;;  %v6265_v48 = vld [vmem:[%s6764_s17 + $0x198] sm:$0xff] (%p406_p0)  ;;  %v4161_v39 = vperm.slane (%p406_p0), %v7285_v5, 4 }
 0x2f2   : > { %v4159_v6 = vperm.slane (%p406_p0), %v7285_v5, 2  ;;  %5356 = vmatpush.bf16.msra.mxu3 (%p406_p0), %v6241_v0  ;;  %v6273_v0 = vld [vmem:[%s6764_s17 + $0x1d8] sm:$0xff] (%p406_p0) }
 0x2f3   : > { %5318 = vmatpush.bf16.msra.mxu0 (%p406_p0), %v6216_v20  ;;  %v4143_v20 = vld [vmem:[#allocation2 + $0x8] sm:$0xff] (%p406_p0) }
 0x2f4   : > { %5331 = vmatpush.bf16.msra.mxu1 (%p406_p0), %v6224_v24  ;;  %v4164_v24 = vperm.slane (%p406_p0), %v7285_v5, 7 }
 0x309   : >> { %v3955_v58 = vpop.f32.mrf.mxu0 }
 0x30a   : >> { %v3968_v7 = vpop.f32.mrf.mxu1 }
 0x30b   : >> { %v3969_v8 = vadd.f32 %v3968_v7, %v3955_v58  ;;  %v7290_v58 = vld [vmem:[%s6762_s15] sm:$0xff] (%p406_p0) }
 0x30c   : > { %v4137_v7 = vld [vmem:[#allocation2 + $0x30] sm:$0xff] (%p406_p0) }
 0x311   : >> { %v3981_v63 = vpop.f32.mrf.mxu2  ;;  %v3957_v9 = vpop.f32.mrf.mxu0 }
 0x312   : >> { %v3982_v10 = vadd.f32 %v3981_v63, %v3969_v8  ;;  %v3994_v40 = vpop.f32.mrf.mxu3  ;;  %v3970_v13 = vpop.f32.mrf.mxu1  ;;  %v4157_v8 = vperm.slane (%p406_p0), %v7285_v5, 0  ;;  %v4160_v63 = vperm.slane (%p406_p0), %v7285_v5, 3  ;;  %v6232_v9 = vld [vmem:[%s6764_s17 + $0x90] sm:$0xff] (%p406_p0) }
 0x313   : > { %v4209_v13 = vperm.slane (%p406_p0), %v7290_v58, 0  ;;  %5344 = vmatpush.bf16.msra.mxu2 (%p406_p0), %v6232_v9  ;;  %v6256_v9 = vld [vmem:[%s6764_s17 + $0x150] sm:$0xff] (%p406_p0) }
 0x314   : >> { %v3995_v14 = vadd.f32 %v3994_v40, %v3982_v10  ;;  %v6240_v10 = vld [vmem:[%s6764_s17 + $0xd0] sm:$0xff] (%p406_p0)  ;;  %v4211_v40 = vperm.slane (%p406_p0), %v7290_v58, 2 }
 0x315   : > { %5357 = vmatpush.bf16.msra.mxu3 (%p406_p0), %v6240_v10  ;;  %v4195_v10 = vmul.f32 (%p406_p0), %v4163_v38, %v4143_v20  ;;  %v4145_v38 = vld [vmem:[#allocation2 + $0x40] sm:$0xff] (%p406_p0) }
 0x316   : >> { %v4115_v15 = vadd.f32 %v3995_v14, %v3253_v46  ;;  %v4212_v46 = vperm.slane (%p406_p0), %v7290_v58, 3  ;;  %v4191_v14 = vmul.f32 (%p406_p0), %v4159_v6, %v4139_v1  ;;  %v4141_v1 = vld [vmem:[#allocation2 + $0x50] sm:$0xff] (%p406_p0)  ;;  %v4162_v6 = vperm.slane (%p406_p0), %v7285_v5, 5 }
 0x318   : >> { %4131 = vst [vmem:[#allocation2 + $0x70] sm:$0xff] %v4115_v15  ;;  %v4189_v15 = vmul.f32 (%p406_p0), %v4157_v8, %v4137_v7  ;;  %v4144_v7 = vld [vmem:[#allocation2 + $0x48] sm:$0xff] (%p406_p0) }
 0x319   : >> { %v3983_v45 = vpop.f32.mrf.mxu2  ;;  %v4142_v8 = vld [vmem:[#allocation2 + $0x68] sm:$0xff] (%p406_p0) }
 0x31a   : >> { %v3996_v51 = vpop.f32.mrf.mxu3  ;;  %v4140_v45 = vld [vmem:[#allocation2 + $0x18] sm:$0xff] (%p406_p0) }
 0x31b   : > { %v4138_v51 = vld [vmem:[#allocation2] sm:$0xff] (%p406_p0) }
 0x332   : >> { %v4007_v52 = vpop.f32.mrf.mxu0 }
 0x333   : >> { %v4020_v16 = vpop.f32.mrf.mxu1 }
 0x334   : >> { %v4021_v17 = vadd.f32 %v4020_v16, %v4007_v52  ;;  %v4158_v52 = vperm.slane (%p406_p0), %v7285_v5, 1  ;;  %v4210_v16 = vperm.slane (%p406_p0), %v7290_v58, 1  ;;  %v6272_v5 = vld [vmem:[%s6764_s17 + $0x1d0] sm:$0xff] (%p406_p0) }
 0x33a   : >> { %v4033_v18 = vpop.f32.mrf.mxu2  ;;  %v4009_v23 = vpop.f32.mrf.mxu0 }
 0x33b   : >> { %v4034_v25 = vadd.f32 %v4033_v18, %v4021_v17  ;;  %v4046_v26 = vpop.f32.mrf.mxu3  ;;  %v4022_v27 = vpop.f32.mrf.mxu1  ;;  %v4192_v17 = vmul.f32 (%p406_p0), %v4160_v63, %v4140_v45  ;;  %v6215_v18 = vld [vmem:[%s6764_s17 + $0x8] sm:$0xff] (%p406_p0)  ;;  %v6248_v63 = vld [vmem:[%s6764_s17 + $0x110] sm:$0xff] (%p406_p0)  ;;  %v4216_v45 = vperm.slane (%p406_p0), %v7290_v58, 7 }
 0x33c   : > { %v6223_v23 = vld [vmem:[%s6764_s17 + $0x48] sm:$0xff] (%p406_p0)  ;;  %v4190_v27 = vmul.f32 (%p406_p0), %v4158_v52, %v4138_v51  ;;  %5319 = vmatpush.bf16.msra.mxu0 (%p406_p0), %v6215_v18  ;;  %v4194_v51 = vmul.f32 (%p406_p0), %v4162_v6, %v4142_v8  ;;  %v4214_v52 = vperm.slane (%p406_p0), %v7290_v58, 5  ;;  %v4148_v6 = vld [vmem:[#allocation2 + $0x38] sm:$0xff] (%p406_p0)  ;;  %v6288_v8 = vld [vmem:[%s6764_s17 + $0x250] sm:$0xff] (%p406_p0) }
 0x33d   : >> { %v4047_v29 = vadd.f32 %v4046_v26, %v4034_v25  ;;  %v4243_v25 = vadd.f32 (%p406_p0), %v4211_v40, %v4191_v14  ;;  %v4241_v26 = vadd.f32 (%p406_p0), %v4209_v13, %v4189_v15  ;;  %5332 = vmatpush.bf16.msra.mxu1 (%p406_p0), %v6223_v23  ;;  %v4215_v40 = vperm.slane (%p406_p0), %v7290_v58, 6  ;;  %v6264_v14 = vld [vmem:[%s6764_s17 + $0x190] sm:$0xff] (%p406_p0) }
 0x33e   : > { %v4193_v13 = vmul.f32 (%p406_p0), %v4161_v39, %v4141_v1  ;;  %v4196_v15 = vmul.f32 (%p406_p0), %v4164_v24, %v4144_v7  ;;  %v7375_v39 = vld [vmem:[%s6762_s15 + $0x8] sm:$0xff] (%p406_p0)  ;;  %v4146_v24 = vld [vmem:[#allocation2 + $0x20] sm:$0xff] (%p406_p0)  ;;  %v6280_v7 = vld [vmem:[%s6764_s17 + $0x210] sm:$0xff] (%p406_p0) }
 0x33f   : >> { %v4116_v53 = vadd.f32 %v4047_v29, %v3254_v28  ;;  %v6231_v28 = vld [vmem:[%s6764_s17 + $0x88] sm:$0xff] (%p406_p0)  ;;  %v4247_v18 = vadd.f32 (%p406_p0), %v4215_v40, %v4195_v10  ;;  %v4219_v40 = vperm.slane (%p406_p0), %v7375_v39, 2 }
 0x340   : > { %v6239_v29 = vld [vmem:[%s6764_s17 + $0xc8] sm:$0xff] (%p406_p0)  ;;  %5345 = vmatpush.bf16.msra.mxu2 (%p406_p0), %v6231_v28  ;;  %v4246_v28 = vadd.f32 (%p406_p0), %v4214_v52, %v4194_v51 }
 0x341   : >> { %4132 = vst [vmem:[#allocation2 + $0x78] sm:$0xff] %v4116_v53  ;;  %v4244_v53 = vadd.f32 (%p406_p0), %v4212_v46, %v4192_v17  ;;  %5358 = vmatpush.bf16.msra.mxu3 (%p406_p0), %v6239_v29  ;;  %v4213_v46 = vperm.slane (%p406_p0), %v7290_v58, 4  ;;  %v6255_v17 = vld [vmem:[%s6764_s17 + $0x148] sm:$0xff] (%p406_p0)  ;;  %v6246_v58 = vld [vmem:[%s6764_s17 + $0x100] sm:$0xff] (%p406_p0) }
 0x342   : >> { %v4035_v31 = vpop.f32.mrf.mxu2  ;;  %v6254_v29 = vld [vmem:[%s6764_s17 + $0x140] sm:$0xff] (%p406_p0)  ;;  %v6279_v51 = vld [vmem:[%s6764_s17 + $0x208] sm:$0xff] (%p406_p0) }
 0x343   : >> { %v4048_v33 = vpop.f32.mrf.mxu3  ;;  %v4242_v31 = vadd.f32 (%p406_p0), %v4210_v16, %v4190_v27  ;;  %v6247_v16 = vld [vmem:[%s6764_s17 + $0x108] sm:$0xff] (%p406_p0)  ;;  %v4245_v23 = vadd.f32 (%p406_p0), %v4213_v46, %v4193_v13  ;;  %v4248_v27 = vadd.f32 (%p406_p0), %v4216_v45, %v4196_v15  ;;  %v6296_v13 = vld [vmem:[%s6764_s17 + $0x290] sm:$0xff] (%p406_p0)  ;;  %v4220_v45 = vperm.slane (%p406_p0), %v7375_v39, 3 }
 0x344   : > { %v6214_v33 = vld [vmem:[%s6764_s17] sm:$0xff] (%p406_p0)  ;;  %v6304_v46 = vld [vmem:[%s6764_s17 + $0x2d0] sm:$0xff] (%p406_p0)  ;;  %v6287_v52 = vld [vmem:[%s6764_s17 + $0x248] sm:$0xff] (%p406_p0) }
 0x345   : > { %5320 = vmatpush.bf16.msra.mxu0 (%p406_p0), %v6214_v33  ;;  %v6262_v33 = vld [vmem:[%s6764_s17 + $0x180] sm:$0xff] (%p406_p0) }
 0x35b   : >> { %v4059_v60 = vpop.f32.mrf.mxu0 }
 0x35c   : >> { %v4072_v34 = vpop.f32.mrf.mxu1 }
 0x35d   : >> { %v4073_v59 = vadd.f32 %v4072_v34, %v4059_v60  ;;  %v6222_v60 = vld [vmem:[%s6764_s17 + $0x40] sm:$0xff] (%p406_p0)  ;;  %v4259_v34 = vmax.f32 (%p406_p0), %v4243_v25, 0.0  ;;  %v6263_v25 = vld [vmem:[%s6764_s17 + $0x188] sm:$0xff] (%p406_p0) }
 0x35e   : > { %5333 = vmatpush.bf16.msra.mxu1 (%p406_p0), %v6222_v60  ;;  %v6270_v60 = vld [vmem:[%s6764_s17 + $0x1c0] sm:$0xff] (%p406_p0) }
 0x363   : >> { %v4085_v3 = vpop.f32.mrf.mxu2  ;;  %v4061_v35 = vpop.f32.mrf.mxu0 }
 0x364   : >> { %v4086_v36 = vadd.f32 %v4085_v3, %v4073_v59  ;;  %v4098_v2 = vpop.f32.mrf.mxu3  ;;  %v4074_v42 = vpop.f32.mrf.mxu1  ;;  %v4257_v59 = vmax.f32 (%p406_p0), %v4241_v26, 0.0  ;;  %v6230_v3 = vld [vmem:[%s6764_s17 + $0x80] sm:$0xff] (%p406_p0)  ;;  %v6271_v26 = vld [vmem:[%s6764_s17 + $0x1c8] sm:$0xff] (%p406_p0) }
 0x365   : > { %v6238_v35 = vld [vmem:[%s6764_s17 + $0xc0] sm:$0xff] (%p406_p0)  ;;  %v6253_v42 = vld [vmem:[%s6764_s17 + $0x138] sm:$0xff] (%p406_p0)  ;;  %5346 = vmatpush.bf16.msra.mxu2 (%p406_p0), %v6230_v3 }
 0x366   : >> { %v4099_v44 = vadd.f32 %v4098_v2, %v4086_v36  ;;  %v4260_v36 = vmax.f32 (%p406_p0), %v4244_v53, 0.0  ;;  %v4258_v2 = vmax.f32 (%p406_p0), %v4242_v31, 0.0  ;;  %5359 = vmatpush.bf16.msra.mxu3 (%p406_p0), %v6238_v35  ;;  %5365 = vmatpush.bf16.msrb.mxu0 (%p406_p0), %v6253_v42  ;;  %v4263_v53 = vmax.f32 (%p406_p0), %v4247_v18, 0.0  ;;  %v6285_v3 = vld [vmem:[%s6764_s17 + $0x238] sm:$0xff] (%p406_p0)  ;;  %v6295_v18 = vld [vmem:[%s6764_s17 + $0x288] sm:$0xff] (%p406_p0) }
 0x367   : > { %v4261_v31 = vmax.f32 (%p406_p0), %v4245_v23, 0.0  ;;  %v6293_v35 = vld [vmem:[%s6764_s17 + $0x278] sm:$0xff] (%p406_p0)  ;;  %v6303_v23 = vld [vmem:[%s6764_s17 + $0x2c8] sm:$0xff] (%p406_p0) }
 0x368   : >> { %v4117_v4 = vadd.f32 %v4099_v44, %v3255_v43  ;;  %408 = sbr.rel (!%p406_p0) target bundleno = 74 (0x4a), region = 134  ;;  %v6261_v43 = vld [vmem:[%s6764_s17 + $0x178] sm:$0xff] (%p406_p0)  ;;  %v4276_v19 = vpack.c.bf16 (%p406_p0), %v4260_v36, %v4260_v36  ;;  %v4274_v21 = vpack.c.bf16 (%p406_p0), %v4258_v2, %v4258_v2  ;;  %v4279_v42 = vpack.c.bf16 (%p406_p0), %v4263_v53, %v4263_v53  ;;  %v6294_v53 = vld [vmem:[%s6764_s17 + $0x280] sm:$0xff] (%p406_p0) }
 0x369   : > { %v6269_v44 = vld [vmem:[%s6764_s17 + $0x1b8] sm:$0xff] (%p406_p0)  ;;  %5378 = vmatpush.bf16.msrb.mxu1 (%p406_p0), %v6261_v43  ;;  %v4277_v43 = vpack.c.bf16 (%p406_p0), %v4261_v31, %v4261_v31  ;;  %v6302_v31 = vld [vmem:[%s6764_s17 + $0x2c0] sm:$0xff] (%p406_p0) }
 0x36a   : >> { %4133 = vst [vmem:[#allocation2 + $0x28] sm:$0xff] %v4117_v4  ;;  %v6277_v4 = vld [vmem:[%s6764_s17 + $0x1f8] sm:$0xff] (%p406_p0)  ;;  %5391 = vmatpush.bf16.msrb.mxu2 (%p406_p0), %v6269_v44  ;;  %5360 = vmatmul.bf16.vlgmr.msra.gmra.mxu3 (%p406_p0), %v4276_v19  ;;  %v6300_v19 = vld [vmem:[%s6764_s17 + $0x2b0] sm:$0xff] (%p406_p0) }
 0x36b   : >> { %v4087_v11 = vpop.f32.mrf.mxu2  ;;  %5404 = vmatpush.bf16.msrb.mxu3 (%p406_p0), %v6277_v4  ;;  %5334 = vmatmul.bf16.vlgmr.msra.gmra.mxu1 (%p406_p0), %v4274_v21  ;;  %v6301_v36 = vld [vmem:[%s6764_s17 + $0x2b8] sm:$0xff] (%p406_p0)  ;;  %v6308_v21 = vld [vmem:[%s6764_s17 + $0x2f0] sm:$0xff] (%p406_p0) }
 0x36c   : >> { %v4100_v47 = vpop.f32.mrf.mxu3  ;;  %v4275_v11 = vpack.c.bf16 (%p406_p0), %v4259_v34, %v4259_v34  ;;  %5366 = vmatpush.bf16.msrb.mxu0 (%p406_p0), %v6252_v49  ;;  %v4264_v34 = vmax.f32 (%p406_p0), %v4248_v27, 0.0  ;;  %v6309_v2 = vld [vmem:[%s6764_s17 + $0x2f8] sm:$0xff] (%p406_p0)  ;;  %v6283_v49 = vld [vmem:[%s6764_s17 + $0x228] sm:$0xff] (%p406_p0)  ;;  %v6278_v27 = vld [vmem:[%s6764_s17 + $0x200] sm:$0xff] (%p406_p0) }
 0x36d   : > { %v4273_v47 = vpack.c.bf16 %v4257_v59, %v4257_v59  ;;  %5379 = vmatpush.bf16.msrb.mxu1 %v6260_v50  ;;  %v4262_v59 = vmax.f32 %v4246_v28, 0.0  ;;  %v6291_v50 = vld [vmem:[%s6764_s17 + $0x268] sm:$0xff]  ;;  %v6286_v28 = vld [vmem:[%s6764_s17 + $0x240] sm:$0xff] }
 0x36e   : > { %5347 = vmatmul.bf16.vlgmr.msra.gmra.mxu2 %v4275_v11  ;;  %v4280_v44 = vpack.c.bf16 %v4264_v34, %v4264_v34  ;;  %v6284_v11 = vld [vmem:[%s6764_s17 + $0x230] sm:$0xff]  ;;  %v6317_v34 = vld [vmem:[%s6764_s17 + $0x338] sm:$0xff] }
 0x36f   : > { %5321 = vmatmul.bf16.vlgmr.msra.gmra.mxu0 %v4273_v47  ;;  %5392 = vmatpush.bf16.msrb.mxu2 %v6268_v54  ;;  %v4278_v4 = vpack.c.bf16 %v4262_v59, %v4262_v59  ;;  %v6292_v47 = vld [vmem:[%s6764_s17 + $0x270] sm:$0xff]  ;;  %v6299_v54 = vld [vmem:[%s6764_s17 + $0x2a8] sm:$0xff]  ;;  %v6325_v59 = vld [vmem:[%s6764_s17 + $0x378] sm:$0xff] }
 0x370   : > { %5405 = vmatpush.bf16.msrb.mxu3 %v6276_v55  ;;  %5367 = vmatpush.bf16.msrb.mxu0 %v6251_v56  ;;  %v6307_v55 = vld [vmem:[%s6764_s17 + $0x2e8] sm:$0xff]  ;;  %v6282_v56 = vld [vmem:[%s6764_s17 + $0x220] sm:$0xff] }
 0x371   : > { %5380 = vmatpush.bf16.msrb.mxu1 %v6259_v57  ;;  %v6290_v57 = vld [vmem:[%s6764_s17 + $0x260] sm:$0xff] }
 0x373   : > { %5393 = vmatpush.bf16.msrb.mxu2 %v6267_v41  ;;  %v6298_v41 = vld [vmem:[%s6764_s17 + $0x2a0] sm:$0xff] }
 0x374   : > { %5406 = vmatpush.bf16.msrb.mxu3 %v6275_v37  ;;  %5368 = vmatpush.bf16.msrb.mxu0 %v6250_v22  ;;  %v6306_v37 = vld [vmem:[%s6764_s17 + $0x2e0] sm:$0xff]  ;;  %v7366_v22 = vld [vmem:[%s6756_s6 + $0x8] sm:$0xff] }
 0x375   : > { %5381 = vmatpush.bf16.msrb.mxu1 %v6258_v61  ;;  %v6281_v61 = vld [vmem:[%s6764_s17 + $0x218] sm:$0xff]  ;;  %v4166_v20 = vperm.slane %v7366_v22, 1  ;;  %v4168_v1 = vperm.slane %v7366_v22, 3 }
 0x377   : > { %5394 = vmatpush.bf16.msrb.mxu2 %v6266_v12  ;;  %v6289_v12 = vld [vmem:[%s6764_s17 + $0x258] sm:$0xff]  ;;  %v4200_v15 = vmul.f32 %v4168_v1, %v4148_v6  ;;  %v4152_v1 = vld [vmem:[#allocation2 + $0x28] sm:$0xff]  ;;  %v4221_v6 = vperm.slane %v7375_v39, 4 }
 0x378   : > { %5407 = vmatpush.bf16.msrb.mxu3 %v6274_v32  ;;  %5369 = vmatpush.bf16.msrb.mxu0 %v6249_v62  ;;  %v6297_v32 = vld [vmem:[%s6764_s17 + $0x298] sm:$0xff] }
 0x379   : > { %5382 = vmatpush.bf16.msrb.mxu1 %v6257_v30  ;;  %v6305_v62 = vld [vmem:[%s6764_s17 + $0x2d8] sm:$0xff]  ;;  %v4165_v30 = vperm.slane %v7366_v22, 0 }
 0x37b   : > { %5395 = vmatpush.bf16.msrb.mxu2 %v6265_v48  ;;  %v4167_v48 = vperm.slane %v7366_v22, 2 }
 0x37c   : > { %5408 = vmatpush.bf16.msrb.mxu3 %v6273_v0  ;;  %5370 = vmatpush.bf16.msrb.mxu0 %v6248_v63  ;;  %v4147_v0 = vld [vmem:[#allocation2 + $0x10] sm:$0xff]  ;;  %v4197_v63 = vmul.f32 %v4165_v30, %v4145_v38  ;;  %v4172_v38 = vperm.slane %v7366_v22, 7 }
 0x37d   : > { %5383 = vmatpush.bf16.msrb.mxu1 %v6256_v9  ;;  %v4217_v9 = vperm.slane %v7375_v39, 0  ;;  %v4199_v10 = vmul.f32 %v4167_v48, %v4147_v0  ;;  %v4150_v30 = vld [vmem:[#allocation2 + $0x70] sm:$0xff]  ;;  %v4171_v48 = vperm.slane %v7366_v22, 6  ;;  %v6337_v0 = vld [vmem:[%s6764_s17 + $0x3d8] sm:$0xff] }
 0x37f   : > { %5396 = vmatpush.bf16.msrb.mxu2 %v6264_v14  ;;  %v4198_v14 = vmul.f32 %v4166_v20, %v4146_v24  ;;  %v4151_v20 = vld [vmem:[#allocation2 + $0x78] sm:$0xff] }
 0x380   : > { %5409 = vmatpush.bf16.msrb.mxu3 %v6272_v5  ;;  %5371 = vmatpush.bf16.msrb.mxu0 %v6247_v16  ;;  %v4218_v5 = vperm.slane %v7375_v39, 1  ;;  %v4249_v16 = vadd.f32 %v4217_v9, %v4197_v63  ;;  %v6312_v63 = vld [vmem:[%s6764_s17 + $0x310] sm:$0xff] }
 0x381   : > { %5384 = vmatpush.bf16.msrb.mxu1 %v6255_v17  ;;  %v4251_v17 = vadd.f32 %v4219_v40, %v4199_v10  ;;  %v6320_v9 = vld [vmem:[%s6764_s17 + $0x350] sm:$0xff]  ;;  %v4223_v10 = vperm.slane %v7375_v39, 6  ;;  %v4204_v40 = vmul.f32 %v4172_v38, %v4152_v1 }
 0x383   : > { %5397 = vmatpush.bf16.msrb.mxu2 %v6263_v25  ;;  %v4250_v25 = vadd.f32 %v4218_v5, %v4198_v14  ;;  %v6336_v14 = vld [vmem:[%s6764_s17 + $0x3d0] sm:$0xff] }
 0x384   : > { %5410 = vmatpush.bf16.msrb.mxu3 %v6271_v26  ;;  %5372 = vmatpush.bf16.msrb.mxu0 %v6246_v58  ;;  %v4252_v26 = vadd.f32 %v4220_v45, %v4200_v15  ;;  %v4265_v58 = vmax.f32 %v4249_v16, 0.0  ;;  %v6311_v45 = vld [vmem:[%s6764_s17 + $0x308] sm:$0xff] }
 0x385   : > { %5385 = vmatpush.bf16.msrb.mxu1 %v6254_v29  ;;  %v4267_v29 = vmax.f32 %v4251_v17, 0.0  ;;  %v6335_v17 = vld [vmem:[%s6764_s17 + $0x3c8] sm:$0xff] }
 0x387   : > { %5398 = vmatpush.bf16.msrb.mxu2 %v6262_v33  ;;  %5373 = vmatmul.bf16.vlgmr.msrb.gmra.mxu0 %v4277_v43  ;;  %v4266_v33 = vmax.f32 %v4250_v25, 0.0  ;;  %v6310_v25 = vld [vmem:[%s6764_s17 + $0x300] sm:$0xff] }
 0x388   : > { %5411 = vmatpush.bf16.msrb.mxu3 %v6270_v60  ;;  %5417 = vmatpush.bf16.msra.mxu0 %v6285_v3  ;;  %v4268_v60 = vmax.f32 %v4252_v26, 0.0  ;;  %v6333_v3 = vld [vmem:[%s6764_s17 + $0x3b8] sm:$0xff]  ;;  %v6318_v26 = vld [vmem:[%s6764_s17 + $0x340] sm:$0xff] }
 0x389   : > { %5430 = vmatpush.bf16.msra.mxu1 %v6293_v35  ;;  %v6341_v35 = vld [vmem:[%s6764_s17 + $0x3f8] sm:$0xff] }
 0x38a   : > { %5399 = vmatmul.bf16.vlgmr.msrb.gmra.mxu2 %v4279_v42  ;;  %5386 = vmatmul.bf16.vlgmr.msrb.gmra.mxu1 %v4278_v4  ;;  %v4282_v42 = vpack.c.bf16 %v4266_v33, %v4266_v33  ;;  %v4284_v43 = vpack.c.bf16 %v4268_v60, %v4268_v60  ;;  %v6324_v4 = vld [vmem:[%s6764_s17 + $0x370] sm:$0xff] }
 0x38b   : > { %5443 = vmatpush.bf16.msra.mxu2 %v6301_v36  ;;  %5412 = vmatmul.bf16.vlgmr.msrb.gmra.mxu3 %v4280_v44  ;;  %v4281_v36 = vpack.c.bf16 %v4265_v58, %v4265_v58  ;;  %v6316_v44 = vld [vmem:[%s6764_s17 + $0x330] sm:$0xff]  ;;  %v6326_v58 = vld [vmem:[%s6764_s17 + $0x380] sm:$0xff] }
 0x38c   : > { %5456 = vmatpush.bf16.msra.mxu3 %v6309_v2  ;;  %5418 = vmatpush.bf16.msra.mxu0 %v6284_v11  ;;  %v4283_v2 = vpack.c.bf16 %v4267_v29, %v4267_v29  ;;  %v6332_v11 = vld [vmem:[%s6764_s17 + $0x3b0] sm:$0xff]  ;;  %v6334_v29 = vld [vmem:[%s6764_s17 + $0x3c0] sm:$0xff] }
 0x38d   : > { %5431 = vmatpush.bf16.msra.mxu1 %v6292_v47  ;;  %v6340_v47 = vld [vmem:[%s6764_s17 + $0x3f0] sm:$0xff] }
 0x38f   : > { %5444 = vmatpush.bf16.msra.mxu2 %v6300_v19  ;;  %v6315_v19 = vld [vmem:[%s6764_s17 + $0x328] sm:$0xff] }
 0x390   : > { %5457 = vmatpush.bf16.msra.mxu3 %v6308_v21  ;;  %5419 = vmatpush.bf16.msra.mxu0 %v6283_v49  ;;  %v6323_v21 = vld [vmem:[%s6764_s17 + $0x368] sm:$0xff] }
 0x391   : > { %5432 = vmatpush.bf16.msra.mxu1 %v6291_v50  ;;  %v6331_v49 = vld [vmem:[%s6764_s17 + $0x3a8] sm:$0xff] }
 0x392   : > { %v6339_v50 = vld [vmem:[%s6764_s17 + $0x3e8] sm:$0xff] }
 0x393   : > { %5445 = vmatpush.bf16.msra.mxu2 %v6299_v54  ;;  %v6314_v54 = vld [vmem:[%s6764_s17 + $0x320] sm:$0xff] }
 0x394   : > { %5458 = vmatpush.bf16.msra.mxu3 %v6307_v55  ;;  %5420 = vmatpush.bf16.msra.mxu0 %v6282_v56  ;;  %v6322_v55 = vld [vmem:[%s6764_s17 + $0x360] sm:$0xff] }
 0x395   : > { %5433 = vmatpush.bf16.msra.mxu1 %v6290_v57  ;;  %v6330_v56 = vld [vmem:[%s6764_s17 + $0x3a0] sm:$0xff] }
 0x396   : > { %v6338_v57 = vld [vmem:[%s6764_s17 + $0x3e0] sm:$0xff] }
 0x397   : > { %5446 = vmatpush.bf16.msra.mxu2 %v6298_v41  ;;  %v6313_v41 = vld [vmem:[%s6764_s17 + $0x318] sm:$0xff] }
 0x398   : > { %5459 = vmatpush.bf16.msra.mxu3 %v6306_v37  ;;  %5421 = vmatpush.bf16.msra.mxu0 %v6281_v61  ;;  %v6321_v37 = vld [vmem:[%s6764_s17 + $0x358] sm:$0xff]  ;;  %v4169_v61 = vperm.slane %v7366_v22, 4 }
 0x399   : > { %5434 = vmatpush.bf16.msra.mxu1 %v6289_v12  ;;  %v4170_v12 = vperm.slane %v7366_v22, 5  ;;  %v4203_v22 = vmul.f32 %v4171_v48, %v4151_v20 }
 0x39b   : > { %5447 = vmatpush.bf16.msra.mxu2 %v6297_v32  ;;  %v6329_v32 = vld [vmem:[%s6764_s17 + $0x398] sm:$0xff] }
 0x39c   : > { %5460 = vmatpush.bf16.msra.mxu3 %v6305_v62  ;;  %5422 = vmatpush.bf16.msra.mxu0 %v6280_v7  ;;  %v4149_v62 = vld [vmem:[#allocation2 + $0x60] sm:$0xff]  ;;  %v4202_v7 = vmul.f32 %v4170_v12, %v4150_v30 }
 0x39d   : > { %5435 = vmatpush.bf16.msra.mxu1 %v6288_v8  ;;  %v4201_v24 = vmul.f32 %v4169_v61, %v4149_v62  ;;  %v4222_v8 = vperm.slane %v7375_v39, 5 }
 0x39f   : > { %5448 = vmatpush.bf16.msra.mxu2 %v6296_v13  ;;  %v4224_v13 = vperm.slane %v7375_v39, 7  ;;  %v4253_v5 = vadd.f32 %v4221_v6, %v4201_v24  ;;  %v4254_v15 = vadd.f32 %v4222_v8, %v4202_v7  ;;  %v6327_v39 = vld [vmem:[%s6764_s17 + $0x388] sm:$0xff] }
 0x3a0   : > { %5461 = vmatpush.bf16.msra.mxu3 %v6304_v46  ;;  %5423 = vmatpush.bf16.msra.mxu0 %v6279_v51  ;;  %v6328_v46 = vld [vmem:[%s6764_s17 + $0x390] sm:$0xff]  ;;  %v6319_v51 = vld [vmem:[%s6764_s17 + $0x348] sm:$0xff] }
 0x3a1   : > { %5436 = vmatpush.bf16.msra.mxu1 %v6287_v52  ;;  %v4255_v52 = vadd.f32 %v4223_v10, %v4203_v22  ;;  %v4256_v16 = vadd.f32 %v4224_v13, %v4204_v40 }
 0x3a3   : > { %5449 = vmatpush.bf16.msra.mxu2 %v6295_v18  ;;  %v4269_v18 = vmax.f32 %v4253_v5, 0.0 }
 0x3a4   : > { %5462 = vmatpush.bf16.msra.mxu3 %v6303_v23  ;;  %5424 = vmatpush.bf16.msra.mxu0 %v6278_v27  ;;  %v4270_v23 = vmax.f32 %v4254_v15, 0.0  ;;  %v4271_v27 = vmax.f32 %v4255_v52, 0.0 }
 0x3a5   : > { %5437 = vmatpush.bf16.msra.mxu1 %v6286_v28  ;;  %v4272_v28 = vmax.f32 %v4256_v16, 0.0 }
 0x3a6   : > { %v4287_v33 = vpack.c.bf16 %v4271_v27, %v4271_v27 }
 0x3a7   : > { %5450 = vmatpush.bf16.msra.mxu2 %v6294_v53  ;;  %5425 = vmatmul.bf16.vlgmr.msra.gmra.mxu0 %v4281_v36  ;;  %v4285_v53 = vpack.c.bf16 %v4269_v18, %v4269_v18  ;;  %v4288_v60 = vpack.c.bf16 %v4272_v28, %v4272_v28 }
 0x3a8   : > { %5463 = vmatpush.bf16.msra.mxu3 %v6302_v31  ;;  %5469 = vmatpush.bf16.msrb.mxu0 %v6317_v34  ;;  %v4286_v31 = vpack.c.bf16 %v4270_v23, %v4270_v23 }
 0x3a9   : > { %5482 = vmatpush.bf16.msrb.mxu1 %v6325_v59 }
 0x3aa   : > { %5451 = vmatmul.bf16.vlgmr.msra.gmra.mxu2 %v4283_v2  ;;  %5438 = vmatmul.bf16.vlgmr.msra.gmra.mxu1 %v4282_v42 }
 0x3ab   : > { %5495 = vmatpush.bf16.msrb.mxu2 %v6333_v3  ;;  %5464 = vmatmul.bf16.vlgmr.msra.gmra.mxu3 %v4284_v43 }
 0x3ac   : > { %5508 = vmatpush.bf16.msrb.mxu3 %v6341_v35  ;;  %5470 = vmatpush.bf16.msrb.mxu0 %v6316_v44 }
 0x3ad   : > { %5483 = vmatpush.bf16.msrb.mxu1 %v6324_v4 }
 0x3af   : > { %5496 = vmatpush.bf16.msrb.mxu2 %v6332_v11 }
 0x3b0   : > { %5509 = vmatpush.bf16.msrb.mxu3 %v6340_v47  ;;  %5471 = vmatpush.bf16.msrb.mxu0 %v6315_v19 }
 0x3b1   : > { %5484 = vmatpush.bf16.msrb.mxu1 %v6323_v21 }
 0x3b3   : > { %5497 = vmatpush.bf16.msrb.mxu2 %v6331_v49 }
 0x3b4   : > { %5510 = vmatpush.bf16.msrb.mxu3 %v6339_v50  ;;  %5472 = vmatpush.bf16.msrb.mxu0 %v6314_v54 }
 0x3b5   : > { %5485 = vmatpush.bf16.msrb.mxu1 %v6322_v55 }
 0x3b7   : > { %5498 = vmatpush.bf16.msrb.mxu2 %v6330_v56 }
 0x3b8   : > { %5511 = vmatpush.bf16.msrb.mxu3 %v6338_v57  ;;  %5473 = vmatpush.bf16.msrb.mxu0 %v6313_v41 }
 0x3b9   : > { %5486 = vmatpush.bf16.msrb.mxu1 %v6321_v37 }
 0x3bb   : > { %5499 = vmatpush.bf16.msrb.mxu2 %v6329_v32 }
 0x3bc   : > { %5512 = vmatpush.bf16.msrb.mxu3 %v6337_v0  ;;  %5474 = vmatpush.bf16.msrb.mxu0 %v6312_v63 }
 0x3bd   : > { %5487 = vmatpush.bf16.msrb.mxu1 %v6320_v9 }
 0x3bf   : > { %5500 = vmatpush.bf16.msrb.mxu2 %v6328_v46 }
 0x3c0   : > { %5513 = vmatpush.bf16.msrb.mxu3 %v6336_v14  ;;  %5475 = vmatpush.bf16.msrb.mxu0 %v6311_v45 }
 0x3c1   : > { %5488 = vmatpush.bf16.msrb.mxu1 %v6319_v51 }
 0x3c3   : > { %5501 = vmatpush.bf16.msrb.mxu2 %v6327_v39 }
 0x3c4   : > { %5514 = vmatpush.bf16.msrb.mxu3 %v6335_v17  ;;  %5476 = vmatpush.bf16.msrb.mxu0 %v6310_v25 }
 0x3c5   : > { %5489 = vmatpush.bf16.msrb.mxu1 %v6318_v26 }
 0x3c7   : > { %5502 = vmatpush.bf16.msrb.mxu2 %v6326_v58  ;;  %5477 = vmatmul.bf16.vlgmr.msrb.gmra.mxu0 %v4285_v53 }
 0x3c8   : > { %5515 = vmatpush.bf16.msrb.mxu3 %v6334_v29  ;;  %5490 = vmatmul.bf16.vlgmr.msrb.gmra.mxu1 %v4286_v31 }
 0x3ca   : > { %5503 = vmatmul.bf16.vlgmr.msrb.gmra.mxu2 %v4287_v33 }
 0x3cb   : > { %5516 = vmatmul.bf16.vlgmr.msrb.gmra.mxu3 %v4288_v60 }
 0x3e8   : > { %v5335_v59 = vpop.f32.mrf.mxu1 }
 0x3ec   : > { %v5322_v34 = vpop.f32.mrf.mxu0 }
 0x3ed   : > { %v5336_v3 = vadd.f32 %v5335_v59, %v5322_v34  ;;  %v5361_v2 = vpop.f32.mrf.mxu3 }
 0x3f0   : > { %v5337_v44 = vpop.f32.mrf.mxu1 }
 0x3f1   : > { %v5348_v35 = vpop.f32.mrf.mxu2 }
 0x3f2   : > { %v5349_v36 = vadd.f32 %v5348_v35, %v5336_v3 }
 0x3f4   : > { %v5324_v42 = vpop.f32.mrf.mxu0  ;;  %v5362_v43 = vadd.f32 %v5361_v2, %v5349_v36 }
 0x3f5   : > { %v5363_v11 = vpop.f32.mrf.mxu3 }
 0x3f9   : > { %v5350_v4 = vpop.f32.mrf.mxu2 }
 0x404   : > { %v5374_v47 = vpop.f32.mrf.mxu0 }
 0x405   : > { %v5375_v37 = vadd.f32 %v5374_v47, %v5362_v43 }
 0x407   : > { %v5387_v19 = vpop.f32.mrf.mxu1 }
 0x408   : > { %v5388_v62 = vadd.f32 %v5387_v19, %v5375_v37 }
 0x40c   : > { %v5376_v50 = vpop.f32.mrf.mxu0 }
 0x40d   : > { %v5400_v21 = vpop.f32.mrf.mxu2 }
 0x40e   : > { %v5413_v49 = vpop.f32.mrf.mxu3  ;;  %v5401_v48 = vadd.f32 %v5400_v21, %v5388_v62 }
 0x40f   : > { %v5389_v54 = vpop.f32.mrf.mxu1 }
 0x410   : > { %v5414_v20 = vadd.f32 %v5413_v49, %v5401_v48 }
 0x415   : > { %v5402_v55 = vpop.f32.mrf.mxu2 }
 0x416   : > { %v5415_v56 = vpop.f32.mrf.mxu3 }
 0x424   : > { %v5426_v57 = vpop.f32.mrf.mxu0 }
 0x425   : > { %v5427_v1 = vadd.f32 %v5426_v57, %v5414_v20 }
 0x427   : > { %v5439_v41 = vpop.f32.mrf.mxu1 }
 0x428   : > { %v5440_v24 = vadd.f32 %v5439_v41, %v5427_v1 }
 0x42c   : > { %v5428_v32 = vpop.f32.mrf.mxu0 }
 0x42d   : > { %v5452_v61 = vpop.f32.mrf.mxu2 }
 0x42e   : > { %v5465_v12 = vpop.f32.mrf.mxu3  ;;  %v5453_v6 = vadd.f32 %v5452_v61, %v5440_v24 }
 0x42f   : > { %v5441_v30 = vpop.f32.mrf.mxu1 }
 0x430   : > { %v5466_v7 = vadd.f32 %v5465_v12, %v5453_v6 }
 0x435   : > { %v5454_v38 = vpop.f32.mrf.mxu2 }
 0x436   : > { %v5467_v0 = vpop.f32.mrf.mxu3 }
 0x444   : > { %v5478_v8 = vpop.f32.mrf.mxu0 }
 0x445   : > { %v5491_v63 = vpop.f32.mrf.mxu1  ;;  %v5479_v9 = vadd.f32 %v5478_v8, %v5466_v7 }
 0x447   : > { %v5492_v22 = vadd.f32 %v5491_v63, %v5479_v9 }
 0x44c   : > { %v5480_v46 = vpop.f32.mrf.mxu0 }
 0x44d   : > { %v5504_v10 = vpop.f32.mrf.mxu2  ;;  %v5493_v14 = vpop.f32.mrf.mxu1 }
 0x44e   : > { %v5517_v40 = vpop.f32.mrf.mxu3  ;;  %v5505_v13 = vadd.f32 %v5504_v10, %v5492_v22 }
 0x450   : > { %v5518_v5 = vadd.f32 %v5517_v40, %v5505_v13 }
 0x452   : > { %5521 = vst [vmem:[%s6775_s12] sm:$0xff] %v5518_v5 }
 0x455   : > { %v5506_v15 = vpop.f32.mrf.mxu2 }
 0x456   : > { %v5519_v45 = vpop.f32.mrf.mxu3 }
 0x457 PF: > { %s24_s23 = sadd.s32 1, %s6608_s23   ;;  %s7478_s16 = sld [smem:[#allocation13_spill]] }
 0x458   : > { %p21_p1 = scmp.ge.s32.totalorder %s24_s23, 4   ;;  %s7479_s20 = sld [smem:[#allocation15_spill]] }
 0x459   : > { %s7480_s26 = sld [smem:[#allocation14_spill]]  ;;  %s7481_s18 = smov %s6592_s19 }
 0x45a   : > { %s7483_s21 = smov %s6604_s22 }
 0x45b   :  { %23 = sbr.rel (!%p21_p1) target bundleno = 12 (0xc), region = 145 }
 0x45d   : > { %s7482_s19 = smov %s7478_s16 }
 0x45f   : > { %s7484_s22 = smov %s7480_s26 }
 0x460   :  { %5541 = vsyncpa [#allocation4], 1 }
 0x461   :  { %5543 = vsyncpa [#allocation4 + $0x1], 1 }
 0x462   :  { %5544 = vsyncpa [#allocation6], 1 }
 0x463   :  { %5546 = vsyncpa [#allocation6 + $0x1], 1 }
 0x464   :  { %5547 = vsyncpa [#allocation9], 1 }
 0x465   :  { %5549 = vsyncpa [#allocation9 + $0x1], 1 }

</bundles_post_ra>
